<compile_context>
chip_gen: v6e
topology: v6e:2x2x1
jax: 0.10.0
libtpu: 0.0.40
codegen_flags: <defaults>
</compile_context>

<pallas_src>
import math

import jax
import jax.numpy as jnp
import numpy as np
from jax.experimental import pallas as pl
from jax.experimental.pallas import tpu as pltpu

jax.config.update("jax_default_matmul_precision", "highest")

# ----------------------------- hyper-parameters ------------------------------
N = 2          # batch
T = 16         # temporal length
D = 32         # n_in == n_out (feature dim)
K = 8          # n_mu (number of EM centers)
N_CLASS = 4    # action classes
C1 = N_CLASS + 1
EM_ITER = 2
W_WEIGHT = 0.5        # args.weight (random-walk restart weight)
SCALE = 20.0          # args.scale_factor
NEUMANN_STEPS = 3     # doubling steps -> 2**(steps+1) = 16 Neumann terms
NEG_INF = -1e30


# ------------------------------ in-kernel helpers -----------------------------
def _l2norm(f):
    # matches torch: f / (||f||_2 + 1e-9)
    n = jnp.sqrt(jnp.sum(f * f, axis=-1, keepdims=True))
    return f / (n + 1e-9)


def _softmax_rows(x):
    m = jnp.max(x, axis=-1, keepdims=True)
    e = jnp.exp(x - m)
    return e / jnp.sum(e, axis=-1, keepdims=True)


def _softmax_ax0(x):
    m = jnp.max(x, axis=0, keepdims=True)
    e = jnp.exp(x - m)
    return e / jnp.sum(e, axis=0, keepdims=True)


def _sigmoid(x):
    return 1.0 / (1.0 + jnp.exp(-x))


# ------------------------------ fused WSNet kernel ----------------------------
def wsnet_kernel(x_ref, w1t_ref, b1_ref, w2t_ref, b2_ref, mu0_ref, ac_ref, fg_ref,
                 kmask_ref, seg_ref, segT_ref, gmask_ref,
                 frm_ref, att_ref, ca_ref, cw_ref, xe_ref, mu_ref):
    f32 = jnp.float32

    # ---- feature embedding, batched over all N*T rows (2 matmuls total) ----
    x = x_ref[...]                                                   # (NT, D)
    h = jnp.maximum(jnp.dot(x, w1t_ref[...], preferred_element_type=f32)
                    + b1_ref[...], 0.0)
    xe = jnp.maximum(jnp.dot(h, w2t_ref[...], preferred_element_type=f32)
                     + b2_ref[...], 0.0)                             # (NT, D)
    xe_ref[...] = xe

    # ---- normalized class centers (hoisted; SCALE folded in) ----
    nac_s = _l2norm(ac_ref[...]) * SCALE                             # (C1, D)
    nfg_s = _l2norm(fg_ref[...]) * SCALE                             # (1, D)

    # ---- EM, block-diagonalized across the batch via a masked softmax ----
    kmask = kmask_ref[...]                                           # (NK, NT)
    nx = _l2norm(xe)                                                 # (NT, D)
    nxt = nx.T                                                       # (D, NT), hoisted
    mu = mu0_ref[...]                                                # (NK, D)
    for _ in range(EM_ITER):
        nmu = _l2norm(mu)
        s = jnp.dot(nmu, nxt, preferred_element_type=f32) * 5.0 + kmask
        lz = _softmax_ax0(s)                                         # (NK, NT)
        nlz = lz / (jnp.sum(lz, axis=-1, keepdims=True) + 1e-9)
        mu = jnp.dot(nlz, xe, preferred_element_type=f32)            # (NK, D)
    mu_ref[...] = mu

    # ---- random walk (block-diag aff; Neumann via repeated squaring) ----
    nmu = _l2norm(mu)
    s = jnp.dot(nmu, nxt, preferred_element_type=f32) * 5.0 + kmask
    lz = _softmax_ax0(s)                                             # (NK, NT)
    nlz = lz / (jnp.sum(lz, axis=-1, keepdims=True) + 1e-9)
    lz_t = lz.T                                                      # (NT, NK)
    aff = jnp.dot(lz_t, nlz, preferred_element_type=f32)             # (NT, NT)
    y2x = W_WEIGHT * jnp.dot(lz_t, mu, preferred_element_type=f32) + xe
    A = (W_WEIGHT * W_WEIGHT) * aff
    S = (1.0 - W_WEIGHT) * y2x                                       # fold (1-w)
    Pm = A
    for _ in range(NEUMANN_STEPS):          # S accumulates (I + A + ... ) * y2x
        S = S + jnp.dot(Pm, S, preferred_element_type=f32)
        Pm = jnp.dot(Pm, Pm, preferred_element_type=f32)
    refined = S + jnp.dot(Pm, S, preferred_element_type=f32)         # 16 terms

    # ---- PredictionModule, vectorized over all 2N passes (orig + refined) ----
    feat = jnp.concatenate([xe, refined], axis=0)                    # (PT, D)
    nxf = _l2norm(feat)
    frm = jnp.einsum('id,cd->ic', nxf, nac_s,
                     preferred_element_type=f32)                     # (PT, C1)
    fb = jnp.sum(nxf * nfg_s, axis=-1, keepdims=True)                # (PT, 1)
    ca_att = _sigmoid(fb)                                            # (PT, 1)
    cw_att = _sigmoid(frm)                                           # (PT, C1)
    frm_ref[...] = frm
    att_ref[...] = ca_att

    seg = seg_ref[...]                                               # (P, PT)
    segT = segT_ref[...]                                             # (PT, P)
    ca_den = jnp.dot(segT, jnp.dot(seg, ca_att, preferred_element_type=f32),
                     preferred_element_type=f32) + 1e-5
    cw_den = jnp.dot(segT, jnp.dot(seg, cw_att, preferred_element_type=f32),
                     preferred_element_type=f32) + 1e-5
    ca_natt = ca_att / ca_den                                        # (PT, 1)
    cw_natt = cw_att / cw_den                                        # (PT, C1)

    # class-agnostic video score
    ca_feat = jnp.dot(seg, ca_natt * feat, preferred_element_type=f32)     # (P, D)
    ca_scr = jnp.einsum('pd,cd->pc', _l2norm(ca_feat), nac_s,
                        preferred_element_type=f32)                        # (P, C1)
    ca_ref[...] = _softmax_rows(ca_scr)

    # class-wise video score without materializing the (P, C1, D) features:
    #   numer[p,c]        = seg @ (cw_natt * (feat @ nac_s^T))
    #   ||cw_feat[p,c]||^2 = seg @ (cw_natt * ((feat feat^T .* gmask) @ cw_natt))
    g_s = jnp.einsum('id,cd->ic', feat, nac_s, preferred_element_type=f32)  # (PT, C1)
    numer = jnp.dot(seg, cw_natt * g_s, preferred_element_type=f32)         # (P, C1)
    gram = jnp.einsum('id,jd->ij', feat, feat,
                      preferred_element_type=f32) * gmask_ref[...]          # (PT, PT)
    hmat = jnp.dot(gram, cw_natt, preferred_element_type=f32)               # (PT, C1)
    sq = jnp.maximum(jnp.dot(seg, cw_natt * hmat, preferred_element_type=f32), 0.0)
    cw_scr = numer / (jnp.sqrt(sq) + 1e-9)                                  # (P, C1)
    cw_ref[...] = _softmax_rows(cw_scr)


# --------------------------------- wrapper ------------------------------------
def wsnet_forward(x, params):
    W1, b1, W2, b2, mu0, ac, fg = params
    n, t, d = x.shape
    k, c1 = mu0.shape[0], ac.shape[0]
    nt, nk, p, pt = n * t, n * k, 2 * n, 2 * n * t

    # constant index / mask matrices (host-built, tiny)
    row_b = np.arange(nk) // k
    col_b = np.arange(nt) // t
    kmask = np.where(row_b[:, None] == col_b[None, :], 0.0, NEG_INF).astype(np.float32)
    pass_id = np.arange(pt) // t
    seg = (pass_id[None, :] == np.arange(p)[:, None]).astype(np.float32)    # (P, PT)
    segT = np.ascontiguousarray(seg.T)                                      # (PT, P)
    gmask = (pass_id[:, None] == pass_id[None, :]).astype(np.float32)       # (PT, PT)

    out_shapes = (
        jax.ShapeDtypeStruct((pt, c1), jnp.float32),   # frame scores (orig | refined)
        jax.ShapeDtypeStruct((pt, 1), jnp.float32),    # class-agnostic attention
        jax.ShapeDtypeStruct((p, c1), jnp.float32),    # class-agnostic video preds
        jax.ShapeDtypeStruct((p, c1), jnp.float32),    # class-wise video preds
        jax.ShapeDtypeStruct((nt, d), jnp.float32),    # embedded features
        jax.ShapeDtypeStruct((nk, d), jnp.float32),    # EM centers
    )
    vmem = pl.BlockSpec(memory_space=pltpu.MemorySpace.VMEM)

    frm, att, ca_pred, cw_pred, xe, mu = pl.pallas_call(
        wsnet_kernel,
        out_shape=out_shapes,
        in_specs=[vmem] * 12,
        out_specs=(vmem,) * 6,
        cost_estimate=pl.CostEstimate(
            flops=1_300_000, transcendentals=3_000, bytes_accessed=45_000),
    )(x.reshape(nt, d), W1.T, b1, W2.T, b2,            # W1/W2 pre-transposed on host
      jnp.tile(mu0, (n, 1)), ac, fg,
      jnp.asarray(kmask), jnp.asarray(seg), jnp.asarray(segT), jnp.asarray(gmask))

    frm = frm.reshape(2, n, t, c1)
    att = att.reshape(2, n, t)
    ca_pred = ca_pred.reshape(2, n, c1)
    cw_pred = cw_pred.reshape(2, n, c1)

    o_out = [ca_pred[0], cw_pred[0], att[0], frm[0]]
    m_out = [ca_pred[1], cw_pred[1], att[1], frm[1]]
    return o_out, m_out, [mu.reshape(n, k, d), xe.reshape(n, t, d)]


# ------------------------------ pure-JAX reference ----------------------------
def wsnet_reference(x, params):
    W1, b1, W2, b2, mu0, ac, fg = params
    n, t, d = x.shape

    def l2n(f):
        return f / (jnp.linalg.norm(f, axis=-1, keepdims=True) + 1e-9)

    h = jax.nn.relu(x @ W1.T + b1)
    xe = jax.nn.relu(h @ W2.T + b2)

    norm_x = l2n(xe)
    mu = jnp.broadcast_to(mu0, (n, mu0.shape[0], d))
    for _ in range(EM_ITER):
        norm_mu = l2n(mu)
        s = jnp.einsum('nkd,ntd->nkt', norm_mu, norm_x) * 5.0
        lz = jax.nn.softmax(s, axis=1)
        nlz = lz / (lz.sum(-1, keepdims=True) + 1e-9)
        mu = jnp.einsum('nkt,ntd->nkd', nlz, xe)

    xn, yn = l2n(xe), l2n(mu)
    lz = jax.nn.softmax(jnp.einsum('nkd,ntd->nkt', yn, xn) * 5.0, axis=1)
    nlz = lz / (lz.sum(-1, keepdims=True) + 1e-9)
    aff = jnp.einsum('nkt,nks->nts', lz, nlz)
    eye = jnp.eye(t, dtype=jnp.float32)
    mat_inv = jnp.linalg.solve(eye[None] - W_WEIGHT ** 2 * aff,
                               jnp.broadcast_to(eye, (n, t, t)))
    y2x = W_WEIGHT * jnp.einsum('nkt,nkd->ntd', lz, mu) + xe
    refined = (1.0 - W_WEIGHT) * jnp.einsum('ntk,nkd->ntd', mat_inv, y2x)

    def pred(xx):
        nx, nac, nfg = l2n(xx), l2n(ac), l2n(fg)
        frm = jnp.einsum('ntd,cd->ntc', nx, nac) * SCALE
        fb = jnp.einsum('ntd,kd->ntk', nx, nfg)[..., 0] * SCALE
        ca, cw = jax.nn.sigmoid(fb), jax.nn.sigmoid(frm)
        can = ca / (ca.sum(1, keepdims=True) + 1e-5)
        cwn = cw / (cw.sum(1, keepdims=True) + 1e-5)
        caf = jnp.einsum('ntd,nt->nd', xx, can)
        cwf = jnp.einsum('ntd,ntc->ncd', xx, cwn)
        cas = jnp.einsum('nd,cd->nc', l2n(caf), nac) * SCALE
        cws = jnp.einsum('ncd,cd->nc', l2n(cwf), nac) * SCALE
        return (jax.nn.softmax(cas, -1), jax.nn.softmax(cws, -1), ca, frm)

    return list(pred(xe)), list(pred(refined)), [mu, xe]


# ----------------------------------- main --------------------------------------
def xavier_uniform(key, shape):
    fan_out, fan_in = shape
    a = math.sqrt(6.0 / (fan_in + fan_out))
    return jax.random.uniform(key, shape, jnp.float32, -a, a)


if __name__ == "__main__":
    root = jax.random.PRNGKey(0)
    k_x, k_w1, k_w2, k_mu, k_ac = jax.random.split(root, 5)

    x = jax.random.normal(k_x, (N, T, D), jnp.float32)

    W1 = xavier_uniform(k_w1, (D, D))
    b1 = jnp.zeros((1, D), jnp.float32)
    W2 = xavier_uniform(k_w2, (D, D))
    b2 = jnp.zeros((1, D), jnp.float32)
    mu0 = xavier_uniform(k_mu, (K, D))
    ac = xavier_uniform(k_ac, (C1, D))
    fg = -1.0 * ac[-1:, :]                      # fg_center = -ac_center[-1][None]
    params = (W1, b1, W2, b2, mu0, ac, fg)

    out = wsnet_forward(x, params)
    jax.block_until_ready(out)

    ref = wsnet_reference(x, params)
    (o_p, m_p, aux_p), (o_r, m_r, aux_r) = out, ref
    for a, b in zip(o_p + m_p + aux_p, o_r + m_r + aux_r):
        np.testing.assert_allclose(np.asarray(a), np.asarray(b), rtol=2e-3, atol=2e-3)

    print("KERNEL_OK")
</pallas_src>

<mosaic_0001>
module attributes {stable_mosaic.version = 11 : i64} {
  func.func @wsnet_kernel(%arg0: memref<32x32xf32, #tpu.memory_space<vmem>>, %arg1: memref<32x32xf32, #tpu.memory_space<vmem>>, %arg2: memref<1x32xf32, #tpu.memory_space<vmem>>, %arg3: memref<32x32xf32, #tpu.memory_space<vmem>>, %arg4: memref<1x32xf32, #tpu.memory_space<vmem>>, %arg5: memref<16x32xf32, #tpu.memory_space<vmem>>, %arg6: memref<5x32xf32, #tpu.memory_space<vmem>>, %arg7: memref<1x32xf32, #tpu.memory_space<vmem>>, %arg8: memref<16x32xf32, #tpu.memory_space<vmem>>, %arg9: memref<4x64xf32, #tpu.memory_space<vmem>>, %arg10: memref<64x4xf32, #tpu.memory_space<vmem>>, %arg11: memref<64x64xf32, #tpu.memory_space<vmem>>, %arg12: memref<64x5xf32, #tpu.memory_space<vmem>>, %arg13: memref<64x1xf32, #tpu.memory_space<vmem>>, %arg14: memref<4x5xf32, #tpu.memory_space<vmem>>, %arg15: memref<4x5xf32, #tpu.memory_space<vmem>>, %arg16: memref<32x32xf32, #tpu.memory_space<vmem>>, %arg17: memref<16x32xf32, #tpu.memory_space<vmem>>) attributes {dimension_semantics = [], scalar_prefetch = 0 : i64, scratch_operands = 0 : i64, tpu.core_type = #tpu.core_type<tc>} {
    %c0 = arith.constant 0 : index
    %c0_0 = arith.constant 0 : index
    %0 = vector.load %arg0[%c0, %c0_0] : memref<32x32xf32, #tpu.memory_space<vmem>>, vector<32x32xf32>
    %c0_1 = arith.constant 0 : index
    %c0_2 = arith.constant 0 : index
    %1 = vector.load %arg1[%c0_1, %c0_2] : memref<32x32xf32, #tpu.memory_space<vmem>>, vector<32x32xf32>
    %cst = arith.constant dense<0.000000e+00> : vector<32x32xf32>
    %2 = tpu.matmul %0, %1, %cst {dimension_numbers = #tpu.dot_dimension_numbers<[1], [0], [0], [1], [0, 0, 1, 1], [], []>, precision = #tpu.contract_precision<fp32>} : vector<32x32xf32>, vector<32x32xf32>, vector<32x32xf32> -> vector<32x32xf32>
    %c0_3 = arith.constant 0 : index
    %c0_4 = arith.constant 0 : index
    %3 = vector.load %arg2[%c0_3, %c0_4] : memref<1x32xf32, #tpu.memory_space<vmem>>, vector<1x32xf32>
    %4 = vector.broadcast %3 : vector<1x32xf32> to vector<32x32xf32>
    %5 = arith.addf %2, %4 : vector<32x32xf32>
    %cst_5 = arith.constant 0.000000e+00 : f32
    %6 = vector.broadcast %cst_5 : f32 to vector<32x32xf32>
    %7 = arith.maximumf %5, %6 : vector<32x32xf32>
    %c0_6 = arith.constant 0 : index
    %c0_7 = arith.constant 0 : index
    %8 = vector.load %arg3[%c0_6, %c0_7] : memref<32x32xf32, #tpu.memory_space<vmem>>, vector<32x32xf32>
    %cst_8 = arith.constant dense<0.000000e+00> : vector<32x32xf32>
    %9 = tpu.matmul %7, %8, %cst_8 {dimension_numbers = #tpu.dot_dimension_numbers<[1], [0], [0], [1], [0, 0, 1, 1], [], []>, precision = #tpu.contract_precision<fp32>} : vector<32x32xf32>, vector<32x32xf32>, vector<32x32xf32> -> vector<32x32xf32>
    %c0_9 = arith.constant 0 : index
    %c0_10 = arith.constant 0 : index
    %10 = vector.load %arg4[%c0_9, %c0_10] : memref<1x32xf32, #tpu.memory_space<vmem>>, vector<1x32xf32>
    %11 = vector.broadcast %10 : vector<1x32xf32> to vector<32x32xf32>
    %12 = arith.addf %9, %11 : vector<32x32xf32>
    %cst_11 = arith.constant 0.000000e+00 : f32
    %13 = vector.broadcast %cst_11 : f32 to vector<32x32xf32>
    %14 = arith.maximumf %12, %13 : vector<32x32xf32>
    %c0_12 = arith.constant 0 : index
    %c0_13 = arith.constant 0 : index
    %15 = vector.load %arg16[%c0_12, %c0_13] : memref<32x32xf32, #tpu.memory_space<vmem>>, vector<32x32xf32>
    tpu.vector_store %arg16[%c0_12, %c0_13], %14 {strides = array<i32>} : memref<32x32xf32, #tpu.memory_space<vmem>>, vector<32x32xf32>,
    %c0_14 = arith.constant 0 : index
    %c0_15 = arith.constant 0 : index
    %16 = vector.load %arg6[%c0_14, %c0_15] : memref<5x32xf32, #tpu.memory_space<vmem>>, vector<5x32xf32>
    %17 = arith.mulf %16, %16 : vector<5x32xf32>
    %cst_16 = arith.constant dense<0.000000e+00> : vector<5xf32>
    %18 = vector.multi_reduction <add>, %17, %cst_16 [1] : vector<5x32xf32> to vector<5xf32>
    %19 = vector.shape_cast %18 : vector<5xf32> to vector<5x1xf32>
    %20 = math.sqrt %19 : vector<5x1xf32>
    %cst_17 = arith.constant 9.99999971E-10 : f32
    %21 = vector.broadcast %cst_17 : f32 to vector<5x1xf32>
    %22 = arith.addf %20, %21 : vector<5x1xf32>
    %23 = vector.broadcast %22 : vector<5x1xf32> to vector<5x32xf32>
    %24 = arith.divf %16, %23 : vector<5x32xf32>
    %cst_18 = arith.constant 2.000000e+01 : f32
    %25 = vector.broadcast %cst_18 : f32 to vector<5x32xf32>
    %26 = arith.mulf %24, %25 : vector<5x32xf32>
    %c0_19 = arith.constant 0 : index
    %c0_20 = arith.constant 0 : index
    %27 = vector.load %arg7[%c0_19, %c0_20] : memref<1x32xf32, #tpu.memory_space<vmem>>, vector<1x32xf32>
    %28 = arith.mulf %27, %27 : vector<1x32xf32>
    %cst_21 = arith.constant dense<0.000000e+00> : vector<1xf32>
    %29 = vector.multi_reduction <add>, %28, %cst_21 [1] : vector<1x32xf32> to vector<1xf32>
    %30 = vector.shape_cast %29 : vector<1xf32> to vector<1x1xf32>
    %31 = math.sqrt %30 : vector<1x1xf32>
    %cst_22 = arith.constant 9.99999971E-10 : f32
    %32 = vector.broadcast %cst_22 : f32 to vector<1x1xf32>
    %33 = arith.addf %31, %32 : vector<1x1xf32>
    %34 = vector.broadcast %33 : vector<1x1xf32> to vector<1x32xf32>
    %35 = arith.divf %27, %34 : vector<1x32xf32>
    %cst_23 = arith.constant 2.000000e+01 : f32
    %36 = vector.broadcast %cst_23 : f32 to vector<1x32xf32>
    %37 = arith.mulf %35, %36 : vector<1x32xf32>
    %c0_24 = arith.constant 0 : index
    %c0_25 = arith.constant 0 : index
    %38 = vector.load %arg8[%c0_24, %c0_25] : memref<16x32xf32, #tpu.memory_space<vmem>>, vector<16x32xf32>
    %39 = arith.mulf %14, %14 : vector<32x32xf32>
    %cst_26 = arith.constant dense<0.000000e+00> : vector<32xf32>
    %40 = vector.multi_reduction <add>, %39, %cst_26 [1] : vector<32x32xf32> to vector<32xf32>
    %41 = vector.shape_cast %40 : vector<32xf32> to vector<32x1xf32>
    %42 = math.sqrt %41 : vector<32x1xf32>
    %cst_27 = arith.constant 9.99999971E-10 : f32
    %43 = vector.broadcast %cst_27 : f32 to vector<32x1xf32>
    %44 = arith.addf %42, %43 : vector<32x1xf32>
    %45 = vector.broadcast %44 : vector<32x1xf32> to vector<32x32xf32>
    %46 = arith.divf %14, %45 : vector<32x32xf32>
    %47 = tpu.transpose %46, [1, 0] : vector<32x32xf32> -> vector<32x32xf32>
    %c0_28 = arith.constant 0 : index
    %c0_29 = arith.constant 0 : index
    %48 = vector.load %arg5[%c0_28, %c0_29] : memref<16x32xf32, #tpu.memory_space<vmem>>, vector<16x32xf32>
    %49 = arith.mulf %48, %48 : vector<16x32xf32>
    %cst_30 = arith.constant dense<0.000000e+00> : vector<16xf32>
    %50 = vector.multi_reduction <add>, %49, %cst_30 [1] : vector<16x32xf32> to vector<16xf32>
    %51 = vector.shape_cast %50 : vector<16xf32> to vector<16x1xf32>
    %52 = math.sqrt %51 : vector<16x1xf32>
    %cst_31 = arith.constant 9.99999971E-10 : f32
    %53 = vector.broadcast %cst_31 : f32 to vector<16x1xf32>
    %54 = arith.addf %52, %53 : vector<16x1xf32>
    %55 = vector.broadcast %54 : vector<16x1xf32> to vector<16x32xf32>
    %56 = arith.divf %48, %55 : vector<16x32xf32>
    %cst_32 = arith.constant dense<0.000000e+00> : vector<16x32xf32>
    %57 = tpu.matmul %56, %47, %cst_32 {dimension_numbers = #tpu.dot_dimension_numbers<[1], [0], [0], [1], [0, 0, 1, 1], [], []>, precision = #tpu.contract_precision<fp32>} : vector<16x32xf32>, vector<32x32xf32>, vector<16x32xf32> -> vector<16x32xf32>
    %cst_33 = arith.constant 5.000000e+00 : f32
    %58 = vector.broadcast %cst_33 : f32 to vector<16x32xf32>
    %59 = arith.mulf %57, %58 : vector<16x32xf32>
    %60 = arith.addf %59, %38 : vector<16x32xf32>
    %cst_34 = arith.constant dense<0xFF800000> : vector<32xf32>
    %61 = vector.multi_reduction <maximumf>, %60, %cst_34 [0] : vector<16x32xf32> to vector<32xf32>
    %62 = vector.shape_cast %61 : vector<32xf32> to vector<1x32xf32>
    %63 = vector.broadcast %62 : vector<1x32xf32> to vector<16x32xf32>
    %64 = arith.subf %60, %63 : vector<16x32xf32>
    %65 = math.exp %64 : vector<16x32xf32>
    %cst_35 = arith.constant dense<0.000000e+00> : vector<32xf32>
    %66 = vector.multi_reduction <add>, %65, %cst_35 [0] : vector<16x32xf32> to vector<32xf32>
    %67 = vector.shape_cast %66 : vector<32xf32> to vector<1x32xf32>
    %68 = vector.broadcast %67 : vector<1x32xf32> to vector<16x32xf32>
    %69 = arith.divf %65, %68 : vector<16x32xf32>
    %cst_36 = arith.constant dense<0.000000e+00> : vector<16xf32>
    %70 = vector.multi_reduction <add>, %69, %cst_36 [1] : vector<16x32xf32> to vector<16xf32>
    %71 = vector.shape_cast %70 : vector<16xf32> to vector<16x1xf32>
    %cst_37 = arith.constant 9.99999971E-10 : f32
    %72 = vector.broadcast %cst_37 : f32 to vector<16x1xf32>
    %73 = arith.addf %71, %72 : vector<16x1xf32>
    %74 = vector.broadcast %73 : vector<16x1xf32> to vector<16x32xf32>
    %75 = arith.divf %69, %74 : vector<16x32xf32>
    %cst_38 = arith.constant dense<0.000000e+00> : vector<16x32xf32>
    %76 = tpu.matmul %75, %14, %cst_38 {dimension_numbers = #tpu.dot_dimension_numbers<[1], [0], [0], [1], [0, 0, 1, 1], [], []>, precision = #tpu.contract_precision<fp32>} : vector<16x32xf32>, vector<32x32xf32>, vector<16x32xf32> -> vector<16x32xf32>
    %77 = arith.mulf %76, %76 : vector<16x32xf32>
    %cst_39 = arith.constant dense<0.000000e+00> : vector<16xf32>
    %78 = vector.multi_reduction <add>, %77, %cst_39 [1] : vector<16x32xf32> to vector<16xf32>
    %79 = vector.shape_cast %78 : vector<16xf32> to vector<16x1xf32>
    %80 = math.sqrt %79 : vector<16x1xf32>
    %cst_40 = arith.constant 9.99999971E-10 : f32
    %81 = vector.broadcast %cst_40 : f32 to vector<16x1xf32>
    %82 = arith.addf %80, %81 : vector<16x1xf32>
    %83 = vector.broadcast %82 : vector<16x1xf32> to vector<16x32xf32>
    %84 = arith.divf %76, %83 : vector<16x32xf32>
    %cst_41 = arith.constant dense<0.000000e+00> : vector<16x32xf32>
    %85 = tpu.matmul %84, %47, %cst_41 {dimension_numbers = #tpu.dot_dimension_numbers<[1], [0], [0], [1], [0, 0, 1, 1], [], []>, precision = #tpu.contract_precision<fp32>} : vector<16x32xf32>, vector<32x32xf32>, vector<16x32xf32> -> vector<16x32xf32>
    %cst_42 = arith.constant 5.000000e+00 : f32
    %86 = vector.broadcast %cst_42 : f32 to vector<16x32xf32>
    %87 = arith.mulf %85, %86 : vector<16x32xf32>
    %88 = arith.addf %87, %38 : vector<16x32xf32>
    %cst_43 = arith.constant dense<0xFF800000> : vector<32xf32>
    %89 = vector.multi_reduction <maximumf>, %88, %cst_43 [0] : vector<16x32xf32> to vector<32xf32>
    %90 = vector.shape_cast %89 : vector<32xf32> to vector<1x32xf32>
    %91 = vector.broadcast %90 : vector<1x32xf32> to vector<16x32xf32>
    %92 = arith.subf %88, %91 : vector<16x32xf32>
    %93 = math.exp %92 : vector<16x32xf32>
    %cst_44 = arith.constant dense<0.000000e+00> : vector<32xf32>
    %94 = vector.multi_reduction <add>, %93, %cst_44 [0] : vector<16x32xf32> to vector<32xf32>
    %95 = vector.shape_cast %94 : vector<32xf32> to vector<1x32xf32>
    %96 = vector.broadcast %95 : vector<1x32xf32> to vector<16x32xf32>
    %97 = arith.divf %93, %96 : vector<16x32xf32>
    %cst_45 = arith.constant dense<0.000000e+00> : vector<16xf32>
    %98 = vector.multi_reduction <add>, %97, %cst_45 [1] : vector<16x32xf32> to vector<16xf32>
    %99 = vector.shape_cast %98 : vector<16xf32> to vector<16x1xf32>
    %cst_46 = arith.constant 9.99999971E-10 : f32
    %100 = vector.broadcast %cst_46 : f32 to vector<16x1xf32>
    %101 = arith.addf %99, %100 : vector<16x1xf32>
    %102 = vector.broadcast %101 : vector<16x1xf32> to vector<16x32xf32>
    %103 = arith.divf %97, %102 : vector<16x32xf32>
    %cst_47 = arith.constant dense<0.000000e+00> : vector<16x32xf32>
    %104 = tpu.matmul %103, %14, %cst_47 {dimension_numbers = #tpu.dot_dimension_numbers<[1], [0], [0], [1], [0, 0, 1, 1], [], []>, precision = #tpu.contract_precision<fp32>} : vector<16x32xf32>, vector<32x32xf32>, vector<16x32xf32> -> vector<16x32xf32>
    %c0_48 = arith.constant 0 : index
    %c0_49 = arith.constant 0 : index
    %105 = vector.load %arg17[%c0_48, %c0_49] : memref<16x32xf32, #tpu.memory_space<vmem>>, vector<16x32xf32>
    tpu.vector_store %arg17[%c0_48, %c0_49], %104 {strides = array<i32>} : memref<16x32xf32, #tpu.memory_space<vmem>>, vector<16x32xf32>,
    %106 = arith.mulf %104, %104 : vector<16x32xf32>
    %cst_50 = arith.constant dense<0.000000e+00> : vector<16xf32>
    %107 = vector.multi_reduction <add>, %106, %cst_50 [1] : vector<16x32xf32> to vector<16xf32>
    %108 = vector.shape_cast %107 : vector<16xf32> to vector<16x1xf32>
    %109 = math.sqrt %108 : vector<16x1xf32>
    %cst_51 = arith.constant 9.99999971E-10 : f32
    %110 = vector.broadcast %cst_51 : f32 to vector<16x1xf32>
    %111 = arith.addf %109, %110 : vector<16x1xf32>
    %112 = vector.broadcast %111 : vector<16x1xf32> to vector<16x32xf32>
    %113 = arith.divf %104, %112 : vector<16x32xf32>
    %cst_52 = arith.constant dense<0.000000e+00> : vector<16x32xf32>
    %114 = tpu.matmul %113, %47, %cst_52 {dimension_numbers = #tpu.dot_dimension_numbers<[1], [0], [0], [1], [0, 0, 1, 1], [], []>, precision = #tpu.contract_precision<fp32>} : vector<16x32xf32>, vector<32x32xf32>, vector<16x32xf32> -> vector<16x32xf32>
    %cst_53 = arith.constant 5.000000e+00 : f32
    %115 = vector.broadcast %cst_53 : f32 to vector<16x32xf32>
    %116 = arith.mulf %114, %115 : vector<16x32xf32>
    %117 = arith.addf %116, %38 : vector<16x32xf32>
    %cst_54 = arith.constant dense<0xFF800000> : vector<32xf32>
    %118 = vector.multi_reduction <maximumf>, %117, %cst_54 [0] : vector<16x32xf32> to vector<32xf32>
    %119 = vector.shape_cast %118 : vector<32xf32> to vector<1x32xf32>
    %120 = vector.broadcast %119 : vector<1x32xf32> to vector<16x32xf32>
    %121 = arith.subf %117, %120 : vector<16x32xf32>
    %122 = math.exp %121 : vector<16x32xf32>
    %cst_55 = arith.constant dense<0.000000e+00> : vector<32xf32>
    %123 = vector.multi_reduction <add>, %122, %cst_55 [0] : vector<16x32xf32> to vector<32xf32>
    %124 = vector.shape_cast %123 : vector<32xf32> to vector<1x32xf32>
    %125 = vector.broadcast %124 : vector<1x32xf32> to vector<16x32xf32>
    %126 = arith.divf %122, %125 : vector<16x32xf32>
    %cst_56 = arith.constant dense<0.000000e+00> : vector<16xf32>
    %127 = vector.multi_reduction <add>, %126, %cst_56 [1] : vector<16x32xf32> to vector<16xf32>
    %128 = vector.shape_cast %127 : vector<16xf32> to vector<16x1xf32>
    %cst_57 = arith.constant 9.99999971E-10 : f32
    %129 = vector.broadcast %cst_57 : f32 to vector<16x1xf32>
    %130 = arith.addf %128, %129 : vector<16x1xf32>
    %131 = vector.broadcast %130 : vector<16x1xf32> to vector<16x32xf32>
    %132 = arith.divf %126, %131 : vector<16x32xf32>
    %133 = tpu.transpose %126, [1, 0] : vector<16x32xf32> -> vector<32x16xf32>
    %cst_58 = arith.constant dense<0.000000e+00> : vector<32x32xf32>
    %134 = tpu.matmul %133, %132, %cst_58 {dimension_numbers = #tpu.dot_dimension_numbers<[1], [0], [0], [1], [0, 0, 1, 1], [], []>, precision = #tpu.contract_precision<fp32>} : vector<32x16xf32>, vector<16x32xf32>, vector<32x32xf32> -> vector<32x32xf32>
    %cst_59 = arith.constant dense<0.000000e+00> : vector<32x32xf32>
    %135 = tpu.matmul %133, %104, %cst_59 {dimension_numbers = #tpu.dot_dimension_numbers<[1], [0], [0], [1], [0, 0, 1, 1], [], []>, precision = #tpu.contract_precision<fp32>} : vector<32x16xf32>, vector<16x32xf32>, vector<32x32xf32> -> vector<32x32xf32>
    %cst_60 = arith.constant 5.000000e-01 : f32
    %136 = vector.broadcast %cst_60 : f32 to vector<32x32xf32>
    %137 = arith.mulf %136, %135 : vector<32x32xf32>
    %138 = arith.addf %137, %14 : vector<32x32xf32>
    %cst_61 = arith.constant 2.500000e-01 : f32
    %139 = vector.broadcast %cst_61 : f32 to vector<32x32xf32>
    %140 = arith.mulf %139, %134 : vector<32x32xf32>
    %cst_62 = arith.constant 5.000000e-01 : f32
    %141 = vector.broadcast %cst_62 : f32 to vector<32x32xf32>
    %142 = arith.mulf %141, %138 : vector<32x32xf32>
    %cst_63 = arith.constant dense<0.000000e+00> : vector<32x32xf32>
    %143 = tpu.matmul %140, %142, %cst_63 {dimension_numbers = #tpu.dot_dimension_numbers<[1], [0], [0], [1], [0, 0, 1, 1], [], []>, precision = #tpu.contract_precision<fp32>} : vector<32x32xf32>, vector<32x32xf32>, vector<32x32xf32> -> vector<32x32xf32>
    %144 = arith.addf %142, %143 : vector<32x32xf32>
    %cst_64 = arith.constant dense<0.000000e+00> : vector<32x32xf32>
    %145 = tpu.matmul %140, %140, %cst_64 {dimension_numbers = #tpu.dot_dimension_numbers<[1], [0], [0], [1], [0, 0, 1, 1], [], []>, precision = #tpu.contract_precision<fp32>} : vector<32x32xf32>, vector<32x32xf32>, vector<32x32xf32> -> vector<32x32xf32>
    %cst_65 = arith.constant dense<0.000000e+00> : vector<32x32xf32>
    %146 = tpu.matmul %145, %144, %cst_65 {dimension_numbers = #tpu.dot_dimension_numbers<[1], [0], [0], [1], [0, 0, 1, 1], [], []>, precision = #tpu.contract_precision<fp32>} : vector<32x32xf32>, vector<32x32xf32>, vector<32x32xf32> -> vector<32x32xf32>
    %147 = arith.addf %144, %146 : vector<32x32xf32>
    %cst_66 = arith.constant dense<0.000000e+00> : vector<32x32xf32>
    %148 = tpu.matmul %145, %145, %cst_66 {dimension_numbers = #tpu.dot_dimension_numbers<[1], [0], [0], [1], [0, 0, 1, 1], [], []>, precision = #tpu.contract_precision<fp32>} : vector<32x32xf32>, vector<32x32xf32>, vector<32x32xf32> -> vector<32x32xf32>
    %cst_67 = arith.constant dense<0.000000e+00> : vector<32x32xf32>
    %149 = tpu.matmul %148, %147, %cst_67 {dimension_numbers = #tpu.dot_dimension_numbers<[1], [0], [0], [1], [0, 0, 1, 1], [], []>, precision = #tpu.contract_precision<fp32>} : vector<32x32xf32>, vector<32x32xf32>, vector<32x32xf32> -> vector<32x32xf32>
    %150 = arith.addf %147, %149 : vector<32x32xf32>
    %cst_68 = arith.constant dense<0.000000e+00> : vector<32x32xf32>
    %151 = tpu.matmul %148, %148, %cst_68 {dimension_numbers = #tpu.dot_dimension_numbers<[1], [0], [0], [1], [0, 0, 1, 1], [], []>, precision = #tpu.contract_precision<fp32>} : vector<32x32xf32>, vector<32x32xf32>, vector<32x32xf32> -> vector<32x32xf32>
    %cst_69 = arith.constant dense<0.000000e+00> : vector<32x32xf32>
    %152 = tpu.matmul %151, %150, %cst_69 {dimension_numbers = #tpu.dot_dimension_numbers<[1], [0], [0], [1], [0, 0, 1, 1], [], []>, precision = #tpu.contract_precision<fp32>} : vector<32x32xf32>, vector<32x32xf32>, vector<32x32xf32> -> vector<32x32xf32>
    %153 = arith.addf %150, %152 : vector<32x32xf32>
    %154 = tpu.concatenate %14, %153 in 0 : vector<32x32xf32>, vector<32x32xf32> -> vector<64x32xf32>
    %155 = arith.mulf %154, %154 : vector<64x32xf32>
    %cst_70 = arith.constant dense<0.000000e+00> : vector<64xf32>
    %156 = vector.multi_reduction <add>, %155, %cst_70 [1] : vector<64x32xf32> to vector<64xf32>
    %157 = vector.shape_cast %156 : vector<64xf32> to vector<64x1xf32>
    %158 = math.sqrt %157 : vector<64x1xf32>
    %cst_71 = arith.constant 9.99999971E-10 : f32
    %159 = vector.broadcast %cst_71 : f32 to vector<64x1xf32>
    %160 = arith.addf %158, %159 : vector<64x1xf32>
    %161 = vector.broadcast %160 : vector<64x1xf32> to vector<64x32xf32>
    %162 = arith.divf %154, %161 : vector<64x32xf32>
    "tpu.trace_start"() <{level = 10 : i32, message = "id,cd->ic"}> : () -> ()
    %cst_72 = arith.constant dense<0.000000e+00> : vector<64x5xf32>
    %163 = tpu.matmul %162, %26, %cst_72 {dimension_numbers = #tpu.dot_dimension_numbers<[1], [1], [0], [0], [0, 0, 1, 0], [], []>, precision = #tpu.contract_precision<fp32>} : vector<64x32xf32>, vector<5x32xf32>, vector<64x5xf32> -> vector<64x5xf32>
    "tpu.trace_stop"() : () -> ()
    %164 = vector.broadcast %37 : vector<1x32xf32> to vector<64x32xf32>
    %165 = arith.mulf %162, %164 : vector<64x32xf32>
    %cst_73 = arith.constant dense<0.000000e+00> : vector<64xf32>
    %166 = vector.multi_reduction <add>, %165, %cst_73 [1] : vector<64x32xf32> to vector<64xf32>
    %167 = vector.shape_cast %166 : vector<64xf32> to vector<64x1xf32>
    %cst_74 = arith.constant 0.000000e+00 : f32
    %168 = vector.broadcast %cst_74 : f32 to vector<64x1xf32>
    %169 = arith.subf %168, %167 : vector<64x1xf32>
    %170 = math.exp %169 : vector<64x1xf32>
    %cst_75 = arith.constant 1.000000e+00 : f32
    %171 = vector.broadcast %cst_75 : f32 to vector<64x1xf32>
    %172 = arith.addf %171, %170 : vector<64x1xf32>
    %cst_76 = arith.constant 1.000000e+00 : f32
    %173 = vector.broadcast %cst_76 : f32 to vector<64x1xf32>
    %174 = arith.divf %173, %172 : vector<64x1xf32>
    %cst_77 = arith.constant 0.000000e+00 : f32
    %175 = vector.broadcast %cst_77 : f32 to vector<64x5xf32>
    %176 = arith.subf %175, %163 : vector<64x5xf32>
    %177 = math.exp %176 : vector<64x5xf32>
    %cst_78 = arith.constant 1.000000e+00 : f32
    %178 = vector.broadcast %cst_78 : f32 to vector<64x5xf32>
    %179 = arith.addf %178, %177 : vector<64x5xf32>
    %cst_79 = arith.constant 1.000000e+00 : f32
    %180 = vector.broadcast %cst_79 : f32 to vector<64x5xf32>
    %181 = arith.divf %180, %179 : vector<64x5xf32>
    %c0_80 = arith.constant 0 : index
    %c0_81 = arith.constant 0 : index
    %182 = vector.load %arg12[%c0_80, %c0_81] : memref<64x5xf32, #tpu.memory_space<vmem>>, vector<64x5xf32>
    tpu.vector_store %arg12[%c0_80, %c0_81], %163 {strides = array<i32>} : memref<64x5xf32, #tpu.memory_space<vmem>>, vector<64x5xf32>,
    %c0_82 = arith.constant 0 : index
    %c0_83 = arith.constant 0 : index
    %183 = vector.load %arg13[%c0_82, %c0_83] : memref<64x1xf32, #tpu.memory_space<vmem>>, vector<64x1xf32>
    tpu.vector_store %arg13[%c0_82, %c0_83], %174 {strides = array<i32>} : memref<64x1xf32, #tpu.memory_space<vmem>>, vector<64x1xf32>,
    %c0_84 = arith.constant 0 : index
    %c0_85 = arith.constant 0 : index
    %184 = vector.load %arg9[%c0_84, %c0_85] : memref<4x64xf32, #tpu.memory_space<vmem>>, vector<4x64xf32>
    %c0_86 = arith.constant 0 : index
    %c0_87 = arith.constant 0 : index
    %185 = vector.load %arg10[%c0_86, %c0_87] : memref<64x4xf32, #tpu.memory_space<vmem>>, vector<64x4xf32>
    %cst_88 = arith.constant dense<0.000000e+00> : vector<4x1xf32>
    %186 = tpu.matmul %184, %174, %cst_88 {dimension_numbers = #tpu.dot_dimension_numbers<[1], [0], [0], [1], [0, 0, 1, 1], [], []>, precision = #tpu.contract_precision<fp32>} : vector<4x64xf32>, vector<64x1xf32>, vector<4x1xf32> -> vector<4x1xf32>
    %cst_89 = arith.constant dense<0.000000e+00> : vector<64x1xf32>
    %187 = tpu.matmul %185, %186, %cst_89 {dimension_numbers = #tpu.dot_dimension_numbers<[1], [0], [0], [1], [0, 0, 1, 1], [], []>, precision = #tpu.contract_precision<fp32>} : vector<64x4xf32>, vector<4x1xf32>, vector<64x1xf32> -> vector<64x1xf32>
    %cst_90 = arith.constant 9.99999974E-6 : f32
    %188 = vector.broadcast %cst_90 : f32 to vector<64x1xf32>
    %189 = arith.addf %187, %188 : vector<64x1xf32>
    %cst_91 = arith.constant dense<0.000000e+00> : vector<4x5xf32>
    %190 = tpu.matmul %184, %181, %cst_91 {dimension_numbers = #tpu.dot_dimension_numbers<[1], [0], [0], [1], [0, 0, 1, 1], [], []>, precision = #tpu.contract_precision<fp32>} : vector<4x64xf32>, vector<64x5xf32>, vector<4x5xf32> -> vector<4x5xf32>
    %cst_92 = arith.constant dense<0.000000e+00> : vector<64x5xf32>
    %191 = tpu.matmul %185, %190, %cst_92 {dimension_numbers = #tpu.dot_dimension_numbers<[1], [0], [0], [1], [0, 0, 1, 1], [], []>, precision = #tpu.contract_precision<fp32>} : vector<64x4xf32>, vector<4x5xf32>, vector<64x5xf32> -> vector<64x5xf32>
    %cst_93 = arith.constant 9.99999974E-6 : f32
    %192 = vector.broadcast %cst_93 : f32 to vector<64x5xf32>
    %193 = arith.addf %191, %192 : vector<64x5xf32>
    %194 = arith.divf %174, %189 : vector<64x1xf32>
    %195 = arith.divf %181, %193 : vector<64x5xf32>
    %196 = vector.broadcast %194 : vector<64x1xf32> to vector<64x32xf32>
    %197 = arith.mulf %196, %154 : vector<64x32xf32>
    %cst_94 = arith.constant dense<0.000000e+00> : vector<4x32xf32>
    %198 = tpu.matmul %184, %197, %cst_94 {dimension_numbers = #tpu.dot_dimension_numbers<[1], [0], [0], [1], [0, 0, 1, 1], [], []>, precision = #tpu.contract_precision<fp32>} : vector<4x64xf32>, vector<64x32xf32>, vector<4x32xf32> -> vector<4x32xf32>
    %199 = arith.mulf %198, %198 : vector<4x32xf32>
    %cst_95 = arith.constant dense<0.000000e+00> : vector<4xf32>
    %200 = vector.multi_reduction <add>, %199, %cst_95 [1] : vector<4x32xf32> to vector<4xf32>
    %201 = vector.shape_cast %200 : vector<4xf32> to vector<4x1xf32>
    %202 = math.sqrt %201 : vector<4x1xf32>
    %cst_96 = arith.constant 9.99999971E-10 : f32
    %203 = vector.broadcast %cst_96 : f32 to vector<4x1xf32>
    %204 = arith.addf %202, %203 : vector<4x1xf32>
    %205 = vector.broadcast %204 : vector<4x1xf32> to vector<4x32xf32>
    %206 = arith.divf %198, %205 : vector<4x32xf32>
    "tpu.trace_start"() <{level = 10 : i32, message = "pd,cd->pc"}> : () -> ()
    %cst_97 = arith.constant dense<0.000000e+00> : vector<4x5xf32>
    %207 = tpu.matmul %206, %26, %cst_97 {dimension_numbers = #tpu.dot_dimension_numbers<[1], [1], [0], [0], [0, 0, 1, 0], [], []>, precision = #tpu.contract_precision<fp32>} : vector<4x32xf32>, vector<5x32xf32>, vector<4x5xf32> -> vector<4x5xf32>
    "tpu.trace_stop"() : () -> ()
    %cst_98 = arith.constant dense<0xFF800000> : vector<4xf32>
    %208 = vector.multi_reduction <maximumf>, %207, %cst_98 [1] : vector<4x5xf32> to vector<4xf32>
    %209 = vector.shape_cast %208 : vector<4xf32> to vector<4x1xf32>
    %210 = vector.broadcast %209 : vector<4x1xf32> to vector<4x5xf32>
    %211 = arith.subf %207, %210 : vector<4x5xf32>
    %212 = math.exp %211 : vector<4x5xf32>
    %cst_99 = arith.constant dense<0.000000e+00> : vector<4xf32>
    %213 = vector.multi_reduction <add>, %212, %cst_99 [1] : vector<4x5xf32> to vector<4xf32>
    %214 = vector.shape_cast %213 : vector<4xf32> to vector<4x1xf32>
    %215 = vector.broadcast %214 : vector<4x1xf32> to vector<4x5xf32>
    %216 = arith.divf %212, %215 : vector<4x5xf32>
    %c0_100 = arith.constant 0 : index
    %c0_101 = arith.constant 0 : index
    %217 = vector.load %arg14[%c0_100, %c0_101] : memref<4x5xf32, #tpu.memory_space<vmem>>, vector<4x5xf32>
    tpu.vector_store %arg14[%c0_100, %c0_101], %216 {strides = array<i32>} : memref<4x5xf32, #tpu.memory_space<vmem>>, vector<4x5xf32>,
    "tpu.trace_start"() <{level = 10 : i32, message = "id,cd->ic"}> : () -> ()
    %cst_102 = arith.constant dense<0.000000e+00> : vector<64x5xf32>
    %218 = tpu.matmul %154, %26, %cst_102 {dimension_numbers = #tpu.dot_dimension_numbers<[1], [1], [0], [0], [0, 0, 1, 0], [], []>, precision = #tpu.contract_precision<fp32>} : vector<64x32xf32>, vector<5x32xf32>, vector<64x5xf32> -> vector<64x5xf32>
    "tpu.trace_stop"() : () -> ()
    %219 = arith.mulf %195, %218 : vector<64x5xf32>
    %cst_103 = arith.constant dense<0.000000e+00> : vector<4x5xf32>
    %220 = tpu.matmul %184, %219, %cst_103 {dimension_numbers = #tpu.dot_dimension_numbers<[1], [0], [0], [1], [0, 0, 1, 1], [], []>, precision = #tpu.contract_precision<fp32>} : vector<4x64xf32>, vector<64x5xf32>, vector<4x5xf32> -> vector<4x5xf32>
    "tpu.trace_start"() <{level = 10 : i32, message = "id,jd->ij"}> : () -> ()
    %cst_104 = arith.constant dense<0.000000e+00> : vector<64x64xf32>
    %221 = tpu.matmul %154, %154, %cst_104 {dimension_numbers = #tpu.dot_dimension_numbers<[1], [1], [0], [0], [0, 0, 1, 0], [], []>, precision = #tpu.contract_precision<fp32>} : vector<64x32xf32>, vector<64x32xf32>, vector<64x64xf32> -> vector<64x64xf32>
    "tpu.trace_stop"() : () -> ()
    %c0_105 = arith.constant 0 : index
    %c0_106 = arith.constant 0 : index
    %222 = vector.load %arg11[%c0_105, %c0_106] : memref<64x64xf32, #tpu.memory_space<vmem>>, vector<64x64xf32>
    %223 = arith.mulf %221, %222 : vector<64x64xf32>
    %cst_107 = arith.constant dense<0.000000e+00> : vector<64x5xf32>
    %224 = tpu.matmul %223, %195, %cst_107 {dimension_numbers = #tpu.dot_dimension_numbers<[1], [0], [0], [1], [0, 0, 1, 1], [], []>, precision = #tpu.contract_precision<fp32>} : vector<64x64xf32>, vector<64x5xf32>, vector<64x5xf32> -> vector<64x5xf32>
    %225 = arith.mulf %195, %224 : vector<64x5xf32>
    %cst_108 = arith.constant dense<0.000000e+00> : vector<4x5xf32>
    %226 = tpu.matmul %184, %225, %cst_108 {dimension_numbers = #tpu.dot_dimension_numbers<[1], [0], [0], [1], [0, 0, 1, 1], [], []>, precision = #tpu.contract_precision<fp32>} : vector<4x64xf32>, vector<64x5xf32>, vector<4x5xf32> -> vector<4x5xf32>
    %cst_109 = arith.constant 0.000000e+00 : f32
    %227 = vector.broadcast %cst_109 : f32 to vector<4x5xf32>
    %228 = arith.maximumf %226, %227 : vector<4x5xf32>
    %229 = math.sqrt %228 : vector<4x5xf32>
    %cst_110 = arith.constant 9.99999971E-10 : f32
    %230 = vector.broadcast %cst_110 : f32 to vector<4x5xf32>
    %231 = arith.addf %229, %230 : vector<4x5xf32>
    %232 = arith.divf %220, %231 : vector<4x5xf32>
    %cst_111 = arith.constant dense<0xFF800000> : vector<4xf32>
    %233 = vector.multi_reduction <maximumf>, %232, %cst_111 [1] : vector<4x5xf32> to vector<4xf32>
    %234 = vector.shape_cast %233 : vector<4xf32> to vector<4x1xf32>
    %235 = vector.broadcast %234 : vector<4x1xf32> to vector<4x5xf32>
    %236 = arith.subf %232, %235 : vector<4x5xf32>
    %237 = math.exp %236 : vector<4x5xf32>
    %cst_112 = arith.constant dense<0.000000e+00> : vector<4xf32>
    %238 = vector.multi_reduction <add>, %237, %cst_112 [1] : vector<4x5xf32> to vector<4xf32>
    %239 = vector.shape_cast %238 : vector<4xf32> to vector<4x1xf32>
    %240 = vector.broadcast %239 : vector<4x1xf32> to vector<4x5xf32>
    %241 = arith.divf %237, %240 : vector<4x5xf32>
    %c0_113 = arith.constant 0 : index
    %c0_114 = arith.constant 0 : index
    %242 = vector.load %arg15[%c0_113, %c0_114] : memref<4x5xf32, #tpu.memory_space<vmem>>, vector<4x5xf32>
    tpu.vector_store %arg15[%c0_113, %c0_114], %241 {strides = array<i32>} : memref<4x5xf32, #tpu.memory_space<vmem>>, vector<4x5xf32>,
    return
  }
}

</mosaic_0001>

<bundles_post_ra>
// kernel: tpu_custom_call.1
= control target key start
LH: loop header
LB: loop body
LE: loop exit
PB: predicated region body
PF: predicated region fallthrough
CT: control target
= control target key end

     0   :  { %s27018_s0 = inlined_call_operand.hbm [shape: f32[32,32], index: 0, kind: input, shape index: {}]   ;;  %s27019_s1 = inlined_call_operand.hbm [shape: f32[32,32], index: 1, kind: input, shape index: {}]   ;;  %s27020_s2 = inlined_call_operand.hbm [shape: f32[1,32], index: 2, kind: input, shape index: {}]   ;;  %s27021_s3 = inlined_call_operand.hbm [shape: f32[32,32], index: 3, kind: input, shape index: {}]   ;;  %s27022_s4 = inlined_call_operand.hbm [shape: f32[1,32], index: 4, kind: input, shape index: {}]   ;;  %s27023_s5 = inlined_call_operand.vmem [shape: f32[16,32], index: 5, kind: input, shape index: {}]   ;;  %s27024_s6 = inlined_call_operand.vmem [shape: f32[5,32], index: 6, kind: input, shape index: {}]   ;;  %s27025_s7 = inlined_call_operand.hbm [shape: f32[1,32], index: 7, kind: input, shape index: {}]   ;;  %s27026_s8 = inlined_call_operand.hbm [shape: f32[16,32], index: 8, kind: input, shape index: {}]   ;;  %s27027_s9 = inlined_call_operand.hbm [shape: f32[4,64], index: 9, kind: input, shape index: {}]   ;;  %s27028_s10 = inlined_call_operand.vmem [shape: f32[64,4], index: 10, kind: input, shape index: {}]   ;;  %s27029_s11 = inlined_call_operand.vmem [shape: f32[64,64], index: 11, kind: input, shape index: {}]   ;;  %s27030_s12 = inlined_call_operand.vmem [shape: f32[64,5], index: 12, kind: output, shape index: {0}]   ;;  %s27031_s13 = inlined_call_operand.vmem [shape: f32[64,1], index: 13, kind: output, shape index: {1}]   ;;  %s27032_s14 = inlined_call_operand.hbm [shape: f32[4,5], index: 14, kind: output, shape index: {2}]   ;;  %s27033_s15 = inlined_call_operand.hbm [shape: f32[4,5], index: 15, kind: output, shape index: {3}]   ;;  %s27034_s16 = inlined_call_operand.hbm [shape: f32[32,32], index: 16, kind: output, shape index: {4}]   ;;  %s27035_s17 = inlined_call_operand.hbm [shape: f32[16,32], index: 17, kind: output, shape index: {5}]  }
   0x1   :  { %27213 = sst [smem:[#allocation86_spill]] %s27018_s0 }
   0x2   :  { %27214 = sst [smem:[#allocation87_spill]] %s27019_s1 }
   0x3   :  { %23 = vsyncpa [#allocation3], 0 }
   0x4   :  { %24 = vsyncpa [#allocation6], 0 }
   0x5   :  { %25 = vsyncpa [#allocation9], 0 }
   0x6   :  { %26 = vsyncpa [#allocation12], 0 }
   0x7   :  { %27 = vsyncpa [#allocation15], 0 }
   0x8   :  { %28 = vsyncpa [#allocation4], 0 }
   0x9   :  { %29 = vsyncpa [#allocation18], 0 }
   0xa   :  { %30 = vsyncpa [#allocation21], 0  ;;  %s22718_s24 = smov [#allocation5]   ;;  %s22719_s26 = smov [#allocation8]  }
   0xb   :  { %s48_s25 = sshll.u32 %s22718_s24, 4  ;;  %s70_s27 = sshll.u32 %s22719_s26, 4  ;;  %s49_s25 = int_to_ptr.vmem [resolvable:$true] %s48_s25  ;;  %s71_s27 = int_to_ptr.vmem [resolvable:$true] %s70_s27 }
   0xc   :  { %s22470_s28 = scalar_lea.vmem %s49_s25, 512  ;;  %p22475_p1 = scmp.lt.s32.totalorder %s49_s25, %s49_s25 }
   0xd   :  { %p22471_p0 = scmp.ne.s32.totalorder %s49_s25, %s22470_s28  ;;  %p22476_p2 = scmp.lt.s32.totalorder %s22470_s28, %s22470_s28 }
   0xf   :  { %p22477_p3 = por %p22476_p2, %p22475_p1 }
  0x11   :  { %p22478_p4 = pnand %p22477_p3, %p22471_p0 }
  0x13   :  { %22481 = shalt.err (!%p22478_p4)
}
  0x14   :  { %s22720_s29 = smov 128   ;;  %s22721_s0 = smov 8  }
  0x15   :  { %s27215_s19 = sld [smem:[#allocation87_spill]]  ;;  %s22490_s1 = scalar_lea.vmem %s71_s27, 512 }
  0x16   :  { %p22491_p5 = scmp.ne.s32.totalorder %s71_s27, %s22490_s1  ;;  %p22495_p6 = scmp.lt.s32.totalorder %s71_s27, %s71_s27 }
  0x17   :  { %p22496_p7 = scmp.lt.s32.totalorder %s22490_s1, %s22490_s1 }
  0x19   :  { %p22497_p8 = por %p22496_p7, %p22495_p6 }
  0x1b   :  { %54 = dma.hbm_to_vmem [thread:$0]  %s27215_s19, 512, %s49_s25, [#allocation6], %s22720_s29, %s22720_s29, %s22721_s0  }
  0x1c   :  { %p22498_p9 = pnand %p22497_p8, %p22491_p5 }
  0x1e   :  { %22501 = shalt.err (!%p22498_p9)
}
  0x1f   :  { %76 = dma.hbm_to_vmem [thread:$0]  %s27021_s3, 512, %s71_s27, [#allocation9], %s22720_s29, %s22720_s29, %s22721_s0  }
  0x20   :  { %s22722_s22 = smov [#allocation11]   ;;  %s22723_s24 = smov [#allocation2]  }
  0x21   :  { %s97_s23 = sshll.u32 %s22722_s22, 4  ;;  %s36_s26 = sshll.u32 %s22723_s24, 4  ;;  %s98_s23 = int_to_ptr.vmem [resolvable:$true] %s97_s23  ;;  %s37_s26 = int_to_ptr.vmem [resolvable:$true] %s36_s26 }
  0x22   :  { %s22510_s25 = scalar_lea.vmem %s98_s23, 16  ;;  %s22514_s28 = scalar_lea.vmem %s98_s23, 32 }
  0x23   :  { %p22511_p10 = scmp.ne.s32.totalorder %s98_s23, %s22510_s25  ;;  %p22515_p11 = scmp.lt.s32.totalorder %s98_s23, %s98_s23 }
  0x24   :  { %p22516_p12 = scmp.lt.s32.totalorder %s22514_s28, %s22510_s25 }
  0x26   :  { %p22517_p13 = por %p22516_p12, %p22515_p11 }
  0x28   :  { %p22518_p0 = pnand %p22517_p13, %p22511_p10 }
  0x2a   :  { %22521 = shalt.err (!%p22518_p0)
}
  0x2b   :  { %100 = dma.hbm_to_vmem [thread:$0]  %s27025_s7, 16, %s98_s23, [#allocation12]  }
  0x2c   :  { %s22530_s19 = scalar_lea.vmem %s37_s26, 512  ;;  %p22535_p2 = scmp.lt.s32.totalorder %s37_s26, %s37_s26 }
  0x2d   :  { %p22531_p1 = scmp.ne.s32.totalorder %s37_s26, %s22530_s19  ;;  %p22536_p3 = scmp.lt.s32.totalorder %s22530_s19, %s22530_s19 }
  0x2f   :  { %p22537_p4 = por %p22536_p3, %p22535_p2 }
  0x31   :  { %p22538_p5 = pnand %p22537_p4, %p22531_p1 }
  0x33   :  { %22541 = shalt.err (!%p22538_p5)
}
  0x34   :  { %s27216_s1 = sld [smem:[#allocation86_spill]]  ;;  %s22724_s20 = smov [#allocation7]  }
  0x35   :  { %s61_s21 = sshll.u32 %s22724_s20, 4  ;;  %s22725_s22 = smov [#allocation10]   ;;  %s62_s21 = int_to_ptr.vmem [resolvable:$true] %s61_s21 }
  0x36   :  { %s83_s24 = sshll.u32 %s22725_s22, 4  ;;  %s22550_s7 = scalar_lea.vmem %s62_s21, 16  ;;  %s84_s24 = int_to_ptr.vmem [resolvable:$true] %s83_s24 }
  0x37   :  { %p22551_p6 = scmp.ne.s32.totalorder %s62_s21, %s22550_s7  ;;  %s22554_s23 = scalar_lea.vmem %s62_s21, 32 }
  0x38   :  { %p22555_p7 = scmp.lt.s32.totalorder %s62_s21, %s62_s21  ;;  %p22556_p8 = scmp.lt.s32.totalorder %s22554_s23, %s22550_s7 }
  0x3a   :  { %42 = dma.hbm_to_vmem [thread:$0]  %s27216_s1, 512, %s37_s26, [#allocation3], %s22720_s29, %s22720_s29, %s22721_s0  }
  0x3b   :  { %p22557_p9 = por %p22556_p8, %p22555_p7 }
  0x3d   :  { %p22558_p10 = pnand %p22557_p9, %p22551_p6 }
  0x3f   :  { %22561 = shalt.err (!%p22558_p10)
}
  0x40   :  { %64 = dma.hbm_to_vmem [thread:$0]  %s27020_s2, 16, %s62_s21, [#allocation6]  }
  0x41   :  { %s22570_s30 = scalar_lea.vmem %s84_s24, 16  ;;  %s22574_s26 = scalar_lea.vmem %s84_s24, 32 }
  0x42   :  { %p22571_p11 = scmp.ne.s32.totalorder %s84_s24, %s22570_s30  ;;  %p22575_p12 = scmp.lt.s32.totalorder %s84_s24, %s84_s24 }
  0x43   :  { %p22576_p13 = scmp.lt.s32.totalorder %s22574_s26, %s22570_s30 }
  0x45   :  { %p22577_p0 = por %p22576_p13, %p22575_p12 }
  0x47   :  { %p22578_p1 = pnand %p22577_p0, %p22571_p11 }
  0x49   :  { %22581 = shalt.err (!%p22578_p1)
}
  0x4a   :  { %86 = dma.hbm_to_vmem [thread:$0]  %s27022_s4, 16, %s84_s24, [#allocation9]  }
  0x4b   :  { %s22726_s3 = smov [#allocation13]   ;;  %s22727_s1 = smov [#allocation14]  }
  0x4c   :  { %s106_s27 = sshll.u32 %s22726_s3, 4  ;;  %s119_s20 = sshll.u32 %s22727_s1, 4  ;;  %s107_s27 = int_to_ptr.vmem [resolvable:$true] %s106_s27  ;;  %s120_s20 = int_to_ptr.vmem [resolvable:$true] %s119_s20 }
  0x4d   :  { %s22590_s22 = scalar_lea.vmem %s107_s27, 256  ;;  %p22595_p3 = scmp.lt.s32.totalorder %s107_s27, %s107_s27 }
  0x4e   :  { %p22591_p2 = scmp.ne.s32.totalorder %s107_s27, %s22590_s22  ;;  %p22596_p4 = scmp.lt.s32.totalorder %s22590_s22, %s22590_s22 }
  0x50   :  { %p22597_p5 = por %p22596_p4, %p22595_p3 }
  0x52   :  { %p22598_p6 = pnand %p22597_p5, %p22591_p2 }
  0x54   :  { %22601 = shalt.err (!%p22598_p6)
}
  0x55   :  { %112 = dma.hbm_to_vmem [thread:$0]  %s27026_s8, 256, %s107_s27, [#allocation12], %s22720_s29, %s22720_s29, %s22721_s0  }
  0x56   :  { %s22610_s4 = scalar_lea.vmem %s120_s20, 64  ;;  %p22615_p8 = scmp.lt.s32.totalorder %s120_s20, %s120_s20 }
  0x57   :  { %p22611_p7 = scmp.ne.s32.totalorder %s120_s20, %s22610_s4  ;;  %p22616_p9 = scmp.lt.s32.totalorder %s22610_s4, %s22610_s4 }
  0x59   :  { %p22617_p10 = por %p22616_p9, %p22615_p8 }
  0x5b   :  { %p22618_p11 = pnand %p22617_p10, %p22611_p7 }
  0x5d   :  { %22621 = shalt.err (!%p22618_p11)
}
  0x5e   :  { %122 = dma.hbm_to_vmem [thread:$0]  %s27027_s9, 64, %s120_s20, [#allocation15]  }
  0x5f   :  { %22702 = dma.done.wait [#allocation3], 512  }
  0x60   :  { %22703 = vsyncadd [#allocation3], 4294966784 }
  0x61   :  { %22704 = dma.done.wait [#allocation6], 528  }
  0x62   :  { %22705 = vsyncadd [#allocation6], 4294966768 }
  0x63   :  { %22706 = dma.done.wait [#allocation9], 528  }
  0x64   :  { %22707 = vsyncadd [#allocation9], 4294966768 }
  0x65   :  { %22708 = dma.done.wait [#allocation12], 272  }
  0x66   :  { %22709 = vsyncadd [#allocation12], 4294967024 }
  0x67   :  { %22710 = dma.done.wait [#allocation15], 64  }
  0x68   :  { %22711 = vsyncadd [#allocation15], 4294967232  ;;  %vm166_vm0 = vcmask 261120   ;;  %v158_v0 = vld [vmem:[#allocation5 + $0x18] sm:$0xff]  ;;  %v157_v1 = vld [vmem:[#allocation5 + $0x10] sm:$0xff] }
  0x69   :  { %v156_v2 = vld [vmem:[#allocation5 + $0x8] sm:$0xff]  ;;  %v22861_v3 = vand.u32 4294901760, %v158_v0  ;;  %v22863_v4 = vand.u32 4294901760, %v157_v1  ;;  %v155_v6 = vld [vmem:[#allocation5] sm:$0xff]  ;;  %v153_v12 = vld [vmem:[#allocation2 + $0x10] sm:$0xff] }
  0x6a   :  { %v22865_v5 = vand.u32 4294901760, %v156_v2  ;;  %v151_v7 = vld [vmem:[#allocation2] sm:$0xff]  ;;  %v152_v8 = vld [vmem:[#allocation2 + $0x8] sm:$0xff]  ;;  %v22867_v9 = vand.u32 4294901760, %v155_v6  ;;  %v154_v13 = vld [vmem:[#allocation2 + $0x18] sm:$0xff]  ;;  %v174_v19 = vsel %vm166_vm0, %v153_v12, 0 }
  0x6b   :  { %v168_v10 = vsel %vm166_vm0, %v151_v7, 0  ;;  %v171_v11 = vsel %vm166_vm0, %v152_v8, 0  ;;  %19757 = vmatprep.subr.mxu0 %v22861_v3  ;;  %v314_v14 = vsub.f32 %v158_v0, %v22861_v3  ;;  %v321_v17 = vsub.f32 %v157_v1, %v22863_v4  ;;  %v800_v52 = vld [vmem:[#allocation8 + $0x18] sm:$0xff]  ;;  %v799_v54 = vld [vmem:[#allocation8 + $0x10] sm:$0xff]  ;;  %v798_v57 = vld [vmem:[#allocation8 + $0x8] sm:$0xff] }
  0x6c   :  { %v22873_v15 = vand.u32 4294901760, %v168_v10  ;;  %v22875_v16 = vand.u32 4294901760, %v171_v11  ;;  %19758 = vmatpush3.msra.mxu0 %v22861_v3  ;;  %v328_v18 = vsub.f32 %v156_v2, %v22865_v5  ;;  %v177_v20 = vsel %vm166_vm0, %v154_v13, 0  ;;  %v797_v61 = vld [vmem:[#allocation8] sm:$0xff] }
  0x6d   :  { %v335_v21 = vsub.f32 %v155_v6, %v22867_v9  ;;  %19759 = vmatprep.subr.mxu0 %v22863_v4  ;;  %v22884_v22 = vand.u32 4294901760, %v314_v14  ;;  %v22892_v25 = vand.u32 4294901760, %v321_v17  ;;  %v22898_v27 = vand.u32 4294901760, %v174_v19 }
  0x6e   :  { %v22887_v23 = vsub.f32 %v168_v10, %v22873_v15  ;;  %v22890_v24 = vsub.f32 %v171_v11, %v22875_v16  ;;  %19779 = vmatprep.mubr.f32.mxu1 %v22873_v15  ;;  %19760 = vmatpush3.msra.mxu0 %v22863_v4  ;;  %v22896_v26 = vand.u32 4294901760, %v328_v18  ;;  %v22900_v28 = vand.u32 4294901760, %v177_v20 }
  0x6f   :  { %v22902_v29 = vand.u32 4294901760, %v335_v21  ;;  %19761 = vmatprep.subr.mxu0 %v22865_v5  ;;  %v316_v30 = vsub.f32 %v314_v14, %v22884_v22  ;;  %v323_v33 = vsub.f32 %v321_v17, %v22892_v25  ;;  %v22912_v35 = vsub.f32 %v174_v19, %v22898_v27  ;;  %v18381_v19 = vld [vmem:[#allocation7] ss:$0 sm:$0xff] }
  0x70   :  { %v250_v31 = vand.u32 4294901760, %v22887_v23  ;;  %v260_v32 = vand.u32 4294901760, %v22890_v24  ;;  %19762 = vmatpush3.msra.mxu0 %v22865_v5  ;;  %v330_v34 = vsub.f32 %v328_v18, %v22896_v26  ;;  %v22915_v36 = vsub.f32 %v177_v20, %v22900_v28 }
  0x71   :  { %19763 = vmatprep.subr.mxu0 %v22867_v9  ;;  %v317_v37 = vand.u32 4294901760, %v316_v30  ;;  %v324_v40 = vand.u32 4294901760, %v323_v33  ;;  %v270_v41 = vand.u32 4294901760, %v22912_v35  ;;  %v337_v43 = vsub.f32 %v335_v21, %v22902_v29 }
  0x72   :  { %v251_v38 = vsub.f32 %v22887_v23, %v250_v31  ;;  %v261_v39 = vsub.f32 %v22890_v24, %v260_v32  ;;  %19764 = vmatpush3.msra.mxu0 %v22867_v9  ;;  %v280_v42 = vand.u32 4294901760, %v22915_v36  ;;  %v331_v46 = vand.u32 4294901760, %v330_v34 }
  0x73   :  { %19771 = vmatprep.subr.mxu1 %v317_v37  ;;  %19785 = vmatprep.subr.mxu0 %v314_v14  ;;  %v271_v47 = vsub.f32 %v22912_v35, %v270_v41  ;;  %v338_v51 = vand.u32 4294901760, %v337_v43  ;;  %v22973_v53 = vand.u32 4294901760, %v800_v52  ;;  %v22978_v56 = vand.u32 4294901760, %v799_v54 }
  0x74   :  { %v252_v44 = vand.u32 4294901760, %v251_v38  ;;  %v262_v45 = vand.u32 4294901760, %v261_v39  ;;  %19772 = vmatpush3.msra.mxu1 %v317_v37  ;;  %v281_v48 = vsub.f32 %v22915_v36, %v280_v42  ;;  %v22988_v60 = vand.u32 4294901760, %v798_v57 }
  0x75   :  { %19773 = vmatprep.subr.mxu1 %v324_v40  ;;  %v272_v49 = vand.u32 4294901760, %v271_v47  ;;  %v22976_v55 = vsub.f32 %v800_v52, %v22973_v53  ;;  %v22986_v59 = vsub.f32 %v799_v54, %v22978_v56  ;;  %v23000_v1 = vand.u32 4294901760, %v797_v61 }
  0x76   :  { %19765 = vmatprep.mubr.f32.mxu0 %v252_v44  ;;  %19774 = vmatpush3.msra.mxu1 %v324_v40  ;;  %v282_v50 = vand.u32 4294901760, %v281_v48  ;;  %v22998_v0 = vsub.f32 %v798_v57, %v22988_v60 }
  0x77   :  { %19766 = vmatmul.mubr.f32.vlgmr.msra.gmra.mxu0 %v262_v45  ;;  %19775 = vmatprep.subr.mxu1 %v331_v46  ;;  %v22983_v58 = vand.u32 4294901760, %v22976_v55  ;;  %v22995_v63 = vand.u32 4294901760, %v22986_v59 }
  0x78   :  { %19786 = vmatpush3.msra.mxu0 %v314_v14  ;;  %19768 = vmatprep.mubr.f32.mxu0 %v272_v49 }
  0x79   :  { %19787 = vmatprep.subr.mxu0 %v321_v17  ;;  %19776 = vmatpush3.msra.mxu1 %v331_v46  ;;  %v957_v62 = vsub.f32 %v22976_v55, %v22983_v58 }
  0x7a   :  { %19788 = vmatpush3.msra.mxu0 %v321_v17  ;;  %19777 = vmatprep.subr.mxu1 %v338_v51 }
  0x7b   :  { %19769 = vmatmul.mubr.f32.gmra.mxu0 %v282_v50  ;;  %19789 = vmatprep.subr.mxu0 %v328_v18  ;;  %v958_v2 = vand.u32 4294901760, %v957_v62 }
  0x7c   :  { %19778 = vmatpush3.msra.mxu1 %v338_v51  ;;  %19790 = vmatpush3.msra.mxu0 %v328_v18 }
  0x7d   :  { %19780 = vmatmul.mubr.f32.vlgmr.msra.gmra.mxu1 %v22875_v16  ;;  %19791 = vmatprep.subr.mxu0 %v335_v21 }
  0x7e   :  { %19799 = vmatprep.subr.mxu1 %v22861_v3  ;;  %19792 = vmatpush3.msra.mxu0 %v335_v21 }
  0x7f   :  { %19793 = vmatprep.mubr.f32.mxu0 %v22887_v23  ;;  %19800 = vmatpush3.msra.mxu1 %v22861_v3 }
  0x80   :  { %19794 = vmatmul.mubr.f32.vlgmr.msra.gmra.mxu0 %v22890_v24  ;;  %19801 = vmatprep.subr.mxu1 %v22863_v4 }
  0x81   :  { %19813 = vmatprep.subr.mxu0 %v22884_v22  ;;  %19782 = vmatprep.mubr.f32.mxu1 %v22898_v27 }
  0x82   :  { %19802 = vmatpush3.msra.mxu1 %v22863_v4  ;;  %19814 = vmatpush3.msra.mxu0 %v22884_v22 }
  0x83   :  { %19783 = vmatmul.mubr.f32.gmra.mxu1 %v22900_v28  ;;  %19803 = vmatprep.subr.mxu1 %v22865_v5 }
  0x84   :  { %19815 = vmatprep.subr.mxu0 %v22892_v25  ;;  %19796 = vmatprep.mubr.f32.mxu0 %v22912_v35 }
  0x85   :  { %19804 = vmatpush3.msra.mxu1 %v22865_v5  ;;  %19816 = vmatpush3.msra.mxu0 %v22892_v25 }
  0x86   :  { %19805 = vmatprep.subr.mxu1 %v22867_v9  ;;  %19797 = vmatmul.mubr.f32.gmra.mxu0 %v22915_v36 }
  0x87   :  { %19817 = vmatprep.subr.mxu0 %v22896_v26  ;;  %19806 = vmatpush3.msra.mxu1 %v22867_v9 }
  0x88   :  { %19807 = vmatprep.mubr.f32.mxu1 %v250_v31  ;;  %19818 = vmatpush3.msra.mxu0 %v22896_v26 }
  0x89   :  { %19808 = vmatmul.mubr.f32.vlgmr.msra.gmra.mxu1 %v260_v32  ;;  %19819 = vmatprep.subr.mxu0 %v22902_v29 }
  0x8a   :  { %19827 = vmatprep.subr.mxu1 %v22861_v3  ;;  %19820 = vmatpush3.msra.mxu0 %v22902_v29 }
  0x8b   :  { %19821 = vmatprep.mubr.f32.mxu0 %v22873_v15  ;;  %19828 = vmatpush3.msra.mxu1 %v22861_v3  ;;  %v964_v3 = vsub.f32 %v22986_v59, %v22995_v63 }
  0x8c   :  { %19822 = vmatmul.mubr.f32.vlgmr.msra.gmra.mxu0 %v22875_v16  ;;  %19829 = vmatprep.subr.mxu1 %v22863_v4 }
  0x8d   :  { %19810 = vmatprep.mubr.f32.mxu1 %v270_v41  ;;  %19830 = vmatpush3.msra.mxu1 %v22863_v4  ;;  %v23007_v4 = vand.u32 4294901760, %v22998_v0  ;;  %v965_v6 = vand.u32 4294901760, %v964_v3 }
  0x8e   :  { %19824 = vmatprep.mubr.f32.mxu0 %v22898_v27  ;;  %19811 = vmatmul.mubr.f32.gmra.mxu1 %v280_v42 }
  0x8f   :  { %19831 = vmatprep.subr.mxu1 %v22865_v5  ;;  %19835 = vmatprep.mubr.f32.mxu1 %v22873_v15  ;;  %v971_v7 = vsub.f32 %v22998_v0, %v23007_v4 }
  0x90   :  { %19832 = vmatpush3.msra.mxu1 %v22865_v5  ;;  %19825 = vmatmul.mubr.f32.gmra.mxu0 %v22900_v28  ;;  %v23010_v5 = vsub.f32 %v797_v61, %v23000_v1 }
  0x91   :  { %19833 = vmatprep.subr.mxu1 %v22867_v9  ;;  %19841 = vmatprep.subr.mxu0 %v22973_v53 }
  0x92   :  { %19834 = vmatpush3.msra.mxu1 %v22867_v9  ;;  %19842 = vmatpush3.msra.mxu0 %v22973_v53  ;;  %v23017_v8 = vand.u32 4294901760, %v23010_v5  ;;  %v972_v9 = vand.u32 4294901760, %v971_v7 }
  0x93   :  { %19836 = vmatmul.mubr.f32.vlgmr.msra.gmra.mxu1 %v22875_v16  ;;  %19843 = vmatprep.subr.mxu0 %v22978_v56 }
  0x94   :  { %19838 = vmatprep.mubr.f32.mxu1 %v22898_v27  ;;  %19844 = vmatpush3.msra.mxu0 %v22978_v56  ;;  %v978_v10 = vsub.f32 %v23010_v5, %v23017_v8 }
  0x95   :  { %19845 = vmatprep.subr.mxu0 %v22988_v60  ;;  %19855 = vmatprep.subr.mxu1 %v958_v2 }
  0x96   :  { %19846 = vmatpush3.msra.mxu0 %v22988_v60  ;;  %19856 = vmatpush3.msra.mxu1 %v958_v2  ;;  %v979_v11 = vand.u32 4294901760, %v978_v10 }
  0x97   :  { %19839 = vmatmul.mubr.f32.gmra.mxu1 %v22900_v28  ;;  %19847 = vmatprep.subr.mxu0 %v23000_v1 }
  0x98   :  { %19848 = vmatpush3.msra.mxu0 %v23000_v1  ;;  %19857 = vmatprep.subr.mxu1 %v965_v6 }
  0x99   :  { %19869 = vmatprep.subr.mxu0 %v22976_v55  ;;  %19858 = vmatpush3.msra.mxu1 %v965_v6 }
  0x9a   :  { %19859 = vmatprep.subr.mxu1 %v972_v9 }
  0x9b   :  { %19860 = vmatpush3.msra.mxu1 %v972_v9 }
  0x9c   :  { %19861 = vmatprep.subr.mxu1 %v979_v11 }
  0x9d   :  { %19862 = vmatpush3.msra.mxu1 %v979_v11 }
  0x9e   :  { %19883 = vmatprep.subr.mxu1 %v22973_v53 }
 0x137   :  { %v19767_v12 = vpop.f32.mrf.mxu0 }
 0x138   :  { %v265_v22 = vadd.f32 %v19767_v12, %v18381_v19 }
 0x139   :  { %v254_v13 = vpop.f32.mrf.mxu0 }
 0x13a   :  { %v255_v25 = vadd.f32 %v18381_v19, %v254_v13 }
 0x13b   :  { %v19770_v14 = vpop.f32.mrf.mxu0 }
 0x13c   :  { %v285_v26 = vadd.f32 %v19770_v14, %v18381_v19 }
 0x13d   :  { %v274_v15 = vpop.f32.mrf.mxu0  ;;  %v19781_v16 = vpop.f32.mrf.mxu1 }
 0x13e   :  { %v382_v27 = vadd.f32 %v19781_v16, %v265_v22  ;;  %v275_v32 = vadd.f32 %v18381_v19, %v274_v15 }
 0x13f   :  { %v375_v17 = vpop.f32.mrf.mxu1 }
 0x140   :  { %v19795_v18 = vpop.f32.mrf.mxu0  ;;  %v376_v30 = vadd.f32 %v375_v17, %v255_v25 }
 0x141   :  { %v481_v33 = vadd.f32 %v19795_v18, %v382_v27 }
 0x142   :  { %v473_v21 = vpop.f32.mrf.mxu0 }
 0x143   :  { %v19784_v20 = vpop.f32.mrf.mxu1  ;;  %v474_v36 = vadd.f32 %v473_v21, %v376_v30 }
 0x144   :  { %v394_v34 = vadd.f32 %v19784_v20, %v285_v26 }
 0x145   :  { %v387_v23 = vpop.f32.mrf.mxu1 }
 0x146   :  { %v19798_v24 = vpop.f32.mrf.mxu0  ;;  %v388_v37 = vadd.f32 %v387_v23, %v275_v32 }
 0x147   :  { %v495_v41 = vadd.f32 %v19798_v24, %v394_v34 }
 0x148   :  { %v487_v28 = vpop.f32.mrf.mxu0 }
 0x149   :  { %v19809_v29 = vpop.f32.mrf.mxu1  ;;  %v488_v45 = vadd.f32 %v487_v28, %v388_v37 }
 0x14a   :  { %v580_v38 = vadd.f32 %v19809_v29, %v481_v33 }
 0x14b   :  { %v571_v31 = vpop.f32.mrf.mxu1 }
 0x14c   :  { %v19823_v35 = vpop.f32.mrf.mxu0  ;;  %v572_v42 = vadd.f32 %v571_v31, %v474_v36 }
 0x14d   :  { %v685_v46 = vadd.f32 %v19823_v35, %v580_v38 }
 0x14e   :  { %v678_v39 = vpop.f32.mrf.mxu0  ;;  %v19812_v40 = vpop.f32.mrf.mxu1 }
 0x14f   :  { %v596_v47 = vadd.f32 %v19812_v40, %v495_v41  ;;  %v679_v49 = vadd.f32 %v678_v39, %v572_v42 }
 0x150   :  { %v587_v43 = vpop.f32.mrf.mxu1  ;;  %v19826_v44 = vpop.f32.mrf.mxu0 }
 0x151   :  { %v588_v50 = vadd.f32 %v587_v43, %v488_v45  ;;  %v697_v57 = vadd.f32 %v19826_v44, %v596_v47 }
 0x152   :  { %v690_v52 = vpop.f32.mrf.mxu0 }
 0x153   :  { %v19837_v48 = vpop.f32.mrf.mxu1  ;;  %v691_v3 = vadd.f32 %v690_v52, %v588_v50 }
 0x154   :  { %v778_v51 = vadd.f32 %v19837_v48, %v685_v46 }
 0x155   :  { %v771_v54 = vpop.f32.mrf.mxu1 }
 0x156   :  { %v794_v61 = vmax.f32 %v778_v51, 0.0  ;;  %v772_v62 = vadd.f32 %v771_v54, %v679_v49 }
 0x157   :  { %v19840_v2 = vpop.f32.mrf.mxu1 }
 0x158   :  { %v812_v6 = vsel %vm166_vm0, %v794_v61, 0  ;;  %v793_v7 = vmax.f32 %v772_v62, 0.0  ;;  %v790_v9 = vadd.f32 %v19840_v2, %v697_v57 }
 0x159   :  { %v23024_v10 = vand.u32 4294901760, %v812_v6  ;;  %v783_v11 = vpop.f32.mrf.mxu1 }
 0x15a   :  { %v809_v12 = vsel %vm166_vm0, %v793_v7, 0  ;;  %v796_v13 = vmax.f32 %v790_v9, 0.0  ;;  %v784_v14 = vadd.f32 %v783_v11, %v691_v3 }
 0x15b   :  { %v900_v15 = vsub.f32 %v812_v6, %v23024_v10  ;;  %v23028_v16 = vand.u32 4294901760, %v809_v12 }
 0x15c   :  { %v818_v17 = vsel %vm166_vm0, %v796_v13, 0  ;;  %v795_v18 = vmax.f32 %v784_v14, 0.0 }
 0x15d   :  { %v901_v19 = vand.u32 4294901760, %v900_v15  ;;  %v890_v20 = vsub.f32 %v809_v12, %v23028_v16  ;;  %v23032_v21 = vand.u32 4294901760, %v818_v17  ;;  %19863 = vmatprep.mubr.f32.mxu1 %v23028_v16 }
 0x15e   :  { %v815_v22 = vsel %vm166_vm0, %v795_v18, 0  ;;  %19864 = vmatmul.mubr.f32.vlgmr.msra.gmra.mxu1 %v23024_v10 }
 0x15f   :  { %v920_v23 = vsub.f32 %v818_v17, %v23032_v21  ;;  %v909_v24 = vand.u32 4294901760, %v815_v22  ;;  %19884 = vmatpush3.msra.mxu1 %v22973_v53  ;;  %v891_v25 = vand.u32 4294901760, %v890_v20  ;;  %v902_v26 = vsub.f32 %v900_v15, %v901_v19 }
 0x160   :  { %19885 = vmatprep.subr.mxu1 %v22978_v56 }
 0x161   :  { %v910_v27 = vsub.f32 %v815_v22, %v909_v24  ;;  %19866 = vmatprep.mubr.f32.mxu1 %v909_v24  ;;  %19886 = vmatpush3.msra.mxu1 %v22978_v56  ;;  %v892_v28 = vsub.f32 %v890_v20, %v891_v25  ;;  %v921_v29 = vand.u32 4294901760, %v920_v23  ;;  %v903_v32 = vand.u32 4294901760, %v902_v26 }
 0x162   :  { %19867 = vmatmul.mubr.f32.gmra.mxu1 %v23032_v21  ;;  %19887 = vmatprep.subr.mxu1 %v22988_v60 }
 0x163   :  { %19888 = vmatpush3.msra.mxu1 %v22988_v60  ;;  %19891 = vmatprep.mubr.f32.mxu1 %v891_v25  ;;  %v893_v30 = vand.u32 4294901760, %v892_v28  ;;  %v911_v31 = vand.u32 4294901760, %v910_v27  ;;  %v922_v34 = vsub.f32 %v920_v23, %v921_v29  ;;  %v23090_v25 = vld [vmem:[%s27023_s5 + $0x8] sm:$0xff] }
 0x164   :  { %19889 = vmatprep.subr.mxu1 %v23000_v1 }
 0x165   :  { %19849 = vmatprep.mubr.f32.mxu0 %v893_v30  ;;  %19890 = vmatpush3.msra.mxu1 %v23000_v1  ;;  %v912_v33 = vsub.f32 %v910_v27, %v911_v31  ;;  %v923_v36 = vand.u32 4294901760, %v922_v34 }
 0x166   :  { %19850 = vmatmul.mubr.f32.vlgmr.msra.gmra.mxu0 %v903_v32  ;;  %19892 = vmatmul.mubr.f32.vlgmr.msra.gmra.mxu1 %v901_v19  ;;  %v23106_v32 = vld [vmem:[%s27023_s5] sm:$0xff] }
 0x167   :  { %19911 = vmatprep.subr.mxu1 %v22973_v53  ;;  %19870 = vmatpush3.msra.mxu0 %v22976_v55  ;;  %v913_v35 = vand.u32 4294901760, %v912_v33 }
 0x168   :  { %19894 = vmatprep.mubr.f32.mxu1 %v911_v31  ;;  %19912 = vmatpush3.msra.mxu1 %v22973_v53  ;;  %v1537_v31 = vmul.f32 %v23090_v25, %v23090_v25 }
 0x169   :  { %19871 = vmatprep.subr.mxu0 %v22986_v59  ;;  %19913 = vmatprep.subr.mxu1 %v22978_v56 }
 0x16a   :  { %19852 = vmatprep.mubr.f32.mxu0 %v913_v35  ;;  %19872 = vmatpush3.msra.mxu0 %v22986_v59 }
 0x16b   :  { %19914 = vmatpush3.msra.mxu1 %v22978_v56  ;;  %19853 = vmatmul.mubr.f32.gmra.mxu0 %v923_v36  ;;  %v1536_v36 = vmul.f32 %v23106_v32, %v23106_v32 }
 0x16c   :  { %19873 = vmatprep.subr.mxu0 %v22998_v0  ;;  %19895 = vmatmul.mubr.f32.gmra.mxu1 %v921_v29 }
 0x16d   :  { %19915 = vmatprep.subr.mxu1 %v22988_v60  ;;  %19874 = vmatpush3.msra.mxu0 %v22998_v0 }
 0x16e   :  { %19877 = vmatprep.mubr.f32.mxu0 %v890_v20  ;;  %19916 = vmatpush3.msra.mxu1 %v22988_v60 }
 0x16f   :  { %19919 = vmatprep.mubr.f32.mxu1 %v23028_v16  ;;  %19875 = vmatprep.subr.mxu0 %v23010_v5 }
 0x170   :  { %19917 = vmatprep.subr.mxu1 %v23000_v1  ;;  %19876 = vmatpush3.msra.mxu0 %v23010_v5 }
 0x171   :  { %19918 = vmatpush3.msra.mxu1 %v23000_v1  ;;  %19878 = vmatmul.mubr.f32.vlgmr.msra.gmra.mxu0 %v900_v15 }
 0x172   :  { %19897 = vmatprep.subr.mxu0 %v22983_v58  ;;  %19920 = vmatmul.mubr.f32.vlgmr.msra.gmra.mxu1 %v23024_v10 }
 0x173   :  { %19880 = vmatprep.mubr.f32.mxu0 %v910_v27  ;;  %19898 = vmatpush3.msra.mxu0 %v22983_v58 }
 0x174   :  { %19922 = vmatprep.mubr.f32.mxu1 %v909_v24  ;;  %19899 = vmatprep.subr.mxu0 %v22995_v63 }
 0x175   :  { %19900 = vmatpush3.msra.mxu0 %v22995_v63 }
 0x176   :  { %19881 = vmatmul.mubr.f32.gmra.mxu0 %v920_v23  ;;  %19901 = vmatprep.subr.mxu0 %v23007_v4 }
 0x177   :  { %19923 = vmatmul.mubr.f32.gmra.mxu1 %v23032_v21  ;;  %19902 = vmatpush3.msra.mxu0 %v23007_v4  ;;  %v18382_v4 = vld [vmem:[#allocation10] ss:$0 sm:$0xff] }
 0x178   :  { %19905 = vmatprep.mubr.f32.mxu0 %v23028_v16  ;;  %19903 = vmatprep.subr.mxu0 %v23017_v8 }
 0x179   :  { %19904 = vmatpush3.msra.mxu0 %v23017_v8 }
 0x17a   :  { %19906 = vmatmul.mubr.f32.vlgmr.msra.gmra.mxu0 %v23024_v10 }
 0x17b   :  { %19908 = vmatprep.mubr.f32.mxu0 %v909_v24 }
 0x17e   :  { %19909 = vmatmul.mubr.f32.gmra.mxu0 %v23032_v21 }
 0x21e   :  { %v19865_v53 = vpop.f32.mrf.mxu1 }
 0x220   :  { %v1016_v55 = vpop.f32.mrf.mxu1 }
 0x222   :  { %v19868_v56 = vpop.f32.mrf.mxu1 }
 0x224   :  { %v1028_v58 = vpop.f32.mrf.mxu1 }
 0x226   :  { %v19851_v59 = vpop.f32.mrf.mxu0  ;;  %v19893_v60 = vpop.f32.mrf.mxu1 }
 0x227   :  { %v906_v37 = vadd.f32 %v19851_v59, %v18382_v4 }
 0x228   :  { %v895_v63 = vpop.f32.mrf.mxu0  ;;  %v1212_v0 = vpop.f32.mrf.mxu1 }
 0x229   :  { %v896_v39 = vadd.f32 %v18382_v4, %v895_v63  ;;  %v1023_v42 = vadd.f32 %v19865_v53, %v906_v37  ;;  %v1541_v53 = vsel %vm166_vm0, %v1537_v31, 0.0 }
 0x22b   :  { %v19854_v1 = vpop.f32.mrf.mxu0  ;;  %v1017_v45 = vadd.f32 %v1016_v55, %v896_v39 }
 0x22c   :  { %v19896_v38 = vpop.f32.mrf.mxu1  ;;  %v926_v40 = vadd.f32 %v19854_v1, %v18382_v4 }
 0x22d   :  { %v915_v5 = vpop.f32.mrf.mxu0 }
 0x22e   :  { %v1228_v41 = vpop.f32.mrf.mxu1  ;;  %v916_v46 = vadd.f32 %v18382_v4, %v915_v5  ;;  %v1035_v50 = vadd.f32 %v19868_v56, %v926_v40  ;;  %v1538_v56 = vsel %vm166_vm0, %v1536_v36, 0.0 }
 0x230   :  { %v1029_v57 = vadd.f32 %v1028_v58, %v916_v46 }
 0x231   :  { %v19879_v8 = vpop.f32.mrf.mxu0 }
 0x232   :  { %v1122_v44 = vadd.f32 %v19879_v8, %v1023_v42  ;;  %v19921_v48 = vpop.f32.mrf.mxu1 }
 0x233   :  { %v1114_v43 = vpop.f32.mrf.mxu0 }
 0x234   :  { %v1115_v49 = vadd.f32 %v1114_v43, %v1017_v45  ;;  %v1221_v54 = vadd.f32 %v19893_v60, %v1122_v44  ;;  %v1412_v62 = vpop.f32.mrf.mxu1 }
 0x236   :  { %v19882_v47 = vpop.f32.mrf.mxu0  ;;  %v1213_v3 = vadd.f32 %v1212_v0, %v1115_v49 }
 0x237   :  { %v1136_v52 = vadd.f32 %v19882_v47, %v1035_v50  ;;  %v19924_v13 = vpop.f32.mrf.mxu1 }
 0x238   :  { %v1128_v51 = vpop.f32.mrf.mxu0 }
 0x239   :  { %v1129_v6 = vadd.f32 %v1128_v51, %v1029_v57  ;;  %v1237_v11 = vadd.f32 %v19896_v38, %v1136_v52  ;;  %v1424_v23 = vpop.f32.mrf.mxu1 }
 0x23a   :  { %v19907_v61 = vpop.f32.mrf.mxu0 }
 0x23b   :  { %v1326_v2 = vadd.f32 %v19907_v61, %v1221_v54  ;;  %v1229_v17 = vadd.f32 %v1228_v41, %v1129_v6 }
 0x23c   :  { %v1319_v7 = vpop.f32.mrf.mxu0 }
 0x23d   :  { %v1419_v9 = vadd.f32 %v19921_v48, %v1326_v2  ;;  %v1320_v10 = vadd.f32 %v1319_v7, %v1213_v3 }
 0x23e   :  { %v19910_v12 = vpop.f32.mrf.mxu0 }
 0x23f   :  { %v23075_v14 = vmax.f32 %v1419_v9, 0.0  ;;  %v1413_v15 = vadd.f32 %v1412_v62, %v1320_v10  ;;  %v1338_v16 = vadd.f32 %v19910_v12, %v1237_v11 }
 0x240   :  { %v1331_v18 = vpop.f32.mrf.mxu0 }
 0x241   :  { %27217 = vst [vmem:[#allocation30_spill] sm:$0xff] %v23075_v14  ;;  %1439 = vst.msk [vmem:[#allocation19 + $0x8] sm:$0xff] %vm166_vm0, %v23075_v14  ;;  %v23079_v19 = vmax.f32 %v1413_v15, 0.0  ;;  %v1431_v20 = vadd.f32 %v19924_v13, %v1338_v16  ;;  %v1332_v21 = vadd.f32 %v1331_v18, %v1229_v17  ;;  %v1479_v22 = vmul.f32 %v23075_v14, %v23075_v14 }
 0x243   :  { %27218 = vst [vmem:[#allocation31_spill] sm:$0xff] %v23079_v19  ;;  %1438 = vst.msk [vmem:[#allocation19] sm:$0xff] %vm166_vm0, %v23079_v19  ;;  %v23085_v24 = vmax.f32 %v1431_v20, 0.0  ;;  %v1425_v26 = vadd.f32 %v1424_v23, %v1332_v21  ;;  %v1485_v27 = vsel %vm166_vm0, %v1479_v22, 0.0  ;;  %v1478_v28 = vmul.f32 %v23079_v19, %v23079_v19 }
 0x244   :  { %1486 = vadd.xlane.f32.xlu1 %v1485_v27 }
 0x245   :  { %27219 = vst [vmem:[#allocation32_spill] sm:$0xff] %v23085_v24  ;;  %1441 = vst.msk [vmem:[#allocation19 + $0x18] sm:$0xff] %vm166_vm0, %v23085_v24  ;;  %v1481_v29 = vmul.f32 %v23085_v24, %v23085_v24  ;;  %v23099_v30 = vmax.f32 %v1425_v26, 0.0  ;;  %v1482_v34 = vsel %vm166_vm0, %v1478_v28, 0.0 }
 0x247   :  { %27220 = vst [vmem:[#allocation33_spill] sm:$0xff] %v23099_v30  ;;  %v1491_v33 = vsel %vm166_vm0, %v1481_v29, 0.0  ;;  %1440 = vst.msk [vmem:[#allocation19 + $0x10] sm:$0xff] %vm166_vm0, %v23099_v30  ;;  %v1480_v35 = vmul.f32 %v23099_v30, %v23099_v30 }
 0x248   :  { %1492 = vadd.xlane.f32.xlu0 %v1491_v33  ;;  %1483 = vadd.xlane.f32.xlu1 %v1482_v34 }
 0x249   :  { %v1488_v55 = vsel %vm166_vm0, %v1480_v35, 0.0 }
 0x24c   :  { %1489 = vadd.xlane.f32.xlu0 %v1488_v55  ;;  %1542 = vadd.xlane.f32.xlu1 %v1541_v53 }
 0x250   :  { %1539 = vadd.xlane.f32.xlu0 %v1538_v56 }
 0x2cd   :  { %v1487_v58 = vpop.xlane.xlu1 %1486 }
 0x2ce   :  { %22254 = vrsqrt.f32 %v1487_v58  ;;  %vm1503_vm1 = vcmp.eq.f32.partialorder %v1487_v58, inf  ;;  %v1506_v37 = vand.u32 2147483648, %v1487_v58  ;;  %vm1505_vm2 = vcmp.eq.f32.partialorder %v1487_v58, 0.0 }
 0x2d1   :  { %v1493_v59 = vpop.xlane.xlu0 %1492  ;;  %v1484_v60 = vpop.xlane.xlu1 %1483 }
 0x2d2   :  { %22256 = vrsqrt.f32 %v1493_v59  ;;  %vm1517_vm3 = vcmp.eq.f32.partialorder %v1493_v59, inf  ;;  %v1520_v43 = vand.u32 2147483648, %v1493_v59  ;;  %vm1519_vm4 = vcmp.eq.f32.partialorder %v1493_v59, 0.0 }
 0x2d3   :  { %22258 = vrsqrt.f32 %v1484_v60  ;;  %vm1496_vm5 = vcmp.eq.f32.partialorder %v1484_v60, inf  ;;  %v1499_v46 = vand.u32 2147483648, %v1484_v60  ;;  %vm1498_vm6 = vcmp.eq.f32.partialorder %v1484_v60, 0.0 }
 0x2d5   :  { %v1490_v63 = vpop.xlane.xlu0 %1489  ;;  %v1543_v0 = vpop.xlane.xlu1 %1542 }
 0x2d6   :  { %22260 = vrsqrt.f32 %v1490_v63  ;;  %vm1510_vm7 = vcmp.eq.f32.partialorder %v1490_v63, inf  ;;  %vm1512_vm8 = vcmp.eq.f32.partialorder %v1490_v63, 0.0  ;;  %v1513_v61 = vand.u32 2147483648, %v1490_v63 }
 0x2d7   :  { %22262 = vrsqrt.f32 %v1543_v0  ;;  %vm1553_vm9 = vcmp.eq.f32.partialorder %v1543_v0, inf  ;;  %v1556_v3 = vand.u32 2147483648, %v1543_v0  ;;  %vm1555_vm10 = vcmp.eq.f32.partialorder %v1543_v0, 0.0 }
 0x2d9   :  { %v1540_v1 = vpop.xlane.xlu0 %1539 }
 0x2da   :  { %22264 = vrsqrt.f32 %v1540_v1  ;;  %vm1546_vm11 = vcmp.eq.f32.partialorder %v1540_v1, inf  ;;  %v1549_v15 = vand.u32 2147483648, %v1540_v1  ;;  %vm1548_vm12 = vcmp.eq.f32.partialorder %v1540_v1, 0.0 }
 0x2db   :  { %v22255_v4 = vpop.eup %22254 }
 0x2dc   :  { %v1502_v5 = vmul.f32 %v22255_v4, %v1487_v58 }
 0x2de   :  { %v1504_v39 = vsel %vm1503_vm1, %v1487_v58, %v1502_v5 }
 0x2df   :  { %v22257_v38 = vpop.eup %22256  ;;  %v1507_v40 = vsel %vm1505_vm2, %v1506_v37, %v1504_v39 }
 0x2e0   :  { %v22259_v8 = vpop.eup %22258  ;;  %v1516_v41 = vmul.f32 %v22257_v38, %v1493_v59  ;;  %v1523_v42 = vadd.f32 1e-09, %v1507_v40 }
 0x2e1   :  { %v1495_v44 = vmul.f32 %v22259_v8, %v1484_v60 }
 0x2e2   :  { %v1518_v45 = vsel %vm1517_vm3, %v1493_v59, %v1516_v41  ;;  %22266 = vrcp.f32 %v1523_v42 }
 0x2e3   :  { %v22261_v47 = vpop.eup %22260  ;;  %v1521_v48 = vsel %vm1519_vm4, %v1520_v43, %v1518_v45  ;;  %v1497_v49 = vsel %vm1496_vm5, %v1484_v60, %v1495_v44 }
 0x2e4   :  { %v22263_v50 = vpop.eup %22262  ;;  %v1525_v51 = vadd.f32 1e-09, %v1521_v48  ;;  %v1500_v52 = vsel %vm1498_vm6, %v1499_v46, %v1497_v49  ;;  %v1509_v54 = vmul.f32 %v22261_v47, %v1490_v63  ;;  %vm1461_vm6 = vcmask 253952  }
 0x2e5   :  { %v1522_v57 = vadd.f32 1e-09, %v1500_v52  ;;  %v1552_v62 = vmul.f32 %v22263_v50, %v1543_v0 }
 0x2e6   :  { %22268 = vrcp.f32 %v1525_v51  ;;  %v1511_v2 = vsel %vm1510_vm7, %v1490_v63, %v1509_v54 }
 0x2e7   :  { %v22265_v6 = vpop.eup %22264  ;;  %22270 = vrcp.f32 %v1522_v57  ;;  %v1514_v7 = vsel %vm1512_vm8, %v1513_v61, %v1511_v2  ;;  %v1554_v9 = vsel %vm1553_vm9, %v1543_v0, %v1552_v62  ;;  %vm4465_vm9 = vcmask 130048  }
 0x2e8   :  { %v1524_v10 = vadd.f32 1e-09, %v1514_v7  ;;  %v1557_v11 = vsel %vm1555_vm10, %v1556_v3, %v1554_v9  ;;  %v1545_v12 = vmul.f32 %v22265_v6, %v1540_v1  ;;  %v23230_v3 = vand.u32 4294901760, %v23085_v24 }
 0x2e9   :  { %v1559_v13 = vadd.f32 1e-09, %v1557_v11  ;;  %v23237_v6 = vand.u32 4294901760, %v23099_v30  ;;  %v23245_v9 = vand.u32 4294901760, %v23075_v14  ;;  %vm10993_vm10 = vcmask 7168  }
 0x2ea   :  { %22272 = vrcp.f32 %v1524_v10  ;;  %v1547_v16 = vsel %vm1546_vm11, %v1540_v1, %v1545_v12  ;;  %v23241_v7 = vsub.f32 %v23085_v24, %v23230_v3  ;;  %v23251_v10 = vand.u32 4294901760, %v23079_v19 }
 0x2eb   :  { %22274 = vrcp.f32 %v1559_v13  ;;  %v1550_v17 = vsel %vm1548_vm12, %v1549_v15, %v1547_v16  ;;  %v23258_v12 = vsub.f32 %v23099_v30, %v23237_v6  ;;  %v23265_v13 = vsub.f32 %v23075_v14, %v23245_v9 }
 0x2ec   :  { %v1558_v18 = vadd.f32 1e-09, %v1550_v17  ;;  %v23254_v11 = vand.u32 4294901760, %v23241_v7  ;;  %v23275_v17 = vsub.f32 %v23079_v19, %v23251_v10  ;;  %vm1444_vm11 = vcmask 258048  }
 0x2ed   :  { %v23271_v16 = vand.u32 4294901760, %v23258_v12 }
 0x2ee   :  { %22276 = vrcp.f32 %v1558_v18  ;;  %v2276_v15 = vsub.f32 %v23241_v7, %v23254_v11  ;;  %v23282_v18 = vand.u32 4294901760, %v23265_v13 }
 0x2ef   :  { %v22267_v20 = vpop.eup %22266 }
 0x2f0   :  { %v23120_v21 = vmul.f32 %v22267_v20, %v23075_v14  ;;  %v23286_v20 = vand.u32 4294901760, %v2276_v15  ;;  %v23319_v15 = vld [vmem:[#allocation13 + $0x8] sm:$0xff] }
 0x2f2   :  { %27221 = vst [vmem:[#allocation34_spill] sm:$0xff] %v23120_v21  ;;  %v1574_v23 = vsel %vm166_vm0, %v23120_v21, 0  ;;  %v23321_v21 = vld [vmem:[#allocation13] sm:$0xff] }
 0x2f3   :  { %v22269_v22 = vpop.eup %22268  ;;  %v23127_v28 = vand.u32 4294901760, %v1574_v23 }
 0x2f4   :  { %v22271_v26 = vpop.eup %22270  ;;  %v23125_v27 = vmul.f32 %v22269_v22, %v23085_v24  ;;  %v2283_v22 = vsub.f32 %v23258_v12, %v23271_v16 }
 0x2f5   :  { %v23130_v29 = vmul.f32 %v22271_v26, %v23079_v19  ;;  %v23142_v55 = vsub.f32 %v1574_v23, %v23127_v28  ;;  %v23291_v23 = vand.u32 4294901760, %v23275_v17  ;;  %v2290_v26 = vsub.f32 %v23265_v13, %v23282_v18 }
 0x2f6   :  { %v1580_v31 = vsel %vm166_vm0, %v23125_v27, 0 }
 0x2f7   :  { %v22273_v33 = vpop.eup %22272  ;;  %v23134_v34 = vand.u32 4294901760, %v1580_v31  ;;  %v1571_v35 = vsel %vm166_vm0, %v23130_v29, 0  ;;  %v23173_v8 = vand.u32 4294901760, %v23142_v55 }
 0x2f8   :  { %v22275_v36 = vpop.eup %22274  ;;  %v23139_v53 = vmul.f32 %v22273_v33, %v23099_v30  ;;  %v23147_v58 = vand.u32 4294901760, %v1571_v35  ;;  %v2297_v33 = vsub.f32 %v23275_v17, %v23291_v23 }
 0x2f9   :  { %v23145_v56 = vsub.f32 %v1580_v31, %v23134_v34  ;;  %19925 = vmatprep.subr.mxu0 %v23134_v34  ;;  %v1563_v59 = vmul.f32 %v22275_v36, %v23090_v25  ;;  %27224 = vst [vmem:[#allocation37_spill] sm:$0xff] %v23173_v8  ;;  %v1713_v46 = vsub.f32 %v23142_v55, %v23173_v8  ;;  %v23302_v31 = vand.u32 4294901760, %v2283_v22 }
 0x2fa   :  { %27222 = vst [vmem:[#allocation35_spill] sm:$0xff] %v23139_v53  ;;  %v1577_v60 = vsel %vm166_vm0, %v23139_v53, 0  ;;  %19926 = vmatpush3.xpose.msra.mxu0 %v23134_v34  ;;  %v23164_v38 = vsub.f32 %v1571_v35, %v23147_v58  ;;  %v23309_v35 = vand.u32 4294901760, %v2290_v26  ;;  %v23313_v36 = vand.u32 4294901760, %v2297_v33 }
 0x2fb   :  { %v22277_v63 = vpop.eup %22276  ;;  %v23154_v0 = vand.u32 4294901760, %v1577_v60  ;;  %v23157_v1 = vand.u32 4294901760, %v23145_v56  ;;  %v1568_v4 = vsel %vm166_vm0, %v1563_v59, 0  ;;  %v23198_v52 = vand.u32 4294901760, %v1713_v46 }
 0x2fc   :  { %v1561_v5 = vmul.f32 %v22277_v63, %v23106_v32  ;;  %v23161_v37 = vand.u32 4294901760, %v1568_v4  ;;  %v23190_v48 = vand.u32 4294901760, %v23164_v38 }
 0x2fd   :  { %27223 = vst [vmem:[#allocation36_spill] sm:$0xff] %v23157_v1  ;;  %v23167_v25 = vsub.f32 %v1577_v60, %v23154_v0  ;;  %19927 = vmatprep.subr.mxu0 %v23154_v0  ;;  %v1699_v39 = vsub.f32 %v23145_v56, %v23157_v1 }
 0x2fe   :  { %19928 = vmatpush3.xpose.msra.mxu0 %v23154_v0  ;;  %v1565_v32 = vsel %vm166_vm0, %v1561_v5, 0  ;;  %v1662_v40 = vsub.f32 %v1568_v4, %v23161_v37  ;;  %v1720_v57 = vsub.f32 %v23164_v38, %v23190_v48 }
 0x2ff   :  { %19929 = vmatprep.subr.mxu0 %v23127_v28  ;;  %v23179_v41 = vand.u32 4294901760, %v1699_v39  ;;  %v1651_v42 = vand.u32 4294901760, %v1565_v32  ;;  %v23182_v43 = vand.u32 4294901760, %v23167_v25 }
 0x300   :  { %v1663_v44 = vand.u32 4294901760, %v1662_v40  ;;  %v23206_v2 = vand.u32 4294901760, %v1720_v57 }
 0x301   :  { %27225 = vst [vmem:[#allocation38_spill] sm:$0xff] %v23182_v43  ;;  %19936 = vmatprep.subr.mxu1 %v23179_v41  ;;  %19944 = vmatprep.mubr.f32.mxu1 %v1651_v42  ;;  %v1706_v45 = vsub.f32 %v23167_v25, %v23182_v43  ;;  %v1652_v47 = vsub.f32 %v1565_v32, %v1651_v42 }
 0x302   :  { %19930 = vmatpush3.xpose.msra.mxu0 %v23127_v28  ;;  %19937 = vmatpush3.xpose.msra.mxu1 %v23179_v41  ;;  %v1664_v51 = vsub.f32 %v1662_v40, %v1663_v44 }
 0x303   :  { %19931 = vmatprep.subr.mxu0 %v23147_v58  ;;  %v23195_v49 = vand.u32 4294901760, %v1706_v45  ;;  %v1653_v50 = vand.u32 4294901760, %v1652_v47 }
 0x304   :  { %v1665_v62 = vand.u32 4294901760, %v1664_v51 }
 0x305   :  { %19938 = vmatprep.subr.mxu1 %v23195_v49  ;;  %v1654_v54 = vsub.f32 %v1652_v47, %v1653_v50 }
 0x306   :  { %19932 = vmatpush3.xpose.msra.mxu0 %v23147_v58  ;;  %19939 = vmatpush3.xpose.msra.mxu1 %v23195_v49 }
 0x307   :  { %19940 = vmatprep.subr.mxu1 %v23198_v52  ;;  %19947 = vmatprep.subr.mxu0 %v23145_v56  ;;  %v1655_v61 = vand.u32 4294901760, %v1654_v54 }
 0x309   :  { %19933 = vmatprep.mubr.f32.mxu0 %v1655_v61 }
 0x30a   :  { %19934 = vmatmul.mubr.f32.vlgmr.msra.gmra.mxu0 %v1665_v62  ;;  %19941 = vmatpush3.xpose.msra.mxu1 %v23198_v52 }
 0x30b   :  { %19948 = vmatpush3.xpose.msra.mxu0 %v23145_v56  ;;  %19942 = vmatprep.subr.mxu1 %v23206_v2 }
 0x30c   :  { %19949 = vmatprep.subr.mxu0 %v23167_v25  ;;  %19955 = vmatprep.mubr.f32.mxu0 %v1652_v47 }
 0x30e   :  { %19943 = vmatpush3.xpose.msra.mxu1 %v23206_v2 }
 0x30f   :  { %19950 = vmatpush3.xpose.msra.mxu0 %v23167_v25  ;;  %19958 = vmatprep.subr.mxu1 %v23134_v34 }
 0x310   :  { %19951 = vmatprep.subr.mxu0 %v23142_v55 }
 0x311   :  { %19945 = vmatmul.mubr.f32.vlgmr.msra.gmra.mxu1 %v23161_v37 }
 0x312   :  { %19959 = vmatpush3.xpose.msra.mxu1 %v23134_v34  ;;  %19966 = vmatprep.mubr.f32.mxu1 %v1653_v50 }
 0x313   :  { %19952 = vmatpush3.xpose.msra.mxu0 %v23142_v55  ;;  %19960 = vmatprep.subr.mxu1 %v23154_v0 }
 0x314   :  { %19953 = vmatprep.subr.mxu0 %v23164_v38 }
 0x316   :  { %19961 = vmatpush3.xpose.msra.mxu1 %v23154_v0 }
 0x317   :  { %19954 = vmatpush3.xpose.msra.mxu0 %v23164_v38  ;;  %19962 = vmatprep.subr.mxu1 %v23127_v28 }
 0x318   :  { %19969 = vmatprep.subr.mxu0 %v23157_v1 }
 0x31a   :  { %19956 = vmatmul.mubr.f32.vlgmr.msra.gmra.mxu0 %v1662_v40  ;;  %19963 = vmatpush3.xpose.msra.mxu1 %v23127_v28 }
 0x31b   :  { %19970 = vmatpush3.xpose.msra.mxu0 %v23157_v1  ;;  %19977 = vmatprep.mubr.f32.mxu0 %v1651_v42 }
 0x31c   :  { %19964 = vmatprep.subr.mxu1 %v23147_v58  ;;  %19971 = vmatprep.subr.mxu0 %v23182_v43 }
 0x31e   :  { %19965 = vmatpush3.xpose.msra.mxu1 %v23147_v58 }
 0x31f   :  { %19972 = vmatpush3.xpose.msra.mxu0 %v23182_v43  ;;  %19980 = vmatprep.subr.mxu1 %v23134_v34 }
 0x320   :  { %19973 = vmatprep.subr.mxu0 %v23173_v8 }
 0x321   :  { %19967 = vmatmul.mubr.f32.vlgmr.msra.gmra.mxu1 %v1663_v44 }
 0x322   :  { %19981 = vmatpush3.xpose.msra.mxu1 %v23134_v34  ;;  %19988 = vmatprep.mubr.f32.mxu1 %v1651_v42 }
 0x323   :  { %19974 = vmatpush3.xpose.msra.mxu0 %v23173_v8  ;;  %19982 = vmatprep.subr.mxu1 %v23154_v0 }
 0x324   :  { %19975 = vmatprep.subr.mxu0 %v23190_v48 }
 0x326   :  { %19983 = vmatpush3.xpose.msra.mxu1 %v23154_v0 }
 0x327   :  { %19976 = vmatpush3.xpose.msra.mxu0 %v23190_v48  ;;  %19984 = vmatprep.subr.mxu1 %v23127_v28 }
 0x328   :  { %19991 = vmatprep.subr.mxu0 %v23230_v3 }
 0x32a   :  { %19978 = vmatmul.mubr.f32.vlgmr.msra.gmra.mxu0 %v23161_v37  ;;  %19985 = vmatpush3.xpose.msra.mxu1 %v23127_v28 }
 0x32b   :  { %19992 = vmatpush3.msra.mxu0 %v23230_v3  ;;  %19986 = vmatprep.subr.mxu1 %v23147_v58 }
 0x32c   :  { %19993 = vmatprep.subr.mxu0 %v23237_v6 }
 0x32d   :  { %19994 = vmatpush3.msra.mxu0 %v23237_v6 }
 0x32e   :  { %19995 = vmatprep.subr.mxu0 %v23245_v9  ;;  %19987 = vmatpush3.xpose.msra.mxu1 %v23147_v58 }
 0x32f   :  { %19996 = vmatpush3.msra.mxu0 %v23245_v9  ;;  %20002 = vmatprep.subr.mxu1 %v23286_v20 }
 0x330   :  { %19997 = vmatprep.subr.mxu0 %v23251_v10 }
 0x331   :  { %19998 = vmatpush3.msra.mxu0 %v23251_v10  ;;  %19989 = vmatmul.mubr.f32.vlgmr.msra.gmra.mxu1 %v23161_v37 }
 0x332   :  { %20013 = vmatprep.subr.mxu0 %v23241_v7  ;;  %20003 = vmatpush3.msra.mxu1 %v23286_v20 }
 0x333   :  { %20004 = vmatprep.subr.mxu1 %v23302_v31 }
 0x334   :  { %20005 = vmatpush3.msra.mxu1 %v23302_v31 }
 0x335   :  { %20006 = vmatprep.subr.mxu1 %v23309_v35 }
 0x336   :  { %20007 = vmatpush3.msra.mxu1 %v23309_v35 }
 0x337   :  { %20008 = vmatprep.subr.mxu1 %v23313_v36 }
 0x338   :  { %20009 = vmatpush3.msra.mxu1 %v23313_v36 }
 0x339   :  { %20024 = vmatprep.subr.mxu1 %v23230_v3 }
 0x3ca   :  { %v19935_v59 = vpop.f32.mrf.mxu0 }
 0x3cc   :  { %v1657_v60 = vpop.f32.mrf.mxu0 }
 0x3d1   :  { %v19946_v63 = vpop.f32.mrf.mxu1 }
 0x3d2   :  { %v1765_v32 = vadd.f32 %v19946_v63, %v19935_v59 }
 0x3d3   :  { %v1758_v5 = vpop.f32.mrf.mxu1 }
 0x3d4   :  { %v1759_v42 = vadd.f32 %v1758_v5, %v1657_v60 }
 0x3da   :  { %v19957_v4 = vpop.f32.mrf.mxu0 }
 0x3db   :  { %v1852_v44 = vadd.f32 %v19957_v4, %v1765_v32 }
 0x3dc   :  { %v1844_v37 = vpop.f32.mrf.mxu0 }
 0x3dd   :  { %v1845_v46 = vadd.f32 %v1844_v37, %v1759_v42 }
 0x3e1   :  { %v19968_v39 = vpop.f32.mrf.mxu1 }
 0x3e2   :  { %v1937_v47 = vadd.f32 %v19968_v39, %v1852_v44 }
 0x3e3   :  { %v1928_v45 = vpop.f32.mrf.mxu1 }
 0x3e4   :  { %v1929_v51 = vadd.f32 %v1928_v45, %v1845_v46 }
 0x3ea   :  { %v19979_v40 = vpop.f32.mrf.mxu0 }
 0x3eb   :  { %v2026_v54 = vadd.f32 %v19979_v40, %v1937_v47 }
 0x3ec   :  { %v2019_v50 = vpop.f32.mrf.mxu0 }
 0x3ed   :  { %v2020_v61 = vadd.f32 %v2019_v50, %v1929_v51 }
 0x3f1   :  { %v19990_v57 = vpop.f32.mrf.mxu1 }
 0x3f2   :  { %v2107_v62 = vadd.f32 %v19990_v57, %v2026_v54 }
 0x3f3   :  { %v2100_v22 = vpop.f32.mrf.mxu1 }
 0x3f4   :  { %v2111_v26 = vmul.f32 5.0, %v2107_v62  ;;  %v2101_v33 = vadd.f32 %v2100_v22, %v2020_v61 }
 0x3f6   :  { %v2113_v59 = vadd.f32 %v2111_v26, %v23319_v15  ;;  %v2110_v60 = vmul.f32 5.0, %v2101_v33 }
 0x3f8   :  { %v2112_v63 = vadd.f32 %v2110_v60, %v23321_v21  ;;  %v2115_v4 = vsel %vm166_vm0, %v2113_v59, -inf }
 0x3fa   :  { %v2114_v5 = vsel %vm166_vm0, %v2112_v63, -inf }
 0x3fb   :  { %v2116_v37 = vmax.f32 %v2114_v5, %v2115_v4 }
 0x3fd   :  { %v2117_v39 = vrot.slane %v2116_v37, 4 }
 0x3ff   :  { %v2118_v32 = vmax.f32 %v2116_v37, %v2117_v39 }
 0x401   :  { %v2119_v40 = vrot.slane %v2118_v32, 2 }
 0x403   :  { %v2120_v42 = vmax.f32 %v2118_v32, %v2119_v40 }
 0x405   :  { %v2121_v44 = vrot.slane %v2120_v42, 1 }
 0x407   :  { %v2122_v45 = vmax.f32 %v2120_v42, %v2121_v44 }
 0x409   :  { %v2123_v46 = vsub.f32 %v2112_v63, %v2122_v45  ;;  %v2124_v47 = vsub.f32 %v2113_v59, %v2122_v45 }
 0x40b   :  { %v2125_v50 = vmul.f32 1.442695, %v2123_v46  ;;  %v2127_v51 = vmul.f32 1.442695, %v2124_v47 }
 0x40d   :  { %22278 = vpow2.f32 %v2125_v50 }
 0x40e   :  { %22280 = vpow2.f32 %v2127_v51 }
 0x41a   :  { %v22279_v54 = vpop.eup %22278 }
 0x41b   :  { %v22281_v57 = vpop.eup %22280  ;;  %v2129_v61 = vsel %vm166_vm0, %v22279_v54, 0.0 }
 0x41c   :  { %v2130_v62 = vsel %vm166_vm0, %v22281_v57, 0.0 }
 0x41d   :  { %v2131_v22 = vadd.f32 %v2130_v62, %v2129_v61 }
 0x41f   :  { %v2132_v26 = vrot.slane %v2131_v22, 4 }
 0x421   :  { %v2133_v33 = vadd.f32 %v2132_v26, %v2131_v22 }
 0x423   :  { %v2134_v60 = vrot.slane %v2133_v33, 2 }
 0x425   :  { %v2135_v4 = vadd.f32 %v2134_v60, %v2133_v33 }
 0x427   :  { %v2136_v5 = vrot.slane %v2135_v4, 1 }
 0x429   :  { %v2137_v37 = vadd.f32 %v2136_v5, %v2135_v4 }
 0x42b   :  { %22282 = vrcp.f32 %v2137_v37 }
 0x438   :  { %v22283_v63 = vpop.eup %22282 }
 0x439   :  { %v2140_v59 = vmul.f32 %v22283_v63, %v22281_v57  ;;  %v2139_v39 = vmul.f32 %v22283_v63, %v22279_v54 }
 0x43b   :  { %v2144_v32 = vsel %vm166_vm0, %v2140_v59, 0.0  ;;  %v2141_v40 = vsel %vm166_vm0, %v2139_v39, 0.0 }
 0x43c   :  { %2145 = vadd.xlane.f32.xlu1 %v2144_v32  ;;  %2142 = vadd.xlane.f32.xlu0 %v2141_v40 }
 0x4c5   :  { %v2146_v42 = vpop.xlane.xlu1 %2145  ;;  %v2143_v44 = vpop.xlane.xlu0 %2142 }
 0x4c6   :  { %v2148_v45 = vadd.f32 1e-09, %v2146_v42  ;;  %v2147_v46 = vadd.f32 1e-09, %v2143_v44 }
 0x4c8   :  { %22284 = vrcp.f32 %v2148_v45 }
 0x4c9   :  { %22286 = vrcp.f32 %v2147_v46 }
 0x4d5   :  { %v22285_v47 = vpop.eup %22284 }
 0x4d6   :  { %v22287_v50 = vpop.eup %22286  ;;  %v2152_v51 = vmul.f32 %v22285_v47, %v2140_v59 }
 0x4d7   :  { %v2150_v61 = vmul.f32 %v22287_v50, %v2139_v39 }
 0x4d8   :  { %v2157_v62 = vsel %vm166_vm0, %v2152_v51, 0 }
 0x4d9   :  { %v2154_v54 = vsel %vm166_vm0, %v2150_v61, 0  ;;  %v2238_v57 = vand.u32 4294901760, %v2157_v62 }
 0x4da   :  { %v2228_v22 = vand.u32 4294901760, %v2154_v54 }
 0x4db   :  { %v2239_v26 = vsub.f32 %v2157_v62, %v2238_v57 }
 0x4dc   :  { %20010 = vmatprep.mubr.f32.mxu1 %v2228_v22  ;;  %v2229_v33 = vsub.f32 %v2154_v54, %v2228_v22 }
 0x4dd   :  { %20011 = vmatmul.mubr.f32.vlgmr.msra.gmra.mxu1 %v2238_v57  ;;  %v2240_v60 = vand.u32 4294901760, %v2239_v26 }
 0x4de   :  { %20025 = vmatpush3.msra.mxu1 %v23230_v3  ;;  %v2230_v4 = vand.u32 4294901760, %v2229_v33 }
 0x4df   :  { %20026 = vmatprep.subr.mxu1 %v23237_v6  ;;  %v2241_v5 = vsub.f32 %v2239_v26, %v2240_v60 }
 0x4e0   :  { %20027 = vmatpush3.msra.mxu1 %v23237_v6  ;;  %20032 = vmatprep.mubr.f32.mxu1 %v2230_v4  ;;  %v2231_v37 = vsub.f32 %v2229_v33, %v2230_v4 }
 0x4e1   :  { %20028 = vmatprep.subr.mxu1 %v23245_v9  ;;  %v2242_v59 = vand.u32 4294901760, %v2241_v5 }
 0x4e2   :  { %20029 = vmatpush3.msra.mxu1 %v23245_v9  ;;  %v2232_v63 = vand.u32 4294901760, %v2231_v37 }
 0x4e3   :  { %20030 = vmatprep.subr.mxu1 %v23251_v10 }
 0x4e4   :  { %20031 = vmatpush3.msra.mxu1 %v23251_v10  ;;  %19999 = vmatprep.mubr.f32.mxu0 %v2232_v63 }
 0x4e5   :  { %20033 = vmatmul.mubr.f32.vlgmr.msra.gmra.mxu1 %v2240_v60  ;;  %20046 = vmatprep.subr.mxu1 %v23230_v3 }
 0x4e6   :  { %20000 = vmatmul.mubr.f32.vlgmr.msra.gmra.mxu0 %v2242_v59  ;;  %20047 = vmatpush3.msra.mxu1 %v23230_v3 }
 0x4e7   :  { %20014 = vmatpush3.msra.mxu0 %v23241_v7  ;;  %20054 = vmatprep.mubr.f32.mxu1 %v2228_v22 }
 0x4e8   :  { %20015 = vmatprep.subr.mxu0 %v23258_v12  ;;  %20021 = vmatprep.mubr.f32.mxu0 %v2229_v33 }
 0x4e9   :  { %20048 = vmatprep.subr.mxu1 %v23237_v6  ;;  %20016 = vmatpush3.msra.mxu0 %v23258_v12 }
 0x4ea   :  { %20049 = vmatpush3.msra.mxu1 %v23237_v6  ;;  %20017 = vmatprep.subr.mxu0 %v23265_v13 }
 0x4eb   :  { %20050 = vmatprep.subr.mxu1 %v23245_v9  ;;  %20018 = vmatpush3.msra.mxu0 %v23265_v13 }
 0x4ec   :  { %20051 = vmatpush3.msra.mxu1 %v23245_v9  ;;  %20019 = vmatprep.subr.mxu0 %v23275_v17 }
 0x4ed   :  { %20052 = vmatprep.subr.mxu1 %v23251_v10  ;;  %20020 = vmatpush3.msra.mxu0 %v23275_v17 }
 0x4ee   :  { %20053 = vmatpush3.msra.mxu1 %v23251_v10  ;;  %20022 = vmatmul.mubr.f32.vlgmr.msra.gmra.mxu0 %v2239_v26 }
 0x4ef   :  { %20035 = vmatprep.subr.mxu0 %v23254_v11  ;;  %20055 = vmatmul.mubr.f32.vlgmr.msra.gmra.mxu1 %v2238_v57 }
 0x4f0   :  { %20068 = vmatprep.subr.mxu1 %v23179_v41  ;;  %20036 = vmatpush3.msra.mxu0 %v23254_v11 }
 0x4f1   :  { %20043 = vmatprep.mubr.f32.mxu0 %v2228_v22  ;;  %20069 = vmatpush3.xpose.msra.mxu1 %v23179_v41 }
 0x4f2   :  { %20037 = vmatprep.subr.mxu0 %v23271_v16  ;;  %20070 = vmatprep.subr.mxu1 %v23195_v49 }
 0x4f3   :  { %20038 = vmatpush3.msra.mxu0 %v23271_v16 }
 0x4f4   :  { %20039 = vmatprep.subr.mxu0 %v23282_v18 }
 0x4f5   :  { %20040 = vmatpush3.msra.mxu0 %v23282_v18  ;;  %20071 = vmatpush3.xpose.msra.mxu1 %v23195_v49 }
 0x4f6   :  { %20041 = vmatprep.subr.mxu0 %v23291_v23  ;;  %20072 = vmatprep.subr.mxu1 %v23198_v52 }
 0x4f7   :  { %20042 = vmatpush3.msra.mxu0 %v23291_v23 }
 0x4f8   :  { %20044 = vmatmul.mubr.f32.vlgmr.msra.gmra.mxu0 %v2238_v57  ;;  %20057 = vmatprep.subr.mxu0 %v23134_v34 }
 0x4f9   :  { %20058 = vmatpush3.xpose.msra.mxu0 %v23134_v34  ;;  %20073 = vmatpush3.xpose.msra.mxu1 %v23198_v52 }
 0x4fa   :  { %20059 = vmatprep.subr.mxu0 %v23154_v0  ;;  %20074 = vmatprep.subr.mxu1 %v23206_v2 }
 0x4fd   :  { %20060 = vmatpush3.xpose.msra.mxu0 %v23154_v0  ;;  %20075 = vmatpush3.xpose.msra.mxu1 %v23206_v2 }
 0x4fe   :  { %20061 = vmatprep.subr.mxu0 %v23127_v28  ;;  %20090 = vmatprep.subr.mxu1 %v23134_v34 }
 0x501   :  { %20062 = vmatpush3.xpose.msra.mxu0 %v23127_v28 }
 0x502   :  { %20063 = vmatprep.subr.mxu0 %v23147_v58 }
 0x505   :  { %20064 = vmatpush3.xpose.msra.mxu0 %v23147_v58 }
 0x506   :  { %20079 = vmatprep.subr.mxu0 %v23145_v56 }
 0x59d   :  { %v20012_v32 = vpop.f32.mrf.mxu1 }
 0x59f   :  { %v2335_v44 = vpop.f32.mrf.mxu1 }
 0x5a5   :  { %v20034_v46 = vpop.f32.mrf.mxu1 }
 0x5a6   :  { %v20001_v39 = vpop.f32.mrf.mxu0 }
 0x5a7   :  { %v2342_v45 = vadd.f32 %v20012_v32, %v20001_v39  ;;  %v2505_v62 = vpop.f32.mrf.mxu1 }
 0x5a8   :  { %v2234_v40 = vpop.f32.mrf.mxu0 }
 0x5a9   :  { %v2336_v50 = vadd.f32 %v2335_v44, %v2234_v40 }
 0x5ae   :  { %v20023_v42 = vpop.f32.mrf.mxu0 }
 0x5af   :  { %v2429_v51 = vadd.f32 %v20023_v42, %v2342_v45  ;;  %v20056_v57 = vpop.f32.mrf.mxu1 }
 0x5b0   :  { %v2421_v47 = vpop.f32.mrf.mxu0 }
 0x5b1   :  { %v2422_v61 = vadd.f32 %v2421_v47, %v2336_v50  ;;  %v2514_v54 = vadd.f32 %v20034_v46, %v2429_v51  ;;  %v2677_v37 = vpop.f32.mrf.mxu1 }
 0x5b3   :  { %v2506_v33 = vadd.f32 %v2505_v62, %v2422_v61 }
 0x5b8   :  { %v20045_v22 = vpop.f32.mrf.mxu0 }
 0x5b9   :  { %v2603_v26 = vadd.f32 %v20045_v22, %v2514_v54 }
 0x5ba   :  { %v2596_v60 = vpop.f32.mrf.mxu0 }
 0x5bb   :  { %v2684_v4 = vadd.f32 %v20056_v57, %v2603_v26  ;;  %v2597_v5 = vadd.f32 %v2596_v60, %v2506_v33 }
 0x5bd   :  { %v2678_v63 = vadd.f32 %v2677_v37, %v2597_v5  ;;  %v2688_v59 = vmul.f32 %v2684_v4, %v2684_v4 }
 0x5bf   :  { %v2692_v53 = vsel %vm166_vm0, %v2688_v59, 0.0  ;;  %v2687_v39 = vmul.f32 %v2678_v63, %v2678_v63 }
 0x5c0   :  { %2693 = vadd.xlane.f32.xlu1 %v2692_v53 }
 0x5c1   :  { %v2689_v32 = vsel %vm166_vm0, %v2687_v39, 0.0 }
 0x5c2   :  { %2690 = vadd.xlane.f32.xlu0 %v2689_v32 }
 0x649   :  { %v2694_v40 = vpop.xlane.xlu1 %2693 }
 0x64a   :  { %22288 = vrsqrt.f32 %v2694_v40  ;;  %vm2704_vm13 = vcmp.eq.f32.partialorder %v2694_v40, inf  ;;  %v2707_v47 = vand.u32 2147483648, %v2694_v40  ;;  %vm2706_vm14 = vcmp.eq.f32.partialorder %v2694_v40, 0.0 }
 0x64b   :  { %v2691_v42 = vpop.xlane.xlu0 %2690 }
 0x64c   :  { %22290 = vrsqrt.f32 %v2691_v42  ;;  %vm2697_vm15 = vcmp.eq.f32.partialorder %v2691_v42, inf  ;;  %v2700_v62 = vand.u32 2147483648, %v2691_v42  ;;  %vm2699_vm1 = vcmp.eq.f32.partialorder %v2691_v42, 0.0 }
 0x657   :  { %v22289_v44 = vpop.eup %22288 }
 0x658   :  { %v2703_v45 = vmul.f32 %v22289_v44, %v2694_v40 }
 0x659   :  { %v22291_v46 = vpop.eup %22290 }
 0x65a   :  { %v2705_v50 = vsel %vm2704_vm13, %v2694_v40, %v2703_v45  ;;  %v2696_v51 = vmul.f32 %v22291_v46, %v2691_v42 }
 0x65b   :  { %v2708_v61 = vsel %vm2706_vm14, %v2707_v47, %v2705_v50 }
 0x65c   :  { %v2710_v54 = vadd.f32 1e-09, %v2708_v61  ;;  %v2698_v53 = vsel %vm2697_vm15, %v2691_v42, %v2696_v51 }
 0x65d   :  { %v2701_v57 = vsel %vm2699_vm1, %v2700_v62, %v2698_v53 }
 0x65e   :  { %22292 = vrcp.f32 %v2710_v54  ;;  %v2709_v22 = vadd.f32 1e-09, %v2701_v57 }
 0x660   :  { %22294 = vrcp.f32 %v2709_v22 }
 0x66b   :  { %v22293_v26 = vpop.eup %22292 }
 0x66c   :  { %v2714_v33 = vmul.f32 %v22293_v26, %v2684_v4 }
 0x66d   :  { %v22295_v60 = vpop.eup %22294 }
 0x66e   :  { %v2712_v5 = vmul.f32 %v22295_v60, %v2678_v63  ;;  %v2719_v37 = vsel %vm166_vm0, %v2714_v33, 0 }
 0x66f   :  { %v2800_v59 = vand.u32 4294901760, %v2719_v37 }
 0x670   :  { %v2716_v39 = vsel %vm166_vm0, %v2712_v5, 0 }
 0x671   :  { %v2790_v32 = vand.u32 4294901760, %v2716_v39  ;;  %v2801_v40 = vsub.f32 %v2719_v37, %v2800_v59 }
 0x673   :  { %20076 = vmatprep.mubr.f32.mxu1 %v2790_v32  ;;  %v2791_v44 = vsub.f32 %v2716_v39, %v2790_v32  ;;  %v2802_v45 = vand.u32 4294901760, %v2801_v40 }
 0x674   :  { %20077 = vmatmul.mubr.f32.vlgmr.msra.gmra.mxu1 %v2800_v59 }
 0x675   :  { %20091 = vmatpush3.xpose.msra.mxu1 %v23134_v34  ;;  %v2792_v42 = vand.u32 4294901760, %v2791_v44  ;;  %v2803_v46 = vsub.f32 %v2801_v40, %v2802_v45 }
 0x676   :  { %20092 = vmatprep.subr.mxu1 %v23154_v0 }
 0x677   :  { %20098 = vmatprep.mubr.f32.mxu1 %v2792_v42  ;;  %v2793_v4 = vsub.f32 %v2791_v44, %v2792_v42  ;;  %v2804_v47 = vand.u32 4294901760, %v2803_v46 }
 0x679   :  { %20093 = vmatpush3.xpose.msra.mxu1 %v23154_v0  ;;  %v2794_v63 = vand.u32 4294901760, %v2793_v4 }
 0x67a   :  { %20094 = vmatprep.subr.mxu1 %v23127_v28 }
 0x67b   :  { %20065 = vmatprep.mubr.f32.mxu0 %v2794_v63 }
 0x67c   :  { %20066 = vmatmul.mubr.f32.vlgmr.msra.gmra.mxu0 %v2804_v47 }
 0x67d   :  { %20080 = vmatpush3.xpose.msra.mxu0 %v23145_v56  ;;  %20095 = vmatpush3.xpose.msra.mxu1 %v23127_v28 }
 0x67e   :  { %20081 = vmatprep.subr.mxu0 %v23167_v25  ;;  %20087 = vmatprep.mubr.f32.mxu0 %v2791_v44 }
 0x67f   :  { %20096 = vmatprep.subr.mxu1 %v23147_v58 }
 0x681   :  { %20082 = vmatpush3.xpose.msra.mxu0 %v23167_v25  ;;  %20097 = vmatpush3.xpose.msra.mxu1 %v23147_v58 }
 0x682   :  { %20083 = vmatprep.subr.mxu0 %v23142_v55  ;;  %20112 = vmatprep.subr.mxu1 %v23134_v34 }
 0x684   :  { %20099 = vmatmul.mubr.f32.vlgmr.msra.gmra.mxu1 %v2802_v45 }
 0x685   :  { %20084 = vmatpush3.xpose.msra.mxu0 %v23142_v55  ;;  %20113 = vmatpush3.xpose.msra.mxu1 %v23134_v34 }
 0x686   :  { %20120 = vmatprep.mubr.f32.mxu1 %v2790_v32  ;;  %20085 = vmatprep.subr.mxu0 %v23164_v38 }
 0x687   :  { %20114 = vmatprep.subr.mxu1 %v23154_v0 }
 0x689   :  { %20086 = vmatpush3.xpose.msra.mxu0 %v23164_v38  ;;  %20115 = vmatpush3.xpose.msra.mxu1 %v23154_v0 }
 0x68a   :  { %20101 = vmatprep.subr.mxu0 %v23157_v1  ;;  %20116 = vmatprep.subr.mxu1 %v23127_v28 }
 0x68c   :  { %20088 = vmatmul.mubr.f32.vlgmr.msra.gmra.mxu0 %v2801_v40 }
 0x68d   :  { %20102 = vmatpush3.xpose.msra.mxu0 %v23157_v1  ;;  %20109 = vmatprep.mubr.f32.mxu0 %v2790_v32 }
 0x68e   :  { %20117 = vmatpush3.xpose.msra.mxu1 %v23127_v28  ;;  %20103 = vmatprep.subr.mxu0 %v23182_v43 }
 0x68f   :  { %20118 = vmatprep.subr.mxu1 %v23147_v58 }
 0x691   :  { %20104 = vmatpush3.xpose.msra.mxu0 %v23182_v43 }
 0x692   :  { %20119 = vmatpush3.xpose.msra.mxu1 %v23147_v58  ;;  %20105 = vmatprep.subr.mxu0 %v23173_v8 }
 0x693   :  { %20134 = vmatprep.subr.mxu1 %v23286_v20 }
 0x695   :  { %20121 = vmatmul.mubr.f32.vlgmr.msra.gmra.mxu1 %v2800_v59  ;;  %20106 = vmatpush3.xpose.msra.mxu0 %v23173_v8 }
 0x696   :  { %20135 = vmatpush3.msra.mxu1 %v23286_v20  ;;  %20107 = vmatprep.subr.mxu0 %v23190_v48 }
 0x697   :  { %20136 = vmatprep.subr.mxu1 %v23302_v31 }
 0x698   :  { %20137 = vmatpush3.msra.mxu1 %v23302_v31 }
 0x699   :  { %20138 = vmatprep.subr.mxu1 %v23309_v35  ;;  %20108 = vmatpush3.xpose.msra.mxu0 %v23190_v48 }
 0x69a   :  { %20139 = vmatpush3.msra.mxu1 %v23309_v35  ;;  %20123 = vmatprep.subr.mxu0 %v23230_v3 }
 0x69b   :  { %20140 = vmatprep.subr.mxu1 %v23313_v36 }
 0x69c   :  { %20141 = vmatpush3.msra.mxu1 %v23313_v36  ;;  %20110 = vmatmul.mubr.f32.vlgmr.msra.gmra.mxu0 %v2800_v59 }
 0x69d   :  { %20156 = vmatprep.subr.mxu1 %v23230_v3  ;;  %20124 = vmatpush3.msra.mxu0 %v23230_v3 }
 0x69e   :  { %20125 = vmatprep.subr.mxu0 %v23237_v6 }
 0x69f   :  { %20126 = vmatpush3.msra.mxu0 %v23237_v6 }
 0x6a0   :  { %20127 = vmatprep.subr.mxu0 %v23245_v9 }
 0x6a1   :  { %20128 = vmatpush3.msra.mxu0 %v23245_v9 }
 0x6a2   :  { %20129 = vmatprep.subr.mxu0 %v23251_v10 }
 0x6a3   :  { %20130 = vmatpush3.msra.mxu0 %v23251_v10 }
 0x6a4   :  { %20145 = vmatprep.subr.mxu0 %v23241_v7 }
 0x734   :  { %v20078_v31 = vpop.f32.mrf.mxu1 }
 0x736   :  { %v2897_v50 = vpop.f32.mrf.mxu1 }
 0x73c   :  { %v20067_v20 = vpop.f32.mrf.mxu0 }
 0x73d   :  { %v2904_v51 = vadd.f32 %v20078_v31, %v20067_v20 }
 0x73e   :  { %v2796_v35 = vpop.f32.mrf.mxu0 }
 0x73f   :  { %v2898_v54 = vadd.f32 %v2897_v50, %v2796_v35 }
 0x744   :  { %v20100_v61 = vpop.f32.mrf.mxu1 }
 0x746   :  { %v3067_v22 = vpop.f32.mrf.mxu1 }
 0x74c   :  { %v20089_v36 = vpop.f32.mrf.mxu0 }
 0x74d   :  { %v2991_v53 = vadd.f32 %v20089_v36, %v2904_v51 }
 0x74e   :  { %v2983_v62 = vpop.f32.mrf.mxu0 }
 0x74f   :  { %v2984_v57 = vadd.f32 %v2983_v62, %v2898_v54  ;;  %v3076_v26 = vadd.f32 %v20100_v61, %v2991_v53 }
 0x751   :  { %v3068_v37 = vadd.f32 %v3067_v22, %v2984_v57 }
 0x755   :  { %v20122_v33 = vpop.f32.mrf.mxu1 }
 0x757   :  { %v3239_v40 = vpop.f32.mrf.mxu1 }
 0x75c   :  { %v20111_v60 = vpop.f32.mrf.mxu0 }
 0x75d   :  { %v3165_v5 = vadd.f32 %v20111_v60, %v3076_v26 }
 0x75e   :  { %v3158_v59 = vpop.f32.mrf.mxu0 }
 0x75f   :  { %v3246_v39 = vadd.f32 %v20122_v33, %v3165_v5  ;;  %v3159_v32 = vadd.f32 %v3158_v59, %v3068_v37 }
 0x761   :  { %v3250_v44 = vmul.f32 5.0, %v3246_v39  ;;  %v3240_v45 = vadd.f32 %v3239_v40, %v3159_v32 }
 0x763   :  { %v3252_v42 = vadd.f32 %v3250_v44, %v23319_v15  ;;  %v3249_v46 = vmul.f32 5.0, %v3240_v45 }
 0x765   :  { %v3251_v4 = vadd.f32 %v3249_v46, %v23321_v21  ;;  %v3254_v63 = vsel %vm166_vm0, %v3252_v42, -inf }
 0x767   :  { %v3253_v47 = vsel %vm166_vm0, %v3251_v4, -inf }
 0x768   :  { %v3255_v20 = vmax.f32 %v3253_v47, %v3254_v63 }
 0x76a   :  { %v3256_v31 = vrot.slane %v3255_v20, 4 }
 0x76c   :  { %v3257_v35 = vmax.f32 %v3255_v20, %v3256_v31 }
 0x76e   :  { %v3258_v36 = vrot.slane %v3257_v35, 2 }
 0x770   :  { %v3259_v50 = vmax.f32 %v3257_v35, %v3258_v36 }
 0x772   :  { %v3260_v51 = vrot.slane %v3259_v50, 1 }
 0x774   :  { %v3261_v61 = vmax.f32 %v3259_v50, %v3260_v51 }
 0x776   :  { %v3262_v62 = vsub.f32 %v3251_v4, %v3261_v61  ;;  %v3263_v54 = vsub.f32 %v3252_v42, %v3261_v61 }
 0x778   :  { %v3264_v53 = vmul.f32 1.442695, %v3262_v62  ;;  %v3266_v57 = vmul.f32 1.442695, %v3263_v54 }
 0x77a   :  { %22296 = vpow2.f32 %v3264_v53 }
 0x77b   :  { %22298 = vpow2.f32 %v3266_v57 }
 0x787   :  { %v22297_v15 = vpop.eup %22296 }
 0x788   :  { %v22299_v22 = vpop.eup %22298  ;;  %v3268_v21 = vsel %vm166_vm0, %v22297_v15, 0.0 }
 0x789   :  { %v3269_v26 = vsel %vm166_vm0, %v22299_v22, 0.0 }
 0x78a   :  { %v3270_v33 = vadd.f32 %v3269_v26, %v3268_v21 }
 0x78c   :  { %v3271_v60 = vrot.slane %v3270_v33, 4 }
 0x78e   :  { %v3272_v5 = vadd.f32 %v3271_v60, %v3270_v33 }
 0x790   :  { %v3273_v37 = vrot.slane %v3272_v5, 2 }
 0x792   :  { %v3274_v59 = vadd.f32 %v3273_v37, %v3272_v5 }
 0x794   :  { %v3275_v39 = vrot.slane %v3274_v59, 1 }
 0x796   :  { %v3276_v32 = vadd.f32 %v3275_v39, %v3274_v59 }
 0x798   :  { %22300 = vrcp.f32 %v3276_v32 }
 0x7a5   :  { %v22301_v40 = vpop.eup %22300 }
 0x7a6   :  { %v3279_v44 = vmul.f32 %v22301_v40, %v22299_v22  ;;  %v3278_v45 = vmul.f32 %v22301_v40, %v22297_v15 }
 0x7a8   :  { %v3283_v42 = vsel %vm166_vm0, %v3279_v44, 0.0  ;;  %v3280_v46 = vsel %vm166_vm0, %v3278_v45, 0.0 }
 0x7a9   :  { %3284 = vadd.xlane.f32.xlu1 %v3283_v42  ;;  %3281 = vadd.xlane.f32.xlu0 %v3280_v46 }
 0x832   :  { %v3285_v4 = vpop.xlane.xlu1 %3284  ;;  %v3282_v63 = vpop.xlane.xlu0 %3281 }
 0x833   :  { %v3287_v47 = vadd.f32 1e-09, %v3285_v4  ;;  %v3286_v20 = vadd.f32 1e-09, %v3282_v63 }
 0x835   :  { %22302 = vrcp.f32 %v3287_v47 }
 0x836   :  { %22304 = vrcp.f32 %v3286_v20 }
 0x842   :  { %v22303_v31 = vpop.eup %22302 }
 0x843   :  { %v22305_v35 = vpop.eup %22304  ;;  %v3291_v36 = vmul.f32 %v22303_v31, %v3279_v44 }
 0x844   :  { %v3289_v50 = vmul.f32 %v22305_v35, %v3278_v45 }
 0x845   :  { %v3296_v51 = vsel %vm166_vm0, %v3291_v36, 0 }
 0x846   :  { %v3293_v61 = vsel %vm166_vm0, %v3289_v50, 0  ;;  %v3377_v62 = vand.u32 4294901760, %v3296_v51 }
 0x847   :  { %v3367_v54 = vand.u32 4294901760, %v3293_v61 }
 0x848   :  { %v3378_v53 = vsub.f32 %v3296_v51, %v3377_v62 }
 0x849   :  { %20142 = vmatprep.mubr.f32.mxu1 %v3367_v54  ;;  %v3368_v57 = vsub.f32 %v3293_v61, %v3367_v54 }
 0x84a   :  { %20143 = vmatmul.mubr.f32.vlgmr.msra.gmra.mxu1 %v3377_v62  ;;  %v3379_v15 = vand.u32 4294901760, %v3378_v53 }
 0x84b   :  { %20157 = vmatpush3.msra.mxu1 %v23230_v3  ;;  %v3369_v22 = vand.u32 4294901760, %v3368_v57 }
 0x84c   :  { %20158 = vmatprep.subr.mxu1 %v23237_v6  ;;  %v3380_v21 = vsub.f32 %v3378_v53, %v3379_v15 }
 0x84d   :  { %20159 = vmatpush3.msra.mxu1 %v23237_v6  ;;  %20164 = vmatprep.mubr.f32.mxu1 %v3369_v22  ;;  %v3370_v26 = vsub.f32 %v3368_v57, %v3369_v22 }
 0x84e   :  { %20160 = vmatprep.subr.mxu1 %v23245_v9  ;;  %v3381_v60 = vand.u32 4294901760, %v3380_v21 }
 0x84f   :  { %20161 = vmatpush3.msra.mxu1 %v23245_v9  ;;  %v3371_v33 = vand.u32 4294901760, %v3370_v26 }
 0x850   :  { %20162 = vmatprep.subr.mxu1 %v23251_v10 }
 0x851   :  { %20163 = vmatpush3.msra.mxu1 %v23251_v10  ;;  %20131 = vmatprep.mubr.f32.mxu0 %v3371_v33 }
 0x852   :  { %20165 = vmatmul.mubr.f32.vlgmr.msra.gmra.mxu1 %v3379_v15  ;;  %20178 = vmatprep.subr.mxu1 %v23230_v3 }
 0x853   :  { %20132 = vmatmul.mubr.f32.vlgmr.msra.gmra.mxu0 %v3381_v60  ;;  %20179 = vmatpush3.msra.mxu1 %v23230_v3 }
 0x854   :  { %20146 = vmatpush3.msra.mxu0 %v23241_v7  ;;  %20186 = vmatprep.mubr.f32.mxu1 %v3367_v54 }
 0x855   :  { %20147 = vmatprep.subr.mxu0 %v23258_v12  ;;  %20153 = vmatprep.mubr.f32.mxu0 %v3368_v57 }
 0x856   :  { %20180 = vmatprep.subr.mxu1 %v23237_v6  ;;  %20148 = vmatpush3.msra.mxu0 %v23258_v12 }
 0x857   :  { %20181 = vmatpush3.msra.mxu1 %v23237_v6  ;;  %20149 = vmatprep.subr.mxu0 %v23265_v13 }
 0x858   :  { %20182 = vmatprep.subr.mxu1 %v23245_v9  ;;  %20150 = vmatpush3.msra.mxu0 %v23265_v13 }
 0x859   :  { %20183 = vmatpush3.msra.mxu1 %v23245_v9  ;;  %20151 = vmatprep.subr.mxu0 %v23275_v17 }
 0x85a   :  { %20184 = vmatprep.subr.mxu1 %v23251_v10  ;;  %20152 = vmatpush3.msra.mxu0 %v23275_v17 }
 0x85b   :  { %20185 = vmatpush3.msra.mxu1 %v23251_v10  ;;  %20154 = vmatmul.mubr.f32.vlgmr.msra.gmra.mxu0 %v3378_v53 }
 0x85c   :  { %20167 = vmatprep.subr.mxu0 %v23254_v11  ;;  %20187 = vmatmul.mubr.f32.vlgmr.msra.gmra.mxu1 %v3377_v62 }
 0x85d   :  { %20200 = vmatprep.subr.mxu1 %v23179_v41  ;;  %20168 = vmatpush3.msra.mxu0 %v23254_v11 }
 0x85e   :  { %20175 = vmatprep.mubr.f32.mxu0 %v3367_v54  ;;  %20201 = vmatpush3.xpose.msra.mxu1 %v23179_v41 }
 0x85f   :  { %20169 = vmatprep.subr.mxu0 %v23271_v16  ;;  %20202 = vmatprep.subr.mxu1 %v23195_v49 }
 0x860   :  { %20170 = vmatpush3.msra.mxu0 %v23271_v16 }
 0x861   :  { %20171 = vmatprep.subr.mxu0 %v23282_v18 }
 0x862   :  { %20172 = vmatpush3.msra.mxu0 %v23282_v18  ;;  %20203 = vmatpush3.xpose.msra.mxu1 %v23195_v49 }
 0x863   :  { %20173 = vmatprep.subr.mxu0 %v23291_v23  ;;  %20204 = vmatprep.subr.mxu1 %v23198_v52 }
 0x864   :  { %20174 = vmatpush3.msra.mxu0 %v23291_v23 }
 0x865   :  { %20176 = vmatmul.mubr.f32.vlgmr.msra.gmra.mxu0 %v3377_v62  ;;  %20189 = vmatprep.subr.mxu0 %v23134_v34 }
 0x866   :  { %20190 = vmatpush3.xpose.msra.mxu0 %v23134_v34  ;;  %20205 = vmatpush3.xpose.msra.mxu1 %v23198_v52 }
 0x867   :  { %20191 = vmatprep.subr.mxu0 %v23154_v0  ;;  %20206 = vmatprep.subr.mxu1 %v23206_v2 }
 0x86a   :  { %20192 = vmatpush3.xpose.msra.mxu0 %v23154_v0  ;;  %20207 = vmatpush3.xpose.msra.mxu1 %v23206_v2 }
 0x86b   :  { %20193 = vmatprep.subr.mxu0 %v23127_v28  ;;  %20222 = vmatprep.subr.mxu1 %v23134_v34 }
 0x86e   :  { %20194 = vmatpush3.xpose.msra.mxu0 %v23127_v28 }
 0x86f   :  { %20195 = vmatprep.subr.mxu0 %v23147_v58 }
 0x872   :  { %20196 = vmatpush3.xpose.msra.mxu0 %v23147_v58 }
 0x873   :  { %20211 = vmatprep.subr.mxu0 %v23145_v56 }
 0x90a   :  { %v20144_v6 = vpop.f32.mrf.mxu1 }
 0x90c   :  { %v3474_v10 = vpop.f32.mrf.mxu1 }
 0x912   :  { %v20166_v12 = vpop.f32.mrf.mxu1 }
 0x913   :  { %v20133_v3 = vpop.f32.mrf.mxu0 }
 0x914   :  { %v3481_v11 = vadd.f32 %v20144_v6, %v20133_v3  ;;  %v3644_v23 = vpop.f32.mrf.mxu1 }
 0x915   :  { %v3373_v7 = vpop.f32.mrf.mxu0 }
 0x916   :  { %v3475_v16 = vadd.f32 %v3474_v10, %v3373_v7 }
 0x91b   :  { %v20155_v9 = vpop.f32.mrf.mxu0 }
 0x91c   :  { %v3568_v17 = vadd.f32 %v20155_v9, %v3481_v11  ;;  %v20188_v37 = vpop.f32.mrf.mxu1 }
 0x91d   :  { %v3560_v13 = vpop.f32.mrf.mxu0 }
 0x91e   :  { %v3561_v18 = vadd.f32 %v3560_v13, %v3475_v16  ;;  %v3653_v5 = vadd.f32 %v20166_v12, %v3568_v17  ;;  %v3816_v42 = vpop.f32.mrf.mxu1 }
 0x920   :  { %v3645_v32 = vadd.f32 %v3644_v23, %v3561_v18 }
 0x925   :  { %v20177_v59 = vpop.f32.mrf.mxu0 }
 0x926   :  { %v3742_v39 = vadd.f32 %v20177_v59, %v3653_v5 }
 0x927   :  { %v3735_v40 = vpop.f32.mrf.mxu0 }
 0x928   :  { %v23491_v44 = vadd.f32 %v20188_v37, %v3742_v39  ;;  %v3736_v45 = vadd.f32 %v3735_v40, %v3645_v32 }
 0x92a   :  { %3827 = vst.msk [vmem:[#allocation20 + $0x8] sm:$0xff] %vm166_vm0, %v23491_v44  ;;  %v23495_v46 = vadd.f32 %v3816_v42, %v3736_v45  ;;  %v3829_v4 = vmul.f32 %v23491_v44, %v23491_v44 }
 0x92c   :  { %3826 = vst.msk [vmem:[#allocation20] sm:$0xff] %vm166_vm0, %v23495_v46  ;;  %v3833_v63 = vsel %vm166_vm0, %v3829_v4, 0.0  ;;  %v3828_v47 = vmul.f32 %v23495_v46, %v23495_v46 }
 0x92d   :  { %3834 = vadd.xlane.f32.xlu1 %v3833_v63 }
 0x92e   :  { %v3830_v20 = vsel %vm166_vm0, %v3828_v47, 0.0 }
 0x92f   :  { %3831 = vadd.xlane.f32.xlu0 %v3830_v20 }
 0x9b6   :  { %v3835_v31 = vpop.xlane.xlu1 %3834 }
 0x9b7   :  { %22306 = vrsqrt.f32 %v3835_v31  ;;  %vm3845_vm2 = vcmp.eq.f32.partialorder %v3835_v31, inf  ;;  %v3848_v61 = vand.u32 2147483648, %v3835_v31  ;;  %vm3847_vm3 = vcmp.eq.f32.partialorder %v3835_v31, 0.0 }
 0x9b8   :  { %v3832_v35 = vpop.xlane.xlu0 %3831 }
 0x9b9   :  { %22308 = vrsqrt.f32 %v3832_v35  ;;  %vm3838_vm4 = vcmp.eq.f32.partialorder %v3832_v35, inf  ;;  %v3841_v57 = vand.u32 2147483648, %v3832_v35  ;;  %vm3840_vm5 = vcmp.eq.f32.partialorder %v3832_v35, 0.0 }
 0x9c4   :  { %v22307_v36 = vpop.eup %22306 }
 0x9c5   :  { %v3844_v50 = vmul.f32 %v22307_v36, %v3835_v31 }
 0x9c6   :  { %v22309_v51 = vpop.eup %22308 }
 0x9c7   :  { %v3846_v62 = vsel %vm3845_vm2, %v3835_v31, %v3844_v50  ;;  %v3837_v54 = vmul.f32 %v22309_v51, %v3832_v35 }
 0x9c8   :  { %v3849_v53 = vsel %vm3847_vm3, %v3848_v61, %v3846_v62 }
 0x9c9   :  { %v3851_v15 = vadd.f32 1e-09, %v3849_v53  ;;  %v3839_v22 = vsel %vm3838_vm4, %v3832_v35, %v3837_v54 }
 0x9ca   :  { %v3842_v21 = vsel %vm3840_vm5, %v3841_v57, %v3839_v22 }
 0x9cb   :  { %22310 = vrcp.f32 %v3851_v15  ;;  %v3850_v26 = vadd.f32 1e-09, %v3842_v21 }
 0x9cd   :  { %22312 = vrcp.f32 %v3850_v26  ;;  %v22460_v26 = vld [vmem:[#allocation13 + $0x8] sm:$0xff] }
 0x9d8   :  { %v22311_v33 = vpop.eup %22310 }
 0x9d9   :  { %v3855_v60 = vmul.f32 %v22311_v33, %v23491_v44 }
 0x9da   :  { %v22313_v3 = vpop.eup %22312 }
 0x9db   :  { %v3853_v6 = vmul.f32 %v22313_v3, %v23495_v46  ;;  %v3860_v7 = vsel %vm166_vm0, %v3855_v60, 0  ;;  %v22461_v3 = vld [vmem:[#allocation13] sm:$0xff] }
 0x9dc   :  { %v3941_v9 = vand.u32 4294901760, %v3860_v7 }
 0x9dd   :  { %v3857_v10 = vsel %vm166_vm0, %v3853_v6, 0 }
 0x9de   :  { %v3931_v11 = vand.u32 4294901760, %v3857_v10  ;;  %v3942_v12 = vsub.f32 %v3860_v7, %v3941_v9 }
 0x9e0   :  { %20208 = vmatprep.mubr.f32.mxu1 %v3931_v11  ;;  %v3932_v13 = vsub.f32 %v3857_v10, %v3931_v11  ;;  %v3943_v16 = vand.u32 4294901760, %v3942_v12 }
 0x9e1   :  { %20209 = vmatmul.mubr.f32.vlgmr.msra.gmra.mxu1 %v3941_v9 }
 0x9e2   :  { %20223 = vmatpush3.xpose.msra.mxu1 %v23134_v34  ;;  %v3933_v17 = vand.u32 4294901760, %v3932_v13  ;;  %v3944_v18 = vsub.f32 %v3942_v12, %v3943_v16 }
 0x9e3   :  { %20224 = vmatprep.subr.mxu1 %v23154_v0 }
 0x9e4   :  { %20230 = vmatprep.mubr.f32.mxu1 %v3933_v17  ;;  %v3934_v23 = vsub.f32 %v3932_v13, %v3933_v17  ;;  %v3945_v37 = vand.u32 4294901760, %v3944_v18 }
 0x9e6   :  { %20225 = vmatpush3.xpose.msra.mxu1 %v23154_v0  ;;  %v3935_v5 = vand.u32 4294901760, %v3934_v23 }
 0x9e7   :  { %20226 = vmatprep.subr.mxu1 %v23127_v28 }
 0x9e8   :  { %20197 = vmatprep.mubr.f32.mxu0 %v3935_v5 }
 0x9e9   :  { %20198 = vmatmul.mubr.f32.vlgmr.msra.gmra.mxu0 %v3945_v37 }
 0x9ea   :  { %20212 = vmatpush3.xpose.msra.mxu0 %v23145_v56  ;;  %20227 = vmatpush3.xpose.msra.mxu1 %v23127_v28 }
 0x9eb   :  { %20213 = vmatprep.subr.mxu0 %v23167_v25  ;;  %20219 = vmatprep.mubr.f32.mxu0 %v3932_v13 }
 0x9ec   :  { %20228 = vmatprep.subr.mxu1 %v23147_v58 }
 0x9ee   :  { %20214 = vmatpush3.xpose.msra.mxu0 %v23167_v25  ;;  %20229 = vmatpush3.xpose.msra.mxu1 %v23147_v58 }
 0x9ef   :  { %20215 = vmatprep.subr.mxu0 %v23142_v55  ;;  %20244 = vmatprep.subr.mxu1 %v23134_v34 }
 0x9f1   :  { %20231 = vmatmul.mubr.f32.vlgmr.msra.gmra.mxu1 %v3943_v16 }
 0x9f2   :  { %20216 = vmatpush3.xpose.msra.mxu0 %v23142_v55  ;;  %20245 = vmatpush3.xpose.msra.mxu1 %v23134_v34 }
 0x9f3   :  { %20252 = vmatprep.mubr.f32.mxu1 %v3931_v11  ;;  %20217 = vmatprep.subr.mxu0 %v23164_v38 }
 0x9f4   :  { %20246 = vmatprep.subr.mxu1 %v23154_v0 }
 0x9f6   :  { %20218 = vmatpush3.xpose.msra.mxu0 %v23164_v38  ;;  %20247 = vmatpush3.xpose.msra.mxu1 %v23154_v0 }
 0x9f7   :  { %20233 = vmatprep.subr.mxu0 %v23157_v1  ;;  %20248 = vmatprep.subr.mxu1 %v23127_v28 }
 0x9f9   :  { %20220 = vmatmul.mubr.f32.vlgmr.msra.gmra.mxu0 %v3942_v12 }
 0x9fa   :  { %20234 = vmatpush3.xpose.msra.mxu0 %v23157_v1  ;;  %20241 = vmatprep.mubr.f32.mxu0 %v3931_v11 }
 0x9fb   :  { %20249 = vmatpush3.xpose.msra.mxu1 %v23127_v28  ;;  %20235 = vmatprep.subr.mxu0 %v23182_v43 }
 0x9fc   :  { %20250 = vmatprep.subr.mxu1 %v23147_v58 }
 0x9fe   :  { %20236 = vmatpush3.xpose.msra.mxu0 %v23182_v43 }
 0x9ff   :  { %20251 = vmatpush3.xpose.msra.mxu1 %v23147_v58  ;;  %20237 = vmatprep.subr.mxu0 %v23173_v8 }
 0xa02   :  { %20253 = vmatmul.mubr.f32.vlgmr.msra.gmra.mxu1 %v3941_v9  ;;  %20238 = vmatpush3.xpose.msra.mxu0 %v23173_v8 }
 0xa03   :  { %20239 = vmatprep.subr.mxu0 %v23190_v48 }
 0xa06   :  { %20240 = vmatpush3.xpose.msra.mxu0 %v23190_v48 }
 0xa09   :  { %20242 = vmatmul.mubr.f32.vlgmr.msra.gmra.mxu0 %v3941_v9 }
 0xaa1   :  { %v20210_v39 = vpop.f32.mrf.mxu1 }
 0xaa3   :  { %v4038_v45 = vpop.f32.mrf.mxu1 }
 0xaa9   :  { %v20199_v59 = vpop.f32.mrf.mxu0 }
 0xaaa   :  { %v4045_v42 = vadd.f32 %v20210_v39, %v20199_v59 }
 0xaab   :  { %v3937_v32 = vpop.f32.mrf.mxu0 }
 0xaac   :  { %v4039_v47 = vadd.f32 %v4038_v45, %v3937_v32 }
 0xab1   :  { %v20232_v4 = vpop.f32.mrf.mxu1 }
 0xab3   :  { %v4208_v35 = vpop.f32.mrf.mxu1 }
 0xab9   :  { %v20221_v40 = vpop.f32.mrf.mxu0 }
 0xaba   :  { %v4132_v20 = vadd.f32 %v20221_v40, %v4045_v42 }
 0xabb   :  { %v4124_v63 = vpop.f32.mrf.mxu0 }
 0xabc   :  { %v4125_v31 = vadd.f32 %v4124_v63, %v4039_v47  ;;  %v4217_v36 = vadd.f32 %v20232_v4, %v4132_v20 }
 0xabe   :  { %v4209_v62 = vadd.f32 %v4208_v35, %v4125_v31 }
 0xac2   :  { %v20254_v50 = vpop.f32.mrf.mxu1 }
 0xac4   :  { %v4380_v15 = vpop.f32.mrf.mxu1 }
 0xac9   :  { %v20243_v51 = vpop.f32.mrf.mxu0 }
 0xaca   :  { %v4306_v61 = vadd.f32 %v20243_v51, %v4217_v36  ;;  %v23543_v36 = vld [vmem:[#allocation11] sm:$0x1] }
 0xacb   :  { %v4299_v54 = vpop.f32.mrf.mxu0 }
 0xacc   :  { %v4387_v53 = vadd.f32 %v20254_v50, %v4306_v61  ;;  %v4300_v57 = vadd.f32 %v4299_v54, %v4209_v62  ;;  %v1460_v62 = vmul.f32 %v23543_v36, %v23543_v36 }
 0xace   :  { %v4391_v22 = vmul.f32 5.0, %v4387_v53  ;;  %v4381_v21 = vadd.f32 %v4380_v15, %v4300_v57  ;;  %v1462_v57 = vsel %vm1461_vm6, %v1460_v62, 0.0 }
 0xad0   :  { %v4393_v33 = vadd.f32 %v22460_v26, %v4391_v22  ;;  %v4390_v60 = vmul.f32 5.0, %v4381_v21 }
 0xad2   :  { %v4392_v6 = vadd.f32 %v22461_v3, %v4390_v60  ;;  %v4395_v7 = vsel %vm166_vm0, %v4393_v33, -inf }
 0xad4   :  { %v4394_v9 = vsel %vm166_vm0, %v4392_v6, -inf }
 0xad5   :  { %v4396_v10 = vmax.f32 %v4394_v9, %v4395_v7 }
 0xad7   :  { %v4397_v11 = vrot.slane %v4396_v10, 4 }
 0xad9   :  { %v4398_v12 = vmax.f32 %v4396_v10, %v4397_v11 }
 0xadb   :  { %v4399_v13 = vrot.slane %v4398_v12, 2 }
 0xadd   :  { %v4400_v16 = vmax.f32 %v4398_v12, %v4399_v13 }
 0xadf   :  { %v4401_v17 = vrot.slane %v4400_v16, 1 }
 0xae1   :  { %v4402_v18 = vmax.f32 %v4400_v16, %v4401_v17 }
 0xae3   :  { %v4403_v23 = vsub.f32 %v4392_v6, %v4402_v18  ;;  %v4404_v5 = vsub.f32 %v4393_v33, %v4402_v18 }
 0xae5   :  { %v4405_v37 = vmul.f32 1.442695, %v4403_v23  ;;  %v4407_v59 = vmul.f32 1.442695, %v4404_v5 }
 0xae7   :  { %22314 = vpow2.f32 %v4405_v37 }
 0xae8   :  { %22316 = vpow2.f32 %v4407_v59 }
 0xaf4   :  { %v22315_v39 = vpop.eup %22314 }
 0xaf5   :  { %v22317_v32 = vpop.eup %22316  ;;  %v4409_v40 = vsel %vm166_vm0, %v22315_v39, 0.0 }
 0xaf6   :  { %v4410_v45 = vsel %vm166_vm0, %v22317_v32, 0.0 }
 0xaf7   :  { %v4411_v42 = vadd.f32 %v4410_v45, %v4409_v40 }
 0xaf9   :  { %v4412_v4 = vrot.slane %v4411_v42, 4 }
 0xafb   :  { %v4413_v63 = vadd.f32 %v4412_v4, %v4411_v42  ;;  %v10851_v42 = vlaneseq }
 0xafd   :  { %v4414_v47 = vrot.slane %v4413_v63, 2 }
 0xaff   :  { %v4415_v20 = vadd.f32 %v4414_v47, %v4413_v63 }
 0xb01   :  { %v4416_v31 = vrot.slane %v4415_v20, 1 }
 0xb03   :  { %v4417_v35 = vadd.f32 %v4416_v31, %v4415_v20  ;;  %v10852_v20 = vshrl.u32 %v10851_v42, 7 }
 0xb05   :  { %22318 = vrcp.f32 %v4417_v35 }
 0xb12   :  { %v22319_v50 = vpop.eup %22318 }
 0xb13   :  { %v4420_v51 = vmul.f32 %v22319_v50, %v22317_v32  ;;  %v4419_v61 = vmul.f32 %v22319_v50, %v22315_v39 }
 0xb15   :  { %v4424_v54 = vsel %vm166_vm0, %v4420_v51, 0.0  ;;  %v4421_v53 = vsel %vm166_vm0, %v4419_v61, 0.0 }
 0xb16   :  { %4425 = vadd.xlane.f32.xlu0 %v4424_v54  ;;  %4422 = vadd.xlane.f32.xlu1 %v4421_v53  ;;  %v23589_v54 = vand.u32 4294901760, %v23491_v44  ;;  %v10853_v53 = vsub.s32 0, %v10852_v20 }
 0xb1a   :  { %1463 = vadd.xlane.f32.xlu1 %v1462_v57 }
 0xb43   :  { %4433 = vxpose.xlu0.b32.start [1/2] (short) (narrow) %v4419_v61, 32 }
 0xb47   :  { %4434 = vxpose.xlu0.b32.end [2/2] (short) (narrow) %v4420_v51, 32 }
 0xb9f   :  { %v4426_v15 = vpop.xlane.xlu0 %4425  ;;  %v4423_v22 = vpop.xlane.xlu1 %4422 }
 0xba0   :  { %v4428_v21 = vadd.f32 1e-09, %v4426_v15  ;;  %v4427_v26 = vadd.f32 1e-09, %v4423_v22 }
 0xba2   :  { %22320 = vrcp.f32 %v4428_v21 }
 0xba3   :  { %22322 = vrcp.f32 %v4427_v26  ;;  %v1464_v33 = vpop.xlane.xlu1 %1463 }
 0xba4   :  { %22324 = vrsqrt.f32 %v1464_v33  ;;  %vm1467_vm7 = vcmp.eq.f32.partialorder %v1464_v33, inf  ;;  %v1470_v10 = vand.u32 2147483648, %v1464_v33  ;;  %vm1469_vm8 = vcmp.eq.f32.partialorder %v1464_v33, 0.0 }
 0xbaf   :  { %v22321_v60 = vpop.eup %22320 }
 0xbb0   :  { %v22323_v3 = vpop.eup %22322  ;;  %v4432_v6 = vmul.f32 %v22321_v60, %v4420_v51 }
 0xbb1   :  { %v22325_v7 = vpop.eup %22324  ;;  %v4430_v9 = vmul.f32 %v22323_v3, %v4419_v61 }
 0xbb2   :  { %v23549_v11 = vand.u32 4294901760, %v4432_v6  ;;  %v1466_v12 = vmul.f32 %v22325_v7, %v1464_v33  ;;  %v23613_v7 = vsub.f32 %v23491_v44, %v23589_v54  ;;  %v23627_v44 = vand.u32 4294901760, %v23495_v46 }
 0xbb3   :  { %v23551_v13 = vand.u32 4294901760, %v4430_v9 }
 0xbb4   :  { %v1468_v16 = vsel %vm1467_vm7, %v1464_v33, %v1466_v12  ;;  %20255 = vmatprep.subr.mxu0 %v23549_v11  ;;  %v23555_v17 = vsub.f32 %v4432_v6, %v23549_v11  ;;  %v5210_v20 = vsub.f32 %v23495_v46, %v23627_v44  ;;  %vm22729_vm7 = vmmov 0  }
 0xbb5   :  { %v1471_v18 = vsel %vm1469_vm8, %v1470_v10, %v1468_v16  ;;  %20256 = vmatpush3.msra.mxu0 %v23549_v11  ;;  %v23559_v23 = vsub.f32 %v4430_v9, %v23551_v13  ;;  %vm11011_vm8 = vcmask 523264  }
 0xbb6   :  { %v1472_v5 = vadd.f32 1e-09, %v1471_v18  ;;  %20257 = vmatprep.subr.mxu0 %v23551_v13  ;;  %v23563_v37 = vand.u32 4294901760, %v23555_v17 }
 0xbb7   :  { %20258 = vmatpush3.msra.mxu0 %v23551_v13  ;;  %v23567_v59 = vand.u32 4294901760, %v23559_v23 }
 0xbb8   :  { %22326 = vrcp.f32 %v1472_v5  ;;  %20275 = vmatprep.subr.mxu0 %v23555_v17  ;;  %v4617_v39 = vsub.f32 %v23555_v17, %v23563_v37 }
 0xbb9   :  { %v4624_v32 = vsub.f32 %v23559_v23, %v23567_v59 }
 0xbba   :  { %v4618_v40 = vand.u32 4294901760, %v4617_v39 }
 0xbbb   :  { %v4625_v45 = vand.u32 4294901760, %v4624_v32 }
 0xbbc   :  { %20265 = vmatprep.subr.mxu1 %v4618_v40 }
 0xbbd   :  { %20266 = vmatpush3.msra.mxu1 %v4618_v40 }
 0xbbe   :  { %20267 = vmatprep.subr.mxu1 %v4625_v45 }
 0xbbf   :  { %v4449_v4 = vpop.trf.xlu0  ;;  %20268 = vmatpush3.msra.mxu1 %v4625_v45  ;;  %v23638_v45 = vand.u32 4294901760, %v23613_v7 }
 0xbc0   :  { %v4467_v63 = vsel %vm4465_vm9, %v4449_v4, 0  ;;  %20285 = vmatprep.subr.mxu1 %v23549_v11 }
 0xbc1   :  { %v23576_v47 = vand.u32 4294901760, %v4467_v63 }
 0xbc3   :  { %v23579_v31 = vsub.f32 %v4467_v63, %v23576_v47  ;;  %20269 = vmatprep.mubr.f32.mxu1 %v23576_v47  ;;  %v4450_v35 = vpop.trf.xlu0 }
 0xbc4   :  { %v4470_v50 = vsel %vm4465_vm9, %v4450_v35, 0  ;;  %v5205_v35 = vsub.f32 %v23613_v7, %v23638_v45 }
 0xbc5   :  { %v22327_v51 = vpop.eup %22326  ;;  %v23583_v61 = vand.u32 4294901760, %v4470_v50  ;;  %v23586_v62 = vand.u32 4294901760, %v23579_v31 }
 0xbc6   :  { %v1474_v57 = vmul.f32 %v22327_v51, %v23543_v36  ;;  %v23664_v51 = vand.u32 4294901760, %v5210_v20  ;;  %v5206_v46 = vand.u32 4294901760, %v5205_v35 }
 0xbc7   :  { %v23593_v15 = vsub.f32 %v4470_v50, %v23583_v61  ;;  %v4451_v22 = vpop.trf.xlu0  ;;  %20270 = vmatmul.mubr.f32.vlgmr.msra.gmra.mxu1 %v23583_v61  ;;  %v4548_v21 = vsub.f32 %v23579_v31, %v23586_v62 }
 0xbc8   :  { %v1475_v26 = vmul.f32 20.0, %v1474_v57  ;;  %v4473_v33 = vsel %vm4465_vm9, %v4451_v22, 0  ;;  %20286 = vmatpush3.msra.mxu1 %v23549_v11 }
 0xbc9   :  { %v23601_v60 = vand.u32 4294901760, %v23593_v15  ;;  %v23603_v3 = vand.u32 4294901760, %v4473_v33  ;;  %20287 = vmatprep.subr.mxu1 %v23551_v13  ;;  %v23606_v36 = vand.u32 4294901760, %v4548_v21 }
 0xbca   :  { %v23608_v6 = vrot.slane %v1475_v26, %v10853_v53  ;;  %20288 = vmatpush3.msra.mxu1 %v23551_v13 }
 0xbcb   :  { %v23616_v9 = vsub.f32 %v4473_v33, %v23603_v3  ;;  %20305 = vmatprep.subr.mxu1 %v23549_v11  ;;  %20259 = vmatprep.mubr.f32.mxu0 %v23606_v36  ;;  %v4452_v10 = vpop.trf.xlu0  ;;  %v4558_v12 = vsub.f32 %v23593_v15, %v23601_v60 }
 0xbcc   :  { %v4476_v16 = vsel %vm4465_vm9, %v4452_v10, 0  ;;  %20272 = vmatprep.mubr.f32.mxu1 %v23603_v3  ;;  %v10856_v18 = vmul.f32 %v23608_v6, %v23130_v29  ;;  %vm10984_vm9 = vcmask 39936  }
 0xbcd   :  { %v23629_v5 = vand.u32 4294901760, %v4476_v16  ;;  %v23631_v39 = vand.u32 4294901760, %v4558_v12  ;;  %v23634_v32 = vand.u32 4294901760, %v23616_v9 }
 0xbce   :  { %v10864_v40 = vsel %vm166_vm0, %v10856_v18, 0.0 }
 0xbcf   :  { %v23641_v42 = vsub.f32 %v4476_v16, %v23629_v5  ;;  %20260 = vmatmul.mubr.f32.vlgmr.msra.gmra.mxu0 %v23631_v39  ;;  %20273 = vmatmul.mubr.f32.gmra.mxu1 %v23629_v5  ;;  %v4568_v29 = vsub.f32 %v23616_v9, %v23634_v32 }
 0xbd0   :  { %20276 = vmatpush3.msra.mxu0 %v23555_v17  ;;  %10865 = vadd.xlane.f32.xlu0 %v10864_v40 }
 0xbd1   :  { %20277 = vmatprep.subr.mxu0 %v23559_v23  ;;  %20289 = vmatprep.mubr.f32.mxu1 %v23586_v62  ;;  %v4569_v4 = vand.u32 4294901760, %v4568_v29  ;;  %v23651_v63 = vand.u32 4294901760, %v23641_v42 }
 0xbd2   :  { %20278 = vmatpush3.msra.mxu0 %v23559_v23 }
 0xbd3   :  { %20295 = vmatprep.subr.mxu0 %v23563_v37  ;;  %20262 = vmatprep.mubr.f32.mxu0 %v4569_v4  ;;  %v4578_v17 = vsub.f32 %v23641_v42, %v23651_v63 }
 0xbd4   :  { %20290 = vmatmul.mubr.f32.vlgmr.msra.gmra.mxu1 %v23601_v60 }
 0xbd5   :  { %20306 = vmatpush3.msra.mxu1 %v23549_v11  ;;  %20292 = vmatprep.mubr.f32.mxu1 %v23634_v32  ;;  %v4579_v50 = vand.u32 4294901760, %v4578_v17  ;;  %v5212_v11 = vsub.f32 %v5210_v20, %v23664_v51 }
 0xbd6   :  { %20307 = vmatprep.subr.mxu1 %v23551_v13 }
 0xbd7   :  { %20308 = vmatpush3.msra.mxu1 %v23551_v13  ;;  %20263 = vmatmul.mubr.f32.gmra.mxu0 %v4579_v50  ;;  %v5213_v13 = vand.u32 4294901760, %v5212_v11 }
 0xbd8   :  { %20325 = vmatprep.subr.mxu1 %v5206_v46  ;;  %20293 = vmatmul.mubr.f32.gmra.mxu1 %v23651_v63 }
 0xbd9   :  { %20279 = vmatprep.mubr.f32.mxu0 %v23579_v31  ;;  %20309 = vmatprep.mubr.f32.mxu1 %v23576_v47 }
 0xbdb   :  { %20280 = vmatmul.mubr.f32.vlgmr.msra.gmra.mxu0 %v23593_v15 }
 0xbdc   :  { %20296 = vmatpush3.msra.mxu0 %v23563_v37  ;;  %20310 = vmatmul.mubr.f32.vlgmr.msra.gmra.mxu1 %v23583_v61 }
 0xbdd   :  { %20326 = vmatpush3.msra.mxu1 %v5206_v46  ;;  %20282 = vmatprep.mubr.f32.mxu0 %v23616_v9 }
 0xbde   :  { %20297 = vmatprep.subr.mxu0 %v23567_v59  ;;  %20312 = vmatprep.mubr.f32.mxu1 %v23603_v3 }
 0xbdf   :  { %20327 = vmatprep.subr.mxu1 %v5213_v13  ;;  %20298 = vmatpush3.msra.mxu0 %v23567_v59 }
 0xbe0   :  { %20328 = vmatpush3.msra.mxu1 %v5213_v13  ;;  %20315 = vmatprep.subr.mxu0 %v23589_v54 }
 0xbe1   :  { %20345 = vmatprep.subr.mxu1 %v23589_v54  ;;  %20283 = vmatmul.mubr.f32.gmra.mxu0 %v23641_v42 }
 0xbe2   :  { %20313 = vmatmul.mubr.f32.gmra.mxu1 %v23629_v5  ;;  %20299 = vmatprep.mubr.f32.mxu0 %v23576_v47 }
 0xbe3   :  { %20329 = vmatprep.mubr.f32.mxu1 %v23576_v47 }
 0xbe5   :  { %20300 = vmatmul.mubr.f32.vlgmr.msra.gmra.mxu0 %v23583_v61 }
 0xbe6   :  { %20316 = vmatpush3.msra.mxu0 %v23589_v54  ;;  %20330 = vmatmul.mubr.f32.vlgmr.msra.gmra.mxu1 %v23583_v61 }
 0xbe7   :  { %20346 = vmatpush3.msra.mxu1 %v23589_v54  ;;  %20302 = vmatprep.mubr.f32.mxu0 %v23603_v3 }
 0xbe8   :  { %20317 = vmatprep.subr.mxu0 %v23627_v44  ;;  %20332 = vmatprep.mubr.f32.mxu1 %v23603_v3 }
 0xbe9   :  { %20347 = vmatprep.subr.mxu1 %v23627_v44  ;;  %20318 = vmatpush3.msra.mxu0 %v23627_v44 }
 0xbea   :  { %20348 = vmatpush3.msra.mxu1 %v23627_v44  ;;  %20335 = vmatprep.subr.mxu0 %v23613_v7 }
 0xbeb   :  { %20365 = vmatprep.subr.mxu1 %v23589_v54  ;;  %20303 = vmatmul.mubr.f32.gmra.mxu0 %v23629_v5 }
 0xbec   :  { %20333 = vmatmul.mubr.f32.gmra.mxu1 %v23629_v5  ;;  %20319 = vmatprep.mubr.f32.mxu0 %v23606_v36 }
 0xbed   :  { %20349 = vmatprep.mubr.f32.mxu1 %v23586_v62 }
 0xbef   :  { %20320 = vmatmul.mubr.f32.vlgmr.msra.gmra.mxu0 %v23631_v39 }
 0xbf0   :  { %20336 = vmatpush3.msra.mxu0 %v23613_v7  ;;  %20350 = vmatmul.mubr.f32.vlgmr.msra.gmra.mxu1 %v23601_v60 }
 0xbf1   :  { %20366 = vmatpush3.msra.mxu1 %v23589_v54  ;;  %20322 = vmatprep.mubr.f32.mxu0 %v4569_v4 }
 0xbf2   :  { %20337 = vmatprep.subr.mxu0 %v5210_v20  ;;  %20352 = vmatprep.mubr.f32.mxu1 %v23634_v32 }
 0xbf3   :  { %20367 = vmatprep.subr.mxu1 %v23627_v44  ;;  %20338 = vmatpush3.msra.mxu0 %v5210_v20 }
 0xbf4   :  { %20368 = vmatpush3.msra.mxu1 %v23627_v44  ;;  %20355 = vmatprep.subr.mxu0 %v23638_v45 }
 0xbf5   :  { %20323 = vmatmul.mubr.f32.gmra.mxu0 %v4579_v50  ;;  %20353 = vmatmul.mubr.f32.gmra.mxu1 %v23651_v63 }
 0xbf6   :  { %20339 = vmatprep.mubr.f32.mxu0 %v23579_v31  ;;  %20369 = vmatprep.mubr.f32.mxu1 %v23576_v47 }
 0xbf9   :  { %20340 = vmatmul.mubr.f32.vlgmr.msra.gmra.mxu0 %v23593_v15  ;;  %20370 = vmatmul.mubr.f32.vlgmr.msra.gmra.mxu1 %v23583_v61 }
 0xbfa   :  { %20356 = vmatpush3.msra.mxu0 %v23638_v45  ;;  %20342 = vmatprep.mubr.f32.mxu0 %v23616_v9 }
 0xbfb   :  { %20357 = vmatprep.subr.mxu0 %v23664_v51  ;;  %20372 = vmatprep.mubr.f32.mxu1 %v23603_v3 }
 0xbfc   :  { %20358 = vmatpush3.msra.mxu0 %v23664_v51 }
 0xbfd   :  { %20343 = vmatmul.mubr.f32.gmra.mxu0 %v23641_v42  ;;  %20373 = vmatmul.mubr.f32.gmra.mxu1 %v23629_v5 }
 0xbfe   :  { %20359 = vmatprep.mubr.f32.mxu0 %v23576_v47 }
 0xc01   :  { %20360 = vmatmul.mubr.f32.vlgmr.msra.gmra.mxu0 %v23583_v61 }
 0xc02   :  { %20362 = vmatprep.mubr.f32.mxu0 %v23603_v3 }
 0xc05   :  { %20363 = vmatmul.mubr.f32.gmra.mxu0 %v23629_v5 }
 0xc59   :  { %v10866_v23 = vpop.xlane.xlu0 %10865 }
 0xc5a   :  { %v10888_v37 = vsub.f32 0.0, %v10866_v23 }
 0xc5c   :  { %v10896_v59 = vmul.f32 1.442695, %v10888_v37 }
 0xc5e   :  { %22328 = vpow2.f32 %v10896_v59 }
 0xc6b   :  { %v22329_v31 = vpop.eup %22328 }
 0xc6c   :  { %v10912_v62 = vadd.f32 1.0, %v22329_v31 }
 0xc6e   :  { %22330 = vrcp.f32 %v10912_v62 }
 0xc7b   :  { %v23725_v54 = vpop.eup %22330 }
 0xc7c   :  { %27226 = vst [vmem:[#allocation39_spill] sm:$0xff] %v23725_v54  ;;  %10994 = vst.msk [vmem:[%s27031_s13] sm:$0xff] %vm10993_vm10, %v23725_v54 }
 0xc87   :  { %v20271_v47 = vpop.f32.mrf.mxu1 }
 0xc89   :  { %v4662_v61 = vpop.f32.mrf.mxu1 }
 0xc8f   :  { %v20274_v53 = vpop.f32.mrf.mxu1  ;;  %v20261_v57 = vpop.f32.mrf.mxu0 }
 0xc90   :  { %v4669_v37 = vadd.f32 %v20271_v47, %v20261_v57 }
 0xc91   :  { %v4674_v15 = vpop.f32.mrf.mxu1  ;;  %v4551_v21 = vpop.f32.mrf.mxu0 }
 0xc92   :  { %v4663_v16 = vadd.f32 %v4662_v61, %v4551_v21 }
 0xc94   :  { %v20291_v22 = vpop.f32.mrf.mxu1 }
 0xc96   :  { %v4852_v26 = vpop.f32.mrf.mxu1 }
 0xc97   :  { %v20264_v33 = vpop.f32.mrf.mxu0 }
 0xc98   :  { %v20294_v60 = vpop.f32.mrf.mxu1 }
 0xc99   :  { %v4571_v3 = vpop.f32.mrf.mxu0 }
 0xc9a   :  { %v4868_v36 = vpop.f32.mrf.mxu1  ;;  %v4675_v31 = vadd.f32 %v4674_v15, %v4571_v3 }
 0xc9b   :  { %v20281_v7 = vpop.f32.mrf.mxu0 }
 0xc9c   :  { %v20311_v9 = vpop.f32.mrf.mxu1  ;;  %v4764_v21 = vadd.f32 %v20281_v7, %v4669_v37 }
 0xc9d   :  { %v4756_v10 = vpop.f32.mrf.mxu0 }
 0xc9e   :  { %v5044_v12 = vpop.f32.mrf.mxu1  ;;  %v4757_v44 = vadd.f32 %v4756_v10, %v4663_v16  ;;  %v4681_v16 = vadd.f32 %v20274_v53, %v20264_v33  ;;  %v4861_v57 = vadd.f32 %v20291_v22, %v4764_v21 }
 0xca0   :  { %v4853_v42 = vadd.f32 %v4852_v26, %v4757_v44 }
 0xca1   :  { %v20284_v18 = vpop.f32.mrf.mxu0 }
 0xca2   :  { %v20314_v5 = vpop.f32.mrf.mxu1  ;;  %v4778_v15 = vadd.f32 %v20284_v18, %v4681_v16 }
 0xca3   :  { %v4770_v39 = vpop.f32.mrf.mxu0 }
 0xca4   :  { %v5056_v32 = vpop.f32.mrf.mxu1  ;;  %v4771_v10 = vadd.f32 %v4770_v39, %v4675_v31  ;;  %v4877_v31 = vadd.f32 %v20294_v60, %v4778_v15 }
 0xca5   :  { %v20301_v40 = vpop.f32.mrf.mxu0 }
 0xca6   :  { %v20331_v45 = vpop.f32.mrf.mxu1  ;;  %v4869_v3 = vadd.f32 %v4868_v36, %v4771_v10 }
 0xca7   :  { %v4953_v29 = vpop.f32.mrf.mxu0 }
 0xca8   :  { %v4954_v4 = vadd.f32 %v4953_v29, %v4853_v42  ;;  %v5250_v63 = vpop.f32.mrf.mxu1 }
 0xcaa   :  { %v5045_v20 = vadd.f32 %v5044_v12, %v4954_v4 }
 0xcab   :  { %v20304_v35 = vpop.f32.mrf.mxu0 }
 0xcac   :  { %v23732_v17 = vmul.f32 0.25, %v5045_v20  ;;  %v20334_v50 = vpop.f32.mrf.mxu1  ;;  %v4960_v20 = vadd.f32 %v20301_v40, %v4861_v57  ;;  %v4972_v43 = vadd.f32 %v20304_v35, %v4877_v31 }
 0xcad   :  { %v4965_v51 = vpop.f32.mrf.mxu0 }
 0xcae   :  { %v5671_v46 = vsel %vm166_vm0, %v23732_v17, 0  ;;  %v5262_v11 = vpop.f32.mrf.mxu1  ;;  %v5051_v33 = vadd.f32 %v20311_v9, %v4960_v20  ;;  %v5063_v57 = vadd.f32 %v20314_v5, %v4972_v43 }
 0xcaf   :  { %v23736_v13 = vand.u32 4294901760, %v5671_v46  ;;  %v20321_v23 = vpop.f32.mrf.mxu0 }
 0xcb0   :  { %v20351_v59 = vpop.f32.mrf.mxu1  ;;  %v5257_v39 = vadd.f32 %v20331_v45, %v20321_v23  ;;  %v23750_v16 = vmul.f32 0.25, %v5051_v33 }
 0xcb1   :  { %v23739_v62 = vsub.f32 %v5671_v46, %v23736_v13  ;;  %v5139_v61 = vpop.f32.mrf.mxu0  ;;  %20397 = vmatprep.mubr.f32.mxu1 %v23736_v13  ;;  %v4966_v46 = vadd.f32 %v4965_v51, %v4869_v3 }
 0xcb2   :  { %v5440_v26 = vpop.f32.mrf.mxu1  ;;  %v5251_v54 = vadd.f32 %v5250_v63, %v5139_v61 }
 0xcb3   :  { %v23743_v12 = vand.u32 4294901760, %v23739_v62  ;;  %v5057_v8 = vadd.f32 %v5056_v32, %v4966_v46  ;;  %v5674_v32 = vsel %vm166_vm0, %v23750_v16, 0 }
 0xcb5   :  { %v20324_v44 = vpop.f32.mrf.mxu0  ;;  %v20354_v42 = vpop.f32.mrf.mxu1  ;;  %v5754_v47 = vsub.f32 %v23739_v62, %v23743_v12  ;;  %v23752_v3 = vmul.f32 0.25, %v5057_v8 }
 0xcb6   :  { %v5269_v36 = vadd.f32 %v20334_v50, %v20324_v44  ;;  %v23756_v44 = vmul.f32 0.25, %v5063_v57 }
 0xcb7   :  { %v5159_v29 = vpop.f32.mrf.mxu0  ;;  %v23747_v4 = vand.u32 4294901760, %v5754_v47  ;;  %v5456_v7 = vpop.f32.mrf.mxu1 }
 0xcb8   :  { %v5263_v40 = vadd.f32 %v5262_v11, %v5159_v29  ;;  %v23760_v29 = vand.u32 4294901760, %v5674_v32 }
 0xcb9   :  { %v20341_v37 = vpop.f32.mrf.mxu0  ;;  %20383 = vmatprep.mubr.f32.mxu0 %v23747_v4  ;;  %v20371_v22 = vpop.f32.mrf.mxu1 }
 0xcba   :  { %v5352_v1 = vadd.f32 %v20341_v37, %v5257_v39 }
 0xcbb   :  { %v5344_v53 = vpop.f32.mrf.mxu0  ;;  %v5632_v60 = vpop.f32.mrf.mxu1 }
 0xcbc   :  { %v5345_v21 = vadd.f32 %v5344_v53, %v5251_v54  ;;  %v5449_v47 = vadd.f32 %v20351_v59, %v5352_v1  ;;  %v5677_v1 = vsel %vm166_vm0, %v23752_v3, 0 }
 0xcbd   :  { %v20344_v18 = vpop.f32.mrf.mxu0  ;;  %v20374_v43 = vpop.f32.mrf.mxu1  ;;  %v23765_v31 = vand.u32 4294901760, %v5677_v1 }
 0xcbe   :  { %v5366_v51 = vadd.f32 %v20344_v18, %v5269_v36  ;;  %v5441_v23 = vadd.f32 %v5440_v26, %v5345_v21  ;;  %v23771_v36 = vsub.f32 %v5674_v32, %v23760_v29 }
 0xcbf   :  { %v5358_v10 = vpop.f32.mrf.mxu0  ;;  %v5644_v53 = vpop.f32.mrf.mxu1 }
 0xcc0   :  { %v5359_v9 = vadd.f32 %v5358_v10, %v5263_v40  ;;  %v5465_v61 = vadd.f32 %v20354_v42, %v5366_v51  ;;  %v5680_v42 = vsel %vm166_vm0, %v23756_v44, 0 }
 0xcc1   :  { %v20361_v45 = vpop.f32.mrf.mxu0  ;;  %v23776_v51 = vand.u32 4294901760, %v5680_v42 }
 0xcc2   :  { %v5548_v63 = vadd.f32 %v20361_v45, %v5449_v47  ;;  %v5457_v15 = vadd.f32 %v5456_v7, %v5359_v9  ;;  %v23779_v47 = vsub.f32 %v5677_v1, %v23765_v31  ;;  %v23788_v9 = vand.u32 4294901760, %v23771_v36 }
 0xcc3   :  { %v5541_v35 = vpop.f32.mrf.mxu0  ;;  %v23799_v32 = vsub.f32 %v5680_v42, %v23776_v51 }
 0xcc4   :  { %v5639_v50 = vadd.f32 %v20371_v22, %v5548_v63  ;;  %v5542_v54 = vadd.f32 %v5541_v35, %v5441_v23 }
 0xcc5   :  { %v20364_v8 = vpop.f32.mrf.mxu0 }
 0xcc6   :  { %v5655_v5 = vmul.f32 0.5, %v5639_v50  ;;  %v5633_v11 = vadd.f32 %v5632_v60, %v5542_v54  ;;  %v5560_v59 = vadd.f32 %v20364_v8, %v5465_v61  ;;  %v23804_v54 = vand.u32 4294901760, %v23779_v47 }
 0xcc7   :  { %v5553_v26 = vpop.f32.mrf.mxu0 }
 0xcc8   :  { %v5659_v20 = vadd.f32 %v5655_v5, %v23075_v14  ;;  %v5654_v46 = vmul.f32 0.5, %v5633_v11  ;;  %v5651_v37 = vadd.f32 %v20374_v43, %v5560_v59  ;;  %v5554_v39 = vadd.f32 %v5553_v26, %v5457_v15 }
 0xcc9   :  { %v5764_v5 = vsub.f32 %v23771_v36, %v23788_v9  ;;  %v5774_v59 = vsub.f32 %v23779_v47, %v23804_v54  ;;  %v23824_v15 = vand.u32 4294901760, %v23799_v32 }
 0xcca   :  { %v23767_v33 = vmul.f32 0.5, %v5659_v20  ;;  %v5658_v22 = vadd.f32 %v5654_v46, %v23079_v19  ;;  %v5657_v18 = vmul.f32 0.5, %v5651_v37  ;;  %v5645_v7 = vadd.f32 %v5644_v53, %v5554_v39 }
 0xccb   :  { %v23829_v37 = vand.u32 4294901760, %v5764_v5 }
 0xccc   :  { %v23773_v21 = vmul.f32 0.5, %v5658_v22  ;;  %v5661_v10 = vadd.f32 %v5657_v18, %v23085_v24  ;;  %v5656_v40 = vmul.f32 0.5, %v5645_v7  ;;  %v23782_v57 = vand.u32 4294901760, %v23767_v33 }
 0xccd   :  { %v23832_v22 = vand.u32 4294901760, %v5774_v59  ;;  %v5784_v18 = vsub.f32 %v23799_v32, %v23824_v15 }
 0xcce   :  { %v23784_v60 = vmul.f32 0.5, %v5661_v10  ;;  %v5660_v45 = vadd.f32 %v5656_v40, %v23099_v30  ;;  %v23791_v63 = vand.u32 4294901760, %v23773_v21  ;;  %v5831_v50 = vsub.f32 %v23767_v33, %v23782_v57 }
 0xcd0   :  { %v23794_v23 = vand.u32 4294901760, %v23784_v60  ;;  %v23796_v35 = vmul.f32 0.5, %v5660_v45  ;;  %v5838_v43 = vsub.f32 %v23773_v21, %v23791_v63  ;;  %v5832_v26 = vand.u32 4294901760, %v5831_v50 }
 0xcd1   :  { %v23838_v45 = vand.u32 4294901760, %v5784_v18 }
 0xcd2   :  { %v5817_v61 = vsub.f32 %v23784_v60, %v23794_v23  ;;  %v23809_v1 = vand.u32 4294901760, %v23796_v35  ;;  %20375 = vmatprep.subr.mxu0 %v23794_v23  ;;  %v5839_v53 = vand.u32 4294901760, %v5838_v43  ;;  %v5833_v7 = vsub.f32 %v5831_v50, %v5832_v26 }
 0xcd3   :  { %20376 = vmatpush3.msra.mxu0 %v23794_v23 }
 0xcd4   :  { %v5824_v8 = vsub.f32 %v23796_v35, %v23809_v1  ;;  %20377 = vmatprep.subr.mxu0 %v23809_v1  ;;  %v5818_v11 = vand.u32 4294901760, %v5817_v61  ;;  %v5840_v40 = vsub.f32 %v5838_v43, %v5839_v53  ;;  %v5834_v5 = vand.u32 4294901760, %v5833_v7 }
 0xcd5   :  { %20378 = vmatpush3.msra.mxu0 %v23809_v1 }
 0xcd6   :  { %20379 = vmatprep.subr.mxu0 %v23782_v57  ;;  %v5819_v20 = vsub.f32 %v5817_v61, %v5818_v11  ;;  %v5825_v46 = vand.u32 4294901760, %v5824_v8  ;;  %v5841_v59 = vand.u32 4294901760, %v5840_v40 }
 0xcd7   :  { %20380 = vmatpush3.msra.mxu0 %v23782_v57 }
 0xcd8   :  { %20381 = vmatprep.subr.mxu0 %v23791_v63  ;;  %v5820_v39 = vand.u32 4294901760, %v5819_v20  ;;  %v5826_v42 = vsub.f32 %v5824_v8, %v5825_v46 }
 0xcd9   :  { %20382 = vmatpush3.msra.mxu0 %v23791_v63 }
 0xcda   :  { %20384 = vmatmul.mubr.f32.vlgmr.msra.gmra.mxu0 %v23829_v37  ;;  %20389 = vmatprep.subr.mxu1 %v5820_v39  ;;  %v5827_v10 = vand.u32 4294901760, %v5826_v42 }
 0xcdb   :  { %20403 = vmatprep.subr.mxu0 %v5817_v61  ;;  %20386 = vmatprep.mubr.f32.mxu0 %v23832_v22 }
 0xcdc   :  { %20390 = vmatpush3.msra.mxu1 %v5820_v39  ;;  %20404 = vmatpush3.msra.mxu0 %v5817_v61  ;;  %v23860_v61 = vand.u32 4294901760, %v23752_v3 }
 0xcdd   :  { %20391 = vmatprep.subr.mxu1 %v5827_v10  ;;  %20405 = vmatprep.subr.mxu0 %v5824_v8 }
 0xcde   :  { %20392 = vmatpush3.msra.mxu1 %v5827_v10  ;;  %20406 = vmatpush3.msra.mxu0 %v5824_v8  ;;  %v23869_v8 = vand.u32 4294901760, %v23750_v16 }
 0xcdf   :  { %20387 = vmatmul.mubr.f32.gmra.mxu0 %v23838_v45  ;;  %20393 = vmatprep.subr.mxu1 %v5834_v5 }
 0xce0   :  { %20407 = vmatprep.subr.mxu0 %v5831_v50  ;;  %20394 = vmatpush3.msra.mxu1 %v5834_v5  ;;  %v6449_v20 = vsub.f32 %v23750_v16, %v23869_v8 }
 0xce1   :  { %20408 = vmatpush3.msra.mxu0 %v5831_v50  ;;  %20411 = vmatprep.mubr.f32.mxu0 %v23739_v62  ;;  %v23853_v50 = vand.u32 4294901760, %v23756_v44 }
 0xce2   :  { %20395 = vmatprep.subr.mxu1 %v5841_v59  ;;  %20409 = vmatprep.subr.mxu0 %v5838_v43  ;;  %v6450_v16 = vand.u32 4294901760, %v6449_v20 }
 0xce3   :  { %20396 = vmatpush3.msra.mxu1 %v5841_v59  ;;  %20410 = vmatpush3.msra.mxu0 %v5838_v43  ;;  %v6435_v43 = vsub.f32 %v23756_v44, %v23853_v50 }
 0xce4   :  { %20398 = vmatmul.mubr.f32.vlgmr.msra.gmra.mxu1 %v23760_v29  ;;  %20412 = vmatmul.mubr.f32.vlgmr.msra.gmra.mxu0 %v23771_v36 }
 0xce5   :  { %20417 = vmatprep.subr.mxu1 %v23794_v23  ;;  %20431 = vmatprep.subr.mxu0 %v5818_v11  ;;  %v6436_v44 = vand.u32 4294901760, %v6435_v43 }
 0xce6   :  { %20400 = vmatprep.mubr.f32.mxu1 %v23765_v31  ;;  %20414 = vmatprep.mubr.f32.mxu0 %v23779_v47 }
 0xce7   :  { %20418 = vmatpush3.msra.mxu1 %v23794_v23  ;;  %20432 = vmatpush3.msra.mxu0 %v5818_v11  ;;  %v6442_v11 = vsub.f32 %v23752_v3, %v23860_v61 }
 0xce8   :  { %20419 = vmatprep.subr.mxu1 %v23809_v1  ;;  %20433 = vmatprep.subr.mxu0 %v5825_v46 }
 0xce9   :  { %20420 = vmatpush3.msra.mxu1 %v23809_v1  ;;  %20434 = vmatpush3.msra.mxu0 %v5825_v46  ;;  %v6443_v3 = vand.u32 4294901760, %v6442_v11 }
 0xcea   :  { %20401 = vmatmul.mubr.f32.gmra.mxu1 %v23776_v51  ;;  %20415 = vmatmul.mubr.f32.gmra.mxu0 %v23799_v32 }
 0xceb   :  { %20421 = vmatprep.subr.mxu1 %v23782_v57  ;;  %20435 = vmatprep.subr.mxu0 %v5832_v26 }
 0xcec   :  { %20422 = vmatpush3.msra.mxu1 %v23782_v57  ;;  %20425 = vmatprep.mubr.f32.mxu1 %v23743_v12 }
 0xced   :  { %20436 = vmatpush3.msra.mxu0 %v5832_v26  ;;  %20439 = vmatprep.mubr.f32.mxu0 %v23736_v13  ;;  %v23880_v26 = vand.u32 4294901760, %v23732_v17 }
 0xcee   :  { %20423 = vmatprep.subr.mxu1 %v23791_v63  ;;  %20437 = vmatprep.subr.mxu0 %v5839_v53 }
 0xcef   :  { %20424 = vmatpush3.msra.mxu1 %v23791_v63  ;;  %20438 = vmatpush3.msra.mxu0 %v5839_v53  ;;  %v6456_v46 = vsub.f32 %v23732_v17, %v23880_v26 }
 0xcf0   :  { %20426 = vmatmul.mubr.f32.vlgmr.msra.gmra.mxu1 %v23788_v9  ;;  %20440 = vmatmul.mubr.f32.vlgmr.msra.gmra.mxu0 %v23760_v29 }
 0xcf1   :  { %20445 = vmatprep.subr.mxu1 %v23794_v23  ;;  %20459 = vmatprep.subr.mxu0 %v23853_v50  ;;  %v6457_v17 = vand.u32 4294901760, %v6456_v46 }
 0xcf2   :  { %20428 = vmatprep.mubr.f32.mxu1 %v23804_v54  ;;  %20442 = vmatprep.mubr.f32.mxu0 %v23765_v31 }
 0xcf3   :  { %20446 = vmatpush3.msra.mxu1 %v23794_v23  ;;  %20460 = vmatpush3.msra.mxu0 %v23853_v50  ;;  %v6437_v23 = vsub.f32 %v6435_v43, %v6436_v44 }
 0xcf4   :  { %20447 = vmatprep.subr.mxu1 %v23809_v1  ;;  %20461 = vmatprep.subr.mxu0 %v23860_v61 }
 0xcf5   :  { %20448 = vmatpush3.msra.mxu1 %v23809_v1  ;;  %20462 = vmatpush3.msra.mxu0 %v23860_v61  ;;  %v6444_v1 = vsub.f32 %v6442_v11, %v6443_v3  ;;  %v6438_v39 = vand.u32 4294901760, %v6437_v23 }
 0xcf6   :  { %20429 = vmatmul.mubr.f32.gmra.mxu1 %v23824_v15  ;;  %20443 = vmatmul.mubr.f32.gmra.mxu0 %v23776_v51 }
 0xcf7   :  { %20449 = vmatprep.subr.mxu1 %v23782_v57  ;;  %20463 = vmatprep.subr.mxu0 %v23869_v8 }
 0xcf8   :  { %20450 = vmatpush3.msra.mxu1 %v23782_v57  ;;  %20453 = vmatprep.mubr.f32.mxu1 %v23736_v13  ;;  %v6451_v57 = vsub.f32 %v6449_v20, %v6450_v16 }
 0xcf9   :  { %20464 = vmatpush3.msra.mxu0 %v23869_v8  ;;  %20467 = vmatprep.mubr.f32.mxu0 %v23747_v4  ;;  %v6445_v4 = vand.u32 4294901760, %v6444_v1 }
 0xcfa   :  { %20451 = vmatprep.subr.mxu1 %v23791_v63  ;;  %20465 = vmatprep.subr.mxu0 %v23880_v26  ;;  %v6452_v42 = vand.u32 4294901760, %v6451_v57 }
 0xcfb   :  { %20452 = vmatpush3.msra.mxu1 %v23791_v63  ;;  %20466 = vmatpush3.msra.mxu0 %v23880_v26  ;;  %v6458_v63 = vsub.f32 %v6456_v46, %v6457_v17 }
 0xcfc   :  { %20454 = vmatmul.mubr.f32.vlgmr.msra.gmra.mxu1 %v23760_v29  ;;  %20468 = vmatmul.mubr.f32.vlgmr.msra.gmra.mxu0 %v23829_v37 }
 0xcfd   :  { %20473 = vmatprep.subr.mxu1 %v6438_v39  ;;  %20487 = vmatprep.subr.mxu0 %v6435_v43  ;;  %v6459_v37 = vand.u32 4294901760, %v6458_v63 }
 0xcfe   :  { %20456 = vmatprep.mubr.f32.mxu1 %v23765_v31  ;;  %20470 = vmatprep.mubr.f32.mxu0 %v23832_v22 }
 0xcff   :  { %20474 = vmatpush3.msra.mxu1 %v6438_v39  ;;  %20488 = vmatpush3.msra.mxu0 %v6435_v43 }
 0xd00   :  { %20475 = vmatprep.subr.mxu1 %v6445_v4  ;;  %20489 = vmatprep.subr.mxu0 %v6442_v11 }
 0xd01   :  { %20476 = vmatpush3.msra.mxu1 %v6445_v4  ;;  %20490 = vmatpush3.msra.mxu0 %v6442_v11 }
 0xd02   :  { %20457 = vmatmul.mubr.f32.gmra.mxu1 %v23776_v51  ;;  %20471 = vmatmul.mubr.f32.gmra.mxu0 %v23838_v45 }
 0xd03   :  { %20477 = vmatprep.subr.mxu1 %v6452_v42  ;;  %20491 = vmatprep.subr.mxu0 %v6449_v20 }
 0xd04   :  { %20478 = vmatpush3.msra.mxu1 %v6452_v42  ;;  %20481 = vmatprep.mubr.f32.mxu1 %v23736_v13 }
 0xd05   :  { %20492 = vmatpush3.msra.mxu0 %v6449_v20  ;;  %20495 = vmatprep.mubr.f32.mxu0 %v23739_v62 }
 0xd06   :  { %20479 = vmatprep.subr.mxu1 %v6459_v37  ;;  %20493 = vmatprep.subr.mxu0 %v6456_v46 }
 0xd07   :  { %20480 = vmatpush3.msra.mxu1 %v6459_v37  ;;  %20494 = vmatpush3.msra.mxu0 %v6456_v46 }
 0xd08   :  { %20482 = vmatmul.mubr.f32.vlgmr.msra.gmra.mxu1 %v23760_v29  ;;  %20496 = vmatmul.mubr.f32.vlgmr.msra.gmra.mxu0 %v23771_v36 }
 0xd09   :  { %20501 = vmatprep.subr.mxu1 %v23853_v50  ;;  %20515 = vmatprep.subr.mxu0 %v6436_v44 }
 0xd0a   :  { %20484 = vmatprep.mubr.f32.mxu1 %v23765_v31  ;;  %20498 = vmatprep.mubr.f32.mxu0 %v23779_v47 }
 0xd0b   :  { %20502 = vmatpush3.msra.mxu1 %v23853_v50  ;;  %20516 = vmatpush3.msra.mxu0 %v6436_v44 }
 0xd0c   :  { %20503 = vmatprep.subr.mxu1 %v23860_v61  ;;  %20517 = vmatprep.subr.mxu0 %v6443_v3 }
 0xd0d   :  { %20504 = vmatpush3.msra.mxu1 %v23860_v61  ;;  %20518 = vmatpush3.msra.mxu0 %v6443_v3 }
 0xd0e   :  { %20485 = vmatmul.mubr.f32.gmra.mxu1 %v23776_v51  ;;  %20499 = vmatmul.mubr.f32.gmra.mxu0 %v23799_v32 }
 0xd0f   :  { %20505 = vmatprep.subr.mxu1 %v23869_v8  ;;  %20519 = vmatprep.subr.mxu0 %v6450_v16 }
 0xd10   :  { %20506 = vmatpush3.msra.mxu1 %v23869_v8  ;;  %20509 = vmatprep.mubr.f32.mxu1 %v23743_v12 }
 0xd11   :  { %20520 = vmatpush3.msra.mxu0 %v6450_v16  ;;  %20523 = vmatprep.mubr.f32.mxu0 %v23736_v13 }
 0xd12   :  { %20507 = vmatprep.subr.mxu1 %v23880_v26  ;;  %20521 = vmatprep.subr.mxu0 %v6457_v17 }
 0xd13   :  { %20508 = vmatpush3.msra.mxu1 %v23880_v26  ;;  %20522 = vmatpush3.msra.mxu0 %v6457_v17 }
 0xd14   :  { %20510 = vmatmul.mubr.f32.vlgmr.msra.gmra.mxu1 %v23788_v9  ;;  %20524 = vmatmul.mubr.f32.vlgmr.msra.gmra.mxu0 %v23760_v29 }
 0xd15   :  { %20529 = vmatprep.subr.mxu1 %v23853_v50  ;;  %20512 = vmatprep.mubr.f32.mxu1 %v23804_v54 }
 0xd16   :  { %20526 = vmatprep.mubr.f32.mxu0 %v23765_v31  ;;  %20530 = vmatpush3.msra.mxu1 %v23853_v50 }
 0xd17   :  { %20531 = vmatprep.subr.mxu1 %v23860_v61 }
 0xd18   :  { %20532 = vmatpush3.msra.mxu1 %v23860_v61  ;;  %20527 = vmatmul.mubr.f32.gmra.mxu0 %v23776_v51 }
 0xd19   :  { %20513 = vmatmul.mubr.f32.gmra.mxu1 %v23824_v15  ;;  %20533 = vmatprep.subr.mxu1 %v23869_v8 }
 0xd1a   :  { %20534 = vmatpush3.msra.mxu1 %v23869_v8  ;;  %20537 = vmatprep.mubr.f32.mxu1 %v23736_v13 }
 0xd1b   :  { %20535 = vmatprep.subr.mxu1 %v23880_v26 }
 0xd1c   :  { %20536 = vmatpush3.msra.mxu1 %v23880_v26 }
 0xd1d   :  { %20538 = vmatmul.mubr.f32.vlgmr.msra.gmra.mxu1 %v23760_v29 }
 0xd1e   :  { %20540 = vmatprep.mubr.f32.mxu1 %v23765_v31 }
 0xd21   :  { %20541 = vmatmul.mubr.f32.gmra.mxu1 %v23776_v51 }
 0xd9a   :  { %v20385_v62 = vpop.f32.mrf.mxu0 }
 0xd9c   :  { %v5757_v12 = vpop.f32.mrf.mxu0 }
 0xd9f   :  { %v20388_v36 = vpop.f32.mrf.mxu0 }
 0xda1   :  { %v5777_v47 = vpop.f32.mrf.mxu0 }
 0xda4   :  { %v20399_v9 = vpop.f32.mrf.mxu1  ;;  %v20413_v32 = vpop.f32.mrf.mxu0 }
 0xda5   :  { %v5885_v40 = vadd.f32 %v20399_v9, %v20385_v62 }
 0xda6   :  { %v5878_v54 = vpop.f32.mrf.mxu1  ;;  %v5976_v15 = vpop.f32.mrf.mxu0 }
 0xda7   :  { %v5879_v31 = vadd.f32 %v5878_v54, %v5757_v12  ;;  %v5984_v5 = vadd.f32 %v20413_v32, %v5885_v40 }
 0xda9   :  { %v5977_v50 = vadd.f32 %v5976_v15, %v5879_v31 }
 0xdaa   :  { %v20402_v53 = vpop.f32.mrf.mxu1  ;;  %v20416_v13 = vpop.f32.mrf.mxu0 }
 0xdab   :  { %v5897_v61 = vadd.f32 %v20402_v53, %v20388_v36 }
 0xdac   :  { %v5890_v22 = vpop.f32.mrf.mxu1  ;;  %v5990_v18 = vpop.f32.mrf.mxu0 }
 0xdad   :  { %v5891_v44 = vadd.f32 %v5890_v22, %v5777_v47  ;;  %v5998_v20 = vadd.f32 %v20416_v13, %v5897_v61 }
 0xdaf   :  { %v5991_v16 = vadd.f32 %v5990_v18, %v5891_v44 }
 0xdb0   :  { %v20427_v7 = vpop.f32.mrf.mxu1  ;;  %v20441_v10 = vpop.f32.mrf.mxu0 }
 0xdb1   :  { %v6083_v43 = vadd.f32 %v20427_v7, %v5984_v5 }
 0xdb2   :  { %v6074_v29 = vpop.f32.mrf.mxu1  ;;  %v6181_v45 = vpop.f32.mrf.mxu0 }
 0xdb3   :  { %v6075_v26 = vadd.f32 %v6074_v29, %v5977_v50  ;;  %v6188_v3 = vadd.f32 %v20441_v10, %v6083_v43 }
 0xdb5   :  { %v6182_v1 = vadd.f32 %v6181_v45, %v6075_v26 }
 0xdb6   :  { %v20430_v51 = vpop.f32.mrf.mxu1  ;;  %v20444_v59 = vpop.f32.mrf.mxu0 }
 0xdb7   :  { %v6099_v39 = vadd.f32 %v20430_v51, %v5998_v20 }
 0xdb8   :  { %v6090_v8 = vpop.f32.mrf.mxu1  ;;  %v6193_v11 = vpop.f32.mrf.mxu0 }
 0xdb9   :  { %v6091_v63 = vadd.f32 %v6090_v8, %v5991_v16  ;;  %v6200_v62 = vadd.f32 %v20444_v59, %v6099_v39 }
 0xdbb   :  { %v6194_v9 = vadd.f32 %v6193_v11, %v6091_v63 }
 0xdbc   :  { %v20455_v23 = vpop.f32.mrf.mxu1  ;;  %v20469_v46 = vpop.f32.mrf.mxu0 }
 0xdbd   :  { %v6281_v17 = vadd.f32 %v20455_v23, %v6188_v3 }
 0xdbe   :  { %v6274_v57 = vpop.f32.mrf.mxu1  ;;  %v6375_v4 = vpop.f32.mrf.mxu0 }
 0xdbf   :  { %v23945_v42 = vadd.f32 %v6281_v17, %v23767_v33  ;;  %v6275_v37 = vadd.f32 %v6274_v57, %v6182_v1 }
 0xdc1   :  { %v23948_v12 = vadd.f32 %v6275_v37, %v23773_v21  ;;  %v23951_v32 = vand.u32 4294901760, %v23945_v42 }
 0xdc2   :  { %v20458_v36 = vpop.f32.mrf.mxu1  ;;  %v20472_v47 = vpop.f32.mrf.mxu0 }
 0xdc3   :  { %v6293_v54 = vadd.f32 %v20458_v36, %v6200_v62  ;;  %v23954_v13 = vand.u32 4294901760, %v23948_v12  ;;  %v23961_v21 = vsub.f32 %v23945_v42, %v23951_v32 }
 0xdc4   :  { %v6286_v15 = vpop.f32.mrf.mxu1  ;;  %v6395_v53 = vpop.f32.mrf.mxu0 }
 0xdc5   :  { %v23957_v33 = vadd.f32 %v6293_v54, %v23784_v60  ;;  %v6287_v22 = vadd.f32 %v6286_v15, %v6194_v9  ;;  %v23971_v29 = vsub.f32 %v23948_v12, %v23954_v13  ;;  %v23991_v59 = vand.u32 4294901760, %v23961_v21 }
 0xdc7   :  { %v23964_v18 = vand.u32 4294901760, %v23957_v33  ;;  %v23967_v7 = vadd.f32 %v6287_v22, %v23796_v35  ;;  %v24001_v43 = vand.u32 4294901760, %v23971_v29  ;;  %v7077_v20 = vsub.f32 %v23961_v21, %v23991_v59 }
 0xdc8   :  { %v20483_v10 = vpop.f32.mrf.mxu1  ;;  %v20497_v40 = vpop.f32.mrf.mxu0 }
 0xdc9   :  { %v23975_v60 = vsub.f32 %v23957_v33, %v23964_v18  ;;  %v23978_v45 = vand.u32 4294901760, %v23967_v7  ;;  %20543 = vmatprep.subr.mxu0 %v23964_v18  ;;  %v7084_v1 = vsub.f32 %v23971_v29, %v24001_v43  ;;  %v6503_v39 = vadd.f32 %v20483_v10, %v20469_v46 }
 0xdca   :  { %v6496_v31 = vpop.f32.mrf.mxu1  ;;  %v6594_v5 = vpop.f32.mrf.mxu0  ;;  %20544 = vmatpush3.msra.mxu0 %v23964_v18  ;;  %v7078_v17 = vand.u32 4294901760, %v7077_v20 }
 0xdcb   :  { %v23984_v35 = vsub.f32 %v23967_v7, %v23978_v45  ;;  %20545 = vmatprep.subr.mxu0 %v23978_v45  ;;  %v23988_v51 = vand.u32 4294901760, %v23975_v60  ;;  %v6497_v57 = vadd.f32 %v6496_v31, %v6375_v4  ;;  %v7085_v62 = vand.u32 4294901760, %v7084_v1 }
 0xdcc   :  { %20546 = vmatpush3.msra.mxu0 %v23978_v45  ;;  %v6602_v36 = vadd.f32 %v20497_v40, %v6503_v39 }
 0xdcd   :  { %20547 = vmatprep.subr.mxu0 %v23951_v32  ;;  %v7063_v50 = vsub.f32 %v23975_v60, %v23988_v51  ;;  %v23998_v61 = vand.u32 4294901760, %v23984_v35  ;;  %v6595_v15 = vadd.f32 %v6594_v5, %v6497_v57 }
 0xdce   :  { %v20486_v8 = vpop.f32.mrf.mxu1  ;;  %v20500_v11 = vpop.f32.mrf.mxu0  ;;  %20548 = vmatpush3.msra.mxu0 %v23951_v32 }
 0xdcf   :  { %20549 = vmatprep.subr.mxu0 %v23954_v13  ;;  %v7064_v44 = vand.u32 4294901760, %v7063_v50  ;;  %v7070_v26 = vsub.f32 %v23984_v35, %v23998_v61  ;;  %v6515_v9 = vadd.f32 %v20486_v8, %v20472_v47 }
 0xdd0   :  { %v6508_v3 = vpop.f32.mrf.mxu1  ;;  %20550 = vmatpush3.msra.mxu0 %v23954_v13  ;;  %v6608_v23 = vpop.f32.mrf.mxu0 }
 0xdd1   :  { %20557 = vmatprep.subr.mxu1 %v7064_v44  ;;  %20571 = vmatprep.subr.mxu0 %v23975_v60  ;;  %v7071_v16 = vand.u32 4294901760, %v7070_v26  ;;  %v6509_v22 = vadd.f32 %v6508_v3, %v6395_v53  ;;  %v6616_v10 = vadd.f32 %v20500_v11, %v6515_v9 }
 0xdd2   :  { %20558 = vmatpush3.msra.mxu1 %v7064_v44 }
 0xdd3   :  { %20559 = vmatprep.subr.mxu1 %v7071_v16  ;;  %v6609_v44 = vadd.f32 %v6608_v23, %v6509_v22 }
 0xdd4   :  { %v20511_v63 = vpop.f32.mrf.mxu1  ;;  %20560 = vmatpush3.msra.mxu1 %v7071_v16  ;;  %v20525_v37 = vpop.f32.mrf.mxu0 }
 0xdd5   :  { %20561 = vmatprep.subr.mxu1 %v7078_v17  ;;  %v6701_v50 = vadd.f32 %v20511_v63, %v6602_v36 }
 0xdd6   :  { %v6692_v54 = vpop.f32.mrf.mxu1  ;;  %20562 = vmatpush3.msra.mxu1 %v7078_v17  ;;  %v6799_v26 = vpop.f32.mrf.mxu0 }
 0xdd7   :  { %20563 = vmatprep.subr.mxu1 %v7085_v62  ;;  %v6693_v4 = vadd.f32 %v6692_v54, %v6595_v15  ;;  %v6806_v20 = vadd.f32 %v20525_v37, %v6701_v50 }
 0xdd8   :  { %20564 = vmatpush3.msra.mxu1 %v7085_v62  ;;  %v20528_v1 = vpop.f32.mrf.mxu0 }
 0xdd9   :  { %v20514_v46 = vpop.f32.mrf.mxu1  ;;  %20585 = vmatprep.subr.mxu1 %v23964_v18  ;;  %v6800_v47 = vadd.f32 %v6799_v26, %v6693_v4 }
 0xdda   :  { %v6717_v16 = vadd.f32 %v20514_v46, %v6616_v10  ;;  %v6811_v57 = vpop.f32.mrf.mxu0 }
 0xddb   :  { %v6708_v31 = vpop.f32.mrf.mxu1 }
 0xddc   :  { %v6709_v8 = vadd.f32 %v6708_v31, %v6609_v44  ;;  %v6818_v5 = vadd.f32 %v20528_v1, %v6717_v16 }
 0xddd   :  { %v20539_v40 = vpop.f32.mrf.mxu1 }
 0xdde   :  { %v6899_v39 = vadd.f32 %v20539_v40, %v6806_v20  ;;  %v6812_v62 = vadd.f32 %v6811_v57, %v6709_v8 }
 0xddf   :  { %v6892_v17 = vpop.f32.mrf.mxu1 }
 0xde0   :  { %v6918_v53 = vsel %vm166_vm0, %v6899_v39, 0  ;;  %v24015_v3 = vadd.f32 %v6892_v17, %v6800_v47 }
 0xde1   :  { %v24017_v63 = vand.u32 4294901760, %v6918_v53  ;;  %v20542_v11 = vpop.f32.mrf.mxu1 }
 0xde2   :  { %v6915_v23 = vsel %vm166_vm0, %v24015_v3, 0  ;;  %v6911_v37 = vadd.f32 %v20542_v11, %v6818_v5 }
 0xde3   :  { %v24022_v36 = vsub.f32 %v6918_v53, %v24017_v63  ;;  %v24024_v9 = vand.u32 4294901760, %v6915_v23  ;;  %v6904_v54 = vpop.f32.mrf.mxu1 }
 0xde4   :  { %v6924_v15 = vsel %vm166_vm0, %v6911_v37, 0  ;;  %v6905_v22 = vadd.f32 %v6904_v54, %v6812_v62  ;;  %v24047_v20 = vand.u32 4294901760, %v6911_v37  ;;  %v24083_v62 = vand.u32 4294901760, %v6899_v39 }
 0xde5   :  { %v24028_v50 = vand.u32 4294901760, %v24022_v36  ;;  %v24031_v26 = vsub.f32 %v6915_v23, %v24024_v9  ;;  %v24033_v46 = vand.u32 4294901760, %v6924_v15  ;;  %20565 = vmatprep.mubr.f32.mxu1 %v24024_v9 }
 0xde6   :  { %v6921_v10 = vsel %vm166_vm0, %v6905_v22, 0  ;;  %20566 = vmatmul.mubr.f32.vlgmr.msra.gmra.mxu1 %v24017_v63  ;;  %v24072_v5 = vsub.f32 %v6911_v37, %v24047_v20  ;;  %v24074_v53 = vand.u32 4294901760, %v6905_v22 }
 0xde7   :  { %v24039_v4 = vsub.f32 %v6924_v15, %v24033_v46  ;;  %v24041_v31 = vand.u32 4294901760, %v6921_v10  ;;  %20586 = vmatpush3.msra.mxu1 %v23964_v18  ;;  %v24045_v44 = vand.u32 4294901760, %v24031_v26  ;;  %v7008_v16 = vsub.f32 %v24022_v36, %v24028_v50 }
 0xde8   :  { %20587 = vmatprep.subr.mxu1 %v23978_v45  ;;  %v24094_v54 = vsub.f32 %v6905_v22, %v24074_v53  ;;  %v24099_v15 = vand.u32 4294901760, %v24072_v5 }
 0xde9   :  { %v24053_v1 = vsub.f32 %v6921_v10, %v24041_v31  ;;  %20588 = vmatpush3.msra.mxu1 %v23978_v45  ;;  %20568 = vmatprep.mubr.f32.mxu1 %v24041_v31  ;;  %v6998_v40 = vsub.f32 %v24031_v26, %v24045_v44  ;;  %v24062_v47 = vand.u32 4294901760, %v24039_v4  ;;  %v24077_v57 = vand.u32 4294901760, %v7008_v16 }
 0xdea   :  { %20589 = vmatprep.subr.mxu1 %v23951_v32  ;;  %20569 = vmatmul.mubr.f32.gmra.mxu1 %v24033_v46  ;;  %v24102_v10 = vand.u32 4294901760, %v24015_v3  ;;  %v7681_v22 = vsub.f32 %v24072_v5, %v24099_v15 }
 0xdeb   :  { %20590 = vmatpush3.msra.mxu1 %v23951_v32  ;;  %20593 = vmatprep.mubr.f32.mxu1 %v24045_v44  ;;  %v24066_v8 = vand.u32 4294901760, %v6998_v40  ;;  %v24069_v17 = vand.u32 4294901760, %v24053_v1  ;;  %v7028_v23 = vsub.f32 %v24039_v4, %v24062_v47 }
 0xdec   :  { %20591 = vmatprep.subr.mxu1 %v23954_v13 }
 0xded   :  { %20592 = vmatpush3.msra.mxu1 %v23954_v13  ;;  %20551 = vmatprep.mubr.f32.mxu0 %v24066_v8  ;;  %v7018_v11 = vsub.f32 %v24053_v1, %v24069_v17 }
 0xdee   :  { %20613 = vmatprep.subr.mxu1 %v23964_v18  ;;  %20552 = vmatmul.mubr.f32.vlgmr.msra.gmra.mxu0 %v24077_v57 }
 0xdef   :  { %20572 = vmatpush3.msra.mxu0 %v23975_v60  ;;  %20594 = vmatmul.mubr.f32.vlgmr.msra.gmra.mxu1 %v24028_v50  ;;  %v24091_v37 = vand.u32 4294901760, %v7018_v11  ;;  %v24107_v60 = vsub.f32 %v6899_v39, %v24083_v62  ;;  %v24120_v39 = vand.u32 4294901760, %v24094_v54 }
 0xdf0   :  { %20614 = vmatpush3.msra.mxu1 %v23964_v18  ;;  %20573 = vmatprep.subr.mxu0 %v23984_v35  ;;  %v24111_v18 = vand.u32 4294901760, %v7028_v23 }
 0xdf1   :  { %20596 = vmatprep.mubr.f32.mxu1 %v24069_v17  ;;  %20615 = vmatprep.subr.mxu1 %v23978_v45 }
 0xdf2   :  { %20574 = vmatpush3.msra.mxu0 %v23984_v35  ;;  %20616 = vmatpush3.msra.mxu1 %v23978_v45  ;;  %v24124_v35 = vsub.f32 %v24015_v3, %v24102_v10  ;;  %v24131_v45 = vand.u32 4294901760, %v24107_v60  ;;  %v7682_v3 = vand.u32 4294901760, %v7681_v22 }
 0xdf3   :  { %20554 = vmatprep.mubr.f32.mxu0 %v24091_v37  ;;  %20575 = vmatprep.subr.mxu0 %v23961_v21 }
 0xdf4   :  { %20617 = vmatprep.subr.mxu1 %v23951_v32  ;;  %20555 = vmatmul.mubr.f32.gmra.mxu0 %v24111_v18  ;;  %v7695_v16 = vsub.f32 %v24107_v60, %v24131_v45 }
 0xdf5   :  { %20576 = vmatpush3.msra.mxu0 %v23961_v21  ;;  %20597 = vmatmul.mubr.f32.gmra.mxu1 %v24062_v47  ;;  %v7688_v21 = vsub.f32 %v24094_v54, %v24120_v39 }
 0xdf6   :  { %20618 = vmatpush3.msra.mxu1 %v23951_v32  ;;  %20577 = vmatprep.subr.mxu0 %v23971_v29  ;;  %v24142_v32 = vand.u32 4294901760, %v24124_v35  ;;  %v7696_v40 = vand.u32 4294901760, %v7695_v16 }
 0xdf7   :  { %20579 = vmatprep.mubr.f32.mxu0 %v24031_v26  ;;  %20619 = vmatprep.subr.mxu1 %v23954_v13 }
 0xdf8   :  { %20621 = vmatprep.mubr.f32.mxu1 %v24024_v9  ;;  %20578 = vmatpush3.msra.mxu0 %v23971_v29  ;;  %v7689_v29 = vand.u32 4294901760, %v7688_v21 }
 0xdf9   :  { %20620 = vmatpush3.msra.mxu1 %v23954_v13  ;;  %20599 = vmatprep.subr.mxu0 %v23988_v51  ;;  %v7702_v13 = vsub.f32 %v24124_v35, %v24142_v32 }
 0xdfa   :  { %20641 = vmatprep.subr.mxu1 %v7682_v3  ;;  %20580 = vmatmul.mubr.f32.vlgmr.msra.gmra.mxu0 %v24022_v36 }
 0xdfb   :  { %20600 = vmatpush3.msra.mxu0 %v23988_v51  ;;  %20622 = vmatmul.mubr.f32.vlgmr.msra.gmra.mxu1 %v24017_v63  ;;  %v7703_v51 = vand.u32 4294901760, %v7702_v13 }
 0xdfc   :  { %20642 = vmatpush3.msra.mxu1 %v7682_v3  ;;  %20582 = vmatprep.mubr.f32.mxu0 %v24053_v1 }
 0xdfd   :  { %20601 = vmatprep.subr.mxu0 %v23998_v61  ;;  %20624 = vmatprep.mubr.f32.mxu1 %v24041_v31 }
 0xdfe   :  { %20643 = vmatprep.subr.mxu1 %v7689_v29  ;;  %20602 = vmatpush3.msra.mxu0 %v23998_v61 }
 0xdff   :  { %20644 = vmatpush3.msra.mxu1 %v7689_v29  ;;  %20603 = vmatprep.subr.mxu0 %v23991_v59 }
 0xe00   :  { %20645 = vmatprep.subr.mxu1 %v7696_v40  ;;  %20583 = vmatmul.mubr.f32.gmra.mxu0 %v24039_v4 }
 0xe01   :  { %20604 = vmatpush3.msra.mxu0 %v23991_v59  ;;  %20625 = vmatmul.mubr.f32.gmra.mxu1 %v24033_v46 }
 0xe02   :  { %20646 = vmatpush3.msra.mxu1 %v7696_v40  ;;  %20605 = vmatprep.subr.mxu0 %v24001_v43 }
 0xe03   :  { %20607 = vmatprep.mubr.f32.mxu0 %v24024_v9  ;;  %20647 = vmatprep.subr.mxu1 %v7703_v51 }
 0xe04   :  { %20649 = vmatprep.mubr.f32.mxu1 %v24024_v9  ;;  %20606 = vmatpush3.msra.mxu0 %v24001_v43 }
 0xe05   :  { %20648 = vmatpush3.msra.mxu1 %v7703_v51  ;;  %20627 = vmatprep.subr.mxu0 %v24047_v20 }
 0xe06   :  { %20669 = vmatprep.subr.mxu1 %v24047_v20  ;;  %20608 = vmatmul.mubr.f32.vlgmr.msra.gmra.mxu0 %v24017_v63 }
 0xe07   :  { %20628 = vmatpush3.msra.mxu0 %v24047_v20  ;;  %20650 = vmatmul.mubr.f32.vlgmr.msra.gmra.mxu1 %v24017_v63 }
 0xe08   :  { %20670 = vmatpush3.msra.mxu1 %v24047_v20  ;;  %20610 = vmatprep.mubr.f32.mxu0 %v24041_v31 }
 0xe09   :  { %20629 = vmatprep.subr.mxu0 %v24074_v53  ;;  %20652 = vmatprep.mubr.f32.mxu1 %v24041_v31 }
 0xe0a   :  { %20671 = vmatprep.subr.mxu1 %v24074_v53  ;;  %20630 = vmatpush3.msra.mxu0 %v24074_v53 }
 0xe0b   :  { %20672 = vmatpush3.msra.mxu1 %v24074_v53  ;;  %20631 = vmatprep.subr.mxu0 %v24083_v62 }
 0xe0c   :  { %20673 = vmatprep.subr.mxu1 %v24083_v62  ;;  %20611 = vmatmul.mubr.f32.gmra.mxu0 %v24033_v46 }
 0xe0d   :  { %20632 = vmatpush3.msra.mxu0 %v24083_v62  ;;  %20653 = vmatmul.mubr.f32.gmra.mxu1 %v24033_v46 }
 0xe0e   :  { %20674 = vmatpush3.msra.mxu1 %v24083_v62  ;;  %20633 = vmatprep.subr.mxu0 %v24102_v10 }
 0xe0f   :  { %20635 = vmatprep.mubr.f32.mxu0 %v24066_v8  ;;  %20675 = vmatprep.subr.mxu1 %v24102_v10 }
 0xe10   :  { %20677 = vmatprep.mubr.f32.mxu1 %v24045_v44  ;;  %20634 = vmatpush3.msra.mxu0 %v24102_v10 }
 0xe11   :  { %20676 = vmatpush3.msra.mxu1 %v24102_v10  ;;  %20655 = vmatprep.subr.mxu0 %v24072_v5 }
 0xe12   :  { %20697 = vmatprep.subr.mxu1 %v24047_v20  ;;  %20636 = vmatmul.mubr.f32.vlgmr.msra.gmra.mxu0 %v24077_v57 }
 0xe13   :  { %20656 = vmatpush3.msra.mxu0 %v24072_v5  ;;  %20678 = vmatmul.mubr.f32.vlgmr.msra.gmra.mxu1 %v24028_v50 }
 0xe14   :  { %20698 = vmatpush3.msra.mxu1 %v24047_v20  ;;  %20638 = vmatprep.mubr.f32.mxu0 %v24091_v37 }
 0xe15   :  { %20657 = vmatprep.subr.mxu0 %v24094_v54  ;;  %20680 = vmatprep.mubr.f32.mxu1 %v24069_v17 }
 0xe16   :  { %20699 = vmatprep.subr.mxu1 %v24074_v53  ;;  %20658 = vmatpush3.msra.mxu0 %v24094_v54 }
 0xe17   :  { %20700 = vmatpush3.msra.mxu1 %v24074_v53  ;;  %20659 = vmatprep.subr.mxu0 %v24107_v60 }
 0xe18   :  { %20701 = vmatprep.subr.mxu1 %v24083_v62  ;;  %20639 = vmatmul.mubr.f32.gmra.mxu0 %v24111_v18 }
 0xe19   :  { %20660 = vmatpush3.msra.mxu0 %v24107_v60  ;;  %20681 = vmatmul.mubr.f32.gmra.mxu1 %v24062_v47 }
 0xe1a   :  { %20702 = vmatpush3.msra.mxu1 %v24083_v62  ;;  %20661 = vmatprep.subr.mxu0 %v24124_v35 }
 0xe1b   :  { %20663 = vmatprep.mubr.f32.mxu0 %v24031_v26  ;;  %20703 = vmatprep.subr.mxu1 %v24102_v10 }
 0xe1c   :  { %20705 = vmatprep.mubr.f32.mxu1 %v24024_v9  ;;  %20662 = vmatpush3.msra.mxu0 %v24124_v35 }
 0xe1d   :  { %20704 = vmatpush3.msra.mxu1 %v24102_v10  ;;  %20683 = vmatprep.subr.mxu0 %v24099_v15 }
 0xe1e   :  { %20664 = vmatmul.mubr.f32.vlgmr.msra.gmra.mxu0 %v24022_v36  ;;  %20706 = vmatmul.mubr.f32.vlgmr.msra.gmra.mxu1 %v24017_v63 }
 0xe1f   :  { %20684 = vmatpush3.msra.mxu0 %v24099_v15  ;;  %20666 = vmatprep.mubr.f32.mxu0 %v24053_v1 }
 0xe20   :  { %20685 = vmatprep.subr.mxu0 %v24120_v39  ;;  %20708 = vmatprep.mubr.f32.mxu1 %v24041_v31 }
 0xe21   :  { %20686 = vmatpush3.msra.mxu0 %v24120_v39 }
 0xe22   :  { %20687 = vmatprep.subr.mxu0 %v24131_v45  ;;  %20667 = vmatmul.mubr.f32.gmra.mxu0 %v24039_v4 }
 0xe23   :  { %20688 = vmatpush3.msra.mxu0 %v24131_v45  ;;  %20709 = vmatmul.mubr.f32.gmra.mxu1 %v24033_v46 }
 0xe24   :  { %20689 = vmatprep.subr.mxu0 %v24142_v32  ;;  %20691 = vmatprep.mubr.f32.mxu0 %v24024_v9 }
 0xe25   :  { %20690 = vmatpush3.msra.mxu0 %v24142_v32 }
 0xe26   :  { %20692 = vmatmul.mubr.f32.vlgmr.msra.gmra.mxu0 %v24017_v63 }
 0xe27   :  { %20694 = vmatprep.mubr.f32.mxu0 %v24041_v31 }
 0xe2a   :  { %20695 = vmatmul.mubr.f32.gmra.mxu0 %v24033_v46 }
 0xea6   :  { %v20567_v59 = vpop.f32.mrf.mxu1 }
 0xea8   :  { %v7122_v61 = vpop.f32.mrf.mxu1 }
 0xeaa   :  { %v20570_v43 = vpop.f32.mrf.mxu1 }
 0xeac   :  { %v7134_v36 = vpop.f32.mrf.mxu1 }
 0xeae   :  { %v20553_v50 = vpop.f32.mrf.mxu0 }
 0xeaf   :  { %v20595_v26 = vpop.f32.mrf.mxu1  ;;  %v7129_v53 = vadd.f32 %v20567_v59, %v20553_v50 }
 0xeb0   :  { %v7001_v4 = vpop.f32.mrf.mxu0 }
 0xeb1   :  { %v7318_v44 = vpop.f32.mrf.mxu1  ;;  %v7123_v57 = vadd.f32 %v7122_v61, %v7001_v4 }
 0xeb4   :  { %v20556_v20 = vpop.f32.mrf.mxu0 }
 0xeb5   :  { %v20598_v1 = vpop.f32.mrf.mxu1  ;;  %v7141_v54 = vadd.f32 %v20570_v43, %v20556_v20 }
 0xeb6   :  { %v7021_v47 = vpop.f32.mrf.mxu0 }
 0xeb7   :  { %v7334_v9 = vpop.f32.mrf.mxu1  ;;  %v7135_v60 = vadd.f32 %v7134_v36, %v7021_v47 }
 0xeba   :  { %v20581_v8 = vpop.f32.mrf.mxu0 }
 0xebb   :  { %v20623_v17 = vpop.f32.mrf.mxu1  ;;  %v7228_v46 = vadd.f32 %v20581_v8, %v7129_v53 }
 0xebc   :  { %v7220_v5 = vpop.f32.mrf.mxu0 }
 0xebd   :  { %v7518_v63 = vpop.f32.mrf.mxu1  ;;  %v7221_v23 = vadd.f32 %v7220_v5, %v7123_v57  ;;  %v7327_v15 = vadd.f32 %v20595_v26, %v7228_v46 }
 0xebf   :  { %v7319_v35 = vadd.f32 %v7318_v44, %v7221_v23 }
 0xec0   :  { %v20584_v31 = vpop.f32.mrf.mxu0 }
 0xec1   :  { %v20626_v11 = vpop.f32.mrf.mxu1  ;;  %v7242_v18 = vadd.f32 %v20584_v31, %v7141_v54 }
 0xec2   :  { %v7234_v62 = vpop.f32.mrf.mxu0 }
 0xec3   :  { %v7530_v37 = vpop.f32.mrf.mxu1  ;;  %v7235_v3 = vadd.f32 %v7234_v62, %v7135_v60  ;;  %v7343_v40 = vadd.f32 %v20598_v1, %v7242_v18 }
 0xec5   :  { %v7335_v36 = vadd.f32 %v7334_v9, %v7235_v3 }
 0xec6   :  { %v20609_v10 = vpop.f32.mrf.mxu0 }
 0xec7   :  { %v7432_v22 = vadd.f32 %v20609_v10, %v7327_v15  ;;  %v20651_v39 = vpop.f32.mrf.mxu1 }
 0xec8   :  { %v7425_v45 = vpop.f32.mrf.mxu0 }
 0xec9   :  { %v7525_v21 = vadd.f32 %v20623_v17, %v7432_v22  ;;  %v7426_v32 = vadd.f32 %v7425_v45, %v7319_v35  ;;  %v7740_v16 = vpop.f32.mrf.mxu1 }
 0xecb   :  { %v24230_v29 = vadd.f32 %v7525_v21, %v23945_v42  ;;  %v7519_v13 = vadd.f32 %v7518_v63, %v7426_v32 }
 0xecc   :  { %v20612_v51 = vpop.f32.mrf.mxu0 }
 0xecd   :  { %v24233_v59 = vadd.f32 %v7519_v13, %v23948_v12  ;;  %v7444_v61 = vadd.f32 %v20612_v51, %v7343_v40  ;;  %v20654_v43 = vpop.f32.mrf.mxu1  ;;  %v24236_v26 = vand.u32 4294901760, %v24230_v29 }
 0xece   :  { %v7437_v50 = vpop.f32.mrf.mxu0 }
 0xecf   :  { %v7537_v4 = vadd.f32 %v20626_v11, %v7444_v61  ;;  %v7438_v44 = vadd.f32 %v7437_v50, %v7335_v36  ;;  %v7752_v20 = vpop.f32.mrf.mxu1  ;;  %v24239_v47 = vand.u32 4294901760, %v24233_v59  ;;  %v24246_v12 = vsub.f32 %v24230_v29, %v24236_v26 }
 0xed1   :  { %v24242_v42 = vadd.f32 %v7537_v4, %v23957_v33  ;;  %v7531_v1 = vadd.f32 %v7530_v37, %v7438_v44  ;;  %v24256_v53 = vsub.f32 %v24233_v59, %v24239_v47  ;;  %v24276_v11 = vand.u32 4294901760, %v24246_v12 }
 0xed2   :  { %v20637_v8 = vpop.f32.mrf.mxu0 }
 0xed3   :  { %v24249_v9 = vand.u32 4294901760, %v24242_v42  ;;  %v24252_v17 = vadd.f32 %v7531_v1, %v23967_v7  ;;  %v20679_v5 = vpop.f32.mrf.mxu1  ;;  %v24286_v54 = vand.u32 4294901760, %v24256_v53  ;;  %v8321_v22 = vsub.f32 %v24246_v12, %v24276_v11 }
 0xed4   :  { %v7619_v63 = vpop.f32.mrf.mxu0  ;;  %v7747_v21 = vadd.f32 %v20651_v39, %v20637_v8 }
 0xed5   :  { %v24260_v33 = vsub.f32 %v24242_v42, %v24249_v9  ;;  %v24263_v31 = vand.u32 4294901760, %v24252_v17  ;;  %20711 = vmatprep.subr.mxu0 %v24249_v9  ;;  %v7936_v57 = vpop.f32.mrf.mxu1  ;;  %v8328_v45 = vsub.f32 %v24256_v53, %v24286_v54  ;;  %v8322_v13 = vand.u32 4294901760, %v8321_v22 }
 0xed6   :  { %20712 = vmatpush3.msra.mxu0 %v24249_v9  ;;  %v7741_v51 = vadd.f32 %v7740_v16, %v7619_v63 }
 0xed7   :  { %v24269_v7 = vsub.f32 %v24252_v17, %v24263_v31  ;;  %20713 = vmatprep.subr.mxu0 %v24263_v31  ;;  %v24273_v46 = vand.u32 4294901760, %v24260_v33  ;;  %v8329_v36 = vand.u32 4294901760, %v8328_v45 }
 0xed8   :  { %v20640_v62 = vpop.f32.mrf.mxu0  ;;  %20714 = vmatpush3.msra.mxu0 %v24263_v31 }
 0xed9   :  { %20715 = vmatprep.subr.mxu0 %v24236_v26  ;;  %v8307_v23 = vsub.f32 %v24260_v33, %v24273_v46  ;;  %v24283_v37 = vand.u32 4294901760, %v24269_v7  ;;  %v20682_v10 = vpop.f32.mrf.mxu1  ;;  %v7759_v4 = vadd.f32 %v20654_v43, %v20640_v62 }
 0xeda   :  { %v7639_v15 = vpop.f32.mrf.mxu0  ;;  %20716 = vmatpush3.msra.mxu0 %v24236_v26 }
 0xedb   :  { %20717 = vmatprep.subr.mxu0 %v24239_v47  ;;  %v8308_v60 = vand.u32 4294901760, %v8307_v23  ;;  %v8314_v18 = vsub.f32 %v24269_v7, %v24283_v37  ;;  %v7952_v32 = vpop.f32.mrf.mxu1  ;;  %v7753_v39 = vadd.f32 %v7752_v20, %v7639_v15 }
 0xedc   :  { %20718 = vmatpush3.msra.mxu0 %v24239_v47 }
 0xedd   :  { %20725 = vmatprep.subr.mxu1 %v8308_v60  ;;  %20739 = vmatprep.subr.mxu0 %v24260_v33  ;;  %v8315_v35 = vand.u32 4294901760, %v8314_v18 }
 0xede   :  { %v20665_v3 = vpop.f32.mrf.mxu0  ;;  %20726 = vmatpush3.msra.mxu1 %v8308_v60  ;;  %v20707_v44 = vpop.f32.mrf.mxu1 }
 0xedf   :  { %20727 = vmatprep.subr.mxu1 %v8315_v35  ;;  %v7846_v61 = vadd.f32 %v20665_v3, %v7747_v21 }
 0xee0   :  { %v7838_v40 = vpop.f32.mrf.mxu0  ;;  %20728 = vmatpush3.msra.mxu1 %v8315_v35  ;;  %v8136_v22 = vpop.f32.mrf.mxu1 }
 0xee1   :  { %20729 = vmatprep.subr.mxu1 %v8322_v13  ;;  %v7839_v1 = vadd.f32 %v7838_v40, %v7741_v51  ;;  %v7945_v60 = vadd.f32 %v20679_v5, %v7846_v61 }
 0xee2   :  { %v20668_v50 = vpop.f32.mrf.mxu0  ;;  %20730 = vmatpush3.msra.mxu1 %v8322_v13 }
 0xee3   :  { %20731 = vmatprep.subr.mxu1 %v8329_v36  ;;  %v7860_v18 = vadd.f32 %v20668_v50, %v7759_v4  ;;  %v7937_v16 = vadd.f32 %v7936_v57, %v7839_v1  ;;  %v20710_v13 = vpop.f32.mrf.mxu1 }
 0xee4   :  { %v7852_v23 = vpop.f32.mrf.mxu0  ;;  %20732 = vmatpush3.msra.mxu1 %v8329_v36 }
 0xee5   :  { %20753 = vmatprep.subr.mxu1 %v24249_v9  ;;  %v7853_v63 = vadd.f32 %v7852_v23, %v7753_v39  ;;  %v7961_v43 = vadd.f32 %v20682_v10, %v7860_v18 }
 0xee6   :  { %v20693_v8 = vpop.f32.mrf.mxu0 }
 0xee7   :  { %v8050_v35 = vadd.f32 %v20693_v8, %v7945_v60  ;;  %v7953_v20 = vadd.f32 %v7952_v32, %v7853_v63 }
 0xee8   :  { %v8043_v3 = vpop.f32.mrf.mxu0 }
 0xee9   :  { %v24299_v45 = vadd.f32 %v20707_v44, %v8050_v35  ;;  %v8044_v21 = vadd.f32 %v8043_v3, %v7937_v16  ;;  %v8148_v44 = vpop.f32.mrf.mxu1 }
 0xeea   :  { %v20696_v62 = vpop.f32.mrf.mxu0 }
 0xeeb   :  { %v8162_v40 = vsel %vm166_vm0, %v24299_v45, 0  ;;  %v24303_v51 = vadd.f32 %v8136_v22, %v8044_v21  ;;  %v8062_v5 = vadd.f32 %v20696_v62, %v7961_v43 }
 0xeec   :  { %v24305_v61 = vand.u32 4294901760, %v8162_v40  ;;  %v8055_v15 = vpop.f32.mrf.mxu0 }
 0xeed   :  { %v8159_v57 = vsel %vm166_vm0, %v24303_v51, 0  ;;  %v8155_v36 = vadd.f32 %v20710_v13, %v8062_v5  ;;  %v8056_v4 = vadd.f32 %v8055_v15, %v7953_v20 }
 0xeee   :  { %v24310_v50 = vsub.f32 %v8162_v40, %v24305_v61  ;;  %v24312_v10 = vand.u32 4294901760, %v8159_v57 }
 0xeef   :  { %v8168_v1 = vsel %vm166_vm0, %v8155_v36, 0  ;;  %v8149_v60 = vadd.f32 %v8148_v44, %v8056_v4  ;;  %v24338_v63 = vand.u32 4294901760, %v8155_v36 }
 0xef0   :  { %v24316_v23 = vand.u32 4294901760, %v24310_v50  ;;  %v24319_v18 = vsub.f32 %v8159_v57, %v24312_v10  ;;  %v24321_v32 = vand.u32 4294901760, %v8168_v1  ;;  %20733 = vmatprep.mubr.f32.mxu1 %v24312_v10  ;;  %v24372_v57 = vand.u32 4294901760, %v24299_v45 }
 0xef1   :  { %20734 = vmatmul.mubr.f32.vlgmr.msra.gmra.mxu1 %v24305_v61  ;;  %v8165_v8 = vsel %vm166_vm0, %v8149_v60, 0  ;;  %v24362_v5 = vsub.f32 %v8155_v36, %v24338_v63  ;;  %v24364_v20 = vand.u32 4294901760, %v8149_v60 }
 0xef2   :  { %v24326_v39 = vsub.f32 %v8168_v1, %v24321_v32  ;;  %20754 = vmatpush3.msra.mxu1 %v24249_v9  ;;  %v24330_v22 = vand.u32 4294901760, %v8165_v8  ;;  %v24334_v35 = vand.u32 4294901760, %v24319_v18  ;;  %v8252_v16 = vsub.f32 %v24310_v50, %v24316_v23 }
 0xef3   :  { %20755 = vmatprep.subr.mxu1 %v24263_v31  ;;  %v24383_v44 = vsub.f32 %v8149_v60, %v24364_v20  ;;  %v24388_v1 = vand.u32 4294901760, %v24362_v5 }
 0xef4   :  { %20756 = vmatpush3.msra.mxu1 %v24263_v31  ;;  %v24342_v3 = vsub.f32 %v8165_v8, %v24330_v22  ;;  %20736 = vmatprep.mubr.f32.mxu1 %v24330_v22  ;;  %v8242_v21 = vsub.f32 %v24319_v18, %v24334_v35  ;;  %v24350_v43 = vand.u32 4294901760, %v24326_v39  ;;  %v24359_v40 = vand.u32 4294901760, %v8252_v16 }
 0xef5   :  { %20757 = vmatprep.subr.mxu1 %v24236_v26  ;;  %20737 = vmatmul.mubr.f32.gmra.mxu1 %v24321_v32  ;;  %v24391_v8 = vand.u32 4294901760, %v24303_v51  ;;  %v8925_v60 = vsub.f32 %v24362_v5, %v24388_v1 }
 0xef6   :  { %20758 = vmatpush3.msra.mxu1 %v24236_v26  ;;  %20761 = vmatprep.mubr.f32.mxu1 %v24334_v35  ;;  %v24354_v62 = vand.u32 4294901760, %v8242_v21  ;;  %v24357_v13 = vand.u32 4294901760, %v24342_v3  ;;  %v8272_v36 = vsub.f32 %v24326_v39, %v24350_v43 }
 0xef7   :  { %20759 = vmatprep.subr.mxu1 %v24239_v47 }
 0xef8   :  { %20760 = vmatpush3.msra.mxu1 %v24239_v47  ;;  %20719 = vmatprep.mubr.f32.mxu0 %v24354_v62  ;;  %v8262_v15 = vsub.f32 %v24342_v3, %v24357_v13 }
 0xef9   :  { %20781 = vmatprep.subr.mxu1 %v24249_v9  ;;  %20720 = vmatmul.mubr.f32.vlgmr.msra.gmra.mxu0 %v24359_v40 }
 0xefa   :  { %20740 = vmatpush3.msra.mxu0 %v24260_v33  ;;  %20762 = vmatmul.mubr.f32.vlgmr.msra.gmra.mxu1 %v24316_v23  ;;  %v24380_v4 = vand.u32 4294901760, %v8262_v15  ;;  %v24397_v33 = vsub.f32 %v24299_v45, %v24372_v57  ;;  %v24410_v45 = vand.u32 4294901760, %v24383_v44 }
 0xefb   :  { %20782 = vmatpush3.msra.mxu1 %v24249_v9  ;;  %20741 = vmatprep.subr.mxu0 %v24269_v7  ;;  %v24401_v9 = vand.u32 4294901760, %v8272_v36 }
 0xefc   :  { %20764 = vmatprep.mubr.f32.mxu1 %v24357_v13  ;;  %20783 = vmatprep.subr.mxu1 %v24263_v31 }
 0xefd   :  { %20742 = vmatpush3.msra.mxu0 %v24269_v7  ;;  %20784 = vmatpush3.msra.mxu1 %v24263_v31  ;;  %v24414_v7 = vsub.f32 %v24303_v51, %v24391_v8  ;;  %v24421_v31 = vand.u32 4294901760, %v24397_v33  ;;  %v8926_v51 = vand.u32 4294901760, %v8925_v60 }
 0xefe   :  { %20722 = vmatprep.mubr.f32.mxu0 %v24380_v4  ;;  %20743 = vmatprep.subr.mxu0 %v24246_v12 }
 0xeff   :  { %20785 = vmatprep.subr.mxu1 %v24236_v26  ;;  %20723 = vmatmul.mubr.f32.gmra.mxu0 %v24401_v9  ;;  %v8939_v16 = vsub.f32 %v24397_v33, %v24421_v31 }
 0xf00   :  { %20744 = vmatpush3.msra.mxu0 %v24246_v12  ;;  %20765 = vmatmul.mubr.f32.gmra.mxu1 %v24350_v43  ;;  %v8932_v12 = vsub.f32 %v24383_v44, %v24410_v45 }
 0xf01   :  { %20786 = vmatpush3.msra.mxu1 %v24236_v26  ;;  %20745 = vmatprep.subr.mxu0 %v24256_v53  ;;  %v24432_v26 = vand.u32 4294901760, %v24414_v7  ;;  %v8940_v21 = vand.u32 4294901760, %v8939_v16 }
 0xf02   :  { %20747 = vmatprep.mubr.f32.mxu0 %v24319_v18  ;;  %20787 = vmatprep.subr.mxu1 %v24239_v47 }
 0xf03   :  { %20789 = vmatprep.mubr.f32.mxu1 %v24312_v10  ;;  %20746 = vmatpush3.msra.mxu0 %v24256_v53  ;;  %v8933_v53 = vand.u32 4294901760, %v8932_v12 }
 0xf04   :  { %20788 = vmatpush3.msra.mxu1 %v24239_v47  ;;  %20767 = vmatprep.subr.mxu0 %v24273_v46  ;;  %v8946_v47 = vsub.f32 %v24414_v7, %v24432_v26 }
 0xf05   :  { %20809 = vmatprep.subr.mxu1 %v8926_v51  ;;  %20748 = vmatmul.mubr.f32.vlgmr.msra.gmra.mxu0 %v24310_v50 }
 0xf06   :  { %20768 = vmatpush3.msra.mxu0 %v24273_v46  ;;  %20790 = vmatmul.mubr.f32.vlgmr.msra.gmra.mxu1 %v24305_v61  ;;  %v8947_v46 = vand.u32 4294901760, %v8946_v47 }
 0xf07   :  { %20810 = vmatpush3.msra.mxu1 %v8926_v51  ;;  %20750 = vmatprep.mubr.f32.mxu0 %v24342_v3 }
 0xf08   :  { %20769 = vmatprep.subr.mxu0 %v24283_v37  ;;  %20792 = vmatprep.mubr.f32.mxu1 %v24330_v22 }
 0xf09   :  { %20811 = vmatprep.subr.mxu1 %v8933_v53  ;;  %20770 = vmatpush3.msra.mxu0 %v24283_v37 }
 0xf0a   :  { %20812 = vmatpush3.msra.mxu1 %v8933_v53  ;;  %20771 = vmatprep.subr.mxu0 %v24276_v11 }
 0xf0b   :  { %20813 = vmatprep.subr.mxu1 %v8940_v21  ;;  %20751 = vmatmul.mubr.f32.gmra.mxu0 %v24326_v39 }
 0xf0c   :  { %20772 = vmatpush3.msra.mxu0 %v24276_v11  ;;  %20793 = vmatmul.mubr.f32.gmra.mxu1 %v24321_v32 }
 0xf0d   :  { %20814 = vmatpush3.msra.mxu1 %v8940_v21  ;;  %20773 = vmatprep.subr.mxu0 %v24286_v54 }
 0xf0e   :  { %20775 = vmatprep.mubr.f32.mxu0 %v24312_v10  ;;  %20815 = vmatprep.subr.mxu1 %v8947_v46 }
 0xf0f   :  { %20817 = vmatprep.mubr.f32.mxu1 %v24312_v10  ;;  %20774 = vmatpush3.msra.mxu0 %v24286_v54 }
 0xf10   :  { %20816 = vmatpush3.msra.mxu1 %v8947_v46  ;;  %20795 = vmatprep.subr.mxu0 %v24338_v63 }
 0xf11   :  { %20837 = vmatprep.subr.mxu1 %v24338_v63  ;;  %20776 = vmatmul.mubr.f32.vlgmr.msra.gmra.mxu0 %v24305_v61 }
 0xf12   :  { %20796 = vmatpush3.msra.mxu0 %v24338_v63  ;;  %20818 = vmatmul.mubr.f32.vlgmr.msra.gmra.mxu1 %v24305_v61 }
 0xf13   :  { %20838 = vmatpush3.msra.mxu1 %v24338_v63  ;;  %20778 = vmatprep.mubr.f32.mxu0 %v24330_v22 }
 0xf14   :  { %20797 = vmatprep.subr.mxu0 %v24364_v20  ;;  %20820 = vmatprep.mubr.f32.mxu1 %v24330_v22 }
 0xf15   :  { %20839 = vmatprep.subr.mxu1 %v24364_v20  ;;  %20798 = vmatpush3.msra.mxu0 %v24364_v20 }
 0xf16   :  { %20840 = vmatpush3.msra.mxu1 %v24364_v20  ;;  %20799 = vmatprep.subr.mxu0 %v24372_v57 }
 0xf17   :  { %20841 = vmatprep.subr.mxu1 %v24372_v57  ;;  %20779 = vmatmul.mubr.f32.gmra.mxu0 %v24321_v32 }
 0xf18   :  { %20800 = vmatpush3.msra.mxu0 %v24372_v57  ;;  %20821 = vmatmul.mubr.f32.gmra.mxu1 %v24321_v32 }
 0xf19   :  { %20842 = vmatpush3.msra.mxu1 %v24372_v57  ;;  %20801 = vmatprep.subr.mxu0 %v24391_v8 }
 0xf1a   :  { %20803 = vmatprep.mubr.f32.mxu0 %v24354_v62  ;;  %20843 = vmatprep.subr.mxu1 %v24391_v8 }
 0xf1b   :  { %20845 = vmatprep.mubr.f32.mxu1 %v24334_v35  ;;  %20802 = vmatpush3.msra.mxu0 %v24391_v8 }
 0xf1c   :  { %20844 = vmatpush3.msra.mxu1 %v24391_v8  ;;  %20823 = vmatprep.subr.mxu0 %v24362_v5 }
 0xf1d   :  { %20865 = vmatprep.subr.mxu1 %v24338_v63  ;;  %20804 = vmatmul.mubr.f32.vlgmr.msra.gmra.mxu0 %v24359_v40 }
 0xf1e   :  { %20824 = vmatpush3.msra.mxu0 %v24362_v5  ;;  %20846 = vmatmul.mubr.f32.vlgmr.msra.gmra.mxu1 %v24316_v23 }
 0xf1f   :  { %20866 = vmatpush3.msra.mxu1 %v24338_v63  ;;  %20806 = vmatprep.mubr.f32.mxu0 %v24380_v4 }
 0xf20   :  { %20825 = vmatprep.subr.mxu0 %v24383_v44  ;;  %20848 = vmatprep.mubr.f32.mxu1 %v24357_v13 }
 0xf21   :  { %20867 = vmatprep.subr.mxu1 %v24364_v20  ;;  %20826 = vmatpush3.msra.mxu0 %v24383_v44 }
 0xf22   :  { %20868 = vmatpush3.msra.mxu1 %v24364_v20  ;;  %20827 = vmatprep.subr.mxu0 %v24397_v33 }
 0xf23   :  { %20869 = vmatprep.subr.mxu1 %v24372_v57  ;;  %20807 = vmatmul.mubr.f32.gmra.mxu0 %v24401_v9 }
 0xf24   :  { %20828 = vmatpush3.msra.mxu0 %v24397_v33  ;;  %20849 = vmatmul.mubr.f32.gmra.mxu1 %v24350_v43 }
 0xf25   :  { %20870 = vmatpush3.msra.mxu1 %v24372_v57  ;;  %20829 = vmatprep.subr.mxu0 %v24414_v7 }
 0xf26   :  { %20831 = vmatprep.mubr.f32.mxu0 %v24319_v18  ;;  %20871 = vmatprep.subr.mxu1 %v24391_v8 }
 0xf27   :  { %20873 = vmatprep.mubr.f32.mxu1 %v24312_v10  ;;  %20830 = vmatpush3.msra.mxu0 %v24414_v7 }
 0xf28   :  { %20872 = vmatpush3.msra.mxu1 %v24391_v8  ;;  %20851 = vmatprep.subr.mxu0 %v24388_v1 }
 0xf29   :  { %20832 = vmatmul.mubr.f32.vlgmr.msra.gmra.mxu0 %v24310_v50  ;;  %20874 = vmatmul.mubr.f32.vlgmr.msra.gmra.mxu1 %v24305_v61 }
 0xf2a   :  { %20852 = vmatpush3.msra.mxu0 %v24388_v1  ;;  %20834 = vmatprep.mubr.f32.mxu0 %v24342_v3 }
 0xf2b   :  { %20853 = vmatprep.subr.mxu0 %v24410_v45  ;;  %20876 = vmatprep.mubr.f32.mxu1 %v24330_v22 }
 0xf2c   :  { %20854 = vmatpush3.msra.mxu0 %v24410_v45 }
 0xf2d   :  { %20855 = vmatprep.subr.mxu0 %v24421_v31  ;;  %20835 = vmatmul.mubr.f32.gmra.mxu0 %v24326_v39 }
 0xf2e   :  { %20856 = vmatpush3.msra.mxu0 %v24421_v31  ;;  %20877 = vmatmul.mubr.f32.gmra.mxu1 %v24321_v32 }
 0xf2f   :  { %20857 = vmatprep.subr.mxu0 %v24432_v26  ;;  %20859 = vmatprep.mubr.f32.mxu0 %v24312_v10 }
 0xf30   :  { %20858 = vmatpush3.msra.mxu0 %v24432_v26 }
 0xf31   :  { %20860 = vmatmul.mubr.f32.vlgmr.msra.gmra.mxu0 %v24305_v61 }
 0xf32   :  { %20862 = vmatprep.mubr.f32.mxu0 %v24330_v22 }
 0xf35   :  { %20863 = vmatmul.mubr.f32.gmra.mxu0 %v24321_v32 }
 0xfb1   :  { %v20735_v11 = vpop.f32.mrf.mxu1 }
 0xfb3   :  { %v8366_v37 = vpop.f32.mrf.mxu1 }
 0xfb5   :  { %v20738_v54 = vpop.f32.mrf.mxu1 }
 0xfb7   :  { %v8378_v50 = vpop.f32.mrf.mxu1 }
 0xfb9   :  { %v20721_v23 = vpop.f32.mrf.mxu0 }
 0xfba   :  { %v20763_v18 = vpop.f32.mrf.mxu1  ;;  %v8373_v5 = vadd.f32 %v20735_v11, %v20721_v23 }
 0xfbb   :  { %v8245_v39 = vpop.f32.mrf.mxu0 }
 0xfbc   :  { %v8562_v35 = vpop.f32.mrf.mxu1  ;;  %v8367_v20 = vadd.f32 %v8366_v37, %v8245_v39 }
 0xfbf   :  { %v20724_v63 = vpop.f32.mrf.mxu0 }
 0xfc0   :  { %v20766_v3 = vpop.f32.mrf.mxu1  ;;  %v8385_v44 = vadd.f32 %v20738_v54, %v20724_v63 }
 0xfc1   :  { %v8265_v43 = vpop.f32.mrf.mxu0 }
 0xfc2   :  { %v8578_v10 = vpop.f32.mrf.mxu1  ;;  %v8379_v33 = vadd.f32 %v8378_v50, %v8265_v43 }
 0xfc5   :  { %v20749_v62 = vpop.f32.mrf.mxu0 }
 0xfc6   :  { %v20791_v13 = vpop.f32.mrf.mxu1  ;;  %v8472_v32 = vadd.f32 %v20749_v62, %v8373_v5 }
 0xfc7   :  { %v8464_v40 = vpop.f32.mrf.mxu0 }
 0xfc8   :  { %v8762_v61 = vpop.f32.mrf.mxu1  ;;  %v8465_v36 = vadd.f32 %v8464_v40, %v8367_v20  ;;  %v8571_v1 = vadd.f32 %v20763_v18, %v8472_v32 }
 0xfca   :  { %v8563_v7 = vadd.f32 %v8562_v35, %v8465_v36 }
 0xfcb   :  { %v20752_v22 = vpop.f32.mrf.mxu0 }
 0xfcc   :  { %v20794_v15 = vpop.f32.mrf.mxu1  ;;  %v8486_v9 = vadd.f32 %v20752_v22, %v8385_v44 }
 0xfcd   :  { %v8478_v57 = vpop.f32.mrf.mxu0 }
 0xfce   :  { %v8774_v4 = vpop.f32.mrf.mxu1  ;;  %v8479_v51 = vadd.f32 %v8478_v57, %v8379_v33  ;;  %v8587_v21 = vadd.f32 %v20766_v3, %v8486_v9 }
 0xfd0   :  { %v8579_v50 = vadd.f32 %v8578_v10, %v8479_v51 }
 0xfd1   :  { %v20777_v8 = vpop.f32.mrf.mxu0 }
 0xfd2   :  { %v8676_v60 = vadd.f32 %v20777_v8, %v8571_v1  ;;  %v20819_v45 = vpop.f32.mrf.mxu1 }
 0xfd3   :  { %v8669_v31 = vpop.f32.mrf.mxu0 }
 0xfd4   :  { %v8769_v12 = vadd.f32 %v20791_v13, %v8676_v60  ;;  %v8670_v26 = vadd.f32 %v8669_v31, %v8563_v7  ;;  %v8984_v16 = vpop.f32.mrf.mxu1 }
 0xfd6   :  { %v24520_v53 = vadd.f32 %v8769_v12, %v24230_v29  ;;  %v8763_v47 = vadd.f32 %v8762_v61, %v8670_v26 }
 0xfd7   :  { %v20780_v46 = vpop.f32.mrf.mxu0 }
 0xfd8   :  { %v24523_v11 = vadd.f32 %v8763_v47, %v24233_v59  ;;  %v8688_v37 = vadd.f32 %v20780_v46, %v8587_v21  ;;  %v20822_v54 = vpop.f32.mrf.mxu1  ;;  %v24526_v18 = vand.u32 4294901760, %v24520_v53 }
 0xfd9   :  { %v8681_v23 = vpop.f32.mrf.mxu0 }
 0xfda   :  { %v8781_v39 = vadd.f32 %v20794_v15, %v8688_v37  ;;  %v8682_v35 = vadd.f32 %v8681_v23, %v8579_v50  ;;  %v8996_v63 = vpop.f32.mrf.mxu1  ;;  %v24529_v43 = vand.u32 4294901760, %v24523_v11  ;;  %v24536_v59 = vsub.f32 %v24520_v53, %v24526_v18 }
 0xfdc   :  { %v24532_v29 = vadd.f32 %v8781_v39, %v24242_v42  ;;  %v8775_v3 = vadd.f32 %v8774_v4, %v8682_v35  ;;  %v24546_v5 = vsub.f32 %v24523_v11, %v24529_v43  ;;  %v24566_v15 = vand.u32 4294901760, %v24536_v59 }
 0xfdd   :  { %v20805_v62 = vpop.f32.mrf.mxu0 }
 0xfde   :  { %v24539_v10 = vand.u32 4294901760, %v24532_v29  ;;  %v24542_v13 = vadd.f32 %v8775_v3, %v24252_v17  ;;  %v20847_v40 = vpop.f32.mrf.mxu1  ;;  %v24576_v44 = vand.u32 4294901760, %v24546_v5  ;;  %v9565_v60 = vsub.f32 %v24536_v59, %v24566_v15 }
 0xfdf   :  { %v8863_v61 = vpop.f32.mrf.mxu0  ;;  %v8991_v26 = vadd.f32 %v20819_v45, %v20805_v62 }
 0xfe0   :  { %v24550_v42 = vsub.f32 %v24532_v29, %v24539_v10  ;;  %v24553_v22 = vand.u32 4294901760, %v24542_v13  ;;  %20879 = vmatprep.subr.mxu0 %v24539_v10  ;;  %v9180_v20 = vpop.f32.mrf.mxu1  ;;  %v9572_v31 = vsub.f32 %v24546_v5, %v24576_v44  ;;  %v9566_v47 = vand.u32 4294901760, %v9565_v60 }
 0xfe1   :  { %20880 = vmatpush3.msra.mxu0 %v24539_v10  ;;  %v8985_v46 = vadd.f32 %v8984_v16, %v8863_v61 }
 0xfe2   :  { %v24559_v17 = vsub.f32 %v24542_v13, %v24553_v22  ;;  %20881 = vmatprep.subr.mxu0 %v24553_v22  ;;  %v24563_v32 = vand.u32 4294901760, %v24550_v42  ;;  %v9573_v50 = vand.u32 4294901760, %v9572_v31 }
 0xfe3   :  { %v20808_v57 = vpop.f32.mrf.mxu0  ;;  %20882 = vmatpush3.msra.mxu0 %v24553_v22 }
 0xfe4   :  { %20883 = vmatprep.subr.mxu0 %v24526_v18  ;;  %v9551_v36 = vsub.f32 %v24550_v42, %v24563_v32  ;;  %v24573_v4 = vand.u32 4294901760, %v24559_v17  ;;  %v20850_v1 = vpop.f32.mrf.mxu1  ;;  %v9003_v35 = vadd.f32 %v20822_v54, %v20808_v57 }
 0xfe5   :  { %v8883_v8 = vpop.f32.mrf.mxu0  ;;  %20884 = vmatpush3.msra.mxu0 %v24526_v18 }
 0xfe6   :  { %20885 = vmatprep.subr.mxu0 %v24529_v43  ;;  %v9552_v33 = vand.u32 4294901760, %v9551_v36  ;;  %v9558_v9 = vsub.f32 %v24559_v17, %v24573_v4  ;;  %v9196_v51 = vpop.f32.mrf.mxu1 }
 0xfe7   :  { %20886 = vmatpush3.msra.mxu0 %v24529_v43 }
 0xfe8   :  { %20893 = vmatprep.subr.mxu1 %v9552_v33  ;;  %20907 = vmatprep.subr.mxu0 %v24550_v42  ;;  %v9559_v7 = vand.u32 4294901760, %v9558_v9  ;;  %v8997_v9 = vadd.f32 %v8996_v63, %v8883_v8 }
 0xfe9   :  { %v20833_v12 = vpop.f32.mrf.mxu0  ;;  %20894 = vmatpush3.msra.mxu1 %v9552_v33  ;;  %v20875_v23 = vpop.f32.mrf.mxu1 }
 0xfea   :  { %20895 = vmatprep.subr.mxu1 %v9559_v7  ;;  %v9090_v37 = vadd.f32 %v20833_v12, %v8991_v26 }
 0xfeb   :  { %v9082_v21 = vpop.f32.mrf.mxu0  ;;  %20896 = vmatpush3.msra.mxu1 %v9559_v7  ;;  %v9380_v45 = vpop.f32.mrf.mxu1 }
 0xfec   :  { %20897 = vmatprep.subr.mxu1 %v9566_v47  ;;  %v9083_v3 = vadd.f32 %v9082_v21, %v8985_v46  ;;  %v9189_v33 = vadd.f32 %v20847_v40, %v9090_v37 }
 0xfed   :  { %v20836_v39 = vpop.f32.mrf.mxu0  ;;  %20898 = vmatpush3.msra.mxu1 %v9566_v47 }
 0xfee   :  { %20899 = vmatprep.subr.mxu1 %v9573_v50  ;;  %v9104_v19 = vadd.f32 %v20836_v39, %v9003_v35  ;;  %v9181_v61 = vadd.f32 %v9180_v20, %v9083_v3  ;;  %v20878_v47 = vpop.f32.mrf.mxu1 }
 0xfef   :  { %v9096_v36 = vpop.f32.mrf.mxu0  ;;  %20900 = vmatpush3.msra.mxu1 %v9573_v50 }
 0xff0   :  { %20921 = vmatprep.subr.mxu1 %v24539_v10  ;;  %v9097_v60 = vadd.f32 %v9096_v36, %v8997_v9  ;;  %v9205_v26 = vadd.f32 %v20850_v1, %v9104_v19  ;;  %v9392_v35 = vpop.f32.mrf.mxu1 }
 0xff1   :  { %v20861_v62 = vpop.f32.mrf.mxu0 }
 0xff2   :  { %v9294_v16 = vadd.f32 %v20861_v62, %v9189_v33  ;;  %v9197_v63 = vadd.f32 %v9196_v51, %v9097_v60 }
 0xff3   :  { %v9287_v7 = vpop.f32.mrf.mxu0 }
 0xff4   :  { %v9387_v31 = vadd.f32 %v20875_v23, %v9294_v16  ;;  %v9288_v12 = vadd.f32 %v9287_v7, %v9181_v61 }
 0xff5   :  { %v20864_v54 = vpop.f32.mrf.mxu0 }
 0xff6   :  { %v9406_v57 = vsel %vm166_vm0, %v9387_v31, 0  ;;  %v9381_v21 = vadd.f32 %v9380_v45, %v9288_v12  ;;  %v9306_v46 = vadd.f32 %v20864_v54, %v9205_v26 }
 0xff7   :  { %v24590_v8 = vand.u32 4294901760, %v9406_v57  ;;  %v9299_v40 = vpop.f32.mrf.mxu0 }
 0xff8   :  { %v9403_v37 = vsel %vm166_vm0, %v9381_v21, 0  ;;  %v9399_v50 = vadd.f32 %v20878_v47, %v9306_v46  ;;  %v9300_v39 = vadd.f32 %v9299_v40, %v9197_v63 }
 0xff9   :  { %v9494_v20 = vsub.f32 %v9406_v57, %v24590_v8  ;;  %v24594_v23 = vand.u32 4294901760, %v9403_v37 }
 0xffa   :  { %v9412_v19 = vsel %vm166_vm0, %v9399_v50, 0  ;;  %v9393_v1 = vadd.f32 %v9392_v35, %v9300_v39 }
 0xffb   :  { %v9495_v3 = vand.u32 4294901760, %v9494_v20  ;;  %v9484_v36 = vsub.f32 %v9403_v37, %v24594_v23  ;;  %v24598_v9 = vand.u32 4294901760, %v9412_v19  ;;  %20901 = vmatprep.mubr.f32.mxu1 %v24594_v23 }
 0xffc   :  { %v9409_v51 = vsel %vm166_vm0, %v9393_v1, 0  ;;  %20902 = vmatmul.mubr.f32.vlgmr.msra.gmra.mxu1 %v24590_v8 }
 0xffd   :  { %v9514_v33 = vsub.f32 %v9412_v19, %v24598_v9  ;;  %v24604_v45 = vand.u32 4294901760, %v9409_v51  ;;  %20922 = vmatpush3.msra.mxu1 %v24539_v10  ;;  %v9485_v62 = vand.u32 4294901760, %v9484_v36  ;;  %v9496_v60 = vsub.f32 %v9494_v20, %v9495_v3 }
 0xffe   :  { %20923 = vmatprep.subr.mxu1 %v24553_v22 }
 0xfff   :  { %v9504_v16 = vsub.f32 %v9409_v51, %v24604_v45  ;;  %20924 = vmatpush3.msra.mxu1 %v24553_v22  ;;  %20904 = vmatprep.mubr.f32.mxu1 %v24604_v45  ;;  %v9486_v61 = vsub.f32 %v9484_v36, %v9485_v62  ;;  %v9515_v7 = vand.u32 4294901760, %v9514_v33  ;;  %v9497_v26 = vand.u32 4294901760, %v9496_v60 }
0x1000   :  { %20925 = vmatprep.subr.mxu1 %v24526_v18  ;;  %20905 = vmatmul.mubr.f32.gmra.mxu1 %v24598_v9 }
0x1001   :  { %20926 = vmatpush3.msra.mxu1 %v24526_v18  ;;  %20929 = vmatprep.mubr.f32.mxu1 %v9485_v62  ;;  %v9487_v31 = vand.u32 4294901760, %v9486_v61  ;;  %v9505_v12 = vand.u32 4294901760, %v9504_v16  ;;  %v9516_v54 = vsub.f32 %v9514_v33, %v9515_v7 }
0x1002   :  { %20927 = vmatprep.subr.mxu1 %v24529_v43 }
0x1003   :  { %20928 = vmatpush3.msra.mxu1 %v24529_v43  ;;  %20887 = vmatprep.mubr.f32.mxu0 %v9487_v31  ;;  %v9506_v47 = vsub.f32 %v9504_v16, %v9505_v12  ;;  %v9517_v21 = vand.u32 4294901760, %v9516_v54 }
0x1004   :  { %20949 = vmatprep.subr.mxu1 %v24539_v10  ;;  %20888 = vmatmul.mubr.f32.vlgmr.msra.gmra.mxu0 %v9497_v26 }
0x1005   :  { %20908 = vmatpush3.msra.mxu0 %v24550_v42  ;;  %20930 = vmatmul.mubr.f32.vlgmr.msra.gmra.mxu1 %v9495_v3  ;;  %v9507_v57 = vand.u32 4294901760, %v9506_v47 }
0x1006   :  { %20950 = vmatpush3.msra.mxu1 %v24539_v10  ;;  %20909 = vmatprep.subr.mxu0 %v24559_v17 }
0x1007   :  { %20932 = vmatprep.mubr.f32.mxu1 %v9505_v12  ;;  %20951 = vmatprep.subr.mxu1 %v24553_v22 }
0x1008   :  { %20910 = vmatpush3.msra.mxu0 %v24559_v17  ;;  %20952 = vmatpush3.msra.mxu1 %v24553_v22 }
0x1009   :  { %20890 = vmatprep.mubr.f32.mxu0 %v9507_v57  ;;  %20911 = vmatprep.subr.mxu0 %v24536_v59 }
0x100a   :  { %20953 = vmatprep.subr.mxu1 %v24526_v18  ;;  %20891 = vmatmul.mubr.f32.gmra.mxu0 %v9517_v21 }
0x100b   :  { %20912 = vmatpush3.msra.mxu0 %v24536_v59  ;;  %20933 = vmatmul.mubr.f32.gmra.mxu1 %v9515_v7 }
0x100c   :  { %20954 = vmatpush3.msra.mxu1 %v24526_v18  ;;  %20913 = vmatprep.subr.mxu0 %v24546_v5 }
0x100d   :  { %20915 = vmatprep.mubr.f32.mxu0 %v9484_v36  ;;  %20955 = vmatprep.subr.mxu1 %v24529_v43 }
0x100e   :  { %20957 = vmatprep.mubr.f32.mxu1 %v24594_v23  ;;  %20914 = vmatpush3.msra.mxu0 %v24546_v5 }
0x100f   :  { %20956 = vmatpush3.msra.mxu1 %v24529_v43  ;;  %20935 = vmatprep.subr.mxu0 %v24563_v32 }
0x1010   :  { %20916 = vmatmul.mubr.f32.vlgmr.msra.gmra.mxu0 %v9494_v20  ;;  %20958 = vmatmul.mubr.f32.vlgmr.msra.gmra.mxu1 %v24590_v8 }
0x1011   :  { %20936 = vmatpush3.msra.mxu0 %v24563_v32  ;;  %20918 = vmatprep.mubr.f32.mxu0 %v9504_v16 }
0x1012   :  { %20937 = vmatprep.subr.mxu0 %v24573_v4  ;;  %20960 = vmatprep.mubr.f32.mxu1 %v24604_v45 }
0x1013   :  { %20938 = vmatpush3.msra.mxu0 %v24573_v4 }
0x1014   :  { %20939 = vmatprep.subr.mxu0 %v24566_v15  ;;  %20919 = vmatmul.mubr.f32.gmra.mxu0 %v9514_v33 }
0x1015   :  { %20940 = vmatpush3.msra.mxu0 %v24566_v15  ;;  %20961 = vmatmul.mubr.f32.gmra.mxu1 %v24598_v9 }
0x1016   :  { %20941 = vmatprep.subr.mxu0 %v24576_v44  ;;  %20943 = vmatprep.mubr.f32.mxu0 %v24594_v23 }
0x1017   :  { %20979 = vmatprep.mubr.f32.mxu1 %v23147_v58  ;;  %20942 = vmatpush3.msra.mxu0 %v24576_v44 }
0x1018   :  { %20944 = vmatmul.mubr.f32.vlgmr.msra.gmra.mxu0 %v24590_v8 }
0x1019   :  { %20946 = vmatprep.mubr.f32.mxu0 %v24604_v45 }
0x101c   :  { %20947 = vmatmul.mubr.f32.gmra.mxu0 %v24598_v9 }
0x101d   :  { %20965 = vmatprep.mubr.f32.mxu0 %v23206_v2 }
0x10bc   :  { %v20903_v18 = vpop.f32.mrf.mxu1 }
0x10be   :  { %v9610_v43 = vpop.f32.mrf.mxu1 }
0x10c0   :  { %v20906_v59 = vpop.f32.mrf.mxu1 }
0x10c2   :  { %v9622_v10 = vpop.f32.mrf.mxu1 }
0x10c4   :  { %v20889_v5 = vpop.f32.mrf.mxu0 }
0x10c5   :  { %v20931_v42 = vpop.f32.mrf.mxu1  ;;  %v9617_v63 = vadd.f32 %v20903_v18, %v20889_v5 }
0x10c6   :  { %v9489_v22 = vpop.f32.mrf.mxu0 }
0x10c7   :  { %v9806_v17 = vpop.f32.mrf.mxu1  ;;  %v9611_v2 = vadd.f32 %v9610_v43, %v9489_v22 }
0x10ca   :  { %v20892_v32 = vpop.f32.mrf.mxu0 }
0x10cb   :  { %v20934_v15 = vpop.f32.mrf.mxu1  ;;  %v9629_v39 = vadd.f32 %v20906_v59, %v20892_v32  ;;  %v24672_v32 = vld [vmem:[%s27024_s6] sm:$0x1f] }
0x10cc   :  { %v9509_v4 = vpop.f32.mrf.mxu0 }
0x10cd   :  { %v9822_v44 = vpop.f32.mrf.mxu1  ;;  %v9623_v20 = vadd.f32 %v9622_v10, %v9509_v4  ;;  %v1443_v4 = vmul.f32 %v24672_v32, %v24672_v32 }
0x10d0   :  { %v20917_v46 = vpop.f32.mrf.mxu0  ;;  %v20959_v37 = vpop.f32.mrf.mxu1 }
0x10d1   :  { %v9716_v40 = vadd.f32 %v20917_v46, %v9617_v63 }
0x10d2   :  { %v9708_v8 = vpop.f32.mrf.mxu0  ;;  %v10006_v3 = vpop.f32.mrf.mxu1 }
0x10d3   :  { %v9815_v19 = vadd.f32 %v20931_v42, %v9716_v40  ;;  %v9709_v1 = vadd.f32 %v9708_v8, %v9611_v2 }
0x10d4   :  { %v20920_v50 = vpop.f32.mrf.mxu0 }
0x10d5   :  { %v9730_v23 = vadd.f32 %v20920_v50, %v9629_v39  ;;  %v20962_v60 = vpop.f32.mrf.mxu1  ;;  %v9807_v16 = vadd.f32 %v9806_v17, %v9709_v1 }
0x10d6   :  { %v9722_v35 = vpop.f32.mrf.mxu0 }
0x10d7   :  { %v9723_v9 = vadd.f32 %v9722_v35, %v9623_v20  ;;  %v9831_v62 = vadd.f32 %v20934_v15, %v9730_v23  ;;  %v10018_v21 = vpop.f32.mrf.mxu1 }
0x10d8   :  { %v20945_v36 = vpop.f32.mrf.mxu0 }
0x10d9   :  { %v9920_v51 = vadd.f32 %v20945_v36, %v9815_v19  ;;  %v9823_v12 = vadd.f32 %v9822_v44, %v9723_v9  ;;  %v1445_v44 = vsel %vm1444_vm11, %v1443_v4, 0.0  ;;  %vm11577_vm11 = vcmask 1043456  }
0x10da   :  { %v9913_v33 = vpop.f32.mrf.mxu0 }
0x10db   :  { %v10013_v45 = vadd.f32 %v20959_v37, %v9920_v51  ;;  %v9914_v26 = vadd.f32 %v9913_v33, %v9807_v16 }
0x10dc   :  { %v20948_v61 = vpop.f32.mrf.mxu0 }
0x10dd   :  { %v24650_v7 = vadd.f32 %v10013_v45, %v24520_v53  ;;  %v9932_v31 = vadd.f32 %v20948_v61, %v9831_v62  ;;  %v10007_v10 = vadd.f32 %v10006_v3, %v9914_v26 }
0x10de   :  { %v9925_v47 = vpop.f32.mrf.mxu0 }
0x10df   :  { %27227 = vst [vmem:[#allocation40_spill] sm:$0xff] %v24650_v7  ;;  %v10025_v54 = vadd.f32 %v20962_v60, %v9932_v31  ;;  %v9926_v57 = vadd.f32 %v9925_v47, %v9823_v12  ;;  %v10033_v18 = vmul.f32 %v24650_v7, %v24650_v7  ;;  %v24665_v17 = vadd.f32 %v10007_v10, %v24523_v11 }
0x10e1   :  { %v24655_v43 = vadd.f32 %v10025_v54, %v24532_v29  ;;  %v10019_v59 = vadd.f32 %v10018_v21, %v9926_v57  ;;  %v10039_v5 = vsel %vm166_vm0, %v10033_v18, 0.0  ;;  %27230 = vst [vmem:[#allocation43_spill] sm:$0xff] %v24665_v17  ;;  %v10032_v15 = vmul.f32 %v24665_v17, %v24665_v17 }
0x10e2   :  { %10040 = vadd.xlane.f32.xlu1 %v10039_v5 }
0x10e3   :  { %27228 = vst [vmem:[#allocation41_spill] sm:$0xff] %v24655_v43  ;;  %v24659_v53 = vadd.f32 %v10019_v59, %v24542_v13  ;;  %v10035_v42 = vmul.f32 %v24655_v43, %v24655_v43  ;;  %v10036_v11 = vsel %vm166_vm0, %v10032_v15, 0.0 }
0x10e5   :  { %27229 = vst [vmem:[#allocation42_spill] sm:$0xff] %v24659_v53  ;;  %v10045_v22 = vsel %vm166_vm0, %v10035_v42, 0.0  ;;  %v10034_v29 = vmul.f32 %v24659_v53, %v24659_v53 }
0x10e6   :  { %10046 = vadd.xlane.f32.xlu1 %v10045_v22 }
0x10e7   :  { %v10042_v13 = vsel %vm166_vm0, %v10034_v29, 0.0 }
0x10ea   :  { %10043 = vadd.xlane.f32.xlu1 %v10042_v13 }
0x10ee   :  { %10037 = vadd.xlane.f32.xlu1 %v10036_v11 }
0x10f2   :  { %1446 = vadd.xlane.f32.xlu1 %v1445_v44 }
0x116b   :  { %v10041_v46 = vpop.xlane.xlu1 %10040 }
0x116c   :  { %22332 = vrsqrt.f32 %v10041_v46  ;;  %vm10057_vm12 = vcmp.eq.f32.partialorder %v10041_v46, inf  ;;  %v10060_v39 = vand.u32 2147483648, %v10041_v46  ;;  %vm10059_vm13 = vcmp.eq.f32.partialorder %v10041_v46, 0.0 }
0x116f   :  { %v10047_v63 = vpop.xlane.xlu1 %10046 }
0x1170   :  { %22334 = vrsqrt.f32 %v10047_v63  ;;  %vm10071_vm14 = vcmp.eq.f32.partialorder %v10047_v63, inf  ;;  %v10074_v9 = vand.u32 2147483648, %v10047_v63  ;;  %vm10073_vm15 = vcmp.eq.f32.partialorder %v10047_v63, 0.0 }
0x1173   :  { %v10044_v8 = vpop.xlane.xlu1 %10043 }
0x1174   :  { %22336 = vrsqrt.f32 %v10044_v8  ;;  %vm10064_vm1 = vcmp.eq.f32.partialorder %v10044_v8, inf  ;;  %v10067_v45 = vand.u32 2147483648, %v10044_v8  ;;  %vm10066_vm2 = vcmp.eq.f32.partialorder %v10044_v8, 0.0 }
0x1177   :  { %v10038_v40 = vpop.xlane.xlu1 %10037 }
0x1178   :  { %22338 = vrsqrt.f32 %v10038_v40  ;;  %vm10050_vm3 = vcmp.eq.f32.partialorder %v10038_v40, inf  ;;  %v10053_v26 = vand.u32 2147483648, %v10038_v40  ;;  %vm10052_vm4 = vcmp.eq.f32.partialorder %v10038_v40, 0.0 }
0x1179   :  { %v22333_v37 = vpop.eup %22332 }
0x117a   :  { %v10056_v50 = vmul.f32 %v22333_v37, %v10041_v46 }
0x117b   :  { %v1447_v2 = vpop.xlane.xlu1 %1446 }
0x117c   :  { %v10058_v35 = vsel %vm10057_vm12, %v10041_v46, %v10056_v50  ;;  %22340 = vrsqrt.f32 %v1447_v2  ;;  %vm1450_vm5 = vcmp.eq.f32.partialorder %v1447_v2, inf  ;;  %v1453_v21 = vand.u32 2147483648, %v1447_v2 }
0x117d   :  { %v22335_v20 = vpop.eup %22334  ;;  %v10061_v23 = vsel %vm10059_vm13, %v10060_v39, %v10058_v35  ;;  %vm1452_vm6 = vcmp.eq.f32.partialorder %v1447_v2, 0.0  ;;  %vm14233_vm12 = vcmask 257024  }
0x117e   :  { %v10077_v19 = vadd.f32 1e-09, %v10061_v23  ;;  %v10070_v1 = vmul.f32 %v22335_v20, %v10047_v63 }
0x1180   :  { %22342 = vrcp.f32 %v10077_v19  ;;  %v10072_v3 = vsel %vm10071_vm14, %v10047_v63, %v10070_v1 }
0x1181   :  { %v22337_v36 = vpop.eup %22336  ;;  %v10075_v33 = vsel %vm10073_vm15, %v10074_v9, %v10072_v3 }
0x1182   :  { %v10063_v51 = vmul.f32 %v22337_v36, %v10044_v8  ;;  %v10079_v61 = vadd.f32 1e-09, %v10075_v33 }
0x1184   :  { %v10065_v62 = vsel %vm10064_vm1, %v10044_v8, %v10063_v51  ;;  %vm14696_vm1 = vcmask 35840  }
0x1185   :  { %v22339_v60 = vpop.eup %22338  ;;  %v10068_v16 = vsel %vm10066_vm2, %v10067_v45, %v10065_v62 }
0x1186   :  { %v10078_v31 = vadd.f32 1e-09, %v10068_v16  ;;  %v10049_v12 = vmul.f32 %v22339_v60, %v10038_v40 }
0x1188   :  { %v10051_v47 = vsel %vm10050_vm3, %v10038_v40, %v10049_v12  ;;  %22344 = vrcp.f32 %v10078_v31 }
0x1189   :  { %v22341_v54 = vpop.eup %22340  ;;  %v10054_v57 = vsel %vm10052_vm4, %v10053_v26, %v10051_v47  ;;  %22346 = vrcp.f32 %v10079_v61  ;;  %v10859_v47 = vmul.f32 %v23608_v6, %v23125_v27 }
0x118a   :  { %v10076_v18 = vadd.f32 1e-09, %v10054_v57  ;;  %v1449_v59 = vmul.f32 %v22341_v54, %v1447_v2 }
0x118c   :  { %22348 = vrcp.f32 %v10076_v18  ;;  %v1451_v10 = vsel %vm1450_vm5, %v1447_v2, %v1449_v59 }
0x118d   :  { %v22343_v5 = vpop.eup %22342  ;;  %v1454_v42 = vsel %vm1452_vm6, %v1453_v21, %v1451_v10  ;;  %v10873_v10 = vsel %vm166_vm0, %v10859_v47, 0.0 }
0x118e   :  { %v1455_v22 = vadd.f32 1e-09, %v1454_v42  ;;  %v10083_v29 = vmul.f32 %v22343_v5, %v24650_v7  ;;  %v27234_v5 = vld [vmem:[#allocation35_spill] sm:$0xff] }
0x118f   :  { %v10858_v42 = vmul.f32 %v23608_v6, %v27234_v5 }
0x1190   :  { %22350 = vrcp.f32 %v1455_v22  ;;  %v10861_v13 = vmul.f32 %v23608_v6, %v10083_v29  ;;  %v10092_v40 = vsel %vm166_vm0, %v10083_v29, 0 }
0x1191   :  { %v24695_v1 = vand.u32 4294901760, %v10092_v40 }
0x1192   :  { %v10879_v15 = vsel %vm166_vm0, %v10861_v13, 0.0 }
0x1193   :  { %10880 = vadd.xlane.f32.xlu1 %v10879_v15  ;;  %v24709_v60 = vsub.f32 %v10092_v40, %v24695_v1 }
0x1195   :  { %v22345_v4 = vpop.eup %22344  ;;  %v10221_v21 = vand.u32 4294901760, %v24709_v60 }
0x1196   :  { %v22347_v11 = vpop.eup %22346  ;;  %v10085_v46 = vmul.f32 %v22345_v4, %v24659_v53  ;;  %v27236_v4 = vld [vmem:[#allocation34_spill] sm:$0xff] }
0x1197   :  { %v10087_v8 = vmul.f32 %v22347_v11, %v24655_v43  ;;  %v10222_v29 = vsub.f32 %v24709_v60, %v10221_v21  ;;  %v10857_v11 = vmul.f32 %v23608_v6, %v27236_v4 }
0x1198   :  { %v10095_v35 = vsel %vm166_vm0, %v10085_v46, 0 }
0x1199   :  { %v22349_v44 = vpop.eup %22348  ;;  %v10863_v19 = vmul.f32 %v23608_v6, %v10087_v8  ;;  %v10098_v9 = vsel %vm166_vm0, %v10087_v8, 0  ;;  %v24701_v51 = vand.u32 4294901760, %v10095_v35 }
0x119a   :  { %v10081_v63 = vmul.f32 %v22349_v44, %v24665_v17  ;;  %v24711_v16 = vand.u32 4294901760, %v10098_v9  ;;  %v10223_v44 = vand.u32 4294901760, %v10222_v29 }
0x119b   :  { %v10885_v45 = vsel %vm166_vm0, %v10863_v19, 0.0  ;;  %v24714_v61 = vsub.f32 %v10095_v35, %v24701_v51 }
0x119c   :  { %v10860_v37 = vmul.f32 %v23608_v6, %v10081_v63  ;;  %v10089_v50 = vsel %vm166_vm0, %v10081_v63, 0  ;;  %v24726_v54 = vsub.f32 %v10098_v9, %v24711_v16 }
0x119d   :  { %v22351_v39 = vpop.eup %22350  ;;  %v24689_v2 = vand.u32 4294901760, %v10089_v50  ;;  %v10231_v59 = vand.u32 4294901760, %v24714_v61 }
0x119e   :  { %v1457_v20 = vmul.f32 %v22351_v39, %v24672_v32  ;;  %v10876_v23 = vsel %vm166_vm0, %v10860_v37, 0.0  ;;  %v10862_v32 = vmul.f32 %v23608_v6, %v10085_v46  ;;  %v10241_v13 = vand.u32 4294901760, %v24726_v54 }
0x119f   :  { %10877 = vadd.xlane.f32.xlu1 %v10876_v23  ;;  %v24698_v36 = vsub.f32 %v10089_v50, %v24689_v2  ;;  %v10232_v15 = vsub.f32 %v24714_v61, %v10231_v59 }
0x11a0   :  { %v1458_v3 = vmul.f32 20.0, %v1457_v20  ;;  %v10882_v26 = vsel %vm166_vm0, %v10862_v32, 0.0  ;;  %v10242_v46 = vsub.f32 %v24726_v54, %v10241_v13 }
0x11a1   :  { %v10211_v31 = vand.u32 4294901760, %v24698_v36  ;;  %v10233_v63 = vand.u32 4294901760, %v10232_v15 }
0x11a2   :  { %v10101_v33 = vsel %vm166_vm0, %v1458_v3, 0  ;;  %v10243_v8 = vand.u32 4294901760, %v10242_v46 }
0x11a3   :  { %v24706_v62 = vand.u32 4294901760, %v10101_v33  ;;  %10886 = vadd.xlane.f32.xlu1 %v10885_v45  ;;  %v10212_v18 = vsub.f32 %v24698_v36, %v10211_v31 }
0x11a5   :  { %27231 = vst [vmem:[#allocation44_spill] sm:$0xff] %v24706_v62  ;;  %v24718_v12 = vsub.f32 %v10101_v33, %v24706_v62  ;;  %20963 = vmatprep.subr.mxu0 %v24706_v62 }
0x11a6   :  { %20964 = vmatpush3.xpose.msra.mxu0 %v24706_v62 }
0x11a7   :  { %27232 = vst [vmem:[#allocation45_spill] sm:$0xff] %v24718_v12  ;;  %10883 = vadd.xlane.f32.xlu1 %v10882_v26  ;;  %v24729_v57 = vand.u32 4294901760, %v24718_v12  ;;  %20991 = vmatprep.subr.mxu0 %v24718_v12 }
0x11a9   :  { %27233 = vst [vmem:[#allocation46_spill] sm:$0xff] %v24729_v57  ;;  %20966 = vmatmul.mubr.f32.vlgmr.msra.gmra.mxu0 %v23198_v52  ;;  %v10283_v27 = vsub.f32 %v24718_v12, %v24729_v57  ;;  %v10213_v52 = vand.u32 4294901760, %v10212_v18 }
0x11aa   :  { %20968 = vmatprep.mubr.f32.mxu0 %v23195_v49  ;;  %20992 = vmatpush3.xpose.msra.mxu0 %v24718_v12  ;;  %v10870_v49 = vsel %vm166_vm0, %v10858_v42, 0.0 }
0x11ab   :  { %10874 = vadd.xlane.f32.xlu1 %v10873_v10  ;;  %v24745_v22 = vand.u32 4294901760, %v10283_v27  ;;  %21019 = vmatprep.subr.mxu0 %v24729_v57  ;;  %v11002_v10 = vld [vmem:[#allocation14] sm:$0xf] }
0x11ad   :  { %27235 = vst [vmem:[#allocation35_spill] sm:$0xff] %v24745_v22  ;;  %20969 = vmatmul.mubr.f32.gmra.mxu0 %v23179_v41  ;;  %20977 = vmatprep.subr.mxu1 %v24745_v22  ;;  %v10867_v41 = vsel %vm166_vm0, %v10857_v11, 0.0 }
0x11ae   :  { %20971 = vmatprep.mubr.f32.mxu0 %v10213_v52  ;;  %20978 = vmatpush3.xpose.msra.mxu1 %v24745_v22 }
0x11af   :  { %10871 = vadd.xlane.f32.xlu1 %v10870_v49  ;;  %21005 = vmatprep.subr.mxu1 %v24706_v62 }
0x11b1   :  { %20972 = vmatmul.mubr.f32.gmra.mxu0 %v10223_v44  ;;  %20980 = vmatmul.mubr.f32.vlgmr.msra.gmra.mxu1 %v23127_v28 }
0x11b2   :  { %20974 = vmatprep.mubr.f32.mxu0 %v10233_v63  ;;  %20982 = vmatprep.mubr.f32.mxu1 %v23154_v0 }
0x11b3   :  { %10868 = vadd.xlane.f32.xlu1 %v10867_v41  ;;  %21006 = vmatpush3.xpose.msra.mxu1 %v24706_v62 }
0x11b4   :  { %21033 = vmatprep.subr.mxu1 %v24706_v62 }
0x11b5   :  { %20975 = vmatmul.mubr.f32.gmra.mxu0 %v10243_v8  ;;  %20983 = vmatmul.mubr.f32.gmra.mxu1 %v23134_v34 }
0x11b6   :  { %20985 = vmatprep.mubr.f32.mxu1 %v24689_v2  ;;  %20993 = vmatprep.mubr.f32.mxu0 %v23164_v38  ;;  %v27237_v38 = vld [vmem:[#allocation37_spill] sm:$0xff] }
0x11b9   :  { %20986 = vmatmul.mubr.f32.gmra.mxu1 %v24695_v1  ;;  %20994 = vmatmul.mubr.f32.vlgmr.msra.gmra.mxu0 %v23142_v55  ;;  %v27238_v55 = vld [vmem:[#allocation38_spill] sm:$0xff] }
0x11ba   :  { %20988 = vmatprep.mubr.f32.mxu1 %v24701_v51  ;;  %20996 = vmatprep.mubr.f32.mxu0 %v23167_v25  ;;  %v27239_v25 = vld [vmem:[#allocation36_spill] sm:$0xff] }
0x11bb   :  { %21020 = vmatpush3.xpose.msra.mxu0 %v24729_v57 }
0x11bd   :  { %20989 = vmatmul.mubr.f32.gmra.mxu1 %v24711_v16  ;;  %20997 = vmatmul.mubr.f32.gmra.mxu0 %v23145_v56  ;;  %v27051_v56 = vmov 0.0  }
0x11be   :  { %20999 = vmatprep.mubr.f32.mxu0 %v24698_v36  ;;  %21007 = vmatprep.mubr.f32.mxu1 %v23190_v48 }
0x11bf   :  { %21047 = vmatprep.subr.mxu0 %v27051_v56 }
0x11c1   :  { %21000 = vmatmul.mubr.f32.gmra.mxu0 %v24709_v60  ;;  %21008 = vmatmul.mubr.f32.vlgmr.msra.gmra.mxu1 %v27237_v38 }
0x11c2   :  { %21002 = vmatprep.mubr.f32.mxu0 %v24714_v61  ;;  %21010 = vmatprep.mubr.f32.mxu1 %v27238_v55 }
0x11c3   :  { %21034 = vmatpush3.xpose.msra.mxu1 %v24706_v62 }
0x11c4   :  { %21066 = vmatprep.subr.mxu1 %v27051_v56 }
0x11c5   :  { %21003 = vmatmul.mubr.f32.gmra.mxu0 %v24726_v54  ;;  %21011 = vmatmul.mubr.f32.gmra.mxu1 %v27239_v25 }
0x11c6   :  { %21013 = vmatprep.mubr.f32.mxu1 %v10211_v31  ;;  %21021 = vmatprep.mubr.f32.mxu0 %v23147_v58 }
0x11c9   :  { %21014 = vmatmul.mubr.f32.gmra.mxu1 %v10221_v21  ;;  %21022 = vmatmul.mubr.f32.vlgmr.msra.gmra.mxu0 %v23127_v28 }
0x11ca   :  { %21016 = vmatprep.mubr.f32.mxu1 %v10231_v59  ;;  %21024 = vmatprep.mubr.f32.mxu0 %v23154_v0 }
0x11cd   :  { %21017 = vmatmul.mubr.f32.gmra.mxu1 %v10241_v13  ;;  %21025 = vmatmul.mubr.f32.gmra.mxu0 %v23134_v34  ;;  %v11013_v13 = vsel %vm11011_vm8, %v11002_v10, 0 }
0x11ce   :  { %21027 = vmatprep.mubr.f32.mxu0 %v24689_v2  ;;  %21035 = vmatprep.mubr.f32.mxu1 %v23147_v58  ;;  %v24842_v44 = vand.u32 4294901760, %v11013_v13 }
0x11d0   :  { %27240 = vst [vmem:[#allocation34_spill] sm:$0xff] %v24842_v44 }
0x11d1   :  { %21028 = vmatmul.mubr.f32.gmra.mxu0 %v24695_v1  ;;  %21036 = vmatmul.mubr.f32.vlgmr.msra.gmra.mxu1 %v23127_v28 }
0x11d2   :  { %21030 = vmatprep.mubr.f32.mxu0 %v24701_v51  ;;  %21038 = vmatprep.mubr.f32.mxu1 %v23154_v0 }
0x11d5   :  { %21031 = vmatmul.mubr.f32.gmra.mxu0 %v24711_v16  ;;  %21039 = vmatmul.mubr.f32.gmra.mxu1 %v23134_v34 }
0x11d6   :  { %21041 = vmatprep.mubr.f32.mxu1 %v24689_v2  ;;  %21063 = vmatprep.mubr.msk.f32.mxu0 %vm22729_vm7, %v27051_v56 }
0x11d9   :  { %21042 = vmatmul.mubr.f32.gmra.mxu1 %v24695_v1 }
0x11da   :  { %21044 = vmatprep.mubr.f32.mxu1 %v24701_v51 }
0x11dd   :  { %21045 = vmatmul.mubr.f32.gmra.mxu1 %v24711_v16 }
0x11de   :  { %21082 = vmatprep.mubr.msk.f32.mxu1 %vm22729_vm7, %v27051_v56 }
0x121c   :  { %v10881_v28 = vpop.xlane.xlu1 %10880 }
0x121d   :  { %v10893_v58 = vsub.f32 0.0, %v10881_v28  ;;  %v24872_v28 = vsub.f32 %v11013_v13, %v24842_v44 }
0x121f   :  { %v10906_v0 = vmul.f32 1.442695, %v10893_v58  ;;  %27241 = vst [vmem:[#allocation37_spill] sm:$0xff] %v24872_v28 }
0x1221   :  { %22352 = vpow2.f32 %v10906_v0 }
0x1228   :  { %v10878_v34 = vpop.xlane.xlu1 %10877 }
0x1229   :  { %v10892_v48 = vsub.f32 0.0, %v10878_v34 }
0x122b   :  { %v10904_v6 = vmul.f32 1.442695, %v10892_v48 }
0x122c   :  { %v10887_v40 = vpop.xlane.xlu1 %10886 }
0x122d   :  { %22354 = vpow2.f32 %v10904_v6  ;;  %v10895_v37 = vsub.f32 0.0, %v10887_v40 }
0x122e   :  { %v22353_v50 = vpop.eup %22352 }
0x122f   :  { %v10917_v39 = vadd.f32 1.0, %v22353_v50  ;;  %v10910_v2 = vmul.f32 1.442695, %v10895_v37  ;;  %v27242_v37 = vld [vmem:[#allocation39_spill] sm:$0xff] }
0x1230   :  { %v10884_v35 = vpop.xlane.xlu1 %10883  ;;  %v24893_v50 = vand.u32 4294901760, %v27242_v37 }
0x1231   :  { %22356 = vrcp.f32 %v10917_v39  ;;  %v10894_v20 = vsub.f32 0.0, %v10884_v35 }
0x1232   :  { %22358 = vpow2.f32 %v10910_v2 }
0x1233   :  { %v10908_v23 = vmul.f32 1.442695, %v10894_v20  ;;  %v24907_v20 = vand.u32 4294901760, %v24872_v28 }
0x1234   :  { %v10875_v19 = vpop.xlane.xlu1 %10874 }
0x1235   :  { %22360 = vpow2.f32 %v10908_v23  ;;  %v10891_v1 = vsub.f32 0.0, %v10875_v19  ;;  %27243 = vst [vmem:[#allocation38_spill] sm:$0xff] %v24907_v20 }
0x1237   :  { %v10902_v3 = vmul.f32 1.442695, %v10891_v1 }
0x1238   :  { %v10872_v36 = vpop.xlane.xlu1 %10871 }
0x1239   :  { %22362 = vpow2.f32 %v10902_v3  ;;  %v10890_v9 = vsub.f32 0.0, %v10872_v36 }
0x123a   :  { %v22355_v51 = vpop.eup %22354 }
0x123b   :  { %v10916_v33 = vadd.f32 1.0, %v22355_v51  ;;  %v10900_v45 = vmul.f32 1.442695, %v10890_v9 }
0x123c   :  { %v10869_v32 = vpop.xlane.xlu1 %10868 }
0x123d   :  { %22364 = vrcp.f32 %v10916_v33  ;;  %v10889_v60 = vsub.f32 0.0, %v10869_v32  ;;  %v11091_v33 = vsub.f32 %v24872_v28, %v24907_v20 }
0x123e   :  { %v24807_v16 = vpop.eup %22356  ;;  %22366 = vpow2.f32 %v10900_v45  ;;  %v24934_v45 = vsub.f32 %v27242_v37, %v24893_v50 }
0x123f   :  { %v22359_v61 = vpop.eup %22358  ;;  %10999 = vst.msk [vmem:[%s27031_s13 + $0x28] sm:$0xff] %vm10993_vm10, %v24807_v16  ;;  %v10898_v31 = vmul.f32 1.442695, %v10889_v60  ;;  %v24822_v42 = vand.u32 4294901760, %v24807_v16 }
0x1240   :  { %v10919_v26 = vadd.f32 1.0, %v22359_v61 }
0x1241   :  { %22368 = vpow2.f32 %v10898_v31  ;;  %v24840_v11 = vsub.f32 %v24807_v16, %v24822_v42 }
0x1242   :  { %v22361_v47 = vpop.eup %22360  ;;  %22370 = vrcp.f32 %v10919_v26 }
0x1243   :  { %v10918_v54 = vadd.f32 1.0, %v22361_v47  ;;  %v11131_v25 = vand.u32 4294901760, %v24840_v11 }
0x1245   :  { %22372 = vrcp.f32 %v10918_v54  ;;  %v11132_v2 = vsub.f32 %v24840_v11, %v11131_v25  ;;  %v24956_v54 = vand.u32 4294901760, %v11091_v33 }
0x1246   :  { %v22363_v21 = vpop.eup %22362 }
0x1247   :  { %v10915_v18 = vadd.f32 1.0, %v22363_v21  ;;  %v11133_v9 = vand.u32 4294901760, %v11132_v2  ;;  %27244 = vst [vmem:[#allocation36_spill] sm:$0xff] %v24956_v54 }
0x1249   :  { %22374 = vrcp.f32 %v10915_v18  ;;  %v11166_v18 = vand.u32 4294901760, %v24934_v45 }
0x124a   :  { %v24814_v59 = vpop.eup %22364 }
0x124b   :  { %v22367_v27 = vpop.eup %22366  ;;  %10998 = vst.msk [vmem:[%s27031_s13 + $0x20] sm:$0xff] %vm10993_vm10, %v24814_v59  ;;  %v24828_v49 = vand.u32 4294901760, %v24814_v59  ;;  %v11167_v13 = vsub.f32 %v24934_v45, %v11166_v18 }
0x124c   :  { %v10914_v5 = vadd.f32 1.0, %v22367_v27 }
0x124d   :  { %v24862_v8 = vsub.f32 %v24814_v59, %v24828_v49 }
0x124e   :  { %v22369_v29 = vpop.eup %22368  ;;  %22376 = vrcp.f32 %v10914_v5 }
0x124f   :  { %v24825_v52 = vpop.eup %22370  ;;  %v10913_v15 = vadd.f32 1.0, %v22369_v29  ;;  %v11138_v6 = vand.u32 4294901760, %v24862_v8 }
0x1250   :  { %11001 = vst.msk [vmem:[%s27031_s13 + $0x38] sm:$0xff] %vm10993_vm10, %v24825_v52  ;;  %v24836_v4 = vand.u32 4294901760, %v24825_v52 }
0x1251   :  { %22378 = vrcp.f32 %v10913_v15  ;;  %v11139_v1 = vsub.f32 %v24862_v8, %v11138_v6 }
0x1252   :  { %v24844_v46 = vpop.eup %22372  ;;  %21048 = vmatpush3.msra.mxu0 %v24836_v4  ;;  %v24849_v63 = vsub.f32 %v24825_v52, %v24836_v4 }
0x1253   :  { %11000 = vst.msk [vmem:[%s27031_s13 + $0x30] sm:$0xff] %vm10993_vm10, %v24844_v46  ;;  %21049 = vmatprep.subr.mxu0 %v27051_v56  ;;  %v24858_v41 = vand.u32 4294901760, %v24844_v46  ;;  %v11140_v31 = vand.u32 4294901760, %v11139_v1 }
0x1254   :  { %v11117_v38 = vand.u32 4294901760, %v24849_v63 }
0x1255   :  { %21050 = vmatpush3.msra.mxu0 %v24858_v41  ;;  %v24868_v55 = vsub.f32 %v24844_v46, %v24858_v41 }
0x1256   :  { %v24874_v58 = vpop.eup %22374  ;;  %21051 = vmatprep.subr.mxu0 %v27051_v56  ;;  %v11118_v0 = vsub.f32 %v24849_v63, %v11117_v38 }
0x1257   :  { %10997 = vst.msk [vmem:[%s27031_s13 + $0x18] sm:$0xff] %vm10993_vm10, %v24874_v58  ;;  %21052 = vmatpush3.msra.mxu0 %v24822_v42  ;;  %v24887_v34 = vand.u32 4294901760, %v24874_v58  ;;  %v11124_v48 = vand.u32 4294901760, %v24868_v55 }
0x1258   :  { %21053 = vmatprep.subr.mxu0 %v27051_v56  ;;  %v11119_v40 = vand.u32 4294901760, %v11118_v0 }
0x1259   :  { %21054 = vmatpush3.msra.mxu0 %v24828_v49  ;;  %v11125_v39 = vsub.f32 %v24868_v55, %v11124_v48  ;;  %v24904_v35 = vsub.f32 %v24874_v58, %v24887_v34 }
0x125a   :  { %21067 = vmatpush3.msra.mxu1 %v11119_v40  ;;  %21055 = vmatprep.subr.mxu0 %v27051_v56  ;;  %v11168_v40 = vand.u32 4294901760, %v11167_v13 }
0x125b   :  { %v24910_v23 = vpop.eup %22376  ;;  %21056 = vmatpush3.msra.mxu0 %v24887_v34  ;;  %21068 = vmatprep.subr.mxu1 %v27051_v56  ;;  %v11126_v19 = vand.u32 4294901760, %v11125_v39  ;;  %v11145_v3 = vand.u32 4294901760, %v24904_v35 }
0x125c   :  { %10996 = vst.msk [vmem:[%s27031_s13 + $0x10] sm:$0xff] %vm10993_vm10, %v24910_v23  ;;  %21057 = vmatprep.subr.mxu0 %v27051_v56  ;;  %v24925_v36 = vand.u32 4294901760, %v24910_v23 }
0x125d   :  { %21069 = vmatpush3.msra.mxu1 %v11126_v19  ;;  %v11146_v51 = vsub.f32 %v24904_v35, %v11145_v3 }
0x125e   :  { %v24936_v32 = vpop.eup %22378  ;;  %21058 = vmatpush3.msra.mxu0 %v24925_v36  ;;  %21070 = vmatprep.subr.mxu1 %v27051_v56  ;;  %v24942_v60 = vsub.f32 %v24910_v23, %v24925_v36 }
0x125f   :  { %10995 = vst.msk [vmem:[%s27031_s13 + $0x8] sm:$0xff] %vm10993_vm10, %v24936_v32  ;;  %21071 = vmatpush3.msra.mxu1 %v11133_v9  ;;  %21059 = vmatprep.subr.mxu0 %v27051_v56  ;;  %v24951_v61 = vand.u32 4294901760, %v24936_v32  ;;  %v11147_v47 = vand.u32 4294901760, %v11146_v51  ;;  %vm11552_vm10 = vcmask 31744  }
0x1260   :  { %21072 = vmatprep.subr.mxu1 %v27051_v56  ;;  %v11152_v26 = vand.u32 4294901760, %v24942_v60 }
0x1261   :  { %21060 = vmatpush3.msra.mxu0 %v24951_v61  ;;  %21073 = vmatpush3.msra.mxu1 %v11140_v31  ;;  %v24960_v21 = vsub.f32 %v24936_v32, %v24951_v61 }
0x1262   :  { %21061 = vmatprep.subr.mxu0 %v27051_v56  ;;  %21074 = vmatprep.subr.mxu1 %v27051_v56  ;;  %v11153_v27 = vsub.f32 %v24942_v60, %v11152_v26 }
0x1263   :  { %21062 = vmatpush3.msra.mxu0 %v24893_v50  ;;  %21075 = vmatpush3.msra.mxu1 %v11147_v47  ;;  %v11159_v10 = vand.u32 4294901760, %v24960_v21 }
0x1264   :  { %21076 = vmatprep.subr.mxu1 %v27051_v56  ;;  %21085 = vmatprep.subr.mxu0 %v27051_v56  ;;  %v11154_v5 = vand.u32 4294901760, %v11153_v27 }
0x1265   :  { %21064 = vmatmul.mubr.f32.vlgmr.msra.gmra.mxu0 %v24956_v54  ;;  %v11160_v29 = vsub.f32 %v24960_v21, %v11159_v10 }
0x1266   :  { %21077 = vmatpush3.msra.mxu1 %v11154_v5  ;;  %21086 = vmatpush3.msra.mxu0 %v24849_v63 }
0x1267   :  { %21087 = vmatprep.subr.mxu0 %v27051_v56  ;;  %21078 = vmatprep.subr.mxu1 %v27051_v56  ;;  %v11161_v15 = vand.u32 4294901760, %v11160_v29 }
0x1268   :  { %21088 = vmatpush3.msra.mxu0 %v24868_v55  ;;  %21101 = vmatprep.mubr.msk.f32.mxu0 %vm22729_vm7, %v27051_v56 }
0x1269   :  { %21089 = vmatprep.subr.mxu0 %v27051_v56  ;;  %v24986_v0 = vpop.f32.mrf.mxu0  ;;  %21079 = vmatpush3.msra.mxu1 %v11161_v15 }
0x126a   :  { %21090 = vmatpush3.msra.mxu0 %v24840_v11  ;;  %21080 = vmatprep.subr.mxu1 %v27051_v56 }
0x126b   :  { %21091 = vmatprep.subr.mxu0 %v27051_v56  ;;  %v24991_v39 = vpop.f32.mrf.mxu0  ;;  %21081 = vmatpush3.msra.mxu1 %v11168_v40 }
0x126c   :  { %21092 = vmatpush3.msra.mxu0 %v24862_v8  ;;  %21083 = vmatmul.mubr.f32.vlgmr.msra.gmra.mxu1 %v24842_v44 }
0x126d   :  { %21093 = vmatprep.subr.mxu0 %v27051_v56  ;;  %21104 = vmatprep.subr.mxu1 %v27051_v56  ;;  %v24997_v2 = vpop.f32.mrf.mxu0 }
0x126e   :  { %21094 = vmatpush3.msra.mxu0 %v24904_v35  ;;  %21105 = vmatpush3.msra.mxu1 %v24836_v4 }
0x126f   :  { %21095 = vmatprep.subr.mxu0 %v27051_v56  ;;  %21106 = vmatprep.subr.mxu1 %v27051_v56  ;;  %v25003_v19 = vpop.f32.mrf.mxu0 }
0x1270   :  { %21096 = vmatpush3.msra.mxu0 %v24942_v60  ;;  %21107 = vmatpush3.msra.mxu1 %v24858_v41 }
0x1271   :  { %21097 = vmatprep.subr.mxu0 %v27051_v56  ;;  %21108 = vmatprep.subr.mxu1 %v27051_v56  ;;  %v25009_v1 = vpop.f32.mrf.mxu0  ;;  %v25011_v9 = vpop.f32.mrf.mxu1 }
0x1272   :  { %21098 = vmatpush3.msra.mxu0 %v24960_v21  ;;  %21109 = vmatpush3.msra.mxu1 %v24822_v42  ;;  %v10328_v21 = vadd.f32 %v25011_v9, %v24986_v0 }
0x1273   :  { %21099 = vmatprep.subr.mxu0 %v27051_v56  ;;  %21110 = vmatprep.subr.mxu1 %v27051_v56  ;;  %v25017_v51 = vpop.f32.mrf.mxu0  ;;  %v25019_v33 = vpop.f32.mrf.mxu1 }
0x1274   :  { %21100 = vmatpush3.msra.mxu0 %v24934_v45  ;;  %21111 = vmatpush3.msra.mxu1 %v24828_v49 }
0x1275   :  { %21102 = vmatmul.mubr.f32.vlgmr.msra.gmra.mxu0 %v24872_v28  ;;  %21112 = vmatprep.subr.mxu1 %v27051_v56  ;;  %v25025_v31 = vpop.f32.mrf.mxu0  ;;  %v25027_v47 = vpop.f32.mrf.mxu1 }
0x1276   :  { %21123 = vmatprep.subr.mxu0 %v27051_v56  ;;  %21113 = vmatpush3.msra.mxu1 %v24887_v34  ;;  %v10340_v57 = vadd.f32 %v25027_v47, %v24997_v2 }
0x1277   :  { %21124 = vmatpush3.msra.mxu0 %v11117_v38  ;;  %21114 = vmatprep.subr.mxu1 %v27051_v56  ;;  %v25034_v27 = vpop.f32.mrf.mxu0  ;;  %v25036_v5 = vpop.f32.mrf.mxu1 }
0x1278   :  { %21125 = vmatprep.subr.mxu0 %v27051_v56  ;;  %21115 = vmatpush3.msra.mxu1 %v24925_v36 }
0x1279   :  { %21126 = vmatpush3.msra.mxu0 %v11124_v48  ;;  %21116 = vmatprep.subr.mxu1 %v27051_v56  ;;  %v25043_v29 = vpop.f32.mrf.mxu1  ;;  %v20995_v13 = vpop.f32.mrf.mxu0 }
0x127a   :  { %21127 = vmatprep.subr.mxu0 %v27051_v56  ;;  %21117 = vmatpush3.msra.mxu1 %v24951_v61  ;;  %v10352_v2 = vadd.f32 %v25043_v29, %v25009_v1 }
0x127b   :  { %21128 = vmatpush3.msra.mxu0 %v11131_v25  ;;  %21118 = vmatprep.subr.mxu1 %v27051_v56  ;;  %v25050_v63 = vpop.f32.mrf.mxu1  ;;  %v10437_v38 = vpop.f32.mrf.mxu0 }
0x127c   :  { %21129 = vmatprep.subr.mxu0 %v27051_v56  ;;  %21119 = vmatpush3.msra.mxu1 %v24893_v50 }
0x127d   :  { %21120 = vmatprep.mubr.msk.f32.mxu1 %vm22729_vm7, %v27051_v56  ;;  %21130 = vmatpush3.msra.mxu0 %v11138_v6  ;;  %v25058_v55 = vpop.f32.mrf.mxu1  ;;  %v20998_v48 = vpop.f32.mrf.mxu0 }
0x127e   :  { %21121 = vmatmul.mubr.f32.vlgmr.msra.gmra.mxu1 %v24907_v20  ;;  %21131 = vmatprep.subr.mxu0 %v27051_v56  ;;  %v10459_v22 = vadd.f32 %v20998_v48, %v10340_v57  ;;  %v10346_v57 = vadd.f32 %v25050_v63, %v25017_v51 }
0x127f   :  { %21142 = vmatprep.subr.mxu1 %v27051_v56  ;;  %21132 = vmatpush3.msra.mxu0 %v11145_v3  ;;  %v25065_v11 = vpop.f32.mrf.mxu1  ;;  %v10451_v25 = vpop.f32.mrf.mxu0 }
0x1280   :  { %21143 = vmatpush3.msra.mxu1 %v24836_v4  ;;  %21133 = vmatprep.subr.mxu0 %v27051_v56 }
0x1281   :  { %21144 = vmatprep.subr.mxu1 %v27051_v56  ;;  %21134 = vmatpush3.msra.mxu0 %v11152_v26  ;;  %v21001_v8 = vpop.f32.mrf.mxu0  ;;  %v21009_v6 = vpop.f32.mrf.mxu1 }
0x1282   :  { %21145 = vmatpush3.msra.mxu1 %v24858_v41  ;;  %21135 = vmatprep.subr.mxu0 %v27051_v56  ;;  %v10473_v48 = vadd.f32 %v21001_v8, %v10352_v2 }
0x1283   :  { %21146 = vmatprep.subr.mxu1 %v27051_v56  ;;  %21136 = vmatpush3.msra.mxu0 %v11159_v10  ;;  %v10465_v35 = vpop.f32.mrf.mxu0  ;;  %v10560_v4 = vpop.f32.mrf.mxu1  ;;  %v10322_v10 = vadd.f32 %v25019_v33, %v24991_v39 }
0x1284   :  { %21147 = vmatpush3.msra.mxu1 %v24822_v42  ;;  %21137 = vmatprep.subr.mxu0 %v27051_v56  ;;  %v10466_v29 = vadd.f32 %v10465_v35, %v10346_v57 }
0x1285   :  { %21148 = vmatprep.subr.mxu1 %v27051_v56  ;;  %21138 = vmatpush3.msra.mxu0 %v11166_v18  ;;  %v21004_v3 = vpop.f32.mrf.mxu0  ;;  %v21012_v41 = vpop.f32.mrf.mxu1  ;;  %v10438_v0 = vadd.f32 %v10437_v38, %v10322_v10 }
0x1286   :  { %21139 = vmatprep.mubr.msk.f32.mxu0 %vm22729_vm7, %v27051_v56  ;;  %21149 = vmatpush3.msra.mxu1 %v24828_v49  ;;  %v10585_v47 = vadd.f32 %v21012_v41, %v10459_v22 }
0x1287   :  { %21140 = vmatmul.mubr.f32.vlgmr.msra.gmra.mxu0 %v24842_v44  ;;  %21150 = vmatprep.subr.mxu1 %v27051_v56  ;;  %v10479_v60 = vpop.f32.mrf.mxu0  ;;  %v10576_v42 = vpop.f32.mrf.mxu1  ;;  %v10561_v39 = vadd.f32 %v10560_v4, %v10438_v0 }
0x1288   :  { %21151 = vmatpush3.msra.mxu1 %v24887_v34  ;;  %21158 = vmatprep.mubr.msk.f32.mxu1 %vm22729_vm7, %v27051_v56  ;;  %v10445_v34 = vadd.f32 %v20995_v13, %v10328_v21 }
0x1289   :  { %21152 = vmatprep.subr.mxu1 %v27051_v56  ;;  %v21015_v45 = vpop.f32.mrf.mxu1  ;;  %v21023_v26 = vpop.f32.mrf.mxu0 }
0x128a   :  { %21153 = vmatpush3.msra.mxu1 %v24925_v36  ;;  %v10569_v9 = vadd.f32 %v21009_v6, %v10445_v34 }
0x128b   :  { %21154 = vmatprep.subr.mxu1 %v27051_v56  ;;  %v10592_v49 = vpop.f32.mrf.mxu1  ;;  %v10690_v18 = vpop.f32.mrf.mxu0 }
0x128c   :  { %21155 = vmatpush3.msra.mxu1 %v24951_v61  ;;  %v10697_v33 = vadd.f32 %v21023_v26, %v10569_v9  ;;  %v10334_v61 = vadd.f32 %v25036_v5, %v25003_v19  ;;  %v10691_v38 = vadd.f32 %v10690_v18, %v10561_v39  ;;  %v10364_v5 = vadd.f32 %v25058_v55, %v25025_v31 }
0x128d   :  { %21156 = vmatprep.subr.mxu1 %v27051_v56  ;;  %v21018_v15 = vpop.f32.mrf.mxu1  ;;  %v21026_v40 = vpop.f32.mrf.mxu0  ;;  %v10593_v18 = vadd.f32 %v10592_v49, %v10466_v29 }
0x128e   :  { %21157 = vmatpush3.msra.mxu1 %v24893_v50  ;;  %v10452_v50 = vadd.f32 %v10451_v25, %v10334_v61  ;;  %v10709_v4 = vadd.f32 %v21026_v40, %v10585_v47  ;;  %v10601_v25 = vadd.f32 %v21015_v45, %v10473_v48  ;;  %v10487_v26 = vadd.f32 %v21004_v3, %v10364_v5  ;;  %v11003_v61 = vld [vmem:[%s27028_s10] sm:$0xff]  ;;  %v11005_v5 = vld [vmem:[%s27028_s10 + $0x10] sm:$0xff] }
0x128f   :  { %21159 = vmatmul.mubr.f32.vlgmr.msra.gmra.mxu1 %v24842_v44  ;;  %v10608_v36 = vpop.f32.mrf.mxu1  ;;  %v10702_v12 = vpop.f32.mrf.mxu0 }
0x1290   :  { %v10577_v22 = vadd.f32 %v10576_v42, %v10452_v50  ;;  %v10358_v42 = vadd.f32 %v25065_v11, %v25034_v27  ;;  %v10617_v45 = vadd.f32 %v21018_v15, %v10487_v26  ;;  %v11007_v26 = vld [vmem:[%s27028_s10 + $0x20] sm:$0xff] }
0x1291   :  { %v21029_v13 = vpop.f32.mrf.mxu0  ;;  %v21037_v21 = vpop.f32.mrf.mxu1 }
0x1292   :  { %v25107_v6 = vadd.f32 %v21037_v21, %v10697_v33  ;;  %v10703_v63 = vadd.f32 %v10702_v12, %v10577_v22  ;;  %v10721_v40 = vadd.f32 %v21029_v13, %v10601_v25  ;;  %v10480_v35 = vadd.f32 %v10479_v60, %v10358_v42 }
0x1293   :  { %v10714_v10 = vpop.f32.mrf.mxu0  ;;  %v10804_v34 = vpop.f32.mrf.mxu1  ;;  %v11554_v13 = vsel %vm11552_vm10, %v11003_v61, 0 }
0x1294   :  { %10986 = vst.msk [vmem:[%s27030_s12 + $0x8] sm:$0xff] %vm10984_vm9, %v25107_v6  ;;  %v25116_v19 = vadd.f32 %v10804_v34, %v10691_v38  ;;  %v10715_v12 = vadd.f32 %v10714_v10, %v10593_v18  ;;  %v10609_v11 = vadd.f32 %v10608_v36, %v10480_v35  ;;  %v25167_v21 = vand.u32 4294901760, %v11554_v13 }
0x1295   :  { %v21040_v1 = vpop.f32.mrf.mxu1  ;;  %v21032_v8 = vpop.f32.mrf.mxu0 }
0x1296   :  { %10985 = vst.msk [vmem:[%s27030_s12] sm:$0xff] %vm10984_vm9, %v25116_v19  ;;  %v25125_v51 = vadd.f32 %v21040_v1, %v10709_v4  ;;  %v10733_v3 = vadd.f32 %v21032_v8, %v10617_v45  ;;  %27245 = vst [vmem:[#allocation47_spill] sm:$0xff] %v25167_v21  ;;  %v25170_v2 = vsub.f32 %v11554_v13, %v25167_v21  ;;  %21177 = vmatprep.mubr.f32.mxu1 %v25167_v21  ;;  %v11004_v1 = vld [vmem:[%s27028_s10 + $0x8] sm:$0xff] }
0x1297   :  { %v10816_v41 = vpop.f32.mrf.mxu1  ;;  %v10726_v9 = vpop.f32.mrf.mxu0  ;;  %v11557_v25 = vsel %vm11552_vm10, %v11004_v1, 0  ;;  %v11560_v8 = vsel %vm11552_vm10, %v11005_v5, 0  ;;  %v11566_v45 = vsel %vm11552_vm10, %v11007_v26, 0 }
0x1298   :  { %10988 = vst.msk [vmem:[%s27030_s12 + $0x18] sm:$0xff] %vm10984_vm9, %v25125_v51  ;;  %v25134_v31 = vadd.f32 %v10816_v41, %v10703_v63  ;;  %v10727_v15 = vadd.f32 %v10726_v9, %v10609_v11  ;;  %27246 = vst [vmem:[#allocation48_spill] sm:$0xff] %v25170_v2  ;;  %v25174_v47 = vand.u32 4294901760, %v25170_v2  ;;  %v11006_v41 = vld [vmem:[%s27028_s10 + $0x18] sm:$0xff]  ;;  %v25192_v42 = vand.u32 4294901760, %v11557_v25 }
0x1299   :  { %v21043_v55 = vpop.f32.mrf.mxu1 }
0x129a   :  { %v25136_v0 = vadd.f32 %v21043_v55, %v10721_v40  ;;  %10987 = vst.msk [vmem:[%s27030_s12 + $0x10] sm:$0xff] %vm10984_vm9, %v25134_v31  ;;  %27247 = vst [vmem:[#allocation49_spill] sm:$0xff] %v25174_v47  ;;  %v11650_v38 = vsub.f32 %v25170_v2, %v25174_v47  ;;  %v25197_v40 = vand.u32 4294901760, %v11560_v8  ;;  %v11563_v55 = vsel %vm11552_vm10, %v11006_v41, 0 }
0x129b   :  { %v10828_v27 = vpop.f32.mrf.mxu1  ;;  %27248 = vst [vmem:[#allocation50_spill] sm:$0xff] %v25192_v42  ;;  %v25205_v9 = vsub.f32 %v11557_v25, %v25192_v42  ;;  %v10939_v41 = vsub.f32 0.0, %v25125_v51 }
0x129c   :  { %10990 = vst.msk [vmem:[%s27030_s12 + $0x28] sm:$0xff] %vm10984_vm9, %v25136_v0  ;;  %v25148_v60 = vadd.f32 %v10828_v27, %v10715_v12  ;;  %v25178_v50 = vand.u32 4294901760, %v11650_v38  ;;  %27249 = vst [vmem:[#allocation51_spill] sm:$0xff] %v25197_v40  ;;  %v11008_v12 = vld [vmem:[%s27028_s10 + $0x28] sm:$0xff]  ;;  %v11009_v27 = vld [vmem:[%s27028_s10 + $0x30] sm:$0xff]  ;;  %v10941_v61 = vsub.f32 0.0, %v25136_v0 }
0x129d   :  { %v21046_v49 = vpop.f32.mrf.mxu1  ;;  %27250 = vst [vmem:[#allocation52_spill] sm:$0xff] %v25205_v9  ;;  %v25225_v5 = vand.u32 4294901760, %v25205_v9 }
0x129e   :  { %10989 = vst.msk [vmem:[%s27030_s12 + $0x20] sm:$0xff] %vm10984_vm9, %v25148_v60  ;;  %v10847_v39 = vadd.f32 %v21046_v49, %v10733_v3  ;;  %21163 = vmatprep.mubr.f32.mxu0 %v25178_v50  ;;  %v25211_v49 = vsub.f32 %v11560_v8, %v25197_v40 }
0x129f   :  { %v10840_v33 = vpop.f32.mrf.mxu1  ;;  %27254 = vst [vmem:[#allocation56_spill] sm:$0xff] %v25225_v5 }
0x12a0   :  { %10992 = vst.msk [vmem:[%s27030_s12 + $0x38] sm:$0xff] %vm10984_vm9, %v10847_v39  ;;  %v10841_v36 = vadd.f32 %v10840_v33, %v10727_v15  ;;  %v10943_v18 = vsub.f32 0.0, %v10847_v39  ;;  %27251 = vst [vmem:[#allocation53_spill] sm:$0xff] %v25211_v49  ;;  %v25213_v15 = vand.u32 4294901760, %v11563_v55  ;;  %v25215_v33 = vand.u32 4294901760, %v11566_v45 }
0x12a2   :  { %10991 = vst.msk [vmem:[%s27030_s12 + $0x30] sm:$0xff] %vm10984_vm9, %v10841_v36  ;;  %v10942_v35 = vsub.f32 0.0, %v10841_v36  ;;  %v10958_v11 = vmul.f32 1.442695, %v10943_v18  ;;  %27252 = vst [vmem:[#allocation54_spill] sm:$0xff] %v25213_v15  ;;  %v11569_v36 = vsel %vm11552_vm10, %v11008_v12, 0  ;;  %v25231_v0 = vsub.f32 %v11563_v55, %v25213_v15 }
0x12a3   :  { %27253 = vst [vmem:[#allocation55_spill] sm:$0xff] %v25215_v33  ;;  %v11660_v55 = vsub.f32 %v25205_v9, %v25225_v5 }
0x12a4   :  { %v10956_v13 = vmul.f32 1.442695, %v10942_v35  ;;  %22380 = vpow2.f32 %v10958_v11  ;;  %27256 = vst [vmem:[#allocation58_spill] sm:$0xff] %v25231_v0 }
0x12a6   :  { %22382 = vpow2.f32 %v10956_v13  ;;  %v10950_v13 = vmul.f32 1.442695, %v10939_v41 }
0x1325   :  { %v11094_v10 = vpop.f32.mrf.mxu0 }
0x1327   :  { %v21065_v34 = vpop.f32.mrf.mxu0 }
0x1328   :  { %v11572_v34 = vsel %vm11552_vm10, %v11009_v27, 0 }
0x1329   :  { %v25238_v8 = vand.u32 4294901760, %v11572_v34 }
0x132b   :  { %27259 = vst [vmem:[#allocation61_spill] sm:$0xff] %v25238_v8 }
0x132c   :  { %v11205_v57 = vpop.f32.mrf.mxu1 }
0x132d   :  { %v11206_v39 = vadd.f32 %v11205_v57, %v11094_v10  ;;  %v25228_v10 = vand.u32 4294901760, %v25211_v49  ;;  %v25233_v57 = vand.u32 4294901760, %v11569_v36 }
0x132e   :  { %v21084_v48 = vpop.f32.mrf.mxu1 }
0x132f   :  { %v11010_v48 = vld [vmem:[%s27028_s10 + $0x38] sm:$0xff]  ;;  %27255 = vst [vmem:[#allocation57_spill] sm:$0xff] %v25228_v10  ;;  %27257 = vst [vmem:[#allocation59_spill] sm:$0xff] %v25233_v57  ;;  %v11670_v11 = vsub.f32 %v25211_v49, %v25228_v10 }
0x1335   :  { %v11293_v4 = vpop.f32.mrf.mxu0 }
0x1336   :  { %v11294_v1 = vadd.f32 %v11293_v4, %v11206_v39  ;;  %v10954_v4 = vmul.f32 1.442695, %v10941_v61  ;;  %v10938_v39 = vsub.f32 0.0, %v25134_v31  ;;  %v10937_v31 = vsub.f32 0.0, %v25107_v6 }
0x1337   :  { %v21103_v22 = vpop.f32.mrf.mxu0 }
0x1338   :  { %v10940_v22 = vsub.f32 0.0, %v25148_v60  ;;  %v11575_v60 = vsel %vm11552_vm10, %v11010_v48, 0  ;;  %22384 = vpow2.f32 %v10954_v4 }
0x1339   :  { %v25250_v12 = vand.u32 4294901760, %v11575_v60 }
0x133a   :  { %v10952_v26 = vmul.f32 1.442695, %v10940_v22 }
0x133b   :  { %27262 = vst [vmem:[#allocation64_spill] sm:$0xff] %v25250_v12 }
0x133c   :  { %22386 = vpow2.f32 %v10952_v26  ;;  %v10948_v26 = vmul.f32 1.442695, %v10938_v39  ;;  %v10946_v39 = vmul.f32 1.442695, %v10937_v31 }
0x133d   :  { %22388 = vpow2.f32 %v10950_v13 }
0x133e   :  { %v11374_v29 = vpop.f32.mrf.mxu1  ;;  %22390 = vpow2.f32 %v10948_v26 }
0x133f   :  { %v11375_v25 = vadd.f32 %v11374_v29, %v11294_v1  ;;  %v25245_v29 = vand.u32 4294901760, %v25231_v0  ;;  %22392 = vpow2.f32 %v10946_v39 }
0x1340   :  { %v21122_v63 = vpop.f32.mrf.mxu1 }
0x1341   :  { %v25236_v63 = vsub.f32 %v11566_v45, %v25215_v33  ;;  %27260 = vst [vmem:[#allocation62_spill] sm:$0xff] %v25245_v29  ;;  %v25248_v45 = vsub.f32 %v11569_v36, %v25233_v57  ;;  %v11680_v22 = vsub.f32 %v25231_v0, %v25245_v29 }
0x1343   :  { %27258 = vst [vmem:[#allocation60_spill] sm:$0xff] %v25236_v63  ;;  %27261 = vst [vmem:[#allocation63_spill] sm:$0xff] %v25248_v45  ;;  %v25255_v51 = vand.u32 4294901760, %v25236_v63  ;;  %v25269_v1 = vand.u32 4294901760, %v25248_v45 }
0x1345   :  { %27263 = vst [vmem:[#allocation65_spill] sm:$0xff] %v25255_v51  ;;  %27266 = vst [vmem:[#allocation68_spill] sm:$0xff] %v25269_v1  ;;  %v11690_v4 = vsub.f32 %v25236_v63, %v25255_v51 }
0x1347   :  { %v11469_v3 = vpop.f32.mrf.mxu0 }
0x1348   :  { %v11470_v18 = vadd.f32 %v11469_v3, %v11375_v25  ;;  %v25258_v3 = vsub.f32 %v11572_v34, %v25238_v8  ;;  %v25272_v34 = vsub.f32 %v11575_v60, %v25250_v12  ;;  %v25275_v25 = vand.u32 4294901760, %v11670_v11  ;;  %v22381_v11 = vpop.eup %22380 }
0x1349   :  { %v21141_v38 = vpop.f32.mrf.mxu0  ;;  %v25287_v60 = vand.u32 4294901760, %v11680_v22  ;;  %v10967_v56 = vadd.f32 1.0, %v22381_v11 }
0x134a   :  { %27264 = vst [vmem:[#allocation66_spill] sm:$0xff] %v25258_v3  ;;  %v25262_v38 = vand.u32 4294901760, %v11660_v55  ;;  %27267 = vst [vmem:[#allocation69_spill] sm:$0xff] %v25272_v34  ;;  %v25280_v41 = vand.u32 4294901760, %v25258_v3  ;;  %v10936_v55 = vsub.f32 0.0, %v25116_v19  ;;  %v25295_v19 = vand.u32 4294901760, %v11690_v4 }
0x134b   :  { %27268 = vst [vmem:[#allocation70_spill] sm:$0xff] %v25275_v25  ;;  %27270 = vst [vmem:[#allocation72_spill] sm:$0xff] %v25287_v60 }
0x134c   :  { %27265 = vst [vmem:[#allocation67_spill] sm:$0xff] %v25262_v38  ;;  %27269 = vst [vmem:[#allocation71_spill] sm:$0xff] %v25280_v41  ;;  %v10944_v22 = vmul.f32 1.442695, %v10936_v55 }
0x134d   :  { %27272 = vst [vmem:[#allocation74_spill] sm:$0xff] %v25295_v19 }
0x134e   :  { %22394 = vpow2.f32 %v10944_v22 }
0x134f   :  { %v11548_v35 = vpop.f32.mrf.mxu1  ;;  %22396 = vrcp.f32 %v10967_v56 }
0x1350   :  { %v11549_v27 = vadd.f32 %v11548_v35, %v11470_v18  ;;  %v11700_v35 = vsub.f32 %v25248_v45, %v25269_v1 }
0x1351   :  { %v21160_v61 = vpop.f32.mrf.mxu1 }
0x1352   :  { %v11579_v36 = vsel %vm11577_vm11, %v11549_v27, 0  ;;  %v25292_v27 = vand.u32 4294901760, %v25272_v34  ;;  %v11710_v61 = vsub.f32 %v25258_v3, %v25280_v41  ;;  %v25300_v14 = vand.u32 4294901760, %v11700_v35 }
0x1353   :  { %v25264_v48 = vand.u32 4294901760, %v11579_v36 }
0x1354   :  { %27271 = vst [vmem:[#allocation73_spill] sm:$0xff] %v25292_v27  ;;  %27273 = vst [vmem:[#allocation75_spill] sm:$0xff] %v25300_v14  ;;  %v11720_v31 = vsub.f32 %v25272_v34, %v25292_v27  ;;  %v25305_v4 = vand.u32 4294901760, %v11710_v61 }
0x1355   :  { %v11759_v18 = vsub.f32 %v11579_v36, %v25264_v48  ;;  %21161 = vmatprep.subr.mxu0 %v25264_v48  ;;  %v22383_v36 = vpop.eup %22382 }
0x1356   :  { %21162 = vmatpush3.msra.mxu0 %v25264_v48  ;;  %27274 = vst [vmem:[#allocation76_spill] sm:$0xff] %v25305_v4  ;;  %v10966_v30 = vadd.f32 1.0, %v22383_v36  ;;  %v22385_v26 = vpop.eup %22384  ;;  %v25309_v55 = vand.u32 4294901760, %v11720_v31 }
0x1357   :  { %21164 = vmatmul.mubr.f32.vlgmr.msra.gmra.mxu0 %v25262_v38  ;;  %21189 = vmatprep.subr.mxu0 %v11759_v18  ;;  %v11760_v6 = vand.u32 4294901760, %v11759_v18  ;;  %v10965_v35 = vadd.f32 1.0, %v22385_v26 }
0x1358   :  { %21190 = vmatpush3.msra.mxu0 %v11759_v18  ;;  %21166 = vmatprep.mubr.f32.mxu0 %v25275_v25  ;;  %27275 = vst [vmem:[#allocation77_spill] sm:$0xff] %v25309_v55  ;;  %22398 = vrcp.f32 %v10966_v30 }
0x1359   :  { %21217 = vmatprep.subr.mxu0 %v11760_v6  ;;  %v11761_v13 = vsub.f32 %v11759_v18, %v11760_v6  ;;  %v22387_v18 = vpop.eup %22386  ;;  %22400 = vrcp.f32 %v10965_v35 }
0x135a   :  { %v10964_v56 = vadd.f32 1.0, %v22387_v18 }
0x135b   :  { %21167 = vmatmul.mubr.f32.gmra.mxu0 %v25287_v60  ;;  %v11762_v62 = vand.u32 4294901760, %v11761_v13  ;;  %v27276_v13 = vmov 0.0  }
0x135c   :  { %21169 = vmatprep.mubr.f32.mxu0 %v25295_v19  ;;  %22402 = vrcp.f32 %v10964_v56 }
0x135d   :  { %21175 = vmatprep.subr.mxu1 %v11762_v62 }
0x135e   :  { %21176 = vmatpush3.msra.mxu1 %v11762_v62  ;;  %v22389_v62 = vpop.eup %22388 }
0x135f   :  { %21170 = vmatmul.mubr.f32.gmra.mxu0 %v25300_v14  ;;  %21178 = vmatmul.mubr.f32.vlgmr.msra.gmra.mxu1 %v25192_v42  ;;  %v22391_v11 = vpop.eup %22390  ;;  %v10963_v39 = vadd.f32 1.0, %v22389_v62 }
0x1360   :  { %21203 = vmatprep.subr.mxu1 %v25264_v48  ;;  %21172 = vmatprep.mubr.f32.mxu0 %v25305_v4  ;;  %v22393_v30 = vpop.eup %22392  ;;  %v10962_v61 = vadd.f32 1.0, %v22391_v11 }
0x1361   :  { %21204 = vmatpush3.msra.mxu1 %v25264_v48  ;;  %21180 = vmatprep.mubr.f32.mxu1 %v25197_v40  ;;  %v22395_v36 = vpop.eup %22394  ;;  %22404 = vrcp.f32 %v10963_v39  ;;  %v10961_v31 = vadd.f32 1.0, %v22393_v30 }
0x1362   :  { %21231 = vmatprep.subr.mxu1 %v25264_v48  ;;  %v25327_v22 = vpop.eup %22396  ;;  %22406 = vrcp.f32 %v10962_v61  ;;  %v10960_v26 = vadd.f32 1.0, %v22395_v36 }
0x1363   :  { %21173 = vmatmul.mubr.f32.gmra.mxu0 %v25309_v55  ;;  %21181 = vmatmul.mubr.f32.gmra.mxu1 %v25213_v15  ;;  %27277 = vst [vmem:[#allocation78_spill] sm:$0xff] %v25327_v22  ;;  %v25336_v18 = vand.u32 4294901760, %v25327_v22  ;;  %22408 = vrcp.f32 %v10961_v31 }
0x1364   :  { %21183 = vmatprep.mubr.f32.mxu1 %v25215_v33  ;;  %21191 = vmatprep.mubr.f32.mxu0 %v25170_v2  ;;  %22410 = vrcp.f32 %v10960_v26 }
0x1365   :  { %v25351_v56 = vsub.f32 %v25327_v22, %v25336_v18 }
0x1367   :  { %21184 = vmatmul.mubr.f32.gmra.mxu1 %v25233_v57  ;;  %21192 = vmatmul.mubr.f32.vlgmr.msra.gmra.mxu0 %v25205_v9  ;;  %v27283_v22 = vand.u32 4294901760, %v25351_v56 }
0x1368   :  { %21218 = vmatpush3.msra.mxu0 %v11760_v6  ;;  %21186 = vmatprep.mubr.f32.mxu1 %v25238_v8  ;;  %v25331_v6 = vpop.eup %22398 }
0x1369   :  { %21194 = vmatprep.mubr.f32.mxu0 %v25211_v49  ;;  %21245 = vmatprep.subr.mxu0 %v27276_v13  ;;  %27278 = vst [vmem:[#allocation79_spill] sm:$0xff] %v25331_v6  ;;  %v25342_v35 = vand.u32 4294901760, %v25331_v6  ;;  %v25345_v62 = vpop.eup %22400  ;;  %v12431_v53 = vsub.f32 %v25351_v56, %v27283_v22 }
0x136a   :  { %27279 = vst [vmem:[#allocation80_spill] sm:$0xff] %v25345_v62  ;;  %v25358_v11 = vand.u32 4294901760, %v25345_v62 }
0x136b   :  { %21187 = vmatmul.mubr.f32.gmra.mxu1 %v25250_v12  ;;  %21195 = vmatmul.mubr.f32.gmra.mxu0 %v25231_v0  ;;  %v25362_v39 = vsub.f32 %v25331_v6, %v25342_v35  ;;  %v12432_v7 = vand.u32 4294901760, %v12431_v53 }
0x136c   :  { %21197 = vmatprep.mubr.f32.mxu0 %v25236_v63  ;;  %21205 = vmatprep.mubr.f32.mxu1 %v25174_v47  ;;  %v25379_v26 = vsub.f32 %v25345_v62, %v25358_v11 }
0x136d   :  { %v27285_v24 = vand.u32 4294901760, %v25362_v39 }
0x136f   :  { %21198 = vmatmul.mubr.f32.gmra.mxu0 %v25248_v45  ;;  %21206 = vmatmul.mubr.f32.vlgmr.msra.gmra.mxu1 %v25225_v5  ;;  %v12438_v22 = vsub.f32 %v25362_v39, %v27285_v24 }
0x1370   :  { %21232 = vmatpush3.msra.mxu1 %v25264_v48  ;;  %21200 = vmatprep.mubr.f32.mxu0 %v25258_v3  ;;  %v25353_v48 = vpop.eup %22402 }
0x1371   :  { %21208 = vmatprep.mubr.f32.mxu1 %v25228_v10  ;;  %21264 = vmatprep.subr.mxu1 %v27276_v13  ;;  %27280 = vst [vmem:[#allocation81_spill] sm:$0xff] %v25353_v48  ;;  %v25367_v30 = vand.u32 4294901760, %v25353_v48  ;;  %v25370_v36 = vpop.eup %22404 }
0x1372   :  { %27281 = vst [vmem:[#allocation82_spill] sm:$0xff] %v25370_v36  ;;  %v25381_v6 = vpop.eup %22406  ;;  %v25387_v61 = vand.u32 4294901760, %v25370_v36 }
0x1373   :  { %21201 = vmatmul.mubr.f32.gmra.mxu0 %v25272_v34  ;;  %21209 = vmatmul.mubr.f32.gmra.mxu1 %v25245_v29  ;;  %27282 = vst [vmem:[#allocation83_spill] sm:$0xff] %v25381_v6  ;;  %v25394_v31 = vsub.f32 %v25353_v48, %v25367_v30  ;;  %v25398_v62 = vpop.eup %22408  ;;  %v25403_v43 = vand.u32 4294901760, %v25381_v6  ;;  %v12439_v48 = vand.u32 4294901760, %v12438_v22 }
0x1374   :  { %21211 = vmatprep.mubr.f32.mxu1 %v25255_v51  ;;  %21219 = vmatprep.mubr.f32.mxu0 %v25167_v21  ;;  %27284 = vst [vmem:[#allocation84_spill] sm:$0xff] %v25398_v62  ;;  %v25410_v17 = vpop.eup %22410  ;;  %v25422_v24 = vand.u32 4294901760, %v25398_v62 }
0x1375   :  { %27286 = vst [vmem:[#allocation85_spill] sm:$0xff] %v25410_v17 }
0x1377   :  { %21212 = vmatmul.mubr.f32.gmra.mxu1 %v25269_v1  ;;  %21220 = vmatmul.mubr.f32.vlgmr.msra.gmra.mxu0 %v25192_v42  ;;  %v27287_v1 = vand.u32 4294901760, %v25379_v26 }
0x1378   :  { %21246 = vmatpush3.msra.mxu0 %v25336_v18  ;;  %21214 = vmatprep.mubr.f32.mxu1 %v25280_v41  ;;  %v25417_v41 = vsub.f32 %v25370_v36, %v25387_v61  ;;  %v25435_v36 = vand.u32 4294901760, %v25410_v17 }
0x1379   :  { %21247 = vmatprep.subr.mxu0 %v27276_v13  ;;  %21222 = vmatprep.mubr.f32.mxu0 %v25197_v40  ;;  %v12445_v53 = vsub.f32 %v25379_v26, %v27287_v1 }
0x137a   :  { %21248 = vmatpush3.msra.mxu0 %v25342_v35 }
0x137b   :  { %21249 = vmatprep.subr.mxu0 %v27276_v13  ;;  %21215 = vmatmul.mubr.f32.gmra.mxu1 %v25292_v27  ;;  %v25430_v27 = vsub.f32 %v25381_v6, %v25403_v43  ;;  %v25446_v6 = vsub.f32 %v25398_v62, %v25422_v24  ;;  %v12446_v51 = vand.u32 4294901760, %v12445_v53  ;;  %v27289_v62 = vand.u32 4294901760, %v25417_v41 }
0x137c   :  { %21223 = vmatmul.mubr.f32.gmra.mxu0 %v25213_v15  ;;  %21233 = vmatprep.mubr.f32.mxu1 %v25167_v21 }
0x137d   :  { %21250 = vmatpush3.msra.mxu0 %v25358_v11  ;;  %21225 = vmatprep.mubr.f32.mxu0 %v25215_v33  ;;  %v12459_v34 = vsub.f32 %v25417_v41, %v27289_v62  ;;  %v27082_v53 = vand.u32 4294901760, %v25446_v6 }
0x137e   :  { %21251 = vmatprep.subr.mxu0 %v27276_v13 }
0x137f   :  { %21252 = vmatpush3.msra.mxu0 %v25367_v30  ;;  %21234 = vmatmul.mubr.f32.vlgmr.msra.gmra.mxu1 %v25192_v42  ;;  %v12460_v62 = vand.u32 4294901760, %v12459_v34 }
0x1380   :  { %21253 = vmatprep.subr.mxu0 %v27276_v13  ;;  %21226 = vmatmul.mubr.f32.gmra.mxu0 %v25233_v57 }
0x1381   :  { %21254 = vmatpush3.msra.mxu0 %v25387_v61  ;;  %21265 = vmatpush3.msra.mxu1 %v12432_v7  ;;  %v27288_v7 = vand.u32 4294901760, %v25394_v31 }
0x1382   :  { %21255 = vmatprep.subr.mxu0 %v27276_v13  ;;  %21266 = vmatprep.subr.mxu1 %v27276_v13 }
0x1383   :  { %21256 = vmatpush3.msra.mxu0 %v25403_v43  ;;  %21267 = vmatpush3.msra.mxu1 %v12439_v48  ;;  %v12452_v22 = vsub.f32 %v25394_v31, %v27288_v7  ;;  %v12465_v48 = vand.u32 4294901760, %v25430_v27  ;;  %v25455_v7 = vsub.f32 %v25410_v17, %v25435_v36 }
0x1384   :  { %21228 = vmatprep.mubr.f32.mxu0 %v25238_v8  ;;  %21236 = vmatprep.mubr.f32.mxu1 %v25197_v40 }
0x1385   :  { %21257 = vmatprep.subr.mxu0 %v27276_v13  ;;  %21268 = vmatprep.subr.mxu1 %v27276_v13  ;;  %v12453_v1 = vand.u32 4294901760, %v12452_v22  ;;  %v12466_v17 = vsub.f32 %v25430_v27, %v12465_v48  ;;  %v12473_v22 = vsub.f32 %v25446_v6, %v27082_v53 }
0x1386   :  { %21229 = vmatmul.mubr.f32.gmra.mxu0 %v25250_v12  ;;  %21237 = vmatmul.mubr.f32.gmra.mxu1 %v25213_v15 }
0x1387   :  { %21258 = vmatpush3.msra.mxu0 %v25422_v24  ;;  %21269 = vmatpush3.msra.mxu1 %v12446_v51  ;;  %v12479_v51 = vand.u32 4294901760, %v25455_v7  ;;  %v12474_v53 = vand.u32 4294901760, %v12473_v22  ;;  %v27292_v22 = vand.u32 4294901760, %v25379_v26 }
0x1388   :  { %21259 = vmatprep.subr.mxu0 %v27276_v13  ;;  %21270 = vmatprep.subr.mxu1 %v27276_v13 }
0x1389   :  { %21260 = vmatpush3.msra.mxu0 %v25435_v36  ;;  %21271 = vmatpush3.msra.mxu1 %v12453_v1  ;;  %v12467_v1 = vand.u32 4294901760, %v12466_v17  ;;  %v12480_v34 = vsub.f32 %v25455_v7, %v12479_v51 }
0x138a   :  { %21239 = vmatprep.mubr.f32.mxu1 %v25215_v33  ;;  %21261 = vmatprep.mubr.msk.f32.mxu0 %vm22729_vm7, %v27276_v13 }
0x138b   :  { %21272 = vmatprep.subr.mxu1 %v27276_v13  ;;  %21283 = vmatprep.subr.mxu0 %v27276_v13  ;;  %v12481_v17 = vand.u32 4294901760, %v12480_v34 }
0x138c   :  { %21240 = vmatmul.mubr.f32.gmra.mxu1 %v25233_v57  ;;  %21262 = vmatmul.mubr.f32.vlgmr.msra.gmra.mxu0 %v24956_v54 }
0x138d   :  { %21273 = vmatpush3.msra.mxu1 %v12460_v62  ;;  %21284 = vmatpush3.msra.mxu0 %v25351_v56  ;;  %v27291_v62 = vand.u32 4294901760, %v25362_v39 }
0x138e   :  { %21274 = vmatprep.subr.mxu1 %v27276_v13  ;;  %21285 = vmatprep.subr.mxu0 %v27276_v13 }
0x138f   :  { %21275 = vmatpush3.msra.mxu1 %v12467_v1  ;;  %21286 = vmatpush3.msra.mxu0 %v25362_v39  ;;  %v27294_v39 = vand.u32 4294901760, %v25417_v41 }
0x1390   :  { %21242 = vmatprep.mubr.f32.mxu1 %v25238_v8  ;;  %21276 = vmatprep.subr.mxu1 %v27276_v13 }
0x1391   :  { %21287 = vmatprep.subr.mxu0 %v27276_v13  ;;  %21243 = vmatmul.mubr.f32.gmra.mxu1 %v25250_v12 }
0x1392   :  { %21277 = vmatpush3.msra.mxu1 %v12474_v53  ;;  %21288 = vmatpush3.msra.mxu0 %v25379_v26  ;;  %v27290_v53 = vand.u32 4294901760, %v25351_v56  ;;  %v27293_v56 = vand.u32 4294901760, %v25394_v31 }
0x1393   :  { %21278 = vmatprep.subr.mxu1 %v27276_v13  ;;  %21289 = vmatprep.subr.mxu0 %v27276_v13 }
0x1394   :  { %21279 = vmatpush3.msra.mxu1 %v12481_v17  ;;  %21290 = vmatpush3.msra.mxu0 %v25394_v31  ;;  %v27295_v31 = vand.u32 4294901760, %v25446_v6 }
0x1395   :  { %21280 = vmatprep.mubr.msk.f32.mxu1 %vm22729_vm7, %v27276_v13  ;;  %21291 = vmatprep.subr.mxu0 %v27276_v13 }
0x1396   :  { %21302 = vmatprep.subr.mxu1 %v27276_v13  ;;  %21281 = vmatmul.mubr.f32.vlgmr.msra.gmra.mxu1 %v24842_v44 }
0x1397   :  { %21292 = vmatpush3.msra.mxu0 %v25417_v41  ;;  %21303 = vmatpush3.msra.mxu1 %v25336_v18  ;;  %v22730_v41 = vmov 0  }
0x1398   :  { %21293 = vmatprep.subr.mxu0 %v27276_v13  ;;  %21304 = vmatprep.subr.mxu1 %v27276_v13 }
0x1399   :  { %21294 = vmatpush3.msra.mxu0 %v25430_v27  ;;  %21305 = vmatpush3.msra.mxu1 %v25342_v35 }
0x139a   :  { %21295 = vmatprep.subr.mxu0 %v27276_v13  ;;  %21306 = vmatprep.subr.mxu1 %v27276_v13 }
0x139b   :  { %21296 = vmatpush3.msra.mxu0 %v25446_v6  ;;  %21307 = vmatpush3.msra.mxu1 %v25358_v11 }
0x139c   :  { %21297 = vmatprep.subr.mxu0 %v27276_v13  ;;  %21308 = vmatprep.subr.mxu1 %v27276_v13 }
0x139d   :  { %21298 = vmatpush3.msra.mxu0 %v25455_v7  ;;  %21309 = vmatpush3.msra.mxu1 %v25367_v30 }
0x139e   :  { %21299 = vmatprep.mubr.msk.f32.mxu0 %vm22729_vm7, %v27276_v13  ;;  %21310 = vmatprep.subr.mxu1 %v27276_v13 }
0x139f   :  { %21321 = vmatprep.subr.mxu0 %v27276_v13  ;;  %21300 = vmatmul.mubr.f32.vlgmr.msra.gmra.mxu0 %v24872_v28 }
0x13a0   :  { %21311 = vmatpush3.msra.mxu1 %v25387_v61  ;;  %21322 = vmatpush3.msra.mxu0 %v27290_v53 }
0x13a1   :  { %21312 = vmatprep.subr.mxu1 %v27276_v13  ;;  %21323 = vmatprep.subr.mxu0 %v27276_v13 }
0x13a2   :  { %21313 = vmatpush3.msra.mxu1 %v25403_v43  ;;  %21324 = vmatpush3.msra.mxu0 %v27291_v62 }
0x13a3   :  { %21314 = vmatprep.subr.mxu1 %v27276_v13  ;;  %21325 = vmatprep.subr.mxu0 %v27276_v13 }
0x13a4   :  { %21315 = vmatpush3.msra.mxu1 %v25422_v24  ;;  %21326 = vmatpush3.msra.mxu0 %v27292_v22 }
0x13a5   :  { %21316 = vmatprep.subr.mxu1 %v27276_v13  ;;  %21327 = vmatprep.subr.mxu0 %v27276_v13 }
0x13a6   :  { %21317 = vmatpush3.msra.mxu1 %v25435_v36  ;;  %21328 = vmatpush3.msra.mxu0 %v27293_v56 }
0x13a7   :  { %21318 = vmatprep.mubr.msk.f32.mxu1 %vm22729_vm7, %v27276_v13  ;;  %21329 = vmatprep.subr.mxu0 %v27276_v13 }
0x13a8   :  { %21340 = vmatprep.subr.mxu1 %v27276_v13  ;;  %21319 = vmatmul.mubr.f32.vlgmr.msra.gmra.mxu1 %v24907_v20 }
0x13a9   :  { %21330 = vmatpush3.msra.mxu0 %v27294_v39  ;;  %21341 = vmatpush3.msra.mxu1 %v25336_v18 }
0x13aa   :  { %21331 = vmatprep.subr.mxu0 %v27276_v13  ;;  %21342 = vmatprep.subr.mxu1 %v27276_v13 }
0x13ab   :  { %21332 = vmatpush3.msra.mxu0 %v12465_v48  ;;  %21343 = vmatpush3.msra.mxu1 %v25342_v35 }
0x13ac   :  { %21333 = vmatprep.subr.mxu0 %v27276_v13  ;;  %21344 = vmatprep.subr.mxu1 %v27276_v13 }
0x13ad   :  { %21334 = vmatpush3.msra.mxu0 %v27295_v31  ;;  %21345 = vmatpush3.msra.mxu1 %v25358_v11 }
0x13ae   :  { %21335 = vmatprep.subr.mxu0 %v27276_v13  ;;  %21346 = vmatprep.subr.mxu1 %v27276_v13 }
0x13af   :  { %21336 = vmatpush3.msra.mxu0 %v12479_v51  ;;  %21347 = vmatpush3.msra.mxu1 %v25367_v30 }
0x13b0   :  { %21348 = vmatprep.subr.mxu1 %v27276_v13  ;;  %21337 = vmatprep.mubr.msk.f32.mxu0 %vm22729_vm7, %v27276_v13 }
0x13b1   :  { %21349 = vmatpush3.msra.mxu1 %v25387_v61  ;;  %21338 = vmatmul.mubr.f32.vlgmr.msra.gmra.mxu0 %v24842_v44 }
0x13b2   :  { %21350 = vmatprep.subr.mxu1 %v27276_v13  ;;  %21356 = vmatprep.mubr.msk.f32.mxu1 %vm22729_vm7, %v27276_v13 }
0x13b3   :  { %21351 = vmatpush3.msra.mxu1 %v25403_v43  ;;  %21361 = vmatprep.mubr.f32.mxu0 %v25178_v50 }
0x13b4   :  { %21352 = vmatprep.subr.mxu1 %v27276_v13  ;;  %22252 = vset.pattern.permute.xlu1 %v22730_v41 }
0x13b5   :  { %21353 = vmatpush3.msra.mxu1 %v25422_v24  ;;  %22253 = vset.pattern.permute.xlu0 %v22730_v41 }
0x13b6   :  { %21354 = vmatprep.subr.mxu1 %v27276_v13 }
0x13b7   :  { %21355 = vmatpush3.msra.mxu1 %v25435_v36 }
0x13b8   :  { %21357 = vmatmul.mubr.f32.vlgmr.msra.gmra.mxu1 %v24842_v44 }
0x13b9   :  { %21375 = vmatprep.mubr.f32.mxu1 %v25167_v21 }
0x1417   :  { %v25575_v27 = vpop.f32.mrf.mxu0 }
0x1419   :  { %v25577_v43 = vpop.f32.mrf.mxu0 }
0x141b   :  { %v21168_v50 = vpop.f32.mrf.mxu0 }
0x141c   :  { %v11684_v10 = vadd.f32 1e-05, %v21168_v50 }
0x141d   :  { %v25579_v6 = vpop.f32.mrf.mxu0 }
0x141f   :  { %v21171_v18 = vpop.f32.mrf.mxu0  ;;  %v25581_v35 = vpop.f32.mrf.mxu1 }
0x1420   :  { %v11704_v49 = vadd.f32 1e-05, %v21171_v18 }
0x1421   :  { %v11693_v11 = vpop.f32.mrf.mxu0  ;;  %v25583_v30 = vpop.f32.mrf.mxu1 }
0x1422   :  { %v11694_v33 = vadd.f32 1e-05, %v11693_v11 }
0x1423   :  { %v21174_v61 = vpop.f32.mrf.mxu0  ;;  %v21182_v36 = vpop.f32.mrf.mxu1 }
0x1424   :  { %v11818_v0 = vadd.f32 %v21182_v36, %v11684_v10  ;;  %v11724_v4 = vadd.f32 1e-05, %v21174_v61 }
0x1425   :  { %v11713_v26 = vpop.f32.mrf.mxu0  ;;  %v25585_v24 = vpop.f32.mrf.mxu1 }
0x1427   :  { %v21185_v48 = vpop.f32.mrf.mxu1  ;;  %v25587_v7 = vpop.f32.mrf.mxu0 }
0x1428   :  { %v11830_v55 = vadd.f32 %v21185_v48, %v11704_v49 }
0x1429   :  { %v11823_v51 = vpop.f32.mrf.mxu1  ;;  %v25589_v1 = vpop.f32.mrf.mxu0 }
0x142a   :  { %v11824_v14 = vadd.f32 %v11823_v51, %v11694_v33 }
0x142b   :  { %v21188_v34 = vpop.f32.mrf.mxu1  ;;  %v21196_v17 = vpop.f32.mrf.mxu0 }
0x142c   :  { %v11937_v8 = vadd.f32 %v21196_v17, %v11818_v0  ;;  %v11842_v25 = vadd.f32 %v21188_v34, %v11724_v4  ;;  %v11714_v0 = vadd.f32 1e-05, %v11713_v26 }
0x142d   :  { %v11835_v53 = vpop.f32.mrf.mxu1  ;;  %v25591_v62 = vpop.f32.mrf.mxu0 }
0x142e   :  { %v11836_v49 = vadd.f32 %v11835_v53, %v11714_v0 }
0x142f   :  { %v21199_v22 = vpop.f32.mrf.mxu0  ;;  %v25593_v56 = vpop.f32.mrf.mxu1 }
0x1430   :  { %v11951_v42 = vadd.f32 %v21199_v22, %v11830_v55 }
0x1431   :  { %v11943_v39 = vpop.f32.mrf.mxu0  ;;  %v25595_v31 = vpop.f32.mrf.mxu1 }
0x1432   :  { %v11944_v10 = vadd.f32 %v11943_v39, %v11824_v14 }
0x1433   :  { %v21202_v41 = vpop.f32.mrf.mxu0  ;;  %v21210_v20 = vpop.f32.mrf.mxu1 }
0x1434   :  { %v12063_v2 = vadd.f32 %v21210_v20, %v11937_v8  ;;  %v11965_v37 = vadd.f32 %v21202_v41, %v11842_v25 }
0x1435   :  { %v11957_v28 = vpop.f32.mrf.mxu0  ;;  %v12054_v44 = vpop.f32.mrf.mxu1 }
0x1436   :  { %v11958_v55 = vadd.f32 %v11957_v28, %v11836_v49  ;;  %v27296_v49 = vld [vmem:[#allocation39_spill] sm:$0xff] }
0x1437   :  { %v21213_v54 = vpop.f32.mrf.mxu1  ;;  %v25597_v21 = vpop.f32.mrf.mxu0 }
0x1438   :  { %v12079_v36 = vadd.f32 %v21213_v54, %v11951_v42  ;;  %v11664_v42 = vadd.f32 1e-05, %v25575_v27 }
0x1439   :  { %v12070_v29 = vpop.f32.mrf.mxu1  ;;  %v25599_v3 = vpop.f32.mrf.mxu0 }
0x143a   :  { %v12071_v17 = vadd.f32 %v12070_v29, %v11944_v10 }
0x143b   :  { %v21216_v45 = vpop.f32.mrf.mxu1 }
0x143c   :  { %v21224_v5 = vpop.f32.mrf.mxu0  ;;  %v12095_v11 = vadd.f32 %v21216_v45, %v11965_v37  ;;  %v11806_v45 = vadd.f32 %v25581_v35, %v11664_v42  ;;  %v27300_v42 = vld [vmem:[#allocation74_spill] sm:$0xff] }
0x143d   :  { %v12086_v63 = vpop.f32.mrf.mxu1  ;;  %v12187_v15 = vadd.f32 %v21224_v5, %v12063_v2 }
0x143e   :  { %v12180_v47 = vpop.f32.mrf.mxu0  ;;  %v11923_v27 = vadd.f32 %v25587_v7, %v11806_v45  ;;  %v27308_v45 = vld [vmem:[#allocation48_spill] sm:$0xff] }
0x143f   :  { %v25601_v12 = vpop.f32.mrf.mxu1 }
0x1440   :  { %v21227_v13 = vpop.f32.mrf.mxu0  ;;  %v12047_v34 = vadd.f32 %v25593_v56, %v11923_v27  ;;  %v27314_v27 = vld [vmem:[#allocation64_spill] sm:$0xff] }
0x1441   :  { %v25603_v57 = vpop.f32.mrf.mxu1  ;;  %v12199_v38 = vadd.f32 %v21227_v13, %v12079_v36 }
0x1442   :  { %v12192_v9 = vpop.f32.mrf.mxu0  ;;  %v12175_v35 = vadd.f32 %v25597_v21, %v12047_v34  ;;  %v27319_v34 = vld [vmem:[#allocation63_spill] sm:$0xff] }
0x1443   :  { %v12193_v2 = vadd.f32 %v12192_v9, %v12071_v17 }
0x1444   :  { %v12289_v7 = vadd.f32 %v25601_v12, %v12175_v35  ;;  %v27322_v35 = vld [vmem:[#allocation62_spill] sm:$0xff] }
0x1446   :  { %v21230_v40 = vpop.f32.mrf.mxu0  ;;  %v21238_v50 = vpop.f32.mrf.mxu1 }
0x1447   :  { %v12301_v19 = vadd.f32 %v21238_v50, %v12187_v15  ;;  %v11674_v15 = vadd.f32 1e-05, %v25579_v6  ;;  %v12211_v54 = vadd.f32 %v21230_v40, %v12095_v11  ;;  %v11654_v40 = vadd.f32 1e-05, %v25577_v43 }
0x1448   :  { %v12294_v60 = vpop.f32.mrf.mxu1  ;;  %v12204_v18 = vpop.f32.mrf.mxu0 }
0x1449   :  { %22412 = vrcp.f32 %v12301_v19  ;;  %v11812_v29 = vadd.f32 %v25585_v24, %v11674_v15  ;;  %v12087_v19 = vadd.f32 %v12086_v63, %v11958_v55  ;;  %v11800_v51 = vadd.f32 %v25583_v30, %v11654_v40 }
0x144a   :  { %v27313_v40 = vmov 0.0  }
0x144b   :  { %v11930_v9 = vadd.f32 %v25591_v62, %v11812_v29  ;;  %v27301_v29 = vld [vmem:[#allocation50_spill] sm:$0xff] }
0x144c   :  { %v21241_v20 = vpop.f32.mrf.mxu1  ;;  %v12407_v8 = vpop.f32.mrf.mxu0 }
0x144d   :  { %v12313_v5 = vadd.f32 %v21241_v20, %v12199_v38  ;;  %v12205_v38 = vadd.f32 %v12204_v18, %v12087_v19  ;;  %v12055_v13 = vadd.f32 %v12054_v44, %v11930_v9  ;;  %v11916_v44 = vadd.f32 %v25589_v1, %v11800_v51  ;;  %v27302_v19 = vld [vmem:[#allocation75_spill] sm:$0xff]  ;;  %v27305_v9 = vld [vmem:[#allocation54_spill] sm:$0xff]  ;;  %v27318_v51 = vld [vmem:[#allocation56_spill] sm:$0xff] }
0x144e   :  { %v12306_v61 = vpop.f32.mrf.mxu1  ;;  %v21263_v33 = vpop.f32.mrf.mxu0 }
0x144f   :  { %22414 = vrcp.f32 %v12313_v5  ;;  %v12307_v14 = vadd.f32 %v12306_v61, %v12193_v2  ;;  %v12181_v24 = vadd.f32 %v12180_v47, %v12055_v13  ;;  %v12039_v43 = vadd.f32 %v25595_v31, %v11916_v44  ;;  %v27297_v33 = vld [vmem:[#allocation67_spill] sm:$0xff]  ;;  %v27321_v44 = vld [vmem:[#allocation66_spill] sm:$0xff] }
0x1450   :  { %v27309_v13 = vld [vmem:[#allocation59_spill] sm:$0xff] }
0x1451   :  { %22416 = vrcp.f32 %v12307_v14  ;;  %v21244_v25 = vpop.f32.mrf.mxu1  ;;  %v12295_v53 = vadd.f32 %v12294_v60, %v12181_v24  ;;  %v12169_v30 = vadd.f32 %v25599_v3, %v12039_v43  ;;  %v27315_v24 = vld [vmem:[#allocation58_spill] sm:$0xff]  ;;  %v27324_v43 = vld [vmem:[#allocation65_spill] sm:$0xff] }
0x1452   :  { %v12325_v4 = vadd.f32 %v21244_v25, %v12211_v54  ;;  %v27299_v54 = vld [vmem:[#allocation72_spill] sm:$0xff]  ;;  %v27303_v25 = vld [vmem:[#allocation51_spill] sm:$0xff] }
0x1453   :  { %v12318_v37 = vpop.f32.mrf.mxu1  ;;  %v12283_v60 = vadd.f32 %v25603_v57, %v12169_v30  ;;  %v27328_v30 = vld [vmem:[#allocation73_spill] sm:$0xff] }
0x1454   :  { %22418 = vrcp.f32 %v12325_v4  ;;  %v12319_v28 = vadd.f32 %v12318_v37, %v12205_v38  ;;  %v27304_v4 = vld [vmem:[#allocation76_spill] sm:$0xff]  ;;  %v27306_v38 = vld [vmem:[#allocation77_spill] sm:$0xff]  ;;  %v27307_v37 = vld [vmem:[#allocation55_spill] sm:$0xff] }
0x1456   :  { %v22413_v6 = vpop.eup %22412  ;;  %v12518_v26 = vpop.f32.mrf.mxu1  ;;  %22420 = vrcp.f32 %v12319_v28  ;;  %v27310_v28 = vld [vmem:[#allocation52_spill] sm:$0xff] }
0x1457   :  { %v13622_v63 = vmul.f32 %v22413_v6, %v24874_v58  ;;  %22422 = vrcp.f32 %v12295_v53  ;;  %v27311_v6 = vld [vmem:[#allocation61_spill] sm:$0xff] }
0x1458   :  { %v21282_v48 = vpop.f32.mrf.mxu1  ;;  %22424 = vrcp.f32 %v12289_v7  ;;  %v27320_v53 = vld [vmem:[#allocation57_spill] sm:$0xff]  ;;  %v27325_v7 = vld [vmem:[#allocation47_spill] sm:$0xff] }
0x1459   :  { %13664 = vperm.xlu1 %22252, %v13622_v63   ;;  %22426 = vrcp.f32 %v12283_v60  ;;  %v27316_v63 = vld [vmem:[#allocation49_spill] sm:$0xff]  ;;  %v27317_v48 = vld [vmem:[#allocation60_spill] sm:$0xff] }
0x145c   :  { %v22415_v62 = vpop.eup %22414 }
0x145d   :  { %v13626_v58 = vmul.f32 %v22415_v62, %v24807_v16  ;;  %v12519_v16 = vadd.f32 %v12518_v26, %v12407_v8  ;;  %v27312_v26 = vld [vmem:[#allocation53_spill] sm:$0xff] }
0x145e   :  { %v22417_v47 = vpop.eup %22416  ;;  %v27323_v62 = vld [vmem:[#allocation69_spill] sm:$0xff] }
0x145f   :  { %13674 = vperm.xlu1 %22252, %v13626_v58   ;;  %v12606_v22 = vpop.f32.mrf.mxu0  ;;  %v13624_v1 = vmul.f32 %v22417_v47, %v24814_v59  ;;  %v27326_v58 = vld [vmem:[#allocation68_spill] sm:$0xff]  ;;  %v27327_v47 = vld [vmem:[#allocation71_spill] sm:$0xff] }
0x1460   :  { %v12607_v10 = vadd.f32 %v12606_v22, %v12519_v16 }
0x1461   :  { %v21301_v56 = vpop.f32.mrf.mxu0  ;;  %v22419_v21 = vpop.eup %22418 }
0x1462   :  { %v13630_v39 = vmul.f32 %v22419_v21, %v24825_v52 }
0x1463   :  { %13669 = vperm.xlu1 %22252, %v13624_v1   ;;  %v22421_v12 = vpop.eup %22420  ;;  %v27329_v1 = vld [vmem:[#allocation40_spill] sm:$0xff] }
0x1464   :  { %v13628_v41 = vmul.f32 %v22421_v12, %v24844_v46  ;;  %v22423_v3 = vpop.eup %22422 }
0x1465   :  { %v13620_v57 = vmul.f32 %v22423_v3, %v24910_v23  ;;  %v22425_v36 = vpop.eup %22424 }
0x1466   :  { %v13618_v0 = vmul.f32 %v22425_v36, %v24936_v32  ;;  %v22427_v17 = vpop.eup %22426  ;;  %v27298_v32 = vld [vmem:[#allocation70_spill] sm:$0xff] }
0x1467   :  { %13684 = vperm.xlu1 %22252, %v13630_v39   ;;  %v13616_v8 = vmul.f32 %v22427_v17, %v27296_v49  ;;  %v27330_v39 = vld [vmem:[#allocation43_spill] sm:$0xff] }
0x1468   :  { %v12687_v31 = vpop.f32.mrf.mxu1 }
0x1469   :  { %v12688_v59 = vadd.f32 %v12687_v31, %v12607_v10 }
0x146a   :  { %v21320_v50 = vpop.f32.mrf.mxu1 }
0x146b   :  { %13679 = vperm.xlu1 %22252, %v13628_v41   ;;  %v27331_v41 = vld [vmem:[#allocation32_spill] sm:$0xff]  ;;  %v27332_v50 = vld [vmem:[#allocation41_spill] sm:$0xff] }
0x146f   :  { %13659 = vperm.xlu1 %22252, %v13620_v57  }
0x1471   :  { %v12782_v18 = vpop.f32.mrf.mxu0 }
0x1472   :  { %v12783_v20 = vadd.f32 %v12782_v18, %v12688_v59 }
0x1473   :  { %13654 = vperm.xlu1 %22252, %v13618_v0   ;;  %v21339_v52 = vpop.f32.mrf.mxu0 }
0x1474   :  { %v27333_v52 = vld [vmem:[#allocation42_spill] sm:$0xff] }
0x1477   :  { %13649 = vperm.xlu1 %22252, %v13616_v8  }
0x1478   :  { %v12861_v46 = vpop.f32.mrf.mxu1 }
0x1479   :  { %v12862_v2 = vadd.f32 %v12861_v46, %v12783_v20 }
0x147a   :  { %v21358_v5 = vpop.f32.mrf.mxu1 }
0x147b   :  { %v12866_v11 = vsel %vm11577_vm11, %v12862_v2, 0 }
0x147c   :  { %v12899_v61 = vand.u32 4294901760, %v12866_v11 }
0x147e   :  { %v13046_v23 = vsub.f32 %v12866_v11, %v12899_v61  ;;  %21359 = vmatprep.subr.mxu0 %v12899_v61 }
0x147f   :  { %21360 = vmatpush3.msra.mxu0 %v12899_v61 }
0x1480   :  { %21362 = vmatmul.mubr.f32.vlgmr.msra.gmra.mxu0 %v27297_v33  ;;  %v13047_v15 = vand.u32 4294901760, %v13046_v23  ;;  %21387 = vmatprep.subr.mxu0 %v13046_v23  ;;  %v27334_v33 = vld [vmem:[#allocation33_spill] sm:$0xff] }
0x1481   :  { %21364 = vmatprep.mubr.f32.mxu0 %v27298_v32  ;;  %21388 = vmatpush3.msra.mxu0 %v13046_v23 }
0x1482   :  { %v13048_v55 = vsub.f32 %v13046_v23, %v13047_v15  ;;  %21415 = vmatprep.subr.mxu0 %v13047_v15 }
0x1484   :  { %v13049_v14 = vand.u32 4294901760, %v13048_v55  ;;  %21365 = vmatmul.mubr.f32.gmra.mxu0 %v27299_v54 }
0x1485   :  { %21367 = vmatprep.mubr.f32.mxu0 %v27300_v42 }
0x1486   :  { %21373 = vmatprep.subr.mxu1 %v13049_v14 }
0x1487   :  { %21374 = vmatpush3.msra.mxu1 %v13049_v14 }
0x1488   :  { %21376 = vmatmul.mubr.f32.vlgmr.msra.gmra.mxu1 %v27301_v29  ;;  %21368 = vmatmul.mubr.f32.gmra.mxu0 %v27302_v19 }
0x1489   :  { %21378 = vmatprep.mubr.f32.mxu1 %v27303_v25  ;;  %21370 = vmatprep.mubr.f32.mxu0 %v27304_v4 }
0x148a   :  { %21401 = vmatprep.subr.mxu1 %v12899_v61 }
0x148b   :  { %21402 = vmatpush3.msra.mxu1 %v12899_v61 }
0x148c   :  { %21379 = vmatmul.mubr.f32.gmra.mxu1 %v27305_v9  ;;  %21371 = vmatmul.mubr.f32.gmra.mxu0 %v27306_v38 }
0x148d   :  { %21381 = vmatprep.mubr.f32.mxu1 %v27307_v37  ;;  %21389 = vmatprep.mubr.f32.mxu0 %v27308_v45 }
0x148e   :  { %21429 = vmatprep.subr.mxu1 %v12899_v61 }
0x1490   :  { %21382 = vmatmul.mubr.f32.gmra.mxu1 %v27309_v13  ;;  %21390 = vmatmul.mubr.f32.vlgmr.msra.gmra.mxu0 %v27310_v28 }
0x1491   :  { %21384 = vmatprep.mubr.f32.mxu1 %v27311_v6  ;;  %21392 = vmatprep.mubr.f32.mxu0 %v27312_v26 }
0x1492   :  { %21416 = vmatpush3.msra.mxu0 %v13047_v15 }
0x1493   :  { %21443 = vmatprep.subr.mxu0 %v27313_v40 }
0x1494   :  { %21385 = vmatmul.mubr.f32.gmra.mxu1 %v27314_v27  ;;  %21393 = vmatmul.mubr.f32.gmra.mxu0 %v27315_v24  ;;  %v27336_v24 = vld [vmem:[#allocation31_spill] sm:$0xff] }
0x1495   :  { %21403 = vmatprep.mubr.f32.mxu1 %v27316_v63  ;;  %21395 = vmatprep.mubr.f32.mxu0 %v27317_v48 }
0x1498   :  { %21404 = vmatmul.mubr.f32.vlgmr.msra.gmra.mxu1 %v27318_v51  ;;  %21396 = vmatmul.mubr.f32.gmra.mxu0 %v27319_v34 }
0x1499   :  { %21406 = vmatprep.mubr.f32.mxu1 %v27320_v53  ;;  %21398 = vmatprep.mubr.f32.mxu0 %v27321_v44 }
0x149a   :  { %21430 = vmatpush3.msra.mxu1 %v12899_v61 }
0x149b   :  { %21462 = vmatprep.subr.mxu1 %v27313_v40 }
0x149c   :  { %21407 = vmatmul.mubr.f32.gmra.mxu1 %v27322_v35  ;;  %21399 = vmatmul.mubr.f32.gmra.mxu0 %v27323_v62 }
0x149d   :  { %21409 = vmatprep.mubr.f32.mxu1 %v27324_v43  ;;  %21417 = vmatprep.mubr.f32.mxu0 %v27325_v7 }
0x14a0   :  { %21410 = vmatmul.mubr.f32.gmra.mxu1 %v27326_v58  ;;  %21418 = vmatmul.mubr.f32.vlgmr.msra.gmra.mxu0 %v27301_v29  ;;  %v27337_v58 = vld [vmem:[#allocation36_spill] sm:$0xff] }
0x14a1   :  { %21412 = vmatprep.mubr.f32.mxu1 %v27327_v47  ;;  %21420 = vmatprep.mubr.f32.mxu0 %v27303_v25 }
0x14a4   :  { %21413 = vmatmul.mubr.f32.gmra.mxu1 %v27328_v30  ;;  %21421 = vmatmul.mubr.f32.gmra.mxu0 %v27305_v9 }
0x14a5   :  { %21431 = vmatprep.mubr.f32.mxu1 %v27325_v7  ;;  %21423 = vmatprep.mubr.f32.mxu0 %v27307_v37 }
0x14a8   :  { %21432 = vmatmul.mubr.f32.vlgmr.msra.gmra.mxu1 %v27301_v29  ;;  %21424 = vmatmul.mubr.f32.gmra.mxu0 %v27309_v13 }
0x14a9   :  { %21434 = vmatprep.mubr.f32.mxu1 %v27303_v25  ;;  %21426 = vmatprep.mubr.f32.mxu0 %v27311_v6 }
0x14ac   :  { %21435 = vmatmul.mubr.f32.gmra.mxu1 %v27305_v9  ;;  %21427 = vmatmul.mubr.f32.gmra.mxu0 %v27314_v27  ;;  %v27335_v9 = vld [vmem:[#allocation30_spill] sm:$0xff] }
0x14ad   :  { %21437 = vmatprep.mubr.f32.mxu1 %v27307_v37  ;;  %21459 = vmatprep.mubr.msk.f32.mxu0 %vm22729_vm7, %v27313_v40 }
0x14b0   :  { %21438 = vmatmul.mubr.f32.gmra.mxu1 %v27309_v13 }
0x14b1   :  { %21440 = vmatprep.mubr.f32.mxu1 %v27311_v6 }
0x14b4   :  { %21441 = vmatmul.mubr.f32.gmra.mxu1 %v27314_v27 }
0x14b5   :  { %21478 = vmatprep.mubr.msk.f32.mxu1 %vm22729_vm7, %v27313_v40 }
0x14d4   :  { %v13665_v22 = vpop.permute.xlu1 %13664 }
0x14d5   :  { %v13690_v3 = vmul.f32 %v13665_v22, %v27331_v41 }
0x14d7   :  { %v25694_v0 = vand.u32 4294901760, %v13690_v3 }
0x14d9   :  { %v25710_v11 = vsub.f32 %v13690_v3, %v25694_v0 }
0x14da   :  { %v13675_v60 = vpop.permute.xlu1 %13674 }
0x14db   :  { %v13692_v56 = vmul.f32 %v13675_v60, %v27329_v1  ;;  %v13825_v19 = vand.u32 4294901760, %v25710_v11 }
0x14dd   :  { %v25683_v31 = vand.u32 4294901760, %v13692_v56  ;;  %v13826_v26 = vsub.f32 %v25710_v11, %v13825_v19 }
0x14de   :  { %v13670_v21 = vpop.permute.xlu1 %13669 }
0x14df   :  { %v13691_v12 = vmul.f32 %v13670_v21, %v27330_v39  ;;  %v25692_v59 = vsub.f32 %v13692_v56, %v25683_v31  ;;  %v13827_v43 = vand.u32 4294901760, %v13826_v26  ;;  %v27338_v56 = vld [vmem:[#allocation34_spill] sm:$0xff]  ;;  %v27339_v21 = vld [vmem:[#allocation37_spill] sm:$0xff] }
0x14e1   :  { %v25687_v57 = vand.u32 4294901760, %v13691_v12  ;;  %v13811_v2 = vand.u32 4294901760, %v25692_v59 }
0x14e2   :  { %v13685_v16 = vpop.permute.xlu1 %13684 }
0x14e3   :  { %v13694_v10 = vmul.f32 %v13685_v16, %v27332_v50  ;;  %v25703_v49 = vsub.f32 %v13691_v12, %v25687_v57  ;;  %v13812_v42 = vsub.f32 %v25692_v59, %v13811_v2  ;;  %v27340_v12 = vld [vmem:[#allocation38_spill] sm:$0xff]  ;;  %v27342_v16 = vld [vmem:[#allocation35_spill] sm:$0xff] }
0x14e5   :  { %v25689_v36 = vand.u32 4294901760, %v13694_v10  ;;  %v13818_v32 = vand.u32 4294901760, %v25703_v49  ;;  %v13813_v48 = vand.u32 4294901760, %v13812_v42 }
0x14e6   :  { %v13680_v18 = vpop.permute.xlu1 %13679 }
0x14e7   :  { %v25697_v17 = vsub.f32 %v13694_v10, %v25689_v36  ;;  %v13693_v20 = vmul.f32 %v13680_v18, %v27333_v52  ;;  %21444 = vmatpush3.msra.mxu0 %v25689_v36  ;;  %v13819_v37 = vsub.f32 %v25703_v49, %v13818_v32 }
0x14e8   :  { %21445 = vmatprep.subr.mxu0 %v27313_v40 }
0x14e9   :  { %v13797_v8 = vand.u32 4294901760, %v25697_v17  ;;  %v25706_v46 = vand.u32 4294901760, %v13693_v20  ;;  %v13820_v44 = vand.u32 4294901760, %v13819_v37 }
0x14ea   :  { %v13660_v5 = vpop.permute.xlu1 %13659 }
0x14eb   :  { %v13798_v61 = vsub.f32 %v25697_v17, %v13797_v8  ;;  %v25716_v23 = vsub.f32 %v13693_v20, %v25706_v46  ;;  %v13689_v15 = vmul.f32 %v13660_v5, %v27334_v33  ;;  %21446 = vmatpush3.msra.mxu0 %v25706_v46 }
0x14ec   :  { %21447 = vmatprep.subr.mxu0 %v27313_v40 }
0x14ed   :  { %v13804_v55 = vand.u32 4294901760, %v25716_v23  ;;  %v25723_v14 = vand.u32 4294901760, %v13689_v15  ;;  %21448 = vmatpush3.msra.mxu0 %v25683_v31  ;;  %v13799_v54 = vand.u32 4294901760, %v13798_v61 }
0x14ee   :  { %21449 = vmatprep.subr.mxu0 %v27313_v40  ;;  %v13655_v29 = vpop.permute.xlu1 %13654 }
0x14ef   :  { %v13805_v25 = vsub.f32 %v25716_v23, %v13804_v55  ;;  %v25735_v4 = vsub.f32 %v13689_v15, %v25723_v14  ;;  %v13688_v38 = vmul.f32 %v13655_v29, %v27335_v9  ;;  %21450 = vmatpush3.msra.mxu0 %v25687_v57  ;;  %21463 = vmatpush3.msra.mxu1 %v13799_v54 }
0x14f0   :  { %21451 = vmatprep.subr.mxu0 %v27313_v40  ;;  %21464 = vmatprep.subr.mxu1 %v27313_v40 }
0x14f1   :  { %v13832_v45 = vand.u32 4294901760, %v25735_v4  ;;  %v25745_v13 = vand.u32 4294901760, %v13688_v38  ;;  %21452 = vmatpush3.msra.mxu0 %v25694_v0  ;;  %v13806_v28 = vand.u32 4294901760, %v13805_v25 }
0x14f2   :  { %21453 = vmatprep.subr.mxu0 %v27313_v40  ;;  %v13650_v6 = vpop.permute.xlu1 %13649 }
0x14f3   :  { %v25753_v27 = vsub.f32 %v13688_v38, %v25745_v13  ;;  %v13687_v63 = vmul.f32 %v13650_v6, %v27336_v24  ;;  %21454 = vmatpush3.msra.mxu0 %v25723_v14  ;;  %21465 = vmatpush3.msra.mxu1 %v13806_v28  ;;  %v13833_v51 = vsub.f32 %v25735_v4, %v13832_v45 }
0x14f4   :  { %21455 = vmatprep.subr.mxu0 %v27313_v40  ;;  %21466 = vmatprep.subr.mxu1 %v27313_v40 }
0x14f5   :  { %v13839_v34 = vand.u32 4294901760, %v25753_v27  ;;  %v25763_v53 = vand.u32 4294901760, %v13687_v63  ;;  %21456 = vmatpush3.msra.mxu0 %v25745_v13  ;;  %21467 = vmatpush3.msra.mxu1 %v13813_v48  ;;  %v13834_v47 = vand.u32 4294901760, %v13833_v51 }
0x14f6   :  { %21457 = vmatprep.subr.mxu0 %v27313_v40  ;;  %21468 = vmatprep.subr.mxu1 %v27313_v40 }
0x14f7   :  { %v13840_v35 = vsub.f32 %v25753_v27, %v13839_v34  ;;  %v25772_v62 = vsub.f32 %v13687_v63, %v25763_v53  ;;  %21458 = vmatpush3.msra.mxu0 %v25763_v53  ;;  %21469 = vmatpush3.msra.mxu1 %v13820_v44 }
0x14f8   :  { %21470 = vmatprep.subr.mxu1 %v27313_v40  ;;  %21481 = vmatprep.subr.mxu0 %v27313_v40 }
0x14f9   :  { %v13846_v7 = vand.u32 4294901760, %v25772_v62  ;;  %21460 = vmatmul.mubr.f32.vlgmr.msra.gmra.mxu0 %v27337_v58  ;;  %21471 = vmatpush3.msra.mxu1 %v13827_v43  ;;  %v13841_v22 = vand.u32 4294901760, %v13840_v35 }
0x14fa   :  { %21482 = vmatpush3.msra.mxu0 %v25697_v17  ;;  %21472 = vmatprep.subr.mxu1 %v27313_v40 }
0x14fb   :  { %v13847_v30 = vsub.f32 %v25772_v62, %v13846_v7  ;;  %21483 = vmatprep.subr.mxu0 %v27313_v40  ;;  %21473 = vmatpush3.msra.mxu1 %v13834_v47 }
0x14fc   :  { %21484 = vmatpush3.msra.mxu0 %v25716_v23  ;;  %21474 = vmatprep.subr.mxu1 %v27313_v40 }
0x14fd   :  { %21485 = vmatprep.subr.mxu0 %v27313_v40  ;;  %21475 = vmatpush3.msra.mxu1 %v13841_v22  ;;  %v13848_v60 = vand.u32 4294901760, %v13847_v30 }
0x14fe   :  { %21486 = vmatpush3.msra.mxu0 %v25692_v59  ;;  %21476 = vmatprep.subr.mxu1 %v27313_v40 }
0x14ff   :  { %21487 = vmatprep.subr.mxu0 %v27313_v40  ;;  %21477 = vmatpush3.msra.mxu1 %v13848_v60 }
0x1500   :  { %21488 = vmatpush3.msra.mxu0 %v25703_v49  ;;  %21500 = vmatprep.subr.mxu1 %v27313_v40 }
0x1501   :  { %21489 = vmatprep.subr.mxu0 %v27313_v40  ;;  %21479 = vmatmul.mubr.f32.vlgmr.msra.gmra.mxu1 %v27338_v56 }
0x1502   :  { %21490 = vmatpush3.msra.mxu0 %v25710_v11  ;;  %21501 = vmatpush3.msra.mxu1 %v25689_v36 }
0x1503   :  { %21491 = vmatprep.subr.mxu0 %v27313_v40  ;;  %21502 = vmatprep.subr.mxu1 %v27313_v40 }
0x1504   :  { %21492 = vmatpush3.msra.mxu0 %v25735_v4  ;;  %21503 = vmatpush3.msra.mxu1 %v25706_v46 }
0x1505   :  { %21493 = vmatprep.subr.mxu0 %v27313_v40  ;;  %21504 = vmatprep.subr.mxu1 %v27313_v40 }
0x1506   :  { %21494 = vmatpush3.msra.mxu0 %v25753_v27  ;;  %21505 = vmatpush3.msra.mxu1 %v25683_v31 }
0x1507   :  { %21495 = vmatprep.subr.mxu0 %v27313_v40  ;;  %21506 = vmatprep.subr.mxu1 %v27313_v40 }
0x1508   :  { %21496 = vmatpush3.msra.mxu0 %v25772_v62  ;;  %21497 = vmatprep.mubr.msk.f32.mxu0 %vm22729_vm7, %v27313_v40 }
0x1509   :  { %21507 = vmatpush3.msra.mxu1 %v25687_v57  ;;  %21498 = vmatmul.mubr.f32.vlgmr.msra.gmra.mxu0 %v27339_v21 }
0x150a   :  { %21508 = vmatprep.subr.mxu1 %v27313_v40  ;;  %21519 = vmatprep.subr.mxu0 %v27313_v40 }
0x150b   :  { %21509 = vmatpush3.msra.mxu1 %v25694_v0  ;;  %21520 = vmatpush3.msra.mxu0 %v13797_v8 }
0x150c   :  { %21510 = vmatprep.subr.mxu1 %v27313_v40  ;;  %21521 = vmatprep.subr.mxu0 %v27313_v40 }
0x150d   :  { %21511 = vmatpush3.msra.mxu1 %v25723_v14  ;;  %21522 = vmatpush3.msra.mxu0 %v13804_v55 }
0x150e   :  { %21512 = vmatprep.subr.mxu1 %v27313_v40  ;;  %21523 = vmatprep.subr.mxu0 %v27313_v40 }
0x150f   :  { %21513 = vmatpush3.msra.mxu1 %v25745_v13  ;;  %21524 = vmatpush3.msra.mxu0 %v13811_v2 }
0x1510   :  { %21514 = vmatprep.subr.mxu1 %v27313_v40  ;;  %21525 = vmatprep.subr.mxu0 %v27313_v40 }
0x1511   :  { %21515 = vmatpush3.msra.mxu1 %v25763_v53  ;;  %21516 = vmatprep.mubr.msk.f32.mxu1 %vm22729_vm7, %v27313_v40 }
0x1512   :  { %21526 = vmatpush3.msra.mxu0 %v13818_v32  ;;  %21517 = vmatmul.mubr.f32.vlgmr.msra.gmra.mxu1 %v27340_v12 }
0x1513   :  { %21527 = vmatprep.subr.mxu0 %v27313_v40  ;;  %21538 = vmatprep.subr.mxu1 %v27313_v40 }
0x1514   :  { %21528 = vmatpush3.msra.mxu0 %v13825_v19  ;;  %21539 = vmatpush3.msra.mxu1 %v25689_v36 }
0x1515   :  { %21529 = vmatprep.subr.mxu0 %v27313_v40  ;;  %21540 = vmatprep.subr.mxu1 %v27313_v40 }
0x1516   :  { %21530 = vmatpush3.msra.mxu0 %v13832_v45  ;;  %21541 = vmatpush3.msra.mxu1 %v25706_v46 }
0x1517   :  { %21531 = vmatprep.subr.mxu0 %v27313_v40  ;;  %21542 = vmatprep.subr.mxu1 %v27313_v40 }
0x1518   :  { %21532 = vmatpush3.msra.mxu0 %v13839_v34  ;;  %21543 = vmatpush3.msra.mxu1 %v25683_v31  ;;  %v27341_v31 = vld [vmem:[#allocation44_spill] sm:$0xff] }
0x1519   :  { %21533 = vmatprep.subr.mxu0 %v27313_v40  ;;  %21544 = vmatprep.subr.mxu1 %v27313_v40 }
0x151a   :  { %21534 = vmatpush3.msra.mxu0 %v13846_v7  ;;  %21535 = vmatprep.mubr.msk.f32.mxu0 %vm22729_vm7, %v27313_v40 }
0x151b   :  { %21545 = vmatpush3.msra.mxu1 %v25687_v57  ;;  %21536 = vmatmul.mubr.f32.vlgmr.msra.gmra.mxu0 %v27338_v56 }
0x151c   :  { %21546 = vmatprep.subr.mxu1 %v27313_v40  ;;  %21557 = vmatprep.subr.mxu0 %v27313_v40 }
0x151d   :  { %21547 = vmatpush3.msra.mxu1 %v25694_v0  ;;  %21558 = vmatpush3.xpose.msra.mxu0 %v27341_v31 }
0x151e   :  { %21548 = vmatprep.subr.mxu1 %v27313_v40  ;;  %21554 = vmatprep.mubr.msk.f32.mxu1 %vm22729_vm7, %v27313_v40 }
0x151f   :  { %21549 = vmatpush3.msra.mxu1 %v25723_v14  ;;  %21559 = vmatprep.mubr.msk.f32.mxu0 %vm22729_vm7, %v27313_v40 }
0x1520   :  { %21550 = vmatprep.subr.mxu1 %v27313_v40  ;;  %21567 = vmatprep.subr.mxu0 %v27313_v40 }
0x1521   :  { %21551 = vmatpush3.msra.mxu1 %v25745_v13 }
0x1522   :  { %21552 = vmatprep.subr.mxu1 %v27313_v40 }
0x1523   :  { %21553 = vmatpush3.msra.mxu1 %v25763_v53 }
0x1524   :  { %21555 = vmatmul.mubr.f32.vlgmr.msra.gmra.mxu1 %v27338_v56  ;;  %21562 = vmatprep.subr.mxu1 %v27313_v40 }
0x1525   :  { %21563 = vmatpush3.xpose.msra.mxu1 %v27342_v16  ;;  %21564 = vmatprep.mubr.msk.f32.mxu1 %vm22729_vm7, %v27313_v40 }
0x1526   :  { %21572 = vmatprep.subr.mxu1 %v27313_v40 }
0x1540   :  { %v21363_v3 = vpop.f32.mrf.mxu0 }
0x1541   :  { %v12951_v36 = vadd.f32 1e-05, %v21363_v3 }
0x1542   :  { %v12940_v10 = vpop.f32.mrf.mxu0 }
0x1543   :  { %v12941_v15 = vadd.f32 1e-05, %v12940_v10 }
0x1544   :  { %v21366_v57 = vpop.f32.mrf.mxu0 }
0x1545   :  { %v12971_v20 = vadd.f32 1e-05, %v21366_v57 }
0x1546   :  { %v12960_v59 = vpop.f32.mrf.mxu0 }
0x1547   :  { %v12961_v4 = vadd.f32 1e-05, %v12960_v59 }
0x1548   :  { %v21377_v18 = vpop.f32.mrf.mxu1  ;;  %v21369_v0 = vpop.f32.mrf.mxu0 }
0x1549   :  { %v13093_v17 = vadd.f32 %v21377_v18, %v12951_v36  ;;  %v12991_v11 = vadd.f32 1e-05, %v21369_v0 }
0x154a   :  { %v13086_v49 = vpop.f32.mrf.mxu1  ;;  %v12980_v8 = vpop.f32.mrf.mxu0 }
0x154b   :  { %v13087_v25 = vadd.f32 %v13086_v49, %v12941_v15  ;;  %v12981_v27 = vadd.f32 1e-05, %v12980_v8 }
0x154c   :  { %v21380_v46 = vpop.f32.mrf.mxu1  ;;  %v21372_v2 = vpop.f32.mrf.mxu0 }
0x154d   :  { %v13105_v5 = vadd.f32 %v21380_v46, %v12971_v20  ;;  %v13011_v54 = vadd.f32 1e-05, %v21372_v2 }
0x154e   :  { %v13098_v61 = vpop.f32.mrf.mxu1  ;;  %v13000_v23 = vpop.f32.mrf.mxu0 }
0x154f   :  { %v13099_v26 = vadd.f32 %v13098_v61, %v12961_v4  ;;  %v13001_v43 = vadd.f32 1e-05, %v13000_v23 }
0x1550   :  { %v21383_v32 = vpop.f32.mrf.mxu1  ;;  %v21391_v55 = vpop.f32.mrf.mxu0 }
0x1551   :  { %v13117_v14 = vadd.f32 %v21383_v32, %v12991_v11  ;;  %v13210_v42 = vadd.f32 %v21391_v55, %v13093_v17 }
0x1552   :  { %v13110_v29 = vpop.f32.mrf.mxu1  ;;  %v13202_v19 = vpop.f32.mrf.mxu0 }
0x1553   :  { %v13203_v63 = vadd.f32 %v13202_v19, %v13087_v25  ;;  %v13111_v62 = vadd.f32 %v13110_v29, %v12981_v27 }
0x1554   :  { %v21386_v38 = vpop.f32.mrf.mxu1  ;;  %v21394_v37 = vpop.f32.mrf.mxu0 }
0x1555   :  { %v13129_v45 = vadd.f32 %v21386_v38, %v13011_v54  ;;  %v13224_v13 = vadd.f32 %v21394_v37, %v13105_v5 }
0x1556   :  { %v13122_v28 = vpop.f32.mrf.mxu1  ;;  %v13216_v6 = vpop.f32.mrf.mxu0 }
0x1557   :  { %v13217_v47 = vadd.f32 %v13216_v6, %v13099_v26  ;;  %v13123_v36 = vadd.f32 %v13122_v28, %v13001_v43 }
0x1558   :  { %v21405_v48 = vpop.f32.mrf.mxu1  ;;  %v21397_v51 = vpop.f32.mrf.mxu0 }
0x1559   :  { %v13334_v34 = vadd.f32 %v21405_v48, %v13210_v42  ;;  %v13238_v53 = vadd.f32 %v21397_v51, %v13117_v14 }
0x155a   :  { %v13325_v44 = vpop.f32.mrf.mxu1  ;;  %v13230_v35 = vpop.f32.mrf.mxu0 }
0x155b   :  { %v13326_v7 = vadd.f32 %v13325_v44, %v13203_v63  ;;  %v13231_v18 = vadd.f32 %v13230_v35, %v13111_v62 }
0x155c   :  { %v21408_v30 = vpop.f32.mrf.mxu1  ;;  %v21400_v22 = vpop.f32.mrf.mxu0 }
0x155d   :  { %v13350_v60 = vadd.f32 %v21408_v30, %v13224_v13  ;;  %v13252_v3 = vadd.f32 %v21400_v22, %v13129_v45 }
0x155e   :  { %v13341_v10 = vpop.f32.mrf.mxu1  ;;  %v13244_v57 = vpop.f32.mrf.mxu0 }
0x155f   :  { %v13342_v59 = vadd.f32 %v13341_v10, %v13217_v47  ;;  %v13245_v5 = vadd.f32 %v13244_v57, %v13123_v36 }
0x1560   :  { %v21411_v0 = vpop.f32.mrf.mxu1  ;;  %v21419_v17 = vpop.f32.mrf.mxu0 }
0x1561   :  { %v13366_v20 = vadd.f32 %v21411_v0, %v13238_v53  ;;  %v13462_v49 = vadd.f32 %v21419_v17, %v13334_v34 }
0x1562   :  { %v13357_v8 = vpop.f32.mrf.mxu1  ;;  %v13455_v46 = vpop.f32.mrf.mxu0 }
0x1563   :  { %v13358_v2 = vadd.f32 %v13357_v8, %v13231_v18  ;;  %v13456_v11 = vadd.f32 %v13455_v46, %v13326_v7 }
0x1564   :  { %v21414_v61 = vpop.f32.mrf.mxu1  ;;  %v21422_v23 = vpop.f32.mrf.mxu0 }
0x1565   :  { %v13382_v15 = vadd.f32 %v21414_v61, %v13252_v3  ;;  %v13474_v32 = vadd.f32 %v21422_v23, %v13350_v60 }
0x1566   :  { %v13373_v55 = vpop.f32.mrf.mxu1  ;;  %v13467_v14 = vpop.f32.mrf.mxu0 }
0x1567   :  { %v25879_v54 = vadd.f32 %v13373_v55, %v13245_v5  ;;  %v13468_v42 = vadd.f32 %v13467_v14, %v13342_v59 }
0x1568   :  { %v21433_v29 = vpop.f32.mrf.mxu1  ;;  %v21425_v19 = vpop.f32.mrf.mxu0 }
0x1569   :  { %v25881_v25 = vadd.f32 %v21433_v29, %v13462_v49  ;;  %v13486_v4 = vadd.f32 %v21425_v19, %v13366_v20  ;;  %v14710_v19 = vsel %vm166_vm0, %v27336_v24, 0 }
0x156a   :  { %v13569_v38 = vpop.f32.mrf.mxu1  ;;  %v13479_v37 = vpop.f32.mrf.mxu0 }
0x156b   :  { %v25883_v45 = vadd.f32 %v13569_v38, %v13456_v11  ;;  %v13480_v13 = vadd.f32 %v13479_v37, %v13358_v2  ;;  %v25902_v37 = vand.u32 4294901760, %v14710_v19 }
0x156c   :  { %v21436_v28 = vpop.f32.mrf.mxu1  ;;  %v21428_v6 = vpop.f32.mrf.mxu0 }
0x156d   :  { %v25885_v26 = vadd.f32 %v21436_v28, %v13474_v32  ;;  %v13498_v27 = vadd.f32 %v21428_v6, %v13382_v15  ;;  %27343 = vst [vmem:[#allocation39_spill] sm:$0xff] %v25902_v37  ;;  %v14713_v28 = vsel %vm166_vm0, %v27335_v9, 0  ;;  %v14716_v6 = vsel %vm166_vm0, %v27334_v33, 0 }
0x156e   :  { %v13581_v63 = vpop.f32.mrf.mxu1  ;;  %v25895_v43 = vpop.f32.mrf.mxu0  ;;  %v25911_v24 = vand.u32 4294901760, %v14713_v28  ;;  %v14719_v9 = vsel %vm166_vm0, %v27331_v41, 0  ;;  %v14722_v33 = vsel %vm166_vm0, %v27330_v39, 0  ;;  %v14725_v39 = vsel %vm166_vm0, %v27329_v1, 0 }
0x156f   :  { %v25887_v48 = vadd.f32 %v13581_v63, %v13468_v42 }
0x1570   :  { %v21439_v51 = vpop.f32.mrf.mxu1  ;;  %27344 = vst [vmem:[#allocation67_spill] sm:$0xff] %v25911_v24  ;;  %v25933_v41 = vsub.f32 %v14713_v28, %v25911_v24 }
0x1571   :  { %v25889_v34 = vadd.f32 %v21439_v51, %v13486_v4  ;;  %v25915_v51 = vsub.f32 %v14710_v19, %v25902_v37 }
0x1572   :  { %v13593_v53 = vpop.f32.mrf.mxu1  ;;  %27349 = vst [vmem:[#allocation75_spill] sm:$0xff] %v25933_v41 }
0x1573   :  { %v25891_v44 = vadd.f32 %v13593_v53, %v13480_v13  ;;  %27345 = vst [vmem:[#allocation70_spill] sm:$0xff] %v25915_v51  ;;  %v25919_v53 = vand.u32 4294901760, %v14716_v6 }
0x1574   :  { %v21442_v35 = vpop.f32.mrf.mxu1 }
0x1575   :  { %v25893_v62 = vadd.f32 %v21442_v35, %v13498_v27  ;;  %27346 = vst [vmem:[#allocation72_spill] sm:$0xff] %v25919_v53 }
0x1576   :  { %v25897_v30 = vpop.f32.mrf.mxu1 }
0x15b9   :  { %v13774_v7 = vpop.f32.mrf.mxu0 }
0x15bb   :  { %v21461_v47 = vpop.f32.mrf.mxu0 }
0x15c1   :  { %v13885_v22 = vpop.f32.mrf.mxu1 }
0x15c2   :  { %v13886_v18 = vadd.f32 %v13885_v22, %v13774_v7  ;;  %v25926_v7 = vand.u32 4294901760, %v14719_v9  ;;  %v25930_v22 = vand.u32 4294901760, %v25915_v51 }
0x15c3   :  { %v21480_v60 = vpop.f32.mrf.mxu1 }
0x15c4   :  { %27347 = vst [vmem:[#allocation74_spill] sm:$0xff] %v25926_v7  ;;  %27348 = vst [vmem:[#allocation50_spill] sm:$0xff] %v25930_v22  ;;  %v25937_v60 = vand.u32 4294901760, %v14722_v33  ;;  %v14802_v1 = vsub.f32 %v25915_v51, %v25930_v22 }
0x15c6   :  { %27350 = vst [vmem:[#allocation51_spill] sm:$0xff] %v25937_v60 }
0x15c9   :  { %v13973_v3 = vpop.f32.mrf.mxu0 }
0x15ca   :  { %v13974_v17 = vadd.f32 %v13973_v3, %v13886_v18  ;;  %v25940_v3 = vsub.f32 %v14716_v6, %v25919_v53  ;;  %v25959_v18 = vsub.f32 %v14722_v33, %v25937_v60 }
0x15cb   :  { %v21499_v10 = vpop.f32.mrf.mxu0 }
0x15cc   :  { %27351 = vst [vmem:[#allocation76_spill] sm:$0xff] %v25940_v3  ;;  %v14728_v10 = vsel %vm166_vm0, %v27333_v52, 0  ;;  %v25956_v52 = vsub.f32 %v14719_v9, %v25926_v7  ;;  %27355 = vst [vmem:[#allocation55_spill] sm:$0xff] %v25959_v18 }
0x15ce   :  { %27354 = vst [vmem:[#allocation77_spill] sm:$0xff] %v25956_v52 }
0x15d2   :  { %v14054_v57 = vpop.f32.mrf.mxu1 }
0x15d3   :  { %v14055_v20 = vadd.f32 %v14054_v57, %v13974_v17  ;;  %v27352_v57 = vld [vmem:[#allocation45_spill] sm:$0xff]  ;;  %v25969_v17 = vand.u32 4294901760, %v25940_v3 }
0x15d4   :  { %v21518_v36 = vpop.f32.mrf.mxu1 }
0x15d5   :  { %v25946_v36 = vand.u32 4294901760, %v14725_v39  ;;  %27356 = vst [vmem:[#allocation48_spill] sm:$0xff] %v25969_v17 }
0x15db   :  { %v14149_v59 = vpop.f32.mrf.mxu0 }
0x15dc   :  { %v14150_v49 = vadd.f32 %v14149_v59, %v14055_v20  ;;  %v25953_v59 = vand.u32 4294901760, %v25933_v41  ;;  %v27357_v20 = vld [vmem:[#allocation46_spill] sm:$0xff] }
0x15dd   :  { %v21537_v0 = vpop.f32.mrf.mxu0 }
0x15de   :  { %27353 = vst [vmem:[#allocation54_spill] sm:$0xff] %v25953_v59  ;;  %v25963_v0 = vand.u32 4294901760, %v14728_v10 }
0x15e4   :  { %v14228_v8 = vpop.f32.mrf.mxu1 }
0x15e5   :  { %v14229_v46 = vadd.f32 %v14228_v8, %v14150_v49  ;;  %v25975_v49 = vsub.f32 %v14725_v39, %v25946_v36  ;;  %v14812_v8 = vsub.f32 %v25933_v41, %v25953_v59 }
0x15e6   :  { %v21556_v2 = vpop.f32.mrf.mxu1 }
0x15e7   :  { %v14232_v5 = vmul.f32 %v14229_v46, %v14229_v46  ;;  %27358 = vst [vmem:[#allocation59_spill] sm:$0xff] %v25975_v49  ;;  %v25987_v2 = vsub.f32 %v14728_v10, %v25963_v0 }
0x15e9   :  { %v14234_v11 = vsel %vm14233_vm12, %v14232_v5, 0.0  ;;  %27360 = vst [vmem:[#allocation61_spill] sm:$0xff] %v25987_v2  ;;  %v25992_v5 = vand.u32 4294901760, %v14802_v1 }
0x15ea   :  { %14235 = vadd.xlane.f32.xlu1 %v14234_v11  ;;  %v14822_v11 = vsub.f32 %v25940_v3, %v25969_v17 }
0x1673   :  { %v14236_v61 = vpop.xlane.xlu1 %14235 }
0x1674   :  { %22428 = vrsqrt.f32 %v14236_v61  ;;  %vm14239_vm13 = vcmp.eq.f32.partialorder %v14236_v61, inf  ;;  %v14242_v32 = vand.u32 2147483648, %v14236_v61  ;;  %vm14241_vm14 = vcmp.eq.f32.partialorder %v14236_v61, 0.0 }
0x1681   :  { %v22429_v23 = vpop.eup %22428 }
0x1682   :  { %v14238_v15 = vmul.f32 %v22429_v23, %v14236_v61 }
0x1684   :  { %v14240_v55 = vsel %vm14239_vm13, %v14236_v61, %v14238_v15  ;;  %v25997_v61 = vand.u32 4294901760, %v25959_v18  ;;  %v26007_v15 = vand.u32 4294901760, %v14812_v8 }
0x1685   :  { %v14243_v14 = vsel %vm14241_vm14, %v14242_v32, %v14240_v55  ;;  %v26012_v55 = vand.u32 4294901760, %v25975_v49 }
0x1686   :  { %v14244_v42 = vadd.f32 1e-09, %v14243_v14  ;;  %27361 = vst [vmem:[#allocation53_spill] sm:$0xff] %v25997_v61  ;;  %27363 = vst [vmem:[#allocation58_spill] sm:$0xff] %v26007_v15  ;;  %v26014_v14 = vand.u32 4294901760, %v14822_v11 }
0x1687   :  { %27364 = vst [vmem:[#allocation49_spill] sm:$0xff] %v26012_v55 }
0x1688   :  { %22430 = vrcp.f32 %v14244_v42  ;;  %27365 = vst [vmem:[#allocation60_spill] sm:$0xff] %v26014_v14  ;;  %v14842_v42 = vsub.f32 %v25959_v18, %v25997_v61 }
0x1689   :  { %22432 = vrcp.f32 %v25885_v26 }
0x168a   :  { %22434 = vrcp.f32 %v25889_v34 }
0x168b   :  { %22436 = vrcp.f32 %v25891_v44 }
0x168c   :  { %22438 = vrcp.f32 %v25887_v48 }
0x168d   :  { %22440 = vrcp.f32 %v25893_v62 }
0x168e   :  { %22442 = vrcp.f32 %v25881_v25 }
0x1695   :  { %v22431_v29 = vpop.eup %22430 }
0x1696   :  { %v14246_v4 = vmul.f32 %v22431_v29, %v14229_v46  ;;  %v25984_v46 = vand.u32 4294901760, %v25956_v52  ;;  %v26019_v29 = vand.u32 4294901760, %v25987_v2 }
0x1698   :  { %v14248_v38 = vsel %vm166_vm0, %v14246_v4, 0  ;;  %27359 = vst [vmem:[#allocation52_spill] sm:$0xff] %v25984_v46  ;;  %v14832_v32 = vsub.f32 %v25956_v52, %v25984_v46  ;;  %27366 = vst [vmem:[#allocation56_spill] sm:$0xff] %v26019_v29  ;;  %v14852_v4 = vsub.f32 %v25975_v49, %v26012_v55  ;;  %v14862_v28 = vsub.f32 %v25987_v2, %v26019_v29 }
0x1699   :  { %v14316_v13 = vand.u32 4294901760, %v14248_v38 }
0x169a   :  { %v26027_v19 = vand.u32 4294901760, %v14832_v32  ;;  %v26042_v6 = vand.u32 4294901760, %v14852_v4 }
0x169b   :  { %v14317_v27 = vsub.f32 %v14248_v38, %v14316_v13  ;;  %21565 = vmatmul.mubr.f32.vlgmr.msra.gmra.mxu1 %v14316_v13 }
0x169c   :  { %21573 = vmatpush3.xpose.msra.mxu1 %v27341_v31  ;;  %21574 = vmatprep.mubr.msk.f32.mxu1 %vm22729_vm7, %v27313_v40  ;;  %27367 = vst [vmem:[#allocation63_spill] sm:$0xff] %v26027_v19  ;;  %27370 = vst [vmem:[#allocation62_spill] sm:$0xff] %v26042_v6 }
0x169d   :  { %21582 = vmatprep.subr.mxu1 %v27313_v40  ;;  %v14318_v63 = vand.u32 4294901760, %v14317_v27 }
0x169f   :  { %21575 = vmatmul.mubr.f32.vlgmr.msra.gmra.mxu1 %v14318_v63  ;;  %v14319_v35 = vsub.f32 %v14317_v27, %v14318_v63  ;;  %v26046_v63 = vand.u32 4294901760, %v14862_v28 }
0x16a0   :  { %21583 = vmatpush3.xpose.msra.mxu1 %v27341_v31  ;;  %21584 = vmatprep.mubr.msk.f32.mxu1 %vm22729_vm7, %v27313_v40 }
0x16a1   :  { %21601 = vmatprep.subr.mxu1 %v27342_v16  ;;  %v14320_v47 = vand.u32 4294901760, %v14319_v35  ;;  %27371 = vst [vmem:[#allocation69_spill] sm:$0xff] %v26046_v63 }
0x16a3   :  { %21560 = vmatmul.mubr.f32.vlgmr.msra.gmra.mxu0 %v14320_v47  ;;  %21585 = vmatmul.mubr.f32.vlgmr.msra.gmra.mxu1 %v14316_v13 }
0x16a4   :  { %21568 = vmatpush3.xpose.msra.mxu0 %v27352_v57  ;;  %21602 = vmatpush3.xpose.msra.mxu1 %v27342_v16  ;;  %v14731_v16 = vsel %vm166_vm0, %v27332_v50, 0 }
0x16a5   :  { %21603 = vmatprep.mubr.f32.mxu1 %v25902_v37  ;;  %21629 = vmatprep.subr.mxu1 %v27341_v31  ;;  %v25977_v50 = vand.u32 4294901760, %v14731_v16 }
0x16a6   :  { %21569 = vmatprep.mubr.msk.f32.mxu0 %vm22729_vm7, %v27313_v40  ;;  %21577 = vmatprep.subr.mxu0 %v27313_v40 }
0x16a7   :  { %21570 = vmatmul.mubr.f32.vlgmr.msra.gmra.mxu0 %v14317_v27  ;;  %21604 = vmatmul.mubr.f32.vlgmr.msra.gmra.mxu1 %v25911_v24  ;;  %v26003_v23 = vsub.f32 %v14731_v16, %v25977_v50 }
0x16a8   :  { %21578 = vmatpush3.xpose.msra.mxu0 %v27357_v20  ;;  %21630 = vmatpush3.xpose.msra.mxu1 %v27341_v31 }
0x16a9   :  { %21587 = vmatprep.subr.mxu0 %v27341_v31  ;;  %21606 = vmatprep.mubr.f32.mxu1 %v25919_v53  ;;  %27362 = vst [vmem:[#allocation64_spill] sm:$0xff] %v26003_v23  ;;  %v26032_v38 = vand.u32 4294901760, %v26003_v23 }
0x16aa   :  { %21657 = vmatprep.subr.mxu1 %v27341_v31  ;;  %21579 = vmatprep.mubr.msk.f32.mxu0 %vm22729_vm7, %v27313_v40 }
0x16ab   :  { %21580 = vmatmul.mubr.f32.vlgmr.msra.gmra.mxu0 %v14316_v13  ;;  %21607 = vmatmul.mubr.f32.gmra.mxu1 %v25926_v7  ;;  %27368 = vst [vmem:[#allocation57_spill] sm:$0xff] %v26032_v38  ;;  %v26034_v13 = vand.u32 4294901760, %v14842_v42  ;;  %v14872_v27 = vsub.f32 %v26003_v23, %v26032_v38 }
0x16ac   :  { %21588 = vmatpush3.xpose.msra.mxu0 %v27341_v31  ;;  %21589 = vmatprep.mubr.f32.mxu0 %v25992_v5 }
0x16ad   :  { %21609 = vmatprep.mubr.f32.mxu1 %v25937_v60  ;;  %21615 = vmatprep.subr.mxu0 %v27352_v57  ;;  %27369 = vst [vmem:[#allocation66_spill] sm:$0xff] %v26034_v13  ;;  %v26053_v9 = vand.u32 4294901760, %v14872_v27 }
0x16af   :  { %21590 = vmatmul.mubr.f32.vlgmr.msra.gmra.mxu0 %v26007_v15  ;;  %21610 = vmatmul.mubr.f32.gmra.mxu1 %v25946_v36  ;;  %27372 = vst [vmem:[#allocation65_spill] sm:$0xff] %v26053_v9 }
0x16b0   :  { %21616 = vmatpush3.xpose.msra.mxu0 %v27352_v57  ;;  %21592 = vmatprep.mubr.f32.mxu0 %v26014_v14 }
0x16b1   :  { %21612 = vmatprep.mubr.f32.mxu1 %v25963_v0  ;;  %21643 = vmatprep.subr.mxu0 %v27357_v20 }
0x16b3   :  { %21593 = vmatmul.mubr.f32.gmra.mxu0 %v26027_v19  ;;  %21613 = vmatmul.mubr.f32.gmra.mxu1 %v25977_v50 }
0x16b4   :  { %21595 = vmatprep.mubr.f32.mxu0 %v26034_v13  ;;  %21631 = vmatprep.mubr.f32.mxu1 %v25930_v22 }
0x16b7   :  { %21596 = vmatmul.mubr.f32.gmra.mxu0 %v26042_v6  ;;  %21632 = vmatmul.mubr.f32.vlgmr.msra.gmra.mxu1 %v25953_v59 }
0x16b8   :  { %21658 = vmatpush3.xpose.msra.mxu1 %v27341_v31  ;;  %21598 = vmatprep.mubr.f32.mxu0 %v26046_v63 }
0x16b9   :  { %21634 = vmatprep.mubr.f32.mxu1 %v25969_v17  ;;  %21690 = vmatprep.subr.mxu1 %v27313_v40 }
0x16bb   :  { %21599 = vmatmul.mubr.f32.gmra.mxu0 %v26053_v9  ;;  %21635 = vmatmul.mubr.f32.gmra.mxu1 %v25984_v46  ;;  %v22433_v9 = vpop.eup %22432 }
0x16bc   :  { %21617 = vmatprep.mubr.f32.mxu0 %v25915_v51  ;;  %21637 = vmatprep.mubr.f32.mxu1 %v25997_v61  ;;  %v13492_v51 = vadd.f32 %v25895_v43, %v25879_v54 }
0x16be   :  { %v13606_v15 = vadd.f32 %v25897_v30, %v13492_v51 }
0x16bf   :  { %21618 = vmatmul.mubr.f32.vlgmr.msra.gmra.mxu0 %v25933_v41  ;;  %21638 = vmatmul.mubr.f32.gmra.mxu1 %v26012_v55 }
0x16c0   :  { %21644 = vmatpush3.xpose.msra.mxu0 %v27357_v20  ;;  %21620 = vmatprep.mubr.f32.mxu0 %v25940_v3  ;;  %22444 = vrcp.f32 %v13606_v15 }
0x16c1   :  { %21640 = vmatprep.mubr.f32.mxu1 %v26019_v29  ;;  %21671 = vmatprep.subr.mxu0 %v27313_v40  ;;  %22446 = vrcp.f32 %v25883_v45 }
0x16c3   :  { %21621 = vmatmul.mubr.f32.gmra.mxu0 %v25956_v52  ;;  %21641 = vmatmul.mubr.f32.gmra.mxu1 %v26032_v38 }
0x16c4   :  { %21623 = vmatprep.mubr.f32.mxu0 %v25959_v18  ;;  %21659 = vmatprep.mubr.f32.mxu1 %v25902_v37 }
0x16c7   :  { %21624 = vmatmul.mubr.f32.gmra.mxu0 %v25975_v49  ;;  %21660 = vmatmul.mubr.f32.vlgmr.msra.gmra.mxu1 %v25911_v24 }
0x16c8   :  { %21626 = vmatprep.mubr.f32.mxu0 %v25987_v2  ;;  %21662 = vmatprep.mubr.f32.mxu1 %v25919_v53 }
0x16cb   :  { %21627 = vmatmul.mubr.f32.gmra.mxu0 %v26003_v23  ;;  %21663 = vmatmul.mubr.f32.gmra.mxu1 %v25926_v7 }
0x16cc   :  { %21645 = vmatprep.mubr.f32.mxu0 %v25902_v37  ;;  %21665 = vmatprep.mubr.f32.mxu1 %v25937_v60 }
0x16cf   :  { %21646 = vmatmul.mubr.f32.vlgmr.msra.gmra.mxu0 %v25911_v24  ;;  %21666 = vmatmul.mubr.f32.gmra.mxu1 %v25946_v36 }
0x16d0   :  { %21648 = vmatprep.mubr.f32.mxu0 %v25919_v53  ;;  %21668 = vmatprep.mubr.f32.mxu1 %v25963_v0 }
0x16d3   :  { %21649 = vmatmul.mubr.f32.gmra.mxu0 %v25926_v7  ;;  %21669 = vmatmul.mubr.f32.gmra.mxu1 %v25977_v50 }
0x16d4   :  { %21651 = vmatprep.mubr.f32.mxu0 %v25937_v60  ;;  %21706 = vmatprep.mubr.msk.f32.mxu1 %vm22729_vm7, %v27313_v40 }
0x16d7   :  { %21652 = vmatmul.mubr.f32.gmra.mxu0 %v25946_v36 }
0x16d8   :  { %21654 = vmatprep.mubr.f32.mxu0 %v25963_v0 }
0x16db   :  { %21655 = vmatmul.mubr.f32.gmra.mxu0 %v25977_v50 }
0x16dc   :  { %21687 = vmatprep.mubr.msk.f32.mxu0 %vm22729_vm7, %v27313_v40 }
0x175b   :  { %v14398_v31 = vpop.f32.mrf.mxu1 }
0x175d   :  { %v21566_v33 = vpop.f32.mrf.mxu1 }
0x175f   :  { %v14546_v35 = vpop.f32.mrf.mxu1 }
0x1761   :  { %v21576_v47 = vpop.f32.mrf.mxu1 }
0x1763   :  { %v14322_v39 = vpop.f32.mrf.mxu0  ;;  %v14692_v10 = vpop.f32.mrf.mxu1 }
0x1764   :  { %v14399_v57 = vadd.f32 %v14398_v31, %v14322_v39 }
0x1765   :  { %v21561_v1 = vpop.f32.mrf.mxu0  ;;  %v21586_v16 = vpop.f32.mrf.mxu1 }
0x1767   :  { %v14472_v20 = vpop.f32.mrf.mxu0  ;;  %v21605_v8 = vpop.f32.mrf.mxu1 }
0x1768   :  { %v14473_v11 = vadd.f32 %v14472_v20, %v14399_v57 }
0x1769   :  { %v21571_v32 = vpop.f32.mrf.mxu0  ;;  %v14951_v42 = vpop.f32.mrf.mxu1 }
0x176a   :  { %v14547_v4 = vadd.f32 %v14546_v35, %v14473_v11 }
0x176b   :  { %v14620_v28 = vpop.f32.mrf.mxu0  ;;  %v21608_v27 = vpop.f32.mrf.mxu1 }
0x176c   :  { %v14621_v46 = vadd.f32 %v14620_v28, %v14547_v4 }
0x176d   :  { %v21581_v61 = vpop.f32.mrf.mxu0  ;;  %v14963_v17 = vpop.f32.mrf.mxu1 }
0x176e   :  { %v26092_v59 = vadd.f32 %v14692_v10, %v14621_v46 }
0x176f   :  { %v21591_v33 = vpop.f32.mrf.mxu0  ;;  %v21611_v47 = vpop.f32.mrf.mxu1 }
0x1770   :  { %27373 = vst [vmem:[#allocation47_spill] sm:$0xff] %v26092_v59  ;;  %v14958_v34 = vadd.f32 %v21605_v8, %v21591_v33  ;;  %v22435_v8 = vpop.eup %22434 }
0x1771   :  { %v14805_v55 = vpop.f32.mrf.mxu0  ;;  %v14975_v29 = vpop.f32.mrf.mxu1 }
0x1772   :  { %v14952_v7 = vadd.f32 %v14951_v42, %v14805_v55  ;;  %v22437_v55 = vpop.eup %22436 }
0x1773   :  { %v21594_v31 = vpop.f32.mrf.mxu0  ;;  %v21614_v39 = vpop.f32.mrf.mxu1 }
0x1774   :  { %v14970_v43 = vadd.f32 %v21608_v27, %v21594_v31 }
0x1775   :  { %v14825_v1 = vpop.f32.mrf.mxu0  ;;  %v14987_v16 = vpop.f32.mrf.mxu1 }
0x1776   :  { %v14964_v13 = vadd.f32 %v14963_v17, %v14825_v1 }
0x1777   :  { %v21597_v38 = vpop.f32.mrf.mxu0  ;;  %v21633_v57 = vpop.f32.mrf.mxu1 }
0x1778   :  { %v14982_v44 = vadd.f32 %v21611_v47, %v21597_v38  ;;  %v22439_v47 = vpop.eup %22438 }
0x1779   :  { %v14845_v20 = vpop.f32.mrf.mxu0  ;;  %v26094_v32 = vpop.f32.mrf.mxu1 }
0x177a   :  { %v14976_v51 = vadd.f32 %v14975_v29, %v14845_v20  ;;  %v22441_v20 = vpop.eup %22440 }
0x177b   :  { %v21600_v35 = vpop.f32.mrf.mxu0  ;;  %v21636_v11 = vpop.f32.mrf.mxu1 }
0x177c   :  { %v14994_v37 = vadd.f32 %v21614_v39, %v21600_v35 }
0x177d   :  { %v14865_v4 = vpop.f32.mrf.mxu0  ;;  %v15206_v61 = vpop.f32.mrf.mxu1 }
0x177e   :  { %v14988_v17 = vadd.f32 %v14987_v16, %v14865_v4  ;;  %v27374_v16 = vld [vmem:[#allocation82_spill] sm:$0xff] }
0x177f   :  { %v21619_v28 = vpop.f32.mrf.mxu0  ;;  %v21639_v46 = vpop.f32.mrf.mxu1 }
0x1780   :  { %v15075_v48 = vadd.f32 %v21619_v28, %v14958_v34 }
0x1781   :  { %v15067_v10 = vpop.f32.mrf.mxu0  ;;  %v15222_v59 = vpop.f32.mrf.mxu1 }
0x1782   :  { %v15068_v15 = vadd.f32 %v15067_v10, %v14952_v7  ;;  %v15199_v38 = vadd.f32 %v21633_v57, %v15075_v48 }
0x1783   :  { %v21622_v41 = vpop.f32.mrf.mxu0  ;;  %v26096_v22 = vpop.f32.mrf.mxu1 }
0x1784   :  { %v15089_v53 = vadd.f32 %v21622_v41, %v14970_v43 }
0x1785   :  { %v15081_v3 = vpop.f32.mrf.mxu0  ;;  %v26098_v52 = vpop.f32.mrf.mxu1 }
0x1786   :  { %v15082_v6 = vadd.f32 %v15081_v3, %v14964_v13  ;;  %v15215_v27 = vadd.f32 %v21636_v11, %v15089_v53  ;;  %v15191_v53 = vadd.f32 %v26094_v32, %v15068_v15  ;;  %v27376_v11 = vld [vmem:[#allocation80_spill] sm:$0xff] }
0x1787   :  { %v21625_v18 = vpop.f32.mrf.mxu0  ;;  %v26102_v49 = vpop.f32.mrf.mxu1  ;;  %v26120_v4 = vmul.f32 %v22435_v8, %v27376_v11  ;;  %v27384_v15 = vld [vmem:[#allocation84_spill] sm:$0xff] }
0x1788   :  { %v15103_v63 = vadd.f32 %v21625_v18, %v14982_v44  ;;  %v15207_v45 = vadd.f32 %v15206_v61, %v15082_v6  ;;  %v27382_v44 = vld [vmem:[#allocation78_spill] sm:$0xff] }
0x1789   :  { %v15095_v2 = vpop.f32.mrf.mxu0  ;;  %v26105_v23 = vpop.f32.mrf.mxu1  ;;  %27377 = vst [vmem:[#allocation71_spill] sm:$0xff] %v26120_v4 }
0x178a   :  { %v15096_v25 = vadd.f32 %v15095_v2, %v14976_v51  ;;  %v15231_v29 = vadd.f32 %v21639_v46, %v15103_v63  ;;  %v22443_v63 = vpop.eup %22442 }
0x178b   :  { %v21628_v14 = vpop.f32.mrf.mxu0  ;;  %v21664_v19 = vpop.f32.mrf.mxu1 }
0x178c   :  { %v15117_v41 = vadd.f32 %v21628_v14, %v14994_v37  ;;  %v15223_v42 = vadd.f32 %v15222_v59, %v15096_v25  ;;  %v26116_v37 = vmul.f32 %v22433_v9, %v27374_v16  ;;  %v22445_v28 = vpop.eup %22444 }
0x178d   :  { %v15109_v54 = vpop.f32.mrf.mxu0  ;;  %v15446_v26 = vpop.f32.mrf.mxu1 }
0x178e   :  { %v15110_v13 = vadd.f32 %v15109_v54, %v14988_v17  ;;  %27375 = vst [vmem:[#allocation68_spill] sm:$0xff] %v26116_v37  ;;  %v15247_v6 = vadd.f32 %v26096_v22, %v15117_v41  ;;  %v27380_v22 = vld [vmem:[#allocation83_spill] sm:$0xff]  ;;  %v22447_v48 = vpop.eup %22446 }
0x178f   :  { %v21647_v24 = vpop.f32.mrf.mxu0  ;;  %v21667_v62 = vpop.f32.mrf.mxu1  ;;  %v26128_v43 = vmul.f32 %v22439_v47, %v27380_v22  ;;  %v27386_v41 = vld [vmem:[#allocation79_spill] sm:$0xff] }
0x1790   :  { %v15327_v39 = vadd.f32 %v21647_v24, %v15199_v38  ;;  %v27378_v24 = vld [vmem:[#allocation81_spill] sm:$0xff] }
0x1791   :  { %v15320_v30 = vpop.f32.mrf.mxu0  ;;  %v15458_v33 = vpop.f32.mrf.mxu1  ;;  %v26123_v61 = vmul.f32 %v22437_v55, %v27378_v24  ;;  %27381 = vst [vmem:[#allocation40_spill] sm:$0xff] %v26128_v43 }
0x1792   :  { %v15321_v57 = vadd.f32 %v15320_v30, %v15191_v53  ;;  %v15441_v54 = vadd.f32 %v26102_v49, %v15327_v39  ;;  %v26132_v30 = vmul.f32 %v22441_v20, %v27382_v44 }
0x1793   :  { %v21650_v60 = vpop.f32.mrf.mxu0  ;;  %v21670_v35 = vpop.f32.mrf.mxu1  ;;  %27379 = vst [vmem:[#allocation73_spill] sm:$0xff] %v26123_v61 }
0x1794   :  { %v15339_v1 = vadd.f32 %v21650_v60, %v15215_v27  ;;  %27383 = vst [vmem:[#allocation43_spill] sm:$0xff] %v26132_v30  ;;  %v15435_v49 = vadd.f32 %v26105_v23, %v15321_v57 }
0x1795   :  { %v15332_v31 = vpop.f32.mrf.mxu0 }
0x1796   :  { %v15333_v18 = vadd.f32 %v15332_v31, %v15207_v45  ;;  %v15453_v60 = vadd.f32 %v21664_v19, %v15339_v1  ;;  %v15239_v19 = vadd.f32 %v26098_v52, %v15110_v13  ;;  %v26137_v52 = vmul.f32 %v22443_v63, %v27384_v15  ;;  %v15470_v31 = vpop.f32.mrf.mxu1 }
0x1797   :  { %v21653_v3 = vpop.f32.mrf.mxu0  ;;  %v26143_v1 = vmul.f32 %v22445_v28, %v27386_v41 }
0x1798   :  { %v15351_v7 = vadd.f32 %v21653_v3, %v15231_v29  ;;  %v15447_v46 = vadd.f32 %v15446_v26, %v15333_v18  ;;  %27385 = vst [vmem:[#allocation32_spill] sm:$0xff] %v26137_v52  ;;  %v15481_v29 = vmul.f32 %v15441_v54, %v26137_v52  ;;  %v27388_v3 = vld [vmem:[#allocation85_spill] sm:$0xff] }
0x1799   :  { %v15344_v2 = vpop.f32.mrf.mxu0  ;;  %27387 = vst [vmem:[#allocation41_spill] sm:$0xff] %v26143_v1  ;;  %v26151_v55 = vmul.f32 %v22447_v48, %v27388_v3  ;;  %v27396_v3 = vld [vmem:[#allocation72_spill] sm:$0xff] }
0x179a   :  { %v15345_v14 = vadd.f32 %v15344_v2, %v15223_v42  ;;  %v15465_v59 = vadd.f32 %v21667_v62, %v15351_v7  ;;  %v15483_v62 = vmul.f32 %v15453_v60, %v26116_v37  ;;  %v15482_v45 = vmul.f32 %v15447_v46, %v26128_v43 }
0x179b   :  { %v21656_v32 = vpop.f32.mrf.mxu0  ;;  %27389 = vst [vmem:[#allocation42_spill] sm:$0xff] %v26151_v55  ;;  %v15480_v47 = vmul.f32 %v15435_v49, %v26151_v55  ;;  %v26173_v20 = vand.u32 4294901760, %v15481_v29 }
0x179c   :  { %v15459_v10 = vadd.f32 %v15458_v33, %v15345_v14  ;;  %v15363_v9 = vadd.f32 %v21656_v32, %v15247_v6  ;;  %v15485_v34 = vmul.f32 %v15465_v59, %v26120_v4  ;;  %v26153_v13 = vand.u32 4294901760, %v15483_v62 }
0x179d   :  { %v15356_v51 = vpop.f32.mrf.mxu0  ;;  %v26162_v39 = vand.u32 4294901760, %v15482_v45  ;;  %v26185_v63 = vand.u32 4294901760, %v15480_v47  ;;  %v26198_v24 = vsub.f32 %v15481_v29, %v26173_v20  ;;  %v27395_v29 = vld [vmem:[#allocation62_spill] sm:$0xff] }
0x179e   :  { %v15484_v26 = vmul.f32 %v15459_v10, %v26123_v61  ;;  %v15477_v25 = vadd.f32 %v21670_v35, %v15363_v9  ;;  %v15357_v27 = vadd.f32 %v15356_v51, %v15239_v19  ;;  %v26140_v17 = vand.u32 4294901760, %v15485_v34 }
0x179f   :  { %v26177_v16 = vsub.f32 %v15483_v62, %v26153_v13  ;;  %v26189_v57 = vsub.f32 %v15482_v45, %v26162_v39  ;;  %v26211_v9 = vsub.f32 %v15480_v47, %v26185_v63  ;;  %v15632_v51 = vand.u32 4294901760, %v26198_v24  ;;  %v27391_v45 = vld [vmem:[#allocation39_spill] sm:$0xff]  ;;  %v27401_v47 = vld [vmem:[#allocation58_spill] sm:$0xff] }
0x17a0   :  { %v26146_v8 = vand.u32 4294901760, %v15484_v26  ;;  %v15487_v38 = vmul.f32 %v15477_v25, %v26132_v30  ;;  %v15471_v33 = vadd.f32 %v15470_v31, %v15357_v27  ;;  %v26156_v23 = vsub.f32 %v15485_v34, %v26140_v17 }
0x17a1   :  { %v15618_v10 = vand.u32 4294901760, %v26177_v16  ;;  %v15625_v22 = vand.u32 4294901760, %v26189_v57  ;;  %v15633_v27 = vsub.f32 %v26198_v24, %v15632_v51 }
0x17a2   :  { %v26158_v18 = vand.u32 4294901760, %v15487_v38  ;;  %v15486_v42 = vmul.f32 %v15471_v33, %v26143_v1  ;;  %v26165_v53 = vsub.f32 %v15484_v26, %v26146_v8  ;;  %v15604_v6 = vand.u32 4294901760, %v26156_v23  ;;  %v27394_v33 = vld [vmem:[#allocation74_spill] sm:$0xff] }
0x17a3   :  { %v15619_v44 = vsub.f32 %v26177_v16, %v15618_v10  ;;  %v15626_v62 = vsub.f32 %v26189_v57, %v15625_v22  ;;  %v15639_v26 = vand.u32 4294901760, %v26211_v9  ;;  %v15634_v31 = vand.u32 4294901760, %v15633_v27 }
0x17a4   :  { %v26168_v7 = vsub.f32 %v15487_v38, %v26158_v18  ;;  %v26170_v2 = vand.u32 4294901760, %v15486_v42  ;;  %21672 = vmatpush3.msra.mxu0 %v26158_v18  ;;  %v15611_v59 = vand.u32 4294901760, %v26165_v53  ;;  %v15605_v46 = vsub.f32 %v26156_v23, %v15604_v6  ;;  %v27393_v38 = vld [vmem:[#allocation69_spill] sm:$0xff] }
0x17a5   :  { %21673 = vmatprep.subr.mxu0 %v27313_v40  ;;  %v15620_v25 = vand.u32 4294901760, %v15619_v44  ;;  %v15627_v15 = vand.u32 4294901760, %v15626_v62  ;;  %v15640_v49 = vsub.f32 %v26211_v9, %v15639_v26  ;;  %v26494_v44 = vand.u32 4294901760, %v26116_v37 }
0x17a6   :  { %v26180_v60 = vsub.f32 %v15486_v42, %v26170_v2  ;;  %21674 = vmatpush3.msra.mxu0 %v26170_v2  ;;  %v15590_v14 = vand.u32 4294901760, %v26168_v7  ;;  %v15612_v54 = vsub.f32 %v26165_v53, %v15611_v59  ;;  %v15606_v34 = vand.u32 4294901760, %v15605_v46  ;;  %v27400_v42 = vld [vmem:[#allocation60_spill] sm:$0xff] }
0x17a7   :  { %21675 = vmatprep.subr.mxu0 %v27313_v40  ;;  %v15641_v41 = vand.u32 4294901760, %v15640_v49  ;;  %v26463_v46 = vand.u32 4294901760, %v26143_v1  ;;  %v26516_v27 = vand.u32 4294901760, %v26137_v52  ;;  %v26523_v49 = vsub.f32 %v26116_v37, %v26494_v44 }
0x17a8   :  { %21676 = vmatpush3.msra.mxu0 %v26140_v17  ;;  %v15591_v35 = vsub.f32 %v26168_v7, %v15590_v14  ;;  %v15597_v11 = vand.u32 4294901760, %v26180_v60  ;;  %v15613_v48 = vand.u32 4294901760, %v15612_v54  ;;  %v26481_v54 = vand.u32 4294901760, %v26123_v61 }
0x17a9   :  { %21677 = vmatprep.subr.mxu0 %v27313_v40 }
0x17aa   :  { %21678 = vmatpush3.msra.mxu0 %v26146_v8  ;;  %v15592_v32 = vand.u32 4294901760, %v15591_v35  ;;  %v15598_v28 = vsub.f32 %v26180_v60, %v15597_v11  ;;  %v27414_v35 = vld [vmem:[#allocation54_spill] sm:$0xff] }
0x17ab   :  { %21679 = vmatprep.subr.mxu0 %v27313_v40 }
0x17ac   :  { %21680 = vmatpush3.msra.mxu0 %v26153_v13  ;;  %21691 = vmatpush3.msra.mxu1 %v15592_v32  ;;  %v15599_v19 = vand.u32 4294901760, %v15598_v28  ;;  %v26448_v32 = vand.u32 4294901760, %v26132_v30 }
0x17ad   :  { %21681 = vmatprep.subr.mxu0 %v27313_v40  ;;  %21692 = vmatprep.subr.mxu1 %v27313_v40 }
0x17ae   :  { %21682 = vmatpush3.msra.mxu0 %v26162_v39  ;;  %21693 = vmatpush3.msra.mxu1 %v15599_v19  ;;  %v26458_v28 = vsub.f32 %v26132_v30, %v26448_v32  ;;  %v26477_v19 = vsub.f32 %v26143_v1, %v26463_v46 }
0x17af   :  { %21683 = vmatprep.subr.mxu0 %v27313_v40  ;;  %21694 = vmatprep.subr.mxu1 %v27313_v40 }
0x17b0   :  { %21684 = vmatpush3.msra.mxu0 %v26173_v20  ;;  %21695 = vmatpush3.msra.mxu1 %v15606_v34 }
0x17b1   :  { %21685 = vmatprep.subr.mxu0 %v27313_v40  ;;  %21696 = vmatprep.subr.mxu1 %v27313_v40 }
0x17b2   :  { %21686 = vmatpush3.msra.mxu0 %v26185_v63  ;;  %21697 = vmatpush3.msra.mxu1 %v15613_v48  ;;  %v26502_v48 = vand.u32 4294901760, %v26128_v43 }
0x17b3   :  { %21698 = vmatprep.subr.mxu1 %v27313_v40  ;;  %21709 = vmatprep.subr.mxu0 %v27313_v40 }
0x17b4   :  { %21688 = vmatmul.mubr.f32.vlgmr.msra.gmra.mxu0 %v27337_v58  ;;  %21699 = vmatpush3.msra.mxu1 %v15620_v25 }
0x17b5   :  { %21710 = vmatpush3.msra.mxu0 %v26168_v7  ;;  %21700 = vmatprep.subr.mxu1 %v27313_v40  ;;  %v27404_v7 = vld [vmem:[#allocation59_spill] sm:$0xff] }
0x17b6   :  { %21711 = vmatprep.subr.mxu0 %v27313_v40  ;;  %21701 = vmatpush3.msra.mxu1 %v15627_v15 }
0x17b7   :  { %21712 = vmatpush3.msra.mxu0 %v26180_v60  ;;  %21702 = vmatprep.subr.mxu1 %v27313_v40  ;;  %v27409_v60 = vld [vmem:[#allocation50_spill] sm:$0xff] }
0x17b8   :  { %21713 = vmatprep.subr.mxu0 %v27313_v40  ;;  %21703 = vmatpush3.msra.mxu1 %v15634_v31  ;;  %v26527_v31 = vand.u32 4294901760, %v26151_v55 }
0x17b9   :  { %21714 = vmatpush3.msra.mxu0 %v26156_v23  ;;  %21704 = vmatprep.subr.mxu1 %v27313_v40  ;;  %v27398_v23 = vld [vmem:[#allocation67_spill] sm:$0xff] }
0x17ba   :  { %21715 = vmatprep.subr.mxu0 %v27313_v40  ;;  %21705 = vmatpush3.msra.mxu1 %v15641_v41 }
0x17bb   :  { %21716 = vmatpush3.msra.mxu0 %v26165_v53  ;;  %21728 = vmatprep.subr.mxu1 %v27313_v40  ;;  %v27403_v53 = vld [vmem:[#allocation61_spill] sm:$0xff] }
0x17bc   :  { %21717 = vmatprep.subr.mxu0 %v27313_v40  ;;  %21707 = vmatmul.mubr.f32.vlgmr.msra.gmra.mxu1 %v27338_v56 }
0x17bd   :  { %21718 = vmatpush3.msra.mxu0 %v26177_v16  ;;  %21729 = vmatpush3.msra.mxu1 %v26158_v18  ;;  %v27408_v16 = vld [vmem:[#allocation76_spill] sm:$0xff] }
0x17be   :  { %21719 = vmatprep.subr.mxu0 %v27313_v40  ;;  %21730 = vmatprep.subr.mxu1 %v27313_v40 }
0x17bf   :  { %21720 = vmatpush3.msra.mxu0 %v26189_v57  ;;  %21731 = vmatpush3.msra.mxu1 %v26170_v2  ;;  %v27413_v57 = vld [vmem:[#allocation49_spill] sm:$0xff] }
0x17c0   :  { %21721 = vmatprep.subr.mxu0 %v27313_v40  ;;  %21732 = vmatprep.subr.mxu1 %v27313_v40 }
0x17c1   :  { %21722 = vmatpush3.msra.mxu0 %v26198_v24  ;;  %21733 = vmatpush3.msra.mxu1 %v26140_v17  ;;  %v27417_v24 = vld [vmem:[#allocation52_spill] sm:$0xff] }
0x17c2   :  { %21723 = vmatprep.subr.mxu0 %v27313_v40  ;;  %21734 = vmatprep.subr.mxu1 %v27313_v40 }
0x17c3   :  { %21724 = vmatpush3.msra.mxu0 %v26211_v9  ;;  %21725 = vmatprep.mubr.msk.f32.mxu0 %vm22729_vm7, %v27313_v40  ;;  %v26471_v9 = vand.u32 4294901760, %v26120_v4 }
0x17c4   :  { %21735 = vmatpush3.msra.mxu1 %v26146_v8  ;;  %21726 = vmatmul.mubr.f32.vlgmr.msra.gmra.mxu0 %v27339_v21 }
0x17c5   :  { %21736 = vmatprep.subr.mxu1 %v27313_v40  ;;  %21747 = vmatprep.subr.mxu0 %v27313_v40  ;;  %v26491_v34 = vsub.f32 %v26120_v4, %v26471_v9 }
0x17c6   :  { %21737 = vmatpush3.msra.mxu1 %v26153_v13  ;;  %21748 = vmatpush3.msra.mxu0 %v15590_v14  ;;  %v27410_v14 = vld [vmem:[#allocation75_spill] sm:$0xff] }
0x17c7   :  { %21738 = vmatprep.subr.mxu1 %v27313_v40  ;;  %21749 = vmatprep.subr.mxu0 %v27313_v40  ;;  %v26513_v25 = vand.u32 4294901760, %v26491_v34 }
0x17c8   :  { %21739 = vmatpush3.msra.mxu1 %v26162_v39  ;;  %21750 = vmatpush3.msra.mxu0 %v15597_v11  ;;  %v27415_v11 = vld [vmem:[#allocation48_spill] sm:$0xff] }
0x17c9   :  { %21740 = vmatprep.subr.mxu1 %v27313_v40  ;;  %21751 = vmatprep.subr.mxu0 %v27313_v40  ;;  %27420 = vst [vmem:[#allocation31_spill] sm:$0xff] %v26513_v25 }
0x17ca   :  { %21741 = vmatpush3.msra.mxu1 %v26173_v20  ;;  %21752 = vmatpush3.msra.mxu0 %v15604_v6  ;;  %v27411_v6 = vld [vmem:[#allocation57_spill] sm:$0xff] }
0x17cb   :  { %21742 = vmatprep.subr.mxu1 %v27313_v40  ;;  %21753 = vmatprep.subr.mxu0 %v27313_v40 }
0x17cc   :  { %21743 = vmatpush3.msra.mxu1 %v26185_v63  ;;  %21744 = vmatprep.mubr.msk.f32.mxu1 %vm22729_vm7, %v27313_v40 }
0x17cd   :  { %21754 = vmatpush3.msra.mxu0 %v15611_v59  ;;  %21745 = vmatmul.mubr.f32.vlgmr.msra.gmra.mxu1 %v27340_v12  ;;  %v27416_v59 = vld [vmem:[#allocation53_spill] sm:$0xff] }
0x17ce   :  { %21755 = vmatprep.subr.mxu0 %v27313_v40  ;;  %21766 = vmatprep.subr.mxu1 %v27313_v40 }
0x17cf   :  { %21756 = vmatpush3.msra.mxu0 %v15618_v10  ;;  %21767 = vmatpush3.msra.mxu1 %v26158_v18  ;;  %v27399_v18 = vld [vmem:[#allocation63_spill] sm:$0xff]  ;;  %v26468_v10 = vand.u32 4294901760, %v26458_v28 }
0x17d0   :  { %21757 = vmatprep.subr.mxu0 %v27313_v40  ;;  %21768 = vmatprep.subr.mxu1 %v27313_v40 }
0x17d1   :  { %21758 = vmatpush3.msra.mxu0 %v15625_v22  ;;  %21769 = vmatpush3.msra.mxu1 %v26170_v2  ;;  %v27405_v2 = vld [vmem:[#allocation55_spill] sm:$0xff]  ;;  %27418 = vst [vmem:[#allocation33_spill] sm:$0xff] %v26468_v10  ;;  %v17076_v22 = vsub.f32 %v26458_v28, %v26468_v10 }
0x17d2   :  { %21759 = vmatprep.subr.mxu0 %v27313_v40  ;;  %21770 = vmatprep.subr.mxu1 %v27313_v40 }
0x17d3   :  { %21760 = vmatpush3.msra.mxu0 %v15632_v51  ;;  %21771 = vmatpush3.msra.mxu1 %v26140_v17  ;;  %v27390_v17 = vld [vmem:[#allocation65_spill] sm:$0xff]  ;;  %v26498_v51 = vand.u32 4294901760, %v26477_v19  ;;  %v17077_v62 = vand.u32 4294901760, %v17076_v22 }
0x17d4   :  { %21761 = vmatprep.subr.mxu0 %v27313_v40  ;;  %21772 = vmatprep.subr.mxu1 %v27313_v40 }
0x17d5   :  { %21762 = vmatpush3.msra.mxu0 %v15639_v26  ;;  %21763 = vmatprep.mubr.msk.f32.mxu0 %vm22729_vm7, %v27313_v40  ;;  %27419 = vst [vmem:[#allocation30_spill] sm:$0xff] %v26498_v51  ;;  %v26508_v26 = vsub.f32 %v26123_v61, %v26481_v54  ;;  %v17083_v15 = vsub.f32 %v26477_v19, %v26498_v51 }
0x17d6   :  { %21773 = vmatpush3.msra.mxu1 %v26146_v8  ;;  %21764 = vmatmul.mubr.f32.vlgmr.msra.gmra.mxu0 %v27338_v56  ;;  %v27392_v8 = vld [vmem:[#allocation51_spill] sm:$0xff] }
0x17d7   :  { %21774 = vmatprep.subr.mxu1 %v27313_v40  ;;  %21785 = vmatprep.subr.mxu0 %v25977_v50  ;;  %v26532_v41 = vand.u32 4294901760, %v26508_v26 }
0x17d8   :  { %21775 = vmatpush3.msra.mxu1 %v26153_v13  ;;  %21786 = vmatpush3.xpose.msra.mxu0 %v25977_v50  ;;  %v27397_v13 = vld [vmem:[#allocation66_spill] sm:$0xff] }
0x17d9   :  { %21801 = vmatprep.mubr.f32.mxu0 %v25992_v5  ;;  %21776 = vmatprep.subr.mxu1 %v27313_v40  ;;  %27421 = vst [vmem:[#allocation44_spill] sm:$0xff] %v26532_v41 }
0x17da   :  { %21787 = vmatprep.subr.mxu0 %v25963_v0  ;;  %21777 = vmatpush3.msra.mxu1 %v26162_v39  ;;  %v27402_v39 = vld [vmem:[#allocation64_spill] sm:$0xff] }
0x17db   :  { %21778 = vmatprep.subr.mxu1 %v27313_v40  ;;  %21782 = vmatprep.mubr.msk.f32.mxu1 %vm22729_vm7, %v27313_v40 }
0x17dc   :  { %21779 = vmatpush3.msra.mxu1 %v26173_v20  ;;  %21788 = vmatpush3.xpose.msra.mxu0 %v25963_v0  ;;  %v27407_v20 = vld [vmem:[#allocation77_spill] sm:$0xff] }
0x17dd   :  { %21780 = vmatprep.subr.mxu1 %v27313_v40  ;;  %21789 = vmatprep.subr.mxu0 %v25946_v36 }
0x17de   :  { %21781 = vmatpush3.msra.mxu1 %v26185_v63  ;;  %v27412_v63 = vld [vmem:[#allocation56_spill] sm:$0xff] }
0x17df   :  { %21783 = vmatmul.mubr.f32.vlgmr.msra.gmra.mxu1 %v27338_v56  ;;  %21813 = vmatprep.subr.mxu1 %v27390_v17 }
0x17e0   :  { %21790 = vmatpush3.xpose.msra.mxu0 %v25946_v36  ;;  %21814 = vmatpush3.xpose.msra.mxu1 %v27390_v17 }
0x17e1   :  { %21829 = vmatprep.mubr.f32.mxu1 %v27391_v45  ;;  %21791 = vmatprep.subr.mxu0 %v27392_v8 }
0x17e2   :  { %21815 = vmatprep.subr.mxu1 %v27393_v38 }
0x17e4   :  { %21792 = vmatpush3.xpose.msra.mxu0 %v27392_v8  ;;  %21816 = vmatpush3.xpose.msra.mxu1 %v27393_v38 }
0x17e5   :  { %21793 = vmatprep.subr.mxu0 %v27394_v33  ;;  %21817 = vmatprep.subr.mxu1 %v27395_v29 }
0x17e8   :  { %21794 = vmatpush3.xpose.msra.mxu0 %v27394_v33  ;;  %21818 = vmatpush3.xpose.msra.mxu1 %v27395_v29 }
0x17e9   :  { %21795 = vmatprep.subr.mxu0 %v27396_v3  ;;  %21819 = vmatprep.subr.mxu1 %v27397_v13 }
0x17ec   :  { %21796 = vmatpush3.xpose.msra.mxu0 %v27396_v3  ;;  %21820 = vmatpush3.xpose.msra.mxu1 %v27397_v13 }
0x17ed   :  { %21797 = vmatprep.subr.mxu0 %v27398_v23  ;;  %21821 = vmatprep.subr.mxu1 %v27399_v18 }
0x17f0   :  { %21798 = vmatpush3.xpose.msra.mxu0 %v27398_v23  ;;  %21822 = vmatpush3.xpose.msra.mxu1 %v27399_v18 }
0x17f1   :  { %21799 = vmatprep.subr.mxu0 %v27391_v45  ;;  %21823 = vmatprep.subr.mxu1 %v27400_v42 }
0x17f4   :  { %21800 = vmatpush3.xpose.msra.mxu0 %v27391_v45  ;;  %21824 = vmatpush3.xpose.msra.mxu1 %v27400_v42 }
0x17f5   :  { %21825 = vmatprep.subr.mxu1 %v27401_v47  ;;  %21841 = vmatprep.subr.mxu0 %v27402_v39 }
0x17f7   :  { %21802 = vmatmul.mubr.f32.vlgmr.msra.gmra.mxu0 %v27401_v47 }
0x17f8   :  { %21804 = vmatprep.mubr.f32.mxu0 %v27400_v42  ;;  %21826 = vmatpush3.xpose.msra.mxu1 %v27401_v47 }
0x17f9   :  { %21842 = vmatpush3.xpose.msra.mxu0 %v27402_v39  ;;  %21827 = vmatprep.subr.mxu1 %v25992_v5 }
0x17fa   :  { %21843 = vmatprep.subr.mxu0 %v27403_v53 }
0x17fb   :  { %21805 = vmatmul.mubr.f32.gmra.mxu0 %v27399_v18 }
0x17fc   :  { %21807 = vmatprep.mubr.f32.mxu0 %v27397_v13  ;;  %21828 = vmatpush3.xpose.msra.mxu1 %v25992_v5  ;;  %v27406_v5 = vld [vmem:[#allocation70_spill] sm:$0xff]  ;;  %v26549_v13 = vsub.f32 %v26137_v52, %v26516_v27 }
0x17fd   :  { %21844 = vmatpush3.xpose.msra.mxu0 %v27403_v53  ;;  %21869 = vmatprep.subr.mxu1 %v25977_v50 }
0x17fe   :  { %21845 = vmatprep.subr.mxu0 %v27404_v7 }
0x17ff   :  { %21808 = vmatmul.mubr.f32.gmra.mxu0 %v27395_v29  ;;  %21830 = vmatmul.mubr.f32.vlgmr.msra.gmra.mxu1 %v27398_v23  ;;  %v26545_v29 = vand.u32 4294901760, %v26523_v49 }
0x1800   :  { %21810 = vmatprep.mubr.f32.mxu0 %v27393_v38  ;;  %21832 = vmatprep.mubr.f32.mxu1 %v27396_v3  ;;  %v17084_v38 = vand.u32 4294901760, %v17083_v15 }
0x1801   :  { %21846 = vmatpush3.xpose.msra.mxu0 %v27404_v7  ;;  %21870 = vmatpush3.xpose.msra.mxu1 %v25977_v50  ;;  %27422 = vst [vmem:[#allocation35_spill] sm:$0xff] %v26545_v29  ;;  %v17104_v47 = vsub.f32 %v26523_v49, %v26545_v29 }
0x1802   :  { %21847 = vmatprep.subr.mxu0 %v27405_v2  ;;  %21871 = vmatprep.subr.mxu1 %v25963_v0 }
0x1803   :  { %21811 = vmatmul.mubr.f32.gmra.mxu0 %v27390_v17  ;;  %21833 = vmatmul.mubr.f32.gmra.mxu1 %v27394_v33  ;;  %v26536_v17 = vsub.f32 %v26128_v43, %v26502_v48 }
0x1804   :  { %21835 = vmatprep.mubr.f32.mxu1 %v27392_v8  ;;  %21857 = vmatprep.mubr.f32.mxu0 %v27406_v5 }
0x1805   :  { %21848 = vmatpush3.xpose.msra.mxu0 %v27405_v2  ;;  %21872 = vmatpush3.xpose.msra.mxu1 %v25963_v0  ;;  %v26556_v18 = vand.u32 4294901760, %v26536_v17 }
0x1806   :  { %21849 = vmatprep.subr.mxu0 %v27407_v20  ;;  %21873 = vmatprep.subr.mxu1 %v25946_v36 }
0x1807   :  { %21836 = vmatmul.mubr.f32.gmra.mxu1 %v25946_v36  ;;  %27423 = vst [vmem:[#allocation45_spill] sm:$0xff] %v26556_v18 }
0x1808   :  { %21838 = vmatprep.mubr.f32.mxu1 %v25963_v0 }
0x1809   :  { %21850 = vmatpush3.xpose.msra.mxu0 %v27407_v20  ;;  %21874 = vmatpush3.xpose.msra.mxu1 %v25946_v36 }
0x180a   :  { %21851 = vmatprep.subr.mxu0 %v27408_v16  ;;  %21875 = vmatprep.subr.mxu1 %v27392_v8 }
0x180b   :  { %21839 = vmatmul.mubr.f32.gmra.mxu1 %v25977_v50 }
0x180c   :  { %21885 = vmatprep.mubr.f32.mxu1 %v27409_v60 }
0x180d   :  { %21852 = vmatpush3.xpose.msra.mxu0 %v27408_v16  ;;  %21876 = vmatpush3.xpose.msra.mxu1 %v27392_v8 }
0x180e   :  { %21853 = vmatprep.subr.mxu0 %v27410_v14  ;;  %21877 = vmatprep.subr.mxu1 %v27394_v33 }
0x1811   :  { %21854 = vmatpush3.xpose.msra.mxu0 %v27410_v14  ;;  %21878 = vmatpush3.xpose.msra.mxu1 %v27394_v33 }
0x1812   :  { %21855 = vmatprep.subr.mxu0 %v27406_v5  ;;  %21879 = vmatprep.subr.mxu1 %v27396_v3 }
0x1815   :  { %21856 = vmatpush3.xpose.msra.mxu0 %v27406_v5  ;;  %21880 = vmatpush3.xpose.msra.mxu1 %v27396_v3 }
0x1816   :  { %21881 = vmatprep.subr.mxu1 %v27398_v23  ;;  %21897 = vmatprep.subr.mxu0 %v27411_v6 }
0x1818   :  { %21858 = vmatmul.mubr.f32.vlgmr.msra.gmra.mxu0 %v27410_v14 }
0x1819   :  { %21860 = vmatprep.mubr.f32.mxu0 %v27408_v16  ;;  %21882 = vmatpush3.xpose.msra.mxu1 %v27398_v23 }
0x181a   :  { %21898 = vmatpush3.xpose.msra.mxu0 %v27411_v6  ;;  %21883 = vmatprep.subr.mxu1 %v27391_v45 }
0x181b   :  { %21899 = vmatprep.subr.mxu0 %v27412_v63 }
0x181c   :  { %21861 = vmatmul.mubr.f32.gmra.mxu0 %v27407_v20 }
0x181d   :  { %21863 = vmatprep.mubr.f32.mxu0 %v27405_v2  ;;  %21884 = vmatpush3.xpose.msra.mxu1 %v27391_v45 }
0x181e   :  { %21900 = vmatpush3.xpose.msra.mxu0 %v27412_v63  ;;  %21925 = vmatprep.subr.mxu1 %v25977_v50 }
0x181f   :  { %21901 = vmatprep.subr.mxu0 %v27413_v57 }
0x1820   :  { %21864 = vmatmul.mubr.f32.gmra.mxu0 %v27404_v7  ;;  %21886 = vmatmul.mubr.f32.vlgmr.msra.gmra.mxu1 %v27414_v35  ;;  %v17111_v7 = vsub.f32 %v26536_v17, %v26556_v18 }
0x1821   :  { %21866 = vmatprep.mubr.f32.mxu0 %v27403_v53  ;;  %21888 = vmatprep.mubr.f32.mxu1 %v27415_v11 }
0x1822   :  { %21902 = vmatpush3.xpose.msra.mxu0 %v27413_v57  ;;  %21926 = vmatpush3.xpose.msra.mxu1 %v25977_v50 }
0x1823   :  { %21903 = vmatprep.subr.mxu0 %v27416_v59  ;;  %21927 = vmatprep.subr.mxu1 %v25963_v0 }
0x1824   :  { %21867 = vmatmul.mubr.f32.gmra.mxu0 %v27402_v39  ;;  %21889 = vmatmul.mubr.f32.gmra.mxu1 %v27417_v24  ;;  %v26568_v39 = vand.u32 4294901760, %v26549_v13 }
0x1825   :  { %21891 = vmatprep.mubr.f32.mxu1 %v27416_v59  ;;  %21913 = vmatprep.mubr.f32.mxu0 %v27391_v45 }
0x1826   :  { %21904 = vmatpush3.xpose.msra.mxu0 %v27416_v59  ;;  %21928 = vmatpush3.xpose.msra.mxu1 %v25963_v0  ;;  %27424 = vst [vmem:[#allocation46_spill] sm:$0xff] %v26568_v39  ;;  %v17118_v5 = vsub.f32 %v26549_v13, %v26568_v39 }
0x1827   :  { %21905 = vmatprep.subr.mxu0 %v27417_v24  ;;  %21929 = vmatprep.subr.mxu1 %v25946_v36 }
0x1828   :  { %21892 = vmatmul.mubr.f32.gmra.mxu1 %v27413_v57  ;;  %v17119_v16 = vand.u32 4294901760, %v17118_v5 }
0x1829   :  { %21894 = vmatprep.mubr.f32.mxu1 %v27412_v63 }
0x182a   :  { %21906 = vmatpush3.xpose.msra.mxu0 %v27417_v24  ;;  %21930 = vmatpush3.xpose.msra.mxu1 %v25946_v36 }
0x182b   :  { %21907 = vmatprep.subr.mxu0 %v27415_v11  ;;  %21931 = vmatprep.subr.mxu1 %v27392_v8 }
0x182c   :  { %21895 = vmatmul.mubr.f32.gmra.mxu1 %v27411_v6 }
0x182d   :  { %21941 = vmatprep.mubr.f32.mxu1 %v27391_v45 }
0x182e   :  { %21908 = vmatpush3.xpose.msra.mxu0 %v27415_v11  ;;  %21932 = vmatpush3.xpose.msra.mxu1 %v27392_v8 }
0x182f   :  { %21909 = vmatprep.subr.mxu0 %v27414_v35  ;;  %21933 = vmatprep.subr.mxu1 %v27394_v33 }
0x1832   :  { %21910 = vmatpush3.xpose.msra.mxu0 %v27414_v35  ;;  %21934 = vmatpush3.xpose.msra.mxu1 %v27394_v33 }
0x1833   :  { %21911 = vmatprep.subr.mxu0 %v27409_v60  ;;  %21935 = vmatprep.subr.mxu1 %v27396_v3 }
0x1836   :  { %21912 = vmatpush3.xpose.msra.mxu0 %v27409_v60  ;;  %21936 = vmatpush3.xpose.msra.mxu1 %v27396_v3 }
0x1837   :  { %21937 = vmatprep.subr.mxu1 %v27398_v23  ;;  %21953 = vmatprep.subr.mxu0 %v26448_v32 }
0x1839   :  { %21914 = vmatmul.mubr.f32.vlgmr.msra.gmra.mxu0 %v27398_v23 }
0x183a   :  { %21916 = vmatprep.mubr.f32.mxu0 %v27396_v3  ;;  %21938 = vmatpush3.xpose.msra.mxu1 %v27398_v23 }
0x183b   :  { %21954 = vmatpush3.msra.mxu0 %v26448_v32  ;;  %21939 = vmatprep.subr.mxu1 %v27391_v45 }
0x183c   :  { %21955 = vmatprep.subr.mxu0 %v26463_v46 }
0x183d   :  { %21956 = vmatpush3.msra.mxu0 %v26463_v46 }
0x183e   :  { %21917 = vmatmul.mubr.f32.gmra.mxu0 %v27394_v33  ;;  %21957 = vmatprep.subr.mxu0 %v26471_v9 }
0x183f   :  { %21919 = vmatprep.mubr.f32.mxu0 %v27392_v8  ;;  %21940 = vmatpush3.xpose.msra.mxu1 %v27391_v45  ;;  %v17090_v45 = vsub.f32 %v26491_v34, %v26513_v25  ;;  %v16864_v25 = vld [vmem:[%s27029_s11 + $0x8] sm:$0xff] }
0x1840   :  { %21958 = vmatpush3.msra.mxu0 %v26471_v9  ;;  %21981 = vmatprep.subr.mxu1 %v17077_v62 }
0x1841   :  { %21959 = vmatprep.subr.mxu0 %v26481_v54  ;;  %v17091_v42 = vand.u32 4294901760, %v17090_v45 }
0x1842   :  { %21960 = vmatpush3.msra.mxu0 %v26481_v54  ;;  %21942 = vmatmul.mubr.f32.vlgmr.msra.gmra.mxu1 %v27398_v23  ;;  %v17097_v23 = vsub.f32 %v26508_v26, %v26532_v41 }
0x1843   :  { %21920 = vmatmul.mubr.f32.gmra.mxu0 %v25946_v36  ;;  %21961 = vmatprep.subr.mxu0 %v26494_v44 }
0x1844   :  { %21922 = vmatprep.mubr.f32.mxu0 %v25963_v0  ;;  %21944 = vmatprep.mubr.f32.mxu1 %v27396_v3  ;;  %v26560_v3 = vsub.f32 %v26151_v55, %v26527_v31  ;;  %v17098_v53 = vand.u32 4294901760, %v17097_v23 }
0x1845   :  { %21962 = vmatpush3.msra.mxu0 %v26494_v44  ;;  %21982 = vmatpush3.msra.mxu1 %v17077_v62 }
0x1846   :  { %21963 = vmatprep.subr.mxu0 %v26502_v48  ;;  %21983 = vmatprep.subr.mxu1 %v17084_v38  ;;  %v26576_v2 = vand.u32 4294901760, %v26560_v3 }
0x1847   :  { %21964 = vmatpush3.msra.mxu0 %v26502_v48  ;;  %21984 = vmatpush3.msra.mxu1 %v17084_v38 }
0x1848   :  { %21923 = vmatmul.mubr.f32.gmra.mxu0 %v25977_v50  ;;  %21945 = vmatmul.mubr.f32.gmra.mxu1 %v27394_v33  ;;  %27425 = vst [vmem:[#allocation82_spill] sm:$0xff] %v26576_v2  ;;  %v17105_v33 = vand.u32 4294901760, %v17104_v47  ;;  %v17125_v20 = vsub.f32 %v26560_v3, %v26576_v2 }
0x1849   :  { %21965 = vmatprep.subr.mxu0 %v26516_v27  ;;  %21985 = vmatprep.subr.mxu1 %v17091_v42 }
0x184a   :  { %21947 = vmatprep.mubr.f32.mxu1 %v27392_v8  ;;  %21966 = vmatpush3.msra.mxu0 %v26516_v27  ;;  %v17112_v8 = vand.u32 4294901760, %v17111_v7  ;;  %v17126_v60 = vand.u32 4294901760, %v17125_v20 }
0x184b   :  { %21986 = vmatpush3.msra.mxu1 %v17091_v42  ;;  %21967 = vmatprep.subr.mxu0 %v26527_v31 }
0x184c   :  { %21987 = vmatprep.subr.mxu1 %v17098_v53  ;;  %21968 = vmatpush3.msra.mxu0 %v26527_v31 }
0x184d   :  { %21988 = vmatpush3.msra.mxu1 %v17098_v53  ;;  %22009 = vmatprep.subr.mxu0 %v26458_v28 }
0x184e   :  { %21948 = vmatmul.mubr.f32.gmra.mxu1 %v25946_v36  ;;  %21989 = vmatprep.subr.mxu1 %v17105_v33 }
0x184f   :  { %21950 = vmatprep.mubr.f32.mxu1 %v25963_v0  ;;  %21990 = vmatpush3.msra.mxu1 %v17105_v33 }
0x1850   :  { %21991 = vmatprep.subr.mxu1 %v17112_v8 }
0x1851   :  { %21992 = vmatpush3.msra.mxu1 %v17112_v8 }
0x1852   :  { %21951 = vmatmul.mubr.f32.gmra.mxu1 %v25977_v50  ;;  %21993 = vmatprep.subr.mxu1 %v17119_v16 }
0x1853   :  { %21994 = vmatpush3.msra.mxu1 %v17119_v16 }
0x1854   :  { %21995 = vmatprep.subr.mxu1 %v17126_v60 }
0x1855   :  { %21996 = vmatpush3.msra.mxu1 %v17126_v60 }
0x1856   :  { %22037 = vmatprep.subr.mxu1 %v26448_v32 }
0x1874   :  { %v15567_v36 = vpop.f32.mrf.mxu0 }
0x1876   :  { %v21689_v14 = vpop.f32.mrf.mxu0 }
0x187c   :  { %v15678_v6 = vpop.f32.mrf.mxu1 }
0x187d   :  { %v15679_v63 = vadd.f32 %v15678_v6, %v15567_v36 }
0x187e   :  { %v21708_v57 = vpop.f32.mrf.mxu1 }
0x1884   :  { %v15766_v35 = vpop.f32.mrf.mxu0 }
0x1885   :  { %v15767_v0 = vadd.f32 %v15766_v35, %v15679_v63 }
0x1886   :  { %v21727_v11 = vpop.f32.mrf.mxu0 }
0x188d   :  { %v15847_v59 = vpop.f32.mrf.mxu1 }
0x188e   :  { %v15848_v24 = vadd.f32 %v15847_v59, %v15767_v0 }
0x188f   :  { %v21746_v22 = vpop.f32.mrf.mxu1 }
0x1896   :  { %v15942_v62 = vpop.f32.mrf.mxu0 }
0x1897   :  { %v15943_v50 = vadd.f32 %v15942_v62, %v15848_v24 }
0x1898   :  { %v21765_v15 = vpop.f32.mrf.mxu0 }
0x189f   :  { %v16021_v45 = vpop.f32.mrf.mxu1 }
0x18a0   :  { %v26589_v38 = vadd.f32 %v16021_v45, %v15943_v50 }
0x18a1   :  { %v21784_v23 = vpop.f32.mrf.mxu1 }
0x18a2   :  { %27426 = vst [vmem:[#allocation80_spill] sm:$0xff] %v26589_v38 }
0x18b7   :  { %v21803_v42 = vpop.f32.mrf.mxu0 }
0x18b9   :  { %v16104_v47 = vpop.f32.mrf.mxu0 }
0x18bb   :  { %v21806_v53 = vpop.f32.mrf.mxu0 }
0x18bd   :  { %v16124_v33 = vpop.f32.mrf.mxu0 }
0x18bf   :  { %v21831_v7 = vpop.f32.mrf.mxu1  ;;  %v21809_v8 = vpop.f32.mrf.mxu0 }
0x18c0   :  { %v16292_v55 = vadd.f32 %v21831_v7, %v21803_v42 }
0x18c1   :  { %v16285_v5 = vpop.f32.mrf.mxu1  ;;  %v16144_v16 = vpop.f32.mrf.mxu0 }
0x18c2   :  { %v16286_v30 = vadd.f32 %v16285_v5, %v16104_v47 }
0x18c3   :  { %v21834_v20 = vpop.f32.mrf.mxu1  ;;  %v21812_v36 = vpop.f32.mrf.mxu0 }
0x18c4   :  { %v16304_v39 = vadd.f32 %v21834_v20, %v21806_v53 }
0x18c5   :  { %v16297_v60 = vpop.f32.mrf.mxu1  ;;  %v26591_v6 = vpop.f32.mrf.mxu0 }
0x18c6   :  { %v16298_v51 = vadd.f32 %v16297_v60, %v16124_v33 }
0x18c7   :  { %v21837_v14 = vpop.f32.mrf.mxu1 }
0x18c9   :  { %v16309_v63 = vpop.f32.mrf.mxu1 }
0x18cb   :  { %v21840_v35 = vpop.f32.mrf.mxu1 }
0x18cd   :  { %v26593_v11 = vpop.f32.mrf.mxu1 }
0x18d8   :  { %v21859_v57 = vpop.f32.mrf.mxu0 }
0x18d9   :  { %v16423_v43 = vadd.f32 %v21859_v57, %v16292_v55 }
0x18da   :  { %v16415_v0 = vpop.f32.mrf.mxu0 }
0x18db   :  { %v16416_v37 = vadd.f32 %v16415_v0, %v16286_v30 }
0x18dc   :  { %v21862_v59 = vpop.f32.mrf.mxu0 }
0x18dd   :  { %v16437_v42 = vadd.f32 %v21862_v59, %v16304_v39  ;;  %v16310_v39 = vadd.f32 %v16309_v63, %v16144_v16  ;;  %v16865_v16 = vld [vmem:[%s27029_s11 + $0x10] sm:$0xff] }
0x18de   :  { %v16429_v22 = vpop.f32.mrf.mxu0 }
0x18df   :  { %v16430_v30 = vadd.f32 %v16429_v22, %v16298_v51 }
0x18e0   :  { %v21887_v24 = vpop.f32.mrf.mxu1  ;;  %v21865_v50 = vpop.f32.mrf.mxu0 }
0x18e1   :  { %v16554_v4 = vadd.f32 %v21887_v24, %v16423_v43  ;;  %v16863_v43 = vld [vmem:[%s27029_s11] sm:$0xff] }
0x18e2   :  { %v16545_v62 = vpop.f32.mrf.mxu1  ;;  %v16443_v45 = vpop.f32.mrf.mxu0 }
0x18e3   :  { %v16546_v18 = vadd.f32 %v16545_v62, %v16416_v37  ;;  %v16444_v63 = vadd.f32 %v16443_v45, %v16310_v39 }
0x18e4   :  { %v21890_v15 = vpop.f32.mrf.mxu1  ;;  %v21868_v38 = vpop.f32.mrf.mxu0 }
0x18e5   :  { %v16570_v5 = vadd.f32 %v21890_v15, %v16437_v42 }
0x18e6   :  { %v16561_v23 = vpop.f32.mrf.mxu1  ;;  %v26595_v21 = vpop.f32.mrf.mxu0 }
0x18e8   :  { %v21893_v12 = vpop.f32.mrf.mxu1 }
0x18ea   :  { %v16577_v56 = vpop.f32.mrf.mxu1 }
0x18ec   :  { %v21896_v52 = vpop.f32.mrf.mxu1 }
0x18ee   :  { %v26597_v40 = vpop.f32.mrf.mxu1 }
0x18f9   :  { %v21915_v58 = vpop.f32.mrf.mxu0 }
0x18fa   :  { %v16703_v29 = vadd.f32 %v21915_v58, %v16554_v4  ;;  %v16316_v58 = vadd.f32 %v21837_v14, %v21809_v8  ;;  %v16562_v4 = vadd.f32 %v16561_v23, %v16430_v30  ;;  %v16328_v8 = vadd.f32 %v21840_v35, %v21812_v36 }
0x18fb   :  { %v16696_v1 = vpop.f32.mrf.mxu0  ;;  %v16578_v23 = vadd.f32 %v16577_v56, %v16444_v63  ;;  %v16869_v63 = vld [vmem:[%s27029_s11 + $0x30] sm:$0xff] }
0x18fc   :  { %v16697_v7 = vadd.f32 %v16696_v1, %v16546_v18  ;;  %v16451_v18 = vadd.f32 %v21865_v50, %v16316_v58  ;;  %v16465_v15 = vadd.f32 %v21868_v38, %v16328_v8  ;;  %v16867_v58 = vld [vmem:[%s27029_s11 + $0x20] sm:$0xff] }
0x18fe   :  { %v21918_v61 = vpop.f32.mrf.mxu0  ;;  %v16586_v24 = vadd.f32 %v21893_v12, %v16451_v18 }
0x18ff   :  { %v16715_v20 = vadd.f32 %v21918_v61, %v16570_v5 }
0x1900   :  { %v16708_v2 = vpop.f32.mrf.mxu0 }
0x1901   :  { %v16709_v51 = vadd.f32 %v16708_v2, %v16562_v4  ;;  %v16322_v2 = vadd.f32 %v26593_v11, %v26591_v6  ;;  %v16868_v6 = vld [vmem:[%s27029_s11 + $0x28] sm:$0xff] }
0x1902   :  { %v21943_v41 = vpop.f32.mrf.mxu1 }
0x1903   :  { %v21921_v10 = vpop.f32.mrf.mxu0  ;;  %v16824_v47 = vadd.f32 %v21943_v41, %v16703_v29  ;;  %v16866_v29 = vld [vmem:[%s27029_s11 + $0x18] sm:$0xff]  ;;  %v16458_v12 = vadd.f32 %v26595_v21, %v16322_v2 }
0x1904   :  { %v16817_v55 = vpop.f32.mrf.mxu1  ;;  %v16727_v42 = vadd.f32 %v21921_v10, %v16586_v24 }
0x1905   :  { %v16872_v53 = vmul.f32 %v16864_v25, %v16824_v47  ;;  %v16818_v37 = vadd.f32 %v16817_v55, %v16697_v7  ;;  %v16720_v0 = vpop.f32.mrf.mxu0  ;;  %v16602_v47 = vadd.f32 %v21896_v52, %v16465_v15  ;;  %v16594_v30 = vadd.f32 %v26597_v40, %v16458_v12 }
0x1906   :  { %v16721_v11 = vadd.f32 %v16720_v0, %v16578_v23 }
0x1907   :  { %v16883_v57 = vsel %vm11011_vm8, %v16872_v53, 0  ;;  %v16871_v33 = vmul.f32 %v16863_v43, %v16818_v37 }
0x1908   :  { %v26606_v1 = vand.u32 4294901760, %v16883_v57  ;;  %v21946_v41 = vpop.f32.mrf.mxu1  ;;  %v21924_v22 = vpop.f32.mrf.mxu0 }
0x1909   :  { %v16880_v25 = vsel %vm11011_vm8, %v16871_v33, 0  ;;  %v16836_v60 = vadd.f32 %v21946_v41, %v16715_v20  ;;  %v16739_v20 = vadd.f32 %v21924_v22, %v16602_v47  ;;  %v16870_v41 = vld [vmem:[%s27029_s11 + $0x38] sm:$0xff]  ;;  %s22731_s11 = smov [#allocation20]  }
0x190a   :  { %v26613_v61 = vsub.f32 %v16883_v57, %v26606_v1  ;;  %v26615_v14 = vand.u32 4294901760, %v16880_v25  ;;  %v16829_v59 = vpop.f32.mrf.mxu1  ;;  %v16732_v43 = vpop.f32.mrf.mxu0  ;;  %s18350_s9 = sshll.u32 %s22731_s11, 4  ;;  %s18351_s9 = int_to_ptr.vmem [resolvable:$true] %s18350_s9 }
0x190b   :  { %v16874_v62 = vmul.f32 %v16866_v29, %v16836_v60  ;;  %v16830_v50 = vadd.f32 %v16829_v59, %v16709_v51  ;;  %v16733_v40 = vadd.f32 %v16732_v43, %v16594_v30  ;;  %s22622_s23 = scalar_lea.vmem %s18351_s9, 256  ;;  %p22627_p13 = scmp.lt.s32.totalorder %s18351_s9, %s18351_s9 }
0x190c   :  { %v16988_v36 = vand.u32 4294901760, %v26613_v61  ;;  %v26624_v35 = vsub.f32 %v16880_v25, %v26615_v14  ;;  %21997 = vmatprep.mubr.f32.mxu1 %v26615_v14  ;;  %p22623_p12 = scmp.ne.s32.totalorder %s18351_s9, %s22622_s23  ;;  %p22628_p0 = scmp.lt.s32.totalorder %s22622_s23, %s22622_s23 }
0x190d   :  { %v16889_v7 = vsel %vm11011_vm8, %v16874_v62, 0  ;;  %v16873_v45 = vmul.f32 %v16865_v16, %v16830_v50  ;;  %21998 = vmatmul.mubr.f32.vlgmr.msra.gmra.mxu1 %v26606_v1 }
0x190e   :  { %v26630_v55 = vand.u32 4294901760, %v16889_v7  ;;  %v21949_v38 = vpop.f32.mrf.mxu1  ;;  %22038 = vmatpush3.msra.mxu1 %v26448_v32  ;;  %v16978_v56 = vand.u32 4294901760, %v26624_v35  ;;  %v16989_v10 = vsub.f32 %v26613_v61, %v16988_v36  ;;  %p22629_p1 = por %p22628_p0, %p22627_p13 }
0x190f   :  { %v16886_v21 = vsel %vm11011_vm8, %v16873_v45, 0  ;;  %v16848_v52 = vadd.f32 %v21949_v38, %v16727_v42  ;;  %22039 = vmatprep.subr.mxu1 %v26463_v46 }
0x1910   :  { %v26644_v5 = vsub.f32 %v16889_v7, %v26630_v55  ;;  %v26646_v53 = vand.u32 4294901760, %v16886_v21  ;;  %v16841_v37 = vpop.f32.mrf.mxu1  ;;  %22040 = vmatpush3.msra.mxu1 %v26463_v46  ;;  %v16979_v4 = vsub.f32 %v26624_v35, %v16978_v56  ;;  %v16990_v51 = vand.u32 4294901760, %v16989_v10  ;;  %p22630_p2 = pnand %p22629_p1, %p22623_p12 }
0x1911   :  { %v16876_v57 = vmul.f32 %v16868_v6, %v16848_v52  ;;  %v16842_v0 = vadd.f32 %v16841_v37, %v16721_v11  ;;  %22041 = vmatprep.subr.mxu1 %v26471_v9 }
0x1912   :  { %v26657_v33 = vsub.f32 %v16886_v21, %v26646_v53  ;;  %v21952_v39 = vpop.f32.mrf.mxu1  ;;  %22000 = vmatprep.mubr.f32.mxu1 %v26646_v53  ;;  %22042 = vmatpush3.msra.mxu1 %v26471_v9  ;;  %v16980_v29 = vand.u32 4294901760, %v16979_v4  ;;  %v17008_v18 = vand.u32 4294901760, %v26644_v5 }
0x1913   :  { %v16895_v25 = vsel %vm11011_vm8, %v16876_v57, 0  ;;  %v16875_v60 = vmul.f32 %v16867_v58, %v16842_v0  ;;  %v16860_v8 = vadd.f32 %v21952_v39, %v16739_v20  ;;  %22001 = vmatmul.mubr.f32.gmra.mxu1 %v26630_v55  ;;  %22043 = vmatprep.subr.mxu1 %v26481_v54 }
0x1914   :  { %v26668_v59 = vand.u32 4294901760, %v16895_v25  ;;  %v16853_v16 = vpop.f32.mrf.mxu1  ;;  %22044 = vmatpush3.msra.mxu1 %v26481_v54  ;;  %21969 = vmatprep.mubr.f32.mxu0 %v16980_v29  ;;  %v16998_v24 = vand.u32 4294901760, %v26657_v33  ;;  %v17009_v2 = vsub.f32 %v26644_v5, %v17008_v18 }
0x1915   :  { %v16892_v22 = vsel %vm11011_vm8, %v16875_v60, 0  ;;  %v16878_v62 = vmul.f32 %v16870_v41, %v16860_v8  ;;  %v16854_v50 = vadd.f32 %v16853_v16, %v16733_v40  ;;  %22045 = vmatprep.subr.mxu1 %v26494_v44  ;;  %21970 = vmatmul.mubr.f32.vlgmr.msra.gmra.mxu0 %v16990_v51 }
0x1916   :  { %v26681_v15 = vsub.f32 %v16895_v25, %v26668_v59  ;;  %v26683_v23 = vand.u32 4294901760, %v16892_v22  ;;  %22010 = vmatpush3.msra.mxu0 %v26458_v28  ;;  %22046 = vmatpush3.msra.mxu1 %v26494_v44  ;;  %v16999_v42 = vsub.f32 %v26657_v33, %v16998_v24  ;;  %v17010_v10 = vand.u32 4294901760, %v17009_v2 }
0x1917   :  { %v16901_v7 = vsel %vm11011_vm8, %v16878_v62, 0  ;;  %v16877_v45 = vmul.f32 %v16869_v63, %v16854_v50  ;;  %22011 = vmatprep.subr.mxu0 %v26477_v19  ;;  %22047 = vmatprep.subr.mxu1 %v26502_v48 }
0x1918   :  { %v26692_v12 = vsub.f32 %v16892_v22, %v26683_v23  ;;  %v26694_v47 = vand.u32 4294901760, %v16901_v7  ;;  %22003 = vmatprep.mubr.f32.mxu1 %v26683_v23  ;;  %22012 = vmatpush3.msra.mxu0 %v26477_v19  ;;  %v17000_v28 = vand.u32 4294901760, %v16999_v42  ;;  %v17028_v38 = vand.u32 4294901760, %v26681_v15 }
0x1919   :  { %v16898_v6 = vsel %vm11011_vm8, %v16877_v45, 0  ;;  %22004 = vmatmul.mubr.f32.gmra.mxu1 %v26668_v59  ;;  %22013 = vmatprep.subr.mxu0 %v26491_v34 }
0x191a   :  { %v26703_v11 = vsub.f32 %v16901_v7, %v26694_v47  ;;  %v26705_v43 = vand.u32 4294901760, %v16898_v6  ;;  %22048 = vmatpush3.msra.mxu1 %v26502_v48  ;;  %21972 = vmatprep.mubr.f32.mxu0 %v17000_v28  ;;  %v17018_v19 = vand.u32 4294901760, %v26692_v12  ;;  %v17029_v30 = vsub.f32 %v26681_v15, %v17028_v38 }
0x191b   :  { %22049 = vmatprep.subr.mxu1 %v26516_v27  ;;  %21973 = vmatmul.mubr.f32.gmra.mxu0 %v17010_v10 }
0x191c   :  { %v26711_v21 = vsub.f32 %v16898_v6, %v26705_v43  ;;  %22006 = vmatprep.mubr.f32.mxu1 %v26705_v43  ;;  %22014 = vmatpush3.msra.mxu0 %v26491_v34  ;;  %v17019_v52 = vsub.f32 %v26692_v12, %v17018_v19  ;;  %v17048_v4 = vand.u32 4294901760, %v26703_v11  ;;  %v17030_v34 = vand.u32 4294901760, %v17029_v30 }
0x191d   :  { %22007 = vmatmul.mubr.f32.gmra.mxu1 %v26694_v47  ;;  %22015 = vmatprep.subr.mxu0 %v26508_v26 }
0x191e   :  { %22050 = vmatpush3.msra.mxu1 %v26516_v27  ;;  %22053 = vmatprep.mubr.f32.mxu1 %v16978_v56  ;;  %v17020_v37 = vand.u32 4294901760, %v17019_v52  ;;  %v17038_v58 = vand.u32 4294901760, %v26711_v21  ;;  %v17049_v57 = vsub.f32 %v26703_v11, %v17048_v4 }
0x191f   :  { %22051 = vmatprep.subr.mxu1 %v26527_v31  ;;  %22016 = vmatpush3.msra.mxu0 %v26508_v26 }
0x1920   :  { %22052 = vmatpush3.msra.mxu1 %v26527_v31  ;;  %21975 = vmatprep.mubr.f32.mxu0 %v17020_v37  ;;  %v17039_v20 = vsub.f32 %v26711_v21, %v17038_v58  ;;  %v17050_v26 = vand.u32 4294901760, %v17049_v57 }
0x1921   :  { %22017 = vmatprep.subr.mxu0 %v26523_v49  ;;  %22093 = vmatprep.subr.mxu1 %v26448_v32 }
0x1922   :  { %21976 = vmatmul.mubr.f32.gmra.mxu0 %v17030_v34  ;;  %22054 = vmatmul.mubr.f32.vlgmr.msra.gmra.mxu1 %v16988_v36  ;;  %v17040_v56 = vand.u32 4294901760, %v17039_v20 }
0x1923   :  { %22018 = vmatpush3.msra.mxu0 %v26523_v49  ;;  %22094 = vmatpush3.msra.mxu1 %v26448_v32  ;;  %v27427_v32 = vld [vmem:[#allocation33_spill] sm:$0xff]  ;;  %v27434_v49 = vld [vmem:[#allocation82_spill] sm:$0xff] }
0x1924   :  { %22019 = vmatprep.subr.mxu0 %v26536_v17  ;;  %22056 = vmatprep.mubr.f32.mxu1 %v16998_v24 }
0x1925   :  { %22095 = vmatprep.subr.mxu1 %v26463_v46  ;;  %22020 = vmatpush3.msra.mxu0 %v26536_v17 }
0x1926   :  { %22096 = vmatpush3.msra.mxu1 %v26463_v46  ;;  %21978 = vmatprep.mubr.f32.mxu0 %v17040_v56  ;;  %v27428_v46 = vld [vmem:[#allocation30_spill] sm:$0xff] }
0x1927   :  { %22021 = vmatprep.subr.mxu0 %v26549_v13  ;;  %22097 = vmatprep.subr.mxu1 %v26471_v9 }
0x1928   :  { %21979 = vmatmul.mubr.f32.gmra.mxu0 %v17050_v26  ;;  %22057 = vmatmul.mubr.f32.gmra.mxu1 %v17008_v18 }
0x1929   :  { %22022 = vmatpush3.msra.mxu0 %v26549_v13  ;;  %22098 = vmatpush3.msra.mxu1 %v26471_v9  ;;  %v27429_v9 = vld [vmem:[#allocation31_spill] sm:$0xff] }
0x192a   :  { %22023 = vmatprep.subr.mxu0 %v26560_v3  ;;  %22025 = vmatprep.mubr.f32.mxu0 %v26624_v35 }
0x192b   :  { %22059 = vmatprep.mubr.f32.mxu1 %v17018_v19  ;;  %22099 = vmatprep.subr.mxu1 %v26481_v54 }
0x192c   :  { %22024 = vmatpush3.msra.mxu0 %v26560_v3  ;;  %22100 = vmatpush3.msra.mxu1 %v26481_v54  ;;  %v27430_v54 = vld [vmem:[#allocation44_spill] sm:$0xff] }
0x192d   :  { %22065 = vmatprep.subr.mxu0 %v27427_v32  ;;  %22101 = vmatprep.subr.mxu1 %v26494_v44 }
0x192e   :  { %22026 = vmatmul.mubr.f32.vlgmr.msra.gmra.mxu0 %v26613_v61  ;;  %22060 = vmatmul.mubr.f32.gmra.mxu1 %v17028_v38 }
0x192f   :  { %22066 = vmatpush3.msra.mxu0 %v27427_v32  ;;  %22102 = vmatpush3.msra.mxu1 %v26494_v44  ;;  %v27431_v44 = vld [vmem:[#allocation35_spill] sm:$0xff] }
0x1930   :  { %22028 = vmatprep.mubr.f32.mxu0 %v26657_v33  ;;  %22062 = vmatprep.mubr.f32.mxu1 %v17038_v58 }
0x1931   :  { %22067 = vmatprep.subr.mxu0 %v27428_v46  ;;  %22103 = vmatprep.subr.mxu1 %v26502_v48 }
0x1932   :  { %22068 = vmatpush3.msra.mxu0 %v27428_v46  ;;  %22104 = vmatpush3.msra.mxu1 %v26502_v48  ;;  %v27432_v48 = vld [vmem:[#allocation45_spill] sm:$0xff] }
0x1933   :  { %22069 = vmatprep.subr.mxu0 %v27429_v9  ;;  %22105 = vmatprep.subr.mxu1 %v26516_v27 }
0x1934   :  { %22029 = vmatmul.mubr.f32.gmra.mxu0 %v26644_v5  ;;  %22063 = vmatmul.mubr.f32.gmra.mxu1 %v17048_v4 }
0x1935   :  { %22070 = vmatpush3.msra.mxu0 %v27429_v9  ;;  %22106 = vmatpush3.msra.mxu1 %v26516_v27  ;;  %v27433_v27 = vld [vmem:[#allocation46_spill] sm:$0xff] }
0x1936   :  { %22031 = vmatprep.mubr.f32.mxu0 %v26692_v12  ;;  %22071 = vmatprep.subr.mxu0 %v27430_v54 }
0x1937   :  { %22107 = vmatprep.subr.mxu1 %v26527_v31  ;;  %22109 = vmatprep.mubr.f32.mxu1 %v26615_v14 }
0x1938   :  { %22072 = vmatpush3.msra.mxu0 %v27430_v54  ;;  %22108 = vmatpush3.msra.mxu1 %v26527_v31  ;;  %v27435_v31 = vmov 0.0  }
0x1939   :  { %22073 = vmatprep.subr.mxu0 %v27431_v44  ;;  %22032 = vmatmul.mubr.f32.gmra.mxu0 %v26681_v15 }
0x193a   :  { %22074 = vmatpush3.msra.mxu0 %v27431_v44  ;;  %22110 = vmatmul.mubr.f32.vlgmr.msra.gmra.mxu1 %v26606_v1 }
0x193b   :  { %22034 = vmatprep.mubr.f32.mxu0 %v26711_v21  ;;  %22075 = vmatprep.subr.mxu0 %v27432_v48 }
0x193c   :  { %22112 = vmatprep.mubr.f32.mxu1 %v26646_v53  ;;  %22076 = vmatpush3.msra.mxu0 %v27432_v48 }
0x193d   :  { %22077 = vmatprep.subr.mxu0 %v27433_v27  ;;  %22035 = vmatmul.mubr.f32.gmra.mxu0 %v26703_v11 }
0x193e   :  { %22078 = vmatpush3.msra.mxu0 %v27433_v27  ;;  %22113 = vmatmul.mubr.f32.gmra.mxu1 %v26630_v55 }
0x193f   :  { %22079 = vmatprep.subr.mxu0 %v27434_v49  ;;  %22081 = vmatprep.mubr.f32.mxu0 %v26615_v14 }
0x1940   :  { %22115 = vmatprep.mubr.f32.mxu1 %v26683_v23  ;;  %22080 = vmatpush3.msra.mxu0 %v27434_v49 }
0x1941   :  { %22082 = vmatmul.mubr.f32.vlgmr.msra.gmra.mxu0 %v26606_v1  ;;  %22121 = vmatprep.subr.mxu0 %v27435_v31 }
0x1942   :  { %22116 = vmatmul.mubr.f32.gmra.mxu1 %v26668_v59  ;;  %22084 = vmatprep.mubr.f32.mxu0 %v26646_v53 }
0x1943   :  { %22118 = vmatprep.mubr.f32.mxu1 %v26705_v43  ;;  %22140 = vmatprep.subr.mxu1 %v27435_v31 }
0x1945   :  { %22085 = vmatmul.mubr.f32.gmra.mxu0 %v26630_v55 }
0x1946   :  { %22119 = vmatmul.mubr.f32.gmra.mxu1 %v26694_v47  ;;  %22087 = vmatprep.mubr.f32.mxu0 %v26683_v23 }
0x1947   :  { %22156 = vmatprep.mubr.msk.f32.mxu1 %vm22729_vm7, %v27435_v31 }
0x1949   :  { %22088 = vmatmul.mubr.f32.gmra.mxu0 %v26668_v59 }
0x194a   :  { %22090 = vmatprep.mubr.f32.mxu0 %v26705_v43 }
0x194d   :  { %22091 = vmatmul.mubr.f32.gmra.mxu0 %v26694_v47 }
0x194e   :  { %22137 = vmatprep.mubr.msk.f32.mxu0 %vm22729_vm7, %v27435_v31 }
0x19cd   :  { %v21999_v17 = vpop.f32.mrf.mxu1 }
0x19cf   :  { %v17163_v13 = vpop.f32.mrf.mxu1 }
0x19d3   :  { %v22002_v3 = vpop.f32.mrf.mxu1 }
0x19d5   :  { %v17175_v1 = vpop.f32.mrf.mxu1  ;;  %v21971_v61 = vpop.f32.mrf.mxu0 }
0x19d6   :  { %v17170_v10 = vadd.f32 %v21999_v17, %v21971_v61 }
0x19d7   :  { %v16982_v14 = vpop.f32.mrf.mxu0 }
0x19d8   :  { %v17164_v52 = vadd.f32 %v17163_v13, %v16982_v14 }
0x19d9   :  { %v22005_v36 = vpop.f32.mrf.mxu1 }
0x19db   :  { %v17187_v35 = vpop.f32.mrf.mxu1  ;;  %v21974_v55 = vpop.f32.mrf.mxu0 }
0x19dc   :  { %v17182_v12 = vadd.f32 %v22002_v3, %v21974_v55 }
0x19dd   :  { %v22008_v5 = vpop.f32.mrf.mxu1  ;;  %v17002_v53 = vpop.f32.mrf.mxu0 }
0x19de   :  { %v17176_v38 = vadd.f32 %v17175_v1, %v17002_v53 }
0x19df   :  { %v17199_v0 = vpop.f32.mrf.mxu1 }
0x19e2   :  { %v21977_v40 = vpop.f32.mrf.mxu0  ;;  %v22055_v33 = vpop.f32.mrf.mxu1 }
0x19e3   :  { %v17194_v11 = vadd.f32 %v22005_v36, %v21977_v40 }
0x19e4   :  { %v17022_v39 = vpop.f32.mrf.mxu0  ;;  %v17423_v41 = vpop.f32.mrf.mxu1 }
0x19e5   :  { %v17188_v19 = vadd.f32 %v17187_v35, %v17022_v39 }
0x19e8   :  { %v21980_v29 = vpop.f32.mrf.mxu0  ;;  %v22058_v18 = vpop.f32.mrf.mxu1 }
0x19e9   :  { %v17206_v34 = vadd.f32 %v22008_v5, %v21980_v29 }
0x19ea   :  { %v17042_v51 = vpop.f32.mrf.mxu0  ;;  %v17439_v25 = vpop.f32.mrf.mxu1 }
0x19eb   :  { %v17200_v32 = vadd.f32 %v17199_v0, %v17042_v51 }
0x19ee   :  { %v22027_v60 = vpop.f32.mrf.mxu0  ;;  %v22061_v8 = vpop.f32.mrf.mxu1 }
0x19ef   :  { %v17301_v30 = vadd.f32 %v22027_v60, %v17170_v10  ;;  %v27436_v60 = vld [vmem:[#allocation71_spill] sm:$0xff] }
0x19f0   :  { %v17293_v59 = vpop.f32.mrf.mxu0  ;;  %v17455_v16 = vpop.f32.mrf.mxu1 }
0x19f1   :  { %v17294_v57 = vadd.f32 %v17293_v59, %v17164_v52  ;;  %v17432_v44 = vadd.f32 %v22055_v33, %v17301_v30 }
0x19f3   :  { %v17424_v61 = vadd.f32 %v17423_v41, %v17294_v57  ;;  %v27438_v41 = vld [vmem:[#allocation73_spill] sm:$0xff] }
0x19f4   :  { %v22030_v63 = vpop.f32.mrf.mxu0  ;;  %v22064_v24 = vpop.f32.mrf.mxu1 }
0x19f5   :  { %v17315_v6 = vadd.f32 %v22030_v63, %v17182_v12 }
0x19f6   :  { %v17307_v22 = vpop.f32.mrf.mxu0  ;;  %v17471_v62 = vpop.f32.mrf.mxu1 }
0x19f7   :  { %v17308_v21 = vadd.f32 %v17307_v22, %v17176_v38  ;;  %v17448_v56 = vadd.f32 %v22058_v18, %v17315_v6  ;;  %v27441_v38 = vld [vmem:[#allocation32_spill] sm:$0xff] }
0x19f9   :  { %v22033_v50 = vpop.f32.mrf.mxu0  ;;  %v17440_v54 = vadd.f32 %v17439_v25, %v17308_v21  ;;  %v27443_v21 = vld [vmem:[#allocation42_spill] sm:$0xff] }
0x19fa   :  { %v22111_v2 = vpop.f32.mrf.mxu1  ;;  %v17329_v37 = vadd.f32 %v22033_v50, %v17194_v11 }
0x19fb   :  { %v17321_v15 = vpop.f32.mrf.mxu0 }
0x19fc   :  { %v17695_v23 = vpop.f32.mrf.mxu1  ;;  %v17322_v20 = vadd.f32 %v17321_v15, %v17188_v19  ;;  %v17464_v27 = vadd.f32 %v22061_v8, %v17329_v37 }
0x19fd   :  { %v22036_v42 = vpop.f32.mrf.mxu0 }
0x19fe   :  { %v22114_v7 = vpop.f32.mrf.mxu1  ;;  %v17343_v46 = vadd.f32 %v22036_v42, %v17206_v34  ;;  %v17456_v13 = vadd.f32 %v17455_v16, %v17322_v20  ;;  %v27437_v16 = vld [vmem:[#allocation68_spill] sm:$0xff] }
0x19ff   :  { %v17335_v45 = vpop.f32.mrf.mxu0 }
0x1a00   :  { %v17707_v47 = vpop.f32.mrf.mxu1  ;;  %v17336_v17 = vadd.f32 %v17335_v45, %v17200_v32  ;;  %v17480_v5 = vadd.f32 %v22064_v24, %v17343_v46  ;;  %v27439_v45 = vld [vmem:[#allocation40_spill] sm:$0xff] }
0x1a01   :  { %v22083_v28 = vpop.f32.mrf.mxu0 }
0x1a02   :  { %v22117_v58 = vpop.f32.mrf.mxu1  ;;  %v17581_v1 = vadd.f32 %v22083_v28, %v17432_v44  ;;  %v17472_v51 = vadd.f32 %v17471_v62, %v17336_v17  ;;  %v27440_v28 = vld [vmem:[#allocation43_spill] sm:$0xff] }
0x1a03   :  { %v17574_v43 = vpop.f32.mrf.mxu0 }
0x1a04   :  { %v17719_v48 = vpop.f32.mrf.mxu1  ;;  %v17575_v53 = vadd.f32 %v17574_v43, %v17424_v61  ;;  %v17702_v25 = vadd.f32 %v22111_v2, %v17581_v1 }
0x1a05   :  { %v22086_v4 = vpop.f32.mrf.mxu0 }
0x1a06   :  { %v17593_v9 = vadd.f32 %v22086_v4, %v17448_v56  ;;  %v22120_v40 = vpop.f32.mrf.mxu1  ;;  %v17696_v42 = vadd.f32 %v17695_v23, %v17575_v53  ;;  %v17742_v6 = vmul.f32 %v17702_v25, %v27441_v38  ;;  %v27442_v23 = vld [vmem:[#allocation41_spill] sm:$0xff] }
0x1a07   :  { %v17586_v26 = vpop.f32.mrf.mxu0 }
0x1a08   :  { %v17587_v3 = vadd.f32 %v17586_v26, %v17440_v54  ;;  %v17714_v35 = vadd.f32 %v22114_v7, %v17593_v9  ;;  %v17731_v24 = vpop.f32.mrf.mxu1  ;;  %v17741_v52 = vmul.f32 %v17696_v42, %v27443_v21  ;;  %v26833_v34 = vand.u32 4294901760, %v17742_v6 }
0x1a09   :  { %v22089_v49 = vpop.f32.mrf.mxu0 }
0x1a0a   :  { %v17605_v14 = vadd.f32 %v22089_v49, %v17464_v27  ;;  %v17708_v29 = vadd.f32 %v17707_v47, %v17587_v3  ;;  %v17744_v63 = vmul.f32 %v17714_v35, %v27437_v16  ;;  %v26845_v32 = vand.u32 4294901760, %v17741_v52 }
0x1a0b   :  { %v17598_v36 = vpop.f32.mrf.mxu0 }
0x1a0c   :  { %v17599_v55 = vadd.f32 %v17598_v36, %v17456_v13  ;;  %v17726_v0 = vadd.f32 %v22117_v58, %v17605_v14  ;;  %v17743_v12 = vmul.f32 %v17708_v29, %v27439_v45  ;;  %v26813_v10 = vand.u32 4294901760, %v17744_v63  ;;  %v27444_v29 = vld [vmem:[#allocation36_spill] sm:$0xff] }
0x1a0d   :  { %v22092_v39 = vpop.f32.mrf.mxu0  ;;  %v26871_v13 = vsub.f32 %v17741_v52, %v26845_v32 }
0x1a0e   :  { %v17720_v18 = vadd.f32 %v17719_v48, %v17599_v55  ;;  %v17617_v33 = vadd.f32 %v22092_v39, %v17480_v5  ;;  %v17746_v8 = vmul.f32 %v17726_v0, %v27436_v60  ;;  %v26822_v30 = vand.u32 4294901760, %v17743_v12  ;;  %v27445_v60 = vld [vmem:[#allocation34_spill] sm:$0xff] }
0x1a0f   :  { %v17610_v59 = vpop.f32.mrf.mxu0  ;;  %v26837_v20 = vsub.f32 %v17744_v63, %v26813_v10  ;;  %v26858_v48 = vsub.f32 %v17742_v6, %v26833_v34 }
0x1a10   :  { %v17745_v22 = vmul.f32 %v17720_v18, %v27438_v41  ;;  %v17738_v50 = vadd.f32 %v22120_v40, %v17617_v33  ;;  %v17611_v15 = vadd.f32 %v17610_v59, %v17472_v51  ;;  %v26806_v7 = vand.u32 4294901760, %v17746_v8  ;;  %v27447_v59 = vld [vmem:[#allocation38_spill] sm:$0xff] }
0x1a11   :  { %v26849_v46 = vsub.f32 %v17743_v12, %v26822_v30  ;;  %v17879_v3 = vand.u32 4294901760, %v26837_v20  ;;  %v17893_v55 = vand.u32 4294901760, %v26858_v48  ;;  %v17900_v40 = vand.u32 4294901760, %v26871_v13 }
0x1a12   :  { %v26809_v47 = vand.u32 4294901760, %v17745_v22  ;;  %v17748_v62 = vmul.f32 %v17738_v50, %v27440_v28  ;;  %v17732_v2 = vadd.f32 %v17731_v24, %v17611_v15  ;;  %v26816_v11 = vsub.f32 %v17746_v8, %v26806_v7  ;;  %v27446_v8 = vld [vmem:[#allocation37_spill] sm:$0xff] }
0x1a13   :  { %v17886_v14 = vand.u32 4294901760, %v26849_v46  ;;  %v17880_v35 = vsub.f32 %v26837_v20, %v17879_v3  ;;  %v17894_v39 = vsub.f32 %v26858_v48, %v17893_v55  ;;  %v17901_v33 = vsub.f32 %v26871_v13, %v17900_v40 }
0x1a14   :  { %v26818_v43 = vand.u32 4294901760, %v17748_v62  ;;  %v17747_v19 = vmul.f32 %v17732_v2, %v27442_v23  ;;  %v26825_v37 = vsub.f32 %v17745_v22, %v26809_v47  ;;  %v17865_v26 = vand.u32 4294901760, %v26816_v11 }
0x1a15   :  { %v17887_v53 = vsub.f32 %v26849_v46, %v17886_v14  ;;  %v17881_v0 = vand.u32 4294901760, %v17880_v35  ;;  %v17895_v51 = vand.u32 4294901760, %v17894_v39  ;;  %v17902_v25 = vand.u32 4294901760, %v17901_v33 }
0x1a16   :  { %v26828_v58 = vsub.f32 %v17748_v62, %v26818_v43  ;;  %v26830_v4 = vand.u32 4294901760, %v17747_v19  ;;  %22122 = vmatpush3.msra.mxu0 %v26818_v43  ;;  %v17872_v44 = vand.u32 4294901760, %v26825_v37  ;;  %v17866_v17 = vsub.f32 %v26816_v11, %v17865_v26 }
0x1a17   :  { %22123 = vmatprep.subr.mxu0 %v27435_v31  ;;  %v17888_v18 = vand.u32 4294901760, %v17887_v53 }
0x1a18   :  { %v26840_v56 = vsub.f32 %v17747_v19, %v26830_v4  ;;  %22124 = vmatpush3.msra.mxu0 %v26830_v4  ;;  %v17851_v57 = vand.u32 4294901760, %v26828_v58  ;;  %v17873_v61 = vsub.f32 %v26825_v37, %v17872_v44  ;;  %v17867_v36 = vand.u32 4294901760, %v17866_v17 }
0x1a19   :  { %22125 = vmatprep.subr.mxu0 %v27435_v31 }
0x1a1a   :  { %22126 = vmatpush3.msra.mxu0 %v26806_v7  ;;  %v17852_v9 = vsub.f32 %v26828_v58, %v17851_v57  ;;  %v17858_v54 = vand.u32 4294901760, %v26840_v56  ;;  %v17874_v5 = vand.u32 4294901760, %v17873_v61 }
0x1a1b   :  { %22127 = vmatprep.subr.mxu0 %v27435_v31 }
0x1a1c   :  { %22128 = vmatpush3.msra.mxu0 %v26809_v47  ;;  %v17853_v27 = vand.u32 4294901760, %v17852_v9  ;;  %v17859_v49 = vsub.f32 %v26840_v56, %v17858_v54 }
0x1a1d   :  { %22129 = vmatprep.subr.mxu0 %v27435_v31 }
0x1a1e   :  { %22130 = vmatpush3.msra.mxu0 %v26813_v10  ;;  %22141 = vmatpush3.msra.mxu1 %v17853_v27  ;;  %v17860_v1 = vand.u32 4294901760, %v17859_v49 }
0x1a1f   :  { %22131 = vmatprep.subr.mxu0 %v27435_v31  ;;  %22142 = vmatprep.subr.mxu1 %v27435_v31 }
0x1a20   :  { %22132 = vmatpush3.msra.mxu0 %v26822_v30  ;;  %22143 = vmatpush3.msra.mxu1 %v17860_v1 }
0x1a21   :  { %22133 = vmatprep.subr.mxu0 %v27435_v31  ;;  %22144 = vmatprep.subr.mxu1 %v27435_v31 }
0x1a22   :  { %22134 = vmatpush3.msra.mxu0 %v26833_v34  ;;  %22145 = vmatpush3.msra.mxu1 %v17867_v36 }
0x1a23   :  { %22135 = vmatprep.subr.mxu0 %v27435_v31  ;;  %22146 = vmatprep.subr.mxu1 %v27435_v31 }
0x1a24   :  { %22136 = vmatpush3.msra.mxu0 %v26845_v32  ;;  %22147 = vmatpush3.msra.mxu1 %v17874_v5 }
0x1a25   :  { %22148 = vmatprep.subr.mxu1 %v27435_v31  ;;  %22159 = vmatprep.subr.mxu0 %v27435_v31 }
0x1a26   :  { %22138 = vmatmul.mubr.f32.vlgmr.msra.gmra.mxu0 %v27444_v29  ;;  %22149 = vmatpush3.msra.mxu1 %v17881_v0 }
0x1a27   :  { %22160 = vmatpush3.msra.mxu0 %v26828_v58  ;;  %22150 = vmatprep.subr.mxu1 %v27435_v31 }
0x1a28   :  { %22161 = vmatprep.subr.mxu0 %v27435_v31  ;;  %22151 = vmatpush3.msra.mxu1 %v17888_v18 }
0x1a29   :  { %22162 = vmatpush3.msra.mxu0 %v26840_v56  ;;  %22152 = vmatprep.subr.mxu1 %v27435_v31 }
0x1a2a   :  { %22163 = vmatprep.subr.mxu0 %v27435_v31  ;;  %22153 = vmatpush3.msra.mxu1 %v17895_v51 }
0x1a2b   :  { %22164 = vmatpush3.msra.mxu0 %v26816_v11  ;;  %22154 = vmatprep.subr.mxu1 %v27435_v31 }
0x1a2c   :  { %22165 = vmatprep.subr.mxu0 %v27435_v31  ;;  %22155 = vmatpush3.msra.mxu1 %v17902_v25 }
0x1a2d   :  { %22166 = vmatpush3.msra.mxu0 %v26825_v37  ;;  %22178 = vmatprep.subr.mxu1 %v27435_v31 }
0x1a2e   :  { %22167 = vmatprep.subr.mxu0 %v27435_v31  ;;  %22157 = vmatmul.mubr.f32.vlgmr.msra.gmra.mxu1 %v27445_v60 }
0x1a2f   :  { %22168 = vmatpush3.msra.mxu0 %v26837_v20  ;;  %22179 = vmatpush3.msra.mxu1 %v26818_v43 }
0x1a30   :  { %22169 = vmatprep.subr.mxu0 %v27435_v31  ;;  %22180 = vmatprep.subr.mxu1 %v27435_v31 }
0x1a31   :  { %22170 = vmatpush3.msra.mxu0 %v26849_v46  ;;  %22181 = vmatpush3.msra.mxu1 %v26830_v4 }
0x1a32   :  { %22171 = vmatprep.subr.mxu0 %v27435_v31  ;;  %22182 = vmatprep.subr.mxu1 %v27435_v31 }
0x1a33   :  { %22172 = vmatpush3.msra.mxu0 %v26858_v48  ;;  %22183 = vmatpush3.msra.mxu1 %v26806_v7 }
0x1a34   :  { %22173 = vmatprep.subr.mxu0 %v27435_v31  ;;  %22184 = vmatprep.subr.mxu1 %v27435_v31 }
0x1a35   :  { %22174 = vmatpush3.msra.mxu0 %v26871_v13  ;;  %22175 = vmatprep.mubr.msk.f32.mxu0 %vm22729_vm7, %v27435_v31 }
0x1a36   :  { %22185 = vmatpush3.msra.mxu1 %v26809_v47  ;;  %22176 = vmatmul.mubr.f32.vlgmr.msra.gmra.mxu0 %v27446_v8 }
0x1a37   :  { %22186 = vmatprep.subr.mxu1 %v27435_v31  ;;  %22197 = vmatprep.subr.mxu0 %v27435_v31 }
0x1a38   :  { %22187 = vmatpush3.msra.mxu1 %v26813_v10  ;;  %22198 = vmatpush3.msra.mxu0 %v17851_v57 }
0x1a39   :  { %22188 = vmatprep.subr.mxu1 %v27435_v31  ;;  %22199 = vmatprep.subr.mxu0 %v27435_v31 }
0x1a3a   :  { %22189 = vmatpush3.msra.mxu1 %v26822_v30  ;;  %22200 = vmatpush3.msra.mxu0 %v17858_v54 }
0x1a3b   :  { %22190 = vmatprep.subr.mxu1 %v27435_v31  ;;  %22201 = vmatprep.subr.mxu0 %v27435_v31 }
0x1a3c   :  { %22191 = vmatpush3.msra.mxu1 %v26833_v34  ;;  %22202 = vmatpush3.msra.mxu0 %v17865_v26 }
0x1a3d   :  { %22192 = vmatprep.subr.mxu1 %v27435_v31  ;;  %22203 = vmatprep.subr.mxu0 %v27435_v31 }
0x1a3e   :  { %22193 = vmatpush3.msra.mxu1 %v26845_v32  ;;  %22194 = vmatprep.mubr.msk.f32.mxu1 %vm22729_vm7, %v27435_v31 }
0x1a3f   :  { %22204 = vmatpush3.msra.mxu0 %v17872_v44  ;;  %22195 = vmatmul.mubr.f32.vlgmr.msra.gmra.mxu1 %v27447_v59 }
0x1a40   :  { %22205 = vmatprep.subr.mxu0 %v27435_v31  ;;  %22216 = vmatprep.subr.mxu1 %v27435_v31 }
0x1a41   :  { %22206 = vmatpush3.msra.mxu0 %v17879_v3  ;;  %22217 = vmatpush3.msra.mxu1 %v26818_v43 }
0x1a42   :  { %22207 = vmatprep.subr.mxu0 %v27435_v31  ;;  %22218 = vmatprep.subr.mxu1 %v27435_v31 }
0x1a43   :  { %22208 = vmatpush3.msra.mxu0 %v17886_v14  ;;  %22219 = vmatpush3.msra.mxu1 %v26830_v4  ;;  %v27449_v4 = vld [vmem:[#allocation47_spill] sm:$0xff] }
0x1a44   :  { %22209 = vmatprep.subr.mxu0 %v27435_v31  ;;  %22220 = vmatprep.subr.mxu1 %v27435_v31 }
0x1a45   :  { %22210 = vmatpush3.msra.mxu0 %v17893_v55  ;;  %22221 = vmatpush3.msra.mxu1 %v26806_v7 }
0x1a46   :  { %22211 = vmatprep.subr.mxu0 %v27435_v31  ;;  %22222 = vmatprep.subr.mxu1 %v27435_v31 }
0x1a47   :  { %22212 = vmatpush3.msra.mxu0 %v17900_v40  ;;  %22213 = vmatprep.mubr.msk.f32.mxu0 %vm22729_vm7, %v27435_v31 }
0x1a48   :  { %22223 = vmatpush3.msra.mxu1 %v26809_v47  ;;  %22214 = vmatmul.mubr.f32.vlgmr.msra.gmra.mxu0 %v27445_v60 }
0x1a49   :  { %22224 = vmatprep.subr.mxu1 %v27435_v31  ;;  %22232 = vmatprep.mubr.msk.f32.mxu1 %vm22729_vm7, %v27435_v31 }
0x1a4a   :  { %22225 = vmatpush3.msra.mxu1 %v26813_v10 }
0x1a4b   :  { %22226 = vmatprep.subr.mxu1 %v27435_v31 }
0x1a4c   :  { %22227 = vmatpush3.msra.mxu1 %v26822_v30  ;;  %v27448_v30 = vld [vmem:[#allocation80_spill] sm:$0xff] }
0x1a4d   :  { %22228 = vmatprep.subr.mxu1 %v27435_v31 }
0x1a4e   :  { %22229 = vmatpush3.msra.mxu1 %v26833_v34  ;;  %v14697_v34 = vsel %vm14696_vm1, %v27449_v4, -inf }
0x1a4f   :  { %22230 = vmatprep.subr.mxu1 %v27435_v31 }
0x1a50   :  { %22231 = vmatpush3.msra.mxu1 %v26845_v32 }
0x1a51   :  { %22233 = vmatmul.mubr.f32.vlgmr.msra.gmra.mxu1 %v27445_v60 }
0x1ae6   :  { %v17828_v16 = vpop.f32.mrf.mxu0 }
0x1ae8   :  { %v22139_v63 = vpop.f32.mrf.mxu0 }
0x1aee   :  { %v17939_v41 = vpop.f32.mrf.mxu1 }
0x1aef   :  { %v17940_v45 = vadd.f32 %v17939_v41, %v17828_v16 }
0x1af0   :  { %v22158_v22 = vpop.f32.mrf.mxu1 }
0x1af6   :  { %v18027_v50 = vpop.f32.mrf.mxu0 }
0x1af7   :  { %v18028_v47 = vadd.f32 %v18027_v50, %v17940_v45 }
0x1af8   :  { %v22177_v15 = vpop.f32.mrf.mxu0 }
0x1aff   :  { %v18108_v42 = vpop.f32.mrf.mxu1 }
0x1b00   :  { %v18109_v28 = vadd.f32 %v18108_v42, %v18028_v47 }
0x1b01   :  { %v22196_v24 = vpop.f32.mrf.mxu1 }
0x1b08   :  { %v18203_v7 = vpop.f32.mrf.mxu0 }
0x1b09   :  { %v18204_v62 = vadd.f32 %v18203_v7, %v18109_v28 }
0x1b0a   :  { %v22215_v12 = vpop.f32.mrf.mxu0 }
0x1b11   :  { %v18282_v2 = vpop.f32.mrf.mxu1 }
0x1b12   :  { %v18283_v31 = vadd.f32 %v18282_v2, %v18204_v62 }
0x1b13   :  { %v22234_v38 = vpop.f32.mrf.mxu1 }
0x1b14   :  { %v18286_v6 = vmax.f32 %v18283_v31, 0.0 }
0x1b16   :  { %22448 = vrsqrt.f32 %v18286_v6  ;;  %vm18289_vm0 = vcmp.eq.f32.partialorder %v18286_v6, inf  ;;  %v18292_v43 = vand.u32 2147483648, %v18286_v6  ;;  %vm18291_vm15 = vcmp.eq.f32.partialorder %v18286_v6, 0.0 }
0x1b23   :  { %v22449_v10 = vpop.eup %22448 }
0x1b24   :  { %v18288_v11 = vmul.f32 %v22449_v10, %v18286_v6 }
0x1b26   :  { %v18290_v23 = vsel %vm18289_vm0, %v18286_v6, %v18288_v11 }
0x1b27   :  { %v18293_v19 = vsel %vm18291_vm15, %v18292_v43, %v18290_v23 }
0x1b28   :  { %v18294_v21 = vadd.f32 1e-09, %v18293_v19 }
0x1b2a   :  { %22450 = vrcp.f32 %v18294_v21 }
0x1b37   :  { %v22451_v52 = vpop.eup %22450 }
0x1b38   :  { %v18296_v37 = vmul.f32 %v22451_v52, %v27448_v30 }
0x1b3a   :  { %v18297_v58 = vsel %vm14696_vm1, %v18296_v37, -inf }
0x1b3b   :  { %18298 = vmax.xlane.f32.xlu0 %v18297_v58 }
0x1b3f   :  { %14698 = vmax.xlane.f32.xlu0 %v14697_v34 }
0x1bc4   :  { %v18299_v20 = vpop.xlane.xlu0 %18298 }
0x1bc5   :  { %v18300_v56 = vsub.f32 %v18296_v37, %v18299_v20 }
0x1bc7   :  { %v18301_v57 = vmul.f32 1.442695, %v18300_v56 }
0x1bc8   :  { %v14699_v26 = vpop.xlane.xlu0 %14698 }
0x1bc9   :  { %22452 = vpow2.f32 %v18301_v57  ;;  %v14700_v32 = vsub.f32 %v27449_v4, %v14699_v26 }
0x1bcb   :  { %v14701_v46 = vmul.f32 1.442695, %v14700_v32 }
0x1bcd   :  { %22454 = vpow2.f32 %v14701_v46 }
0x1bd6   :  { %v22453_v9 = vpop.eup %22452 }
0x1bd7   :  { %v18303_v54 = vsel %vm14696_vm1, %v22453_v9, 0.0 }
0x1bd8   :  { %18304 = vadd.xlane.f32.xlu0 %v18303_v54 }
0x1bda   :  { %v22455_v44 = vpop.eup %22454 }
0x1bdb   :  { %v14703_v48 = vsel %vm14696_vm1, %v22455_v44, 0.0 }
0x1bdc   :  { %14704 = vadd.xlane.f32.xlu0 %v14703_v48 }
0x1bdd   :  { %22633 = shalt.err (!%p22630_p2)
}
0x1bde   :  { %18356 = dma.vmem_to_hbm [thread:$0]  %s18351_s9, 256, %s27035_s17, [#allocation21], %s22720_s29, %s22720_s29, %s22721_s0  }
0x1bdf   :  { %s22732_s28 = smov [#allocation17]   ;;  %s22733_s26 = smov [#allocation19]  }
0x1be0   :  { %s18329_s30 = sshll.u32 %s22732_s28, 4  ;;  %s18338_s6 = sshll.u32 %s22733_s26, 4  ;;  %s18330_s30 = int_to_ptr.vmem [resolvable:$true] %s18329_s30  ;;  %s18339_s6 = int_to_ptr.vmem [resolvable:$true] %s18338_s6 }
0x1be1   :  { %s22734_s10 = smov [#allocation16]   ;;  %s22642_s19 = scalar_lea.vmem %s18330_s30, 64 }
0x1be2   :  { %s18319_s18 = sshll.u32 %s22734_s10, 4  ;;  %p22643_p3 = scmp.ne.s32.totalorder %s18330_s30, %s22642_s19  ;;  %s18320_s18 = int_to_ptr.vmem [resolvable:$true] %s18319_s18 }
0x1be3   :  { %p22647_p4 = scmp.lt.s32.totalorder %s18330_s30, %s18330_s30  ;;  %p22648_p5 = scmp.lt.s32.totalorder %s22642_s19, %s22642_s19 }
0x1be5   :  { %p22649_p6 = por %p22648_p5, %p22647_p4 }
0x1be7   :  { %p22650_p7 = pnand %p22649_p6, %p22643_p3 }
0x1c61   :  { %v18305_v27 = vpop.xlane.xlu0 %18304 }
0x1c62   :  { %22456 = vrcp.f32 %v18305_v27 }
0x1c65   :  { %v14705_v49 = vpop.xlane.xlu0 %14704 }
0x1c66   :  { %22458 = vrcp.f32 %v14705_v49 }
0x1c6f   :  { %v22457_v17 = vpop.eup %22456 }
0x1c70   :  { %v18307_v3 = vmul.f32 %v22457_v17, %v22453_v9 }
0x1c72   :  { %18308 = vst.msk [vmem:[#allocation17] sm:$0xf] %vm14696_vm1, %v18307_v3 }
0x1c73   :  { %v22459_v13 = vpop.eup %22458 }
0x1c74   :  { %22653 = shalt.err (!%p22650_p7)
}
0x1c75   :  { %18332 = dma.vmem_to_hbm [thread:$0]  %s18330_s30, 64, %s27033_s15, [#allocation18]   ;;  %v14707_v1 = vmul.f32 %v22459_v13, %v22455_v44 }
0x1c76   :  { %s22662_s27 = scalar_lea.vmem %s18339_s6, 512  ;;  %p22667_p9 = scmp.lt.s32.totalorder %s18339_s6, %s18339_s6 }
0x1c77   :  { %p22663_p8 = scmp.ne.s32.totalorder %s18339_s6, %s22662_s27  ;;  %p22668_p10 = scmp.lt.s32.totalorder %s22662_s27, %s22662_s27 }
0x1c79   :  { %p22669_p11 = por %p22668_p10, %p22667_p9 }
0x1c7b   :  { %p22670_p12 = pnand %p22669_p11, %p22663_p8 }
0x1c7d   :  { %22673 = shalt.err (!%p22670_p12)
}
0x1c7e   :  { %18344 = dma.vmem_to_hbm [thread:$0]  %s18339_s6, 512, %s27034_s16, [#allocation18], %s22720_s29, %s22720_s29, %s22721_s0   ;;  %14708 = vst.msk [vmem:[#allocation16] sm:$0xf] %vm14696_vm1, %v14707_v1 }
0x1c7f   :  { %s22682_s22 = scalar_lea.vmem %s18320_s18, 64  ;;  %p22687_p0 = scmp.lt.s32.totalorder %s18320_s18, %s18320_s18 }
0x1c80   :  { %p22683_p13 = scmp.ne.s32.totalorder %s18320_s18, %s22682_s22  ;;  %p22688_p1 = scmp.lt.s32.totalorder %s22682_s22, %s22682_s22 }
0x1c82   :  { %p22689_p2 = por %p22688_p1, %p22687_p0 }
0x1c84   :  { %p22690_p3 = pnand %p22689_p2, %p22683_p13 }
0x1c86   :  { %22693 = shalt.err (!%p22690_p3)
}
0x1c87   :  { %18322 = dma.vmem_to_hbm [thread:$0]  %s18320_s18, 64, %s27032_s14, [#allocation4]  }
0x1c88   :  { %22712 = dma.done.wait [#allocation4], 64  }
0x1c89   :  { %22713 = vsyncadd [#allocation4], 4294967232 }
0x1c8a   :  { %22714 = dma.done.wait [#allocation18], 576  }
0x1c8b   :  { %22715 = vsyncadd [#allocation18], 4294966720 }
0x1c8c   :  { %22716 = dma.done.wait [#allocation21], 256  }
0x1c8d   :  { %22717 = vsyncadd [#allocation21], 4294967040 }
0x1c8e   :  { %18373 = vsyncpa [#allocation3], 1 }
0x1c8f   :  { %18374 = vsyncpa [#allocation6], 1 }
0x1c90   :  { %18375 = vsyncpa [#allocation9], 1 }
0x1c91   :  { %18376 = vsyncpa [#allocation12], 1 }
0x1c92   :  { %18377 = vsyncpa [#allocation15], 1 }
0x1c93   :  { %18378 = vsyncpa [#allocation4], 1 }
0x1c94   :  { %18379 = vsyncpa [#allocation18], 1 }
0x1c95   :  { %18380 = vsyncpa [#allocation21], 1 }

</bundles_post_ra>
